<compile_context>
chip_gen: v7x
topology: tpu7x:2x2x1
jax: 0.10.0
libtpu: 0.0.40
codegen_flags: <defaults>
</compile_context>

<pallas_src>
import jax
import jax.numpy as jnp
from jax.experimental import pallas as pl
from jax.experimental.pallas import tpu as pltpu

NEG_SLOPE = 0.1   # nn.LeakyReLU(0.1)
BN_EPS = 1e-5     # nn.BatchNorm1d default eps


def _lrelu(x):
    return jnp.where(x >= 0, x, NEG_SLOPE * x)


# ----------------------------------------------------------------------------
# Kernel: one batch tile of x in, one batch tile of y out, all params in VMEM.
# Parameter order must match build_params() below.
# ----------------------------------------------------------------------------
def _mlp_kernel(x_ref, *refs):
    out_ref = refs[-1]
    it = iter(refs[:-1])
    nxt = lambda: next(it)

    def linear(h, w_ref, b_ref):
        return jnp.dot(h, w_ref[...], preferred_element_type=jnp.float32) + b_ref[...]

    def bn(h, s_ref, sh_ref):              # folded BatchNorm1d (eval mode)
        return h * s_ref[...] + sh_ref[...]

    h = x_ref[...].astype(jnp.float32)

    # --- input_layer: Linear -> LeakyReLU -> BatchNorm1d -> Dropout(eval=id)
    w, b, s, sh = nxt(), nxt(), nxt(), nxt()
    h = bn(_lrelu(linear(h, w, b)), s, sh)

    # --- residual blocks: (1024->512), (512->256), (256->128)
    for _ in range(3):
        w1, b1, s1, sh1 = nxt(), nxt(), nxt(), nxt()
        w2, b2, s2, sh2 = nxt(), nxt(), nxt(), nxt()
        wsk, bsk = nxt(), nxt()
        identity = linear(h, wsk, bsk)                 # skip projection
        o = _lrelu(bn(linear(h, w1, b1), s1, sh1))     # linear1 -> bn1 -> act
        # dropout: identity in eval mode
        o = bn(linear(o, w2, b2), s2, sh2)             # linear2 -> bn2
        h = _lrelu(o + identity)                       # residual add -> act

    # --- output_layers: Linear->LeakyReLU->BN -> Linear->LeakyReLU -> Linear
    w, b, s, sh = nxt(), nxt(), nxt(), nxt()
    h = bn(_lrelu(linear(h, w, b)), s, sh)
    w, b = nxt(), nxt()
    h = _lrelu(linear(h, w, b))
    w, b = nxt(), nxt()
    y = linear(h, w, b)

    out_ref[...] = y.astype(out_ref.dtype)


# ----------------------------------------------------------------------------
# Wrapper
# ----------------------------------------------------------------------------
def enhanced_residual_mlp(x, params, *, batch_tile=8):
    B, D = x.shape
    assert B % batch_tile == 0 and (batch_tile % 8 == 0 or batch_tile == B)
    grid = (B // batch_tile,)

    x_spec = pl.BlockSpec((batch_tile, D), lambda i: (i, 0))
    # Full-extent blocks for every parameter; constant index_map keeps them
    # resident in VMEM across batch tiles (no re-DMA).
    param_specs = [pl.BlockSpec(p.shape, lambda i: (0, 0)) for p in params]
    out_spec = pl.BlockSpec((batch_tile, 1), lambda i: (i, 0))

    return pl.pallas_call(
        _mlp_kernel,
        out_shape=jax.ShapeDtypeStruct((B, 1), jnp.float32),
        grid=grid,
        in_specs=[x_spec] + param_specs,
        out_specs=out_spec,
        compiler_params=pltpu.CompilerParams(
            dimension_semantics=("parallel",),      # batch tiles -> both TCs on v7x
            vmem_limit_bytes=48 * 1024 * 1024,      # headroom, still < v7x 64 MiB
        ),
    )(x, *params)


# ----------------------------------------------------------------------------
# Parameter construction (PyTorch-style init; BN folded to scale/shift)
# ----------------------------------------------------------------------------
def _linear_params(key, din, dout):
    kw, kb = jax.random.split(key)
    bound = 1.0 / (din ** 0.5)
    w = jax.random.uniform(kw, (din, dout), jnp.float32, -bound, bound)
    b = jax.random.uniform(kb, (1, dout), jnp.float32, -bound, bound)
    return w, b


def _bn_params(key, d):
    kg, kb, km, kv = jax.random.split(key, 4)
    gamma = 1.0 + 0.1 * jax.random.normal(kg, (1, d), jnp.float32)
    beta = 0.1 * jax.random.normal(kb, (1, d), jnp.float32)
    mean = 0.1 * jax.random.normal(km, (1, d), jnp.float32)
    var = 1.0 + 0.1 * jnp.abs(jax.random.normal(kv, (1, d), jnp.float32))
    scale = gamma / jnp.sqrt(var + BN_EPS)
    shift = beta - mean * scale
    return scale, shift


def build_params(key, input_size):
    keys = iter(jax.random.split(key, 32))
    nk = lambda: next(keys)
    params = []
    # input layer
    w, b = _linear_params(nk(), input_size, 1024)
    s, sh = _bn_params(nk(), 1024)
    params += [w, b, s, sh]
    # residual blocks
    for din, dout in ((1024, 512), (512, 256), (256, 128)):
        w1, b1 = _linear_params(nk(), din, dout)
        s1, sh1 = _bn_params(nk(), dout)
        w2, b2 = _linear_params(nk(), dout, dout)
        s2, sh2 = _bn_params(nk(), dout)
        wsk, bsk = _linear_params(nk(), din, dout)
        params += [w1, b1, s1, sh1, w2, b2, s2, sh2, wsk, bsk]
    # output head
    w, b = _linear_params(nk(), 128, 64)
    s, sh = _bn_params(nk(), 64)
    params += [w, b, s, sh]
    w, b = _linear_params(nk(), 64, 32)
    params += [w, b]
    w, b = _linear_params(nk(), 32, 1)
    params += [w, b]
    return params


# ----------------------------------------------------------------------------
# Pure-JAX reference (same param list, same eval-mode semantics)
# ----------------------------------------------------------------------------
def ref_forward(x, params):
    it = iter(params)
    nxt = lambda: next(it)
    lin = lambda h, w, b: jnp.dot(h, w, precision=jax.lax.Precision.HIGHEST) + b
    h = x.astype(jnp.float32)
    w, b, s, sh = nxt(), nxt(), nxt(), nxt()
    h = _lrelu(lin(h, w, b)) * s + sh
    for _ in range(3):
        w1, b1, s1, sh1 = nxt(), nxt(), nxt(), nxt()
        w2, b2, s2, sh2 = nxt(), nxt(), nxt(), nxt()
        wsk, bsk = nxt(), nxt()
        identity = lin(h, wsk, bsk)
        o = _lrelu(lin(h, w1, b1) * s1 + sh1)
        o = lin(o, w2, b2) * s2 + sh2
        h = _lrelu(o + identity)
    w, b, s, sh = nxt(), nxt(), nxt(), nxt()
    h = _lrelu(lin(h, w, b)) * s + sh
    w, b = nxt(), nxt()
    h = _lrelu(lin(h, w, b))
    w, b = nxt(), nxt()
    return lin(h, w, b)


if __name__ == "__main__":
    key = jax.random.PRNGKey(0)
    kx, kp = jax.random.split(key)

    B, input_size = 16, 32          # small demo shapes: batch=16, features=32
    x = jax.random.normal(kx, (B, input_size), dtype=jnp.float32)
    params = build_params(kp, input_size)

    y = enhanced_residual_mlp(x, params, batch_tile=8)
    y = jax.block_until_ready(y)

    y_ref = ref_forward(x, params)
    assert y.shape == (B, 1)
    assert jnp.allclose(y, y_ref, rtol=2e-2, atol=2e-2), (y, y_ref)

    print("KERNEL_OK")
</pallas_src>

<mosaic_0001>
module attributes {stable_mosaic.version = 11 : i64} {
  func.func @_mlp_kernel(%arg0: i32, %arg1: memref<8x32xf32, #tpu.memory_space<vmem>>, %arg2: memref<32x1024xf32, #tpu.memory_space<vmem>>, %arg3: memref<1x1024xf32, #tpu.memory_space<vmem>>, %arg4: memref<1x1024xf32, #tpu.memory_space<vmem>>, %arg5: memref<1x1024xf32, #tpu.memory_space<vmem>>, %arg6: memref<1024x512xf32, #tpu.memory_space<vmem>>, %arg7: memref<1x512xf32, #tpu.memory_space<vmem>>, %arg8: memref<1x512xf32, #tpu.memory_space<vmem>>, %arg9: memref<1x512xf32, #tpu.memory_space<vmem>>, %arg10: memref<512x512xf32, #tpu.memory_space<vmem>>, %arg11: memref<1x512xf32, #tpu.memory_space<vmem>>, %arg12: memref<1x512xf32, #tpu.memory_space<vmem>>, %arg13: memref<1x512xf32, #tpu.memory_space<vmem>>, %arg14: memref<1024x512xf32, #tpu.memory_space<vmem>>, %arg15: memref<1x512xf32, #tpu.memory_space<vmem>>, %arg16: memref<512x256xf32, #tpu.memory_space<vmem>>, %arg17: memref<1x256xf32, #tpu.memory_space<vmem>>, %arg18: memref<1x256xf32, #tpu.memory_space<vmem>>, %arg19: memref<1x256xf32, #tpu.memory_space<vmem>>, %arg20: memref<256x256xf32, #tpu.memory_space<vmem>>, %arg21: memref<1x256xf32, #tpu.memory_space<vmem>>, %arg22: memref<1x256xf32, #tpu.memory_space<vmem>>, %arg23: memref<1x256xf32, #tpu.memory_space<vmem>>, %arg24: memref<512x256xf32, #tpu.memory_space<vmem>>, %arg25: memref<1x256xf32, #tpu.memory_space<vmem>>, %arg26: memref<256x128xf32, #tpu.memory_space<vmem>>, %arg27: memref<1x128xf32, #tpu.memory_space<vmem>>, %arg28: memref<1x128xf32, #tpu.memory_space<vmem>>, %arg29: memref<1x128xf32, #tpu.memory_space<vmem>>, %arg30: memref<128x128xf32, #tpu.memory_space<vmem>>, %arg31: memref<1x128xf32, #tpu.memory_space<vmem>>, %arg32: memref<1x128xf32, #tpu.memory_space<vmem>>, %arg33: memref<1x128xf32, #tpu.memory_space<vmem>>, %arg34: memref<256x128xf32, #tpu.memory_space<vmem>>, %arg35: memref<1x128xf32, #tpu.memory_space<vmem>>, %arg36: memref<128x64xf32, #tpu.memory_space<vmem>>, %arg37: memref<1x64xf32, #tpu.memory_space<vmem>>, %arg38: memref<1x64xf32, #tpu.memory_space<vmem>>, %arg39: memref<1x64xf32, #tpu.memory_space<vmem>>, %arg40: memref<64x32xf32, #tpu.memory_space<vmem>>, %arg41: memref<1x32xf32, #tpu.memory_space<vmem>>, %arg42: memref<32x1xf32, #tpu.memory_space<vmem>>, %arg43: memref<1x1xf32, #tpu.memory_space<vmem>>, %arg44: memref<8x1xf32, #tpu.memory_space<vmem>>) attributes {dimension_semantics = [#tpu.dimension_semantics<parallel>], iteration_bounds = array<i64: 2>, scalar_prefetch = 0 : i64, scratch_operands = 0 : i64, tpu.core_type = #tpu.core_type<tc>, window_params = [{transform_indices = @transform_0, window_bounds = array<i64: 8, 32>}, {pipeline_mode = #tpu.pipeline_mode<synchronous>, transform_indices = @transform_1, window_bounds = array<i64: 32, 1024>}, {pipeline_mode = #tpu.pipeline_mode<synchronous>, transform_indices = @transform_2, window_bounds = array<i64: 1, 1024>}, {pipeline_mode = #tpu.pipeline_mode<synchronous>, transform_indices = @transform_3, window_bounds = array<i64: 1, 1024>}, {pipeline_mode = #tpu.pipeline_mode<synchronous>, transform_indices = @transform_4, window_bounds = array<i64: 1, 1024>}, {pipeline_mode = #tpu.pipeline_mode<synchronous>, transform_indices = @transform_5, window_bounds = array<i64: 1024, 512>}, {pipeline_mode = #tpu.pipeline_mode<synchronous>, transform_indices = @transform_6, window_bounds = array<i64: 1, 512>}, {pipeline_mode = #tpu.pipeline_mode<synchronous>, transform_indices = @transform_7, window_bounds = array<i64: 1, 512>}, {pipeline_mode = #tpu.pipeline_mode<synchronous>, transform_indices = @transform_8, window_bounds = array<i64: 1, 512>}, {pipeline_mode = #tpu.pipeline_mode<synchronous>, transform_indices = @transform_9, window_bounds = array<i64: 512, 512>}, {pipeline_mode = #tpu.pipeline_mode<synchronous>, transform_indices = @transform_10, window_bounds = array<i64: 1, 512>}, {pipeline_mode = #tpu.pipeline_mode<synchronous>, transform_indices = @transform_11, window_bounds = array<i64: 1, 512>}, {pipeline_mode = #tpu.pipeline_mode<synchronous>, transform_indices = @transform_12, window_bounds = array<i64: 1, 512>}, {pipeline_mode = #tpu.pipeline_mode<synchronous>, transform_indices = @transform_13, window_bounds = array<i64: 1024, 512>}, {pipeline_mode = #tpu.pipeline_mode<synchronous>, transform_indices = @transform_14, window_bounds = array<i64: 1, 512>}, {pipeline_mode = #tpu.pipeline_mode<synchronous>, transform_indices = @transform_15, window_bounds = array<i64: 512, 256>}, {pipeline_mode = #tpu.pipeline_mode<synchronous>, transform_indices = @transform_16, window_bounds = array<i64: 1, 256>}, {pipeline_mode = #tpu.pipeline_mode<synchronous>, transform_indices = @transform_17, window_bounds = array<i64: 1, 256>}, {pipeline_mode = #tpu.pipeline_mode<synchronous>, transform_indices = @transform_18, window_bounds = array<i64: 1, 256>}, {pipeline_mode = #tpu.pipeline_mode<synchronous>, transform_indices = @transform_19, window_bounds = array<i64: 256, 256>}, {pipeline_mode = #tpu.pipeline_mode<synchronous>, transform_indices = @transform_20, window_bounds = array<i64: 1, 256>}, {pipeline_mode = #tpu.pipeline_mode<synchronous>, transform_indices = @transform_21, window_bounds = array<i64: 1, 256>}, {pipeline_mode = #tpu.pipeline_mode<synchronous>, transform_indices = @transform_22, window_bounds = array<i64: 1, 256>}, {pipeline_mode = #tpu.pipeline_mode<synchronous>, transform_indices = @transform_23, window_bounds = array<i64: 512, 256>}, {pipeline_mode = #tpu.pipeline_mode<synchronous>, transform_indices = @transform_24, window_bounds = array<i64: 1, 256>}, {pipeline_mode = #tpu.pipeline_mode<synchronous>, transform_indices = @transform_25, window_bounds = array<i64: 256, 128>}, {pipeline_mode = #tpu.pipeline_mode<synchronous>, transform_indices = @transform_26, window_bounds = array<i64: 1, 128>}, {pipeline_mode = #tpu.pipeline_mode<synchronous>, transform_indices = @transform_27, window_bounds = array<i64: 1, 128>}, {pipeline_mode = #tpu.pipeline_mode<synchronous>, transform_indices = @transform_28, window_bounds = array<i64: 1, 128>}, {pipeline_mode = #tpu.pipeline_mode<synchronous>, transform_indices = @transform_29, window_bounds = array<i64: 128, 128>}, {pipeline_mode = #tpu.pipeline_mode<synchronous>, transform_indices = @transform_30, window_bounds = array<i64: 1, 128>}, {pipeline_mode = #tpu.pipeline_mode<synchronous>, transform_indices = @transform_31, window_bounds = array<i64: 1, 128>}, {pipeline_mode = #tpu.pipeline_mode<synchronous>, transform_indices = @transform_32, window_bounds = array<i64: 1, 128>}, {pipeline_mode = #tpu.pipeline_mode<synchronous>, transform_indices = @transform_33, window_bounds = array<i64: 256, 128>}, {pipeline_mode = #tpu.pipeline_mode<synchronous>, transform_indices = @transform_34, window_bounds = array<i64: 1, 128>}, {pipeline_mode = #tpu.pipeline_mode<synchronous>, transform_indices = @transform_35, window_bounds = array<i64: 128, 64>}, {pipeline_mode = #tpu.pipeline_mode<synchronous>, transform_indices = @transform_36, window_bounds = array<i64: 1, 64>}, {pipeline_mode = #tpu.pipeline_mode<synchronous>, transform_indices = @transform_37, window_bounds = array<i64: 1, 64>}, {pipeline_mode = #tpu.pipeline_mode<synchronous>, transform_indices = @transform_38, window_bounds = array<i64: 1, 64>}, {pipeline_mode = #tpu.pipeline_mode<synchronous>, transform_indices = @transform_39, window_bounds = array<i64: 64, 32>}, {pipeline_mode = #tpu.pipeline_mode<synchronous>, transform_indices = @transform_40, window_bounds = array<i64: 1, 32>}, {pipeline_mode = #tpu.pipeline_mode<synchronous>, transform_indices = @transform_41, window_bounds = array<i64: 32, 1>}, {pipeline_mode = #tpu.pipeline_mode<synchronous>, transform_indices = @transform_42, window_bounds = array<i64: 1, 1>}, {transform_indices = @transform_43, window_bounds = array<i64: 8, 1>}]} {
    %c0 = arith.constant 0 : index
    %c0_0 = arith.constant 0 : index
    %0 = vector.load %arg1[%c0, %c0_0] : memref<8x32xf32, #tpu.memory_space<vmem>>, vector<8x32xf32>
    %c0_1 = arith.constant 0 : index
    %c0_2 = arith.constant 0 : index
    %1 = vector.load %arg2[%c0_1, %c0_2] : memref<32x1024xf32, #tpu.memory_space<vmem>>, vector<32x1024xf32>
    %cst = arith.constant dense<0.000000e+00> : vector<8x1024xf32>
    %2 = tpu.matmul %0, %1, %cst {dimension_numbers = #tpu.dot_dimension_numbers<[1], [0], [0], [1], [0, 0, 1, 1], [], []>} : vector<8x32xf32>, vector<32x1024xf32>, vector<8x1024xf32> -> vector<8x1024xf32>
    %c0_3 = arith.constant 0 : index
    %c0_4 = arith.constant 0 : index
    %3 = vector.load %arg3[%c0_3, %c0_4] : memref<1x1024xf32, #tpu.memory_space<vmem>>, vector<1x1024xf32>
    %4 = vector.broadcast %3 : vector<1x1024xf32> to vector<8x1024xf32>
    %5 = arith.addf %2, %4 : vector<8x1024xf32>
    %cst_5 = arith.constant 0.000000e+00 : f32
    %6 = vector.broadcast %cst_5 : f32 to vector<8x1024xf32>
    %7 = arith.cmpf oge, %5, %6 : vector<8x1024xf32>
    %cst_6 = arith.constant 1.000000e-01 : f32
    %8 = vector.broadcast %cst_6 : f32 to vector<8x1024xf32>
    %9 = arith.mulf %8, %5 : vector<8x1024xf32>
    %10 = arith.select %7, %5, %9 : vector<8x1024xi1>, vector<8x1024xf32>
    %c0_7 = arith.constant 0 : index
    %c0_8 = arith.constant 0 : index
    %11 = vector.load %arg4[%c0_7, %c0_8] : memref<1x1024xf32, #tpu.memory_space<vmem>>, vector<1x1024xf32>
    %12 = vector.broadcast %11 : vector<1x1024xf32> to vector<8x1024xf32>
    %13 = arith.mulf %10, %12 : vector<8x1024xf32>
    %c0_9 = arith.constant 0 : index
    %c0_10 = arith.constant 0 : index
    %14 = vector.load %arg5[%c0_9, %c0_10] : memref<1x1024xf32, #tpu.memory_space<vmem>>, vector<1x1024xf32>
    %15 = vector.broadcast %14 : vector<1x1024xf32> to vector<8x1024xf32>
    %16 = arith.addf %13, %15 : vector<8x1024xf32>
    %c0_11 = arith.constant 0 : index
    %c0_12 = arith.constant 0 : index
    %17 = vector.load %arg14[%c0_11, %c0_12] : memref<1024x512xf32, #tpu.memory_space<vmem>>, vector<1024x512xf32>
    %cst_13 = arith.constant dense<0.000000e+00> : vector<8x512xf32>
    %18 = tpu.matmul %16, %17, %cst_13 {dimension_numbers = #tpu.dot_dimension_numbers<[1], [0], [0], [1], [0, 0, 1, 1], [], []>} : vector<8x1024xf32>, vector<1024x512xf32>, vector<8x512xf32> -> vector<8x512xf32>
    %c0_14 = arith.constant 0 : index
    %c0_15 = arith.constant 0 : index
    %19 = vector.load %arg15[%c0_14, %c0_15] : memref<1x512xf32, #tpu.memory_space<vmem>>, vector<1x512xf32>
    %20 = vector.broadcast %19 : vector<1x512xf32> to vector<8x512xf32>
    %21 = arith.addf %18, %20 : vector<8x512xf32>
    %c0_16 = arith.constant 0 : index
    %c0_17 = arith.constant 0 : index
    %22 = vector.load %arg6[%c0_16, %c0_17] : memref<1024x512xf32, #tpu.memory_space<vmem>>, vector<1024x512xf32>
    %cst_18 = arith.constant dense<0.000000e+00> : vector<8x512xf32>
    %23 = tpu.matmul %16, %22, %cst_18 {dimension_numbers = #tpu.dot_dimension_numbers<[1], [0], [0], [1], [0, 0, 1, 1], [], []>} : vector<8x1024xf32>, vector<1024x512xf32>, vector<8x512xf32> -> vector<8x512xf32>
    %c0_19 = arith.constant 0 : index
    %c0_20 = arith.constant 0 : index
    %24 = vector.load %arg7[%c0_19, %c0_20] : memref<1x512xf32, #tpu.memory_space<vmem>>, vector<1x512xf32>
    %25 = vector.broadcast %24 : vector<1x512xf32> to vector<8x512xf32>
    %26 = arith.addf %23, %25 : vector<8x512xf32>
    %c0_21 = arith.constant 0 : index
    %c0_22 = arith.constant 0 : index
    %27 = vector.load %arg8[%c0_21, %c0_22] : memref<1x512xf32, #tpu.memory_space<vmem>>, vector<1x512xf32>
    %28 = vector.broadcast %27 : vector<1x512xf32> to vector<8x512xf32>
    %29 = arith.mulf %26, %28 : vector<8x512xf32>
    %c0_23 = arith.constant 0 : index
    %c0_24 = arith.constant 0 : index
    %30 = vector.load %arg9[%c0_23, %c0_24] : memref<1x512xf32, #tpu.memory_space<vmem>>, vector<1x512xf32>
    %31 = vector.broadcast %30 : vector<1x512xf32> to vector<8x512xf32>
    %32 = arith.addf %29, %31 : vector<8x512xf32>
    %cst_25 = arith.constant 0.000000e+00 : f32
    %33 = vector.broadcast %cst_25 : f32 to vector<8x512xf32>
    %34 = arith.cmpf oge, %32, %33 : vector<8x512xf32>
    %cst_26 = arith.constant 1.000000e-01 : f32
    %35 = vector.broadcast %cst_26 : f32 to vector<8x512xf32>
    %36 = arith.mulf %35, %32 : vector<8x512xf32>
    %37 = arith.select %34, %32, %36 : vector<8x512xi1>, vector<8x512xf32>
    %c0_27 = arith.constant 0 : index
    %c0_28 = arith.constant 0 : index
    %38 = vector.load %arg10[%c0_27, %c0_28] : memref<512x512xf32, #tpu.memory_space<vmem>>, vector<512x512xf32>
    %cst_29 = arith.constant dense<0.000000e+00> : vector<8x512xf32>
    %39 = tpu.matmul %37, %38, %cst_29 {dimension_numbers = #tpu.dot_dimension_numbers<[1], [0], [0], [1], [0, 0, 1, 1], [], []>} : vector<8x512xf32>, vector<512x512xf32>, vector<8x512xf32> -> vector<8x512xf32>
    %c0_30 = arith.constant 0 : index
    %c0_31 = arith.constant 0 : index
    %40 = vector.load %arg11[%c0_30, %c0_31] : memref<1x512xf32, #tpu.memory_space<vmem>>, vector<1x512xf32>
    %41 = vector.broadcast %40 : vector<1x512xf32> to vector<8x512xf32>
    %42 = arith.addf %39, %41 : vector<8x512xf32>
    %c0_32 = arith.constant 0 : index
    %c0_33 = arith.constant 0 : index
    %43 = vector.load %arg12[%c0_32, %c0_33] : memref<1x512xf32, #tpu.memory_space<vmem>>, vector<1x512xf32>
    %44 = vector.broadcast %43 : vector<1x512xf32> to vector<8x512xf32>
    %45 = arith.mulf %42, %44 : vector<8x512xf32>
    %c0_34 = arith.constant 0 : index
    %c0_35 = arith.constant 0 : index
    %46 = vector.load %arg13[%c0_34, %c0_35] : memref<1x512xf32, #tpu.memory_space<vmem>>, vector<1x512xf32>
    %47 = vector.broadcast %46 : vector<1x512xf32> to vector<8x512xf32>
    %48 = arith.addf %45, %47 : vector<8x512xf32>
    %49 = arith.addf %48, %21 : vector<8x512xf32>
    %cst_36 = arith.constant 0.000000e+00 : f32
    %50 = vector.broadcast %cst_36 : f32 to vector<8x512xf32>
    %51 = arith.cmpf oge, %49, %50 : vector<8x512xf32>
    %cst_37 = arith.constant 1.000000e-01 : f32
    %52 = vector.broadcast %cst_37 : f32 to vector<8x512xf32>
    %53 = arith.mulf %52, %49 : vector<8x512xf32>
    %54 = arith.select %51, %49, %53 : vector<8x512xi1>, vector<8x512xf32>
    %c0_38 = arith.constant 0 : index
    %c0_39 = arith.constant 0 : index
    %55 = vector.load %arg24[%c0_38, %c0_39] : memref<512x256xf32, #tpu.memory_space<vmem>>, vector<512x256xf32>
    %cst_40 = arith.constant dense<0.000000e+00> : vector<8x256xf32>
    %56 = tpu.matmul %54, %55, %cst_40 {dimension_numbers = #tpu.dot_dimension_numbers<[1], [0], [0], [1], [0, 0, 1, 1], [], []>} : vector<8x512xf32>, vector<512x256xf32>, vector<8x256xf32> -> vector<8x256xf32>
    %c0_41 = arith.constant 0 : index
    %c0_42 = arith.constant 0 : index
    %57 = vector.load %arg25[%c0_41, %c0_42] : memref<1x256xf32, #tpu.memory_space<vmem>>, vector<1x256xf32>
    %58 = vector.broadcast %57 : vector<1x256xf32> to vector<8x256xf32>
    %59 = arith.addf %56, %58 : vector<8x256xf32>
    %c0_43 = arith.constant 0 : index
    %c0_44 = arith.constant 0 : index
    %60 = vector.load %arg16[%c0_43, %c0_44] : memref<512x256xf32, #tpu.memory_space<vmem>>, vector<512x256xf32>
    %cst_45 = arith.constant dense<0.000000e+00> : vector<8x256xf32>
    %61 = tpu.matmul %54, %60, %cst_45 {dimension_numbers = #tpu.dot_dimension_numbers<[1], [0], [0], [1], [0, 0, 1, 1], [], []>} : vector<8x512xf32>, vector<512x256xf32>, vector<8x256xf32> -> vector<8x256xf32>
    %c0_46 = arith.constant 0 : index
    %c0_47 = arith.constant 0 : index
    %62 = vector.load %arg17[%c0_46, %c0_47] : memref<1x256xf32, #tpu.memory_space<vmem>>, vector<1x256xf32>
    %63 = vector.broadcast %62 : vector<1x256xf32> to vector<8x256xf32>
    %64 = arith.addf %61, %63 : vector<8x256xf32>
    %c0_48 = arith.constant 0 : index
    %c0_49 = arith.constant 0 : index
    %65 = vector.load %arg18[%c0_48, %c0_49] : memref<1x256xf32, #tpu.memory_space<vmem>>, vector<1x256xf32>
    %66 = vector.broadcast %65 : vector<1x256xf32> to vector<8x256xf32>
    %67 = arith.mulf %64, %66 : vector<8x256xf32>
    %c0_50 = arith.constant 0 : index
    %c0_51 = arith.constant 0 : index
    %68 = vector.load %arg19[%c0_50, %c0_51] : memref<1x256xf32, #tpu.memory_space<vmem>>, vector<1x256xf32>
    %69 = vector.broadcast %68 : vector<1x256xf32> to vector<8x256xf32>
    %70 = arith.addf %67, %69 : vector<8x256xf32>
    %cst_52 = arith.constant 0.000000e+00 : f32
    %71 = vector.broadcast %cst_52 : f32 to vector<8x256xf32>
    %72 = arith.cmpf oge, %70, %71 : vector<8x256xf32>
    %cst_53 = arith.constant 1.000000e-01 : f32
    %73 = vector.broadcast %cst_53 : f32 to vector<8x256xf32>
    %74 = arith.mulf %73, %70 : vector<8x256xf32>
    %75 = arith.select %72, %70, %74 : vector<8x256xi1>, vector<8x256xf32>
    %c0_54 = arith.constant 0 : index
    %c0_55 = arith.constant 0 : index
    %76 = vector.load %arg20[%c0_54, %c0_55] : memref<256x256xf32, #tpu.memory_space<vmem>>, vector<256x256xf32>
    %cst_56 = arith.constant dense<0.000000e+00> : vector<8x256xf32>
    %77 = tpu.matmul %75, %76, %cst_56 {dimension_numbers = #tpu.dot_dimension_numbers<[1], [0], [0], [1], [0, 0, 1, 1], [], []>} : vector<8x256xf32>, vector<256x256xf32>, vector<8x256xf32> -> vector<8x256xf32>
    %c0_57 = arith.constant 0 : index
    %c0_58 = arith.constant 0 : index
    %78 = vector.load %arg21[%c0_57, %c0_58] : memref<1x256xf32, #tpu.memory_space<vmem>>, vector<1x256xf32>
    %79 = vector.broadcast %78 : vector<1x256xf32> to vector<8x256xf32>
    %80 = arith.addf %77, %79 : vector<8x256xf32>
    %c0_59 = arith.constant 0 : index
    %c0_60 = arith.constant 0 : index
    %81 = vector.load %arg22[%c0_59, %c0_60] : memref<1x256xf32, #tpu.memory_space<vmem>>, vector<1x256xf32>
    %82 = vector.broadcast %81 : vector<1x256xf32> to vector<8x256xf32>
    %83 = arith.mulf %80, %82 : vector<8x256xf32>
    %c0_61 = arith.constant 0 : index
    %c0_62 = arith.constant 0 : index
    %84 = vector.load %arg23[%c0_61, %c0_62] : memref<1x256xf32, #tpu.memory_space<vmem>>, vector<1x256xf32>
    %85 = vector.broadcast %84 : vector<1x256xf32> to vector<8x256xf32>
    %86 = arith.addf %83, %85 : vector<8x256xf32>
    %87 = arith.addf %86, %59 : vector<8x256xf32>
    %cst_63 = arith.constant 0.000000e+00 : f32
    %88 = vector.broadcast %cst_63 : f32 to vector<8x256xf32>
    %89 = arith.cmpf oge, %87, %88 : vector<8x256xf32>
    %cst_64 = arith.constant 1.000000e-01 : f32
    %90 = vector.broadcast %cst_64 : f32 to vector<8x256xf32>
    %91 = arith.mulf %90, %87 : vector<8x256xf32>
    %92 = arith.select %89, %87, %91 : vector<8x256xi1>, vector<8x256xf32>
    %c0_65 = arith.constant 0 : index
    %c0_66 = arith.constant 0 : index
    %93 = vector.load %arg34[%c0_65, %c0_66] : memref<256x128xf32, #tpu.memory_space<vmem>>, vector<256x128xf32>
    %cst_67 = arith.constant dense<0.000000e+00> : vector<8x128xf32>
    %94 = tpu.matmul %92, %93, %cst_67 {dimension_numbers = #tpu.dot_dimension_numbers<[1], [0], [0], [1], [0, 0, 1, 1], [], []>} : vector<8x256xf32>, vector<256x128xf32>, vector<8x128xf32> -> vector<8x128xf32>
    %c0_68 = arith.constant 0 : index
    %c0_69 = arith.constant 0 : index
    %95 = vector.load %arg35[%c0_68, %c0_69] : memref<1x128xf32, #tpu.memory_space<vmem>>, vector<1x128xf32>
    %96 = vector.broadcast %95 : vector<1x128xf32> to vector<8x128xf32>
    %97 = arith.addf %94, %96 : vector<8x128xf32>
    %c0_70 = arith.constant 0 : index
    %c0_71 = arith.constant 0 : index
    %98 = vector.load %arg26[%c0_70, %c0_71] : memref<256x128xf32, #tpu.memory_space<vmem>>, vector<256x128xf32>
    %cst_72 = arith.constant dense<0.000000e+00> : vector<8x128xf32>
    %99 = tpu.matmul %92, %98, %cst_72 {dimension_numbers = #tpu.dot_dimension_numbers<[1], [0], [0], [1], [0, 0, 1, 1], [], []>} : vector<8x256xf32>, vector<256x128xf32>, vector<8x128xf32> -> vector<8x128xf32>
    %c0_73 = arith.constant 0 : index
    %c0_74 = arith.constant 0 : index
    %100 = vector.load %arg27[%c0_73, %c0_74] : memref<1x128xf32, #tpu.memory_space<vmem>>, vector<1x128xf32>
    %101 = vector.broadcast %100 : vector<1x128xf32> to vector<8x128xf32>
    %102 = arith.addf %99, %101 : vector<8x128xf32>
    %c0_75 = arith.constant 0 : index
    %c0_76 = arith.constant 0 : index
    %103 = vector.load %arg28[%c0_75, %c0_76] : memref<1x128xf32, #tpu.memory_space<vmem>>, vector<1x128xf32>
    %104 = vector.broadcast %103 : vector<1x128xf32> to vector<8x128xf32>
    %105 = arith.mulf %102, %104 : vector<8x128xf32>
    %c0_77 = arith.constant 0 : index
    %c0_78 = arith.constant 0 : index
    %106 = vector.load %arg29[%c0_77, %c0_78] : memref<1x128xf32, #tpu.memory_space<vmem>>, vector<1x128xf32>
    %107 = vector.broadcast %106 : vector<1x128xf32> to vector<8x128xf32>
    %108 = arith.addf %105, %107 : vector<8x128xf32>
    %cst_79 = arith.constant 0.000000e+00 : f32
    %109 = vector.broadcast %cst_79 : f32 to vector<8x128xf32>
    %110 = arith.cmpf oge, %108, %109 : vector<8x128xf32>
    %cst_80 = arith.constant 1.000000e-01 : f32
    %111 = vector.broadcast %cst_80 : f32 to vector<8x128xf32>
    %112 = arith.mulf %111, %108 : vector<8x128xf32>
    %113 = arith.select %110, %108, %112 : vector<8x128xi1>, vector<8x128xf32>
    %c0_81 = arith.constant 0 : index
    %c0_82 = arith.constant 0 : index
    %114 = vector.load %arg30[%c0_81, %c0_82] : memref<128x128xf32, #tpu.memory_space<vmem>>, vector<128x128xf32>
    %cst_83 = arith.constant dense<0.000000e+00> : vector<8x128xf32>
    %115 = tpu.matmul %113, %114, %cst_83 {dimension_numbers = #tpu.dot_dimension_numbers<[1], [0], [0], [1], [0, 0, 1, 1], [], []>} : vector<8x128xf32>, vector<128x128xf32>, vector<8x128xf32> -> vector<8x128xf32>
    %c0_84 = arith.constant 0 : index
    %c0_85 = arith.constant 0 : index
    %116 = vector.load %arg31[%c0_84, %c0_85] : memref<1x128xf32, #tpu.memory_space<vmem>>, vector<1x128xf32>
    %117 = vector.broadcast %116 : vector<1x128xf32> to vector<8x128xf32>
    %118 = arith.addf %115, %117 : vector<8x128xf32>
    %c0_86 = arith.constant 0 : index
    %c0_87 = arith.constant 0 : index
    %119 = vector.load %arg32[%c0_86, %c0_87] : memref<1x128xf32, #tpu.memory_space<vmem>>, vector<1x128xf32>
    %120 = vector.broadcast %119 : vector<1x128xf32> to vector<8x128xf32>
    %121 = arith.mulf %118, %120 : vector<8x128xf32>
    %c0_88 = arith.constant 0 : index
    %c0_89 = arith.constant 0 : index
    %122 = vector.load %arg33[%c0_88, %c0_89] : memref<1x128xf32, #tpu.memory_space<vmem>>, vector<1x128xf32>
    %123 = vector.broadcast %122 : vector<1x128xf32> to vector<8x128xf32>
    %124 = arith.addf %121, %123 : vector<8x128xf32>
    %125 = arith.addf %124, %97 : vector<8x128xf32>
    %cst_90 = arith.constant 0.000000e+00 : f32
    %126 = vector.broadcast %cst_90 : f32 to vector<8x128xf32>
    %127 = arith.cmpf oge, %125, %126 : vector<8x128xf32>
    %cst_91 = arith.constant 1.000000e-01 : f32
    %128 = vector.broadcast %cst_91 : f32 to vector<8x128xf32>
    %129 = arith.mulf %128, %125 : vector<8x128xf32>
    %130 = arith.select %127, %125, %129 : vector<8x128xi1>, vector<8x128xf32>
    %c0_92 = arith.constant 0 : index
    %c0_93 = arith.constant 0 : index
    %131 = vector.load %arg36[%c0_92, %c0_93] : memref<128x64xf32, #tpu.memory_space<vmem>>, vector<128x64xf32>
    %cst_94 = arith.constant dense<0.000000e+00> : vector<8x64xf32>
    %132 = tpu.matmul %130, %131, %cst_94 {dimension_numbers = #tpu.dot_dimension_numbers<[1], [0], [0], [1], [0, 0, 1, 1], [], []>} : vector<8x128xf32>, vector<128x64xf32>, vector<8x64xf32> -> vector<8x64xf32>
    %c0_95 = arith.constant 0 : index
    %c0_96 = arith.constant 0 : index
    %133 = vector.load %arg37[%c0_95, %c0_96] : memref<1x64xf32, #tpu.memory_space<vmem>>, vector<1x64xf32>
    %134 = vector.broadcast %133 : vector<1x64xf32> to vector<8x64xf32>
    %135 = arith.addf %132, %134 : vector<8x64xf32>
    %cst_97 = arith.constant 0.000000e+00 : f32
    %136 = vector.broadcast %cst_97 : f32 to vector<8x64xf32>
    %137 = arith.cmpf oge, %135, %136 : vector<8x64xf32>
    %cst_98 = arith.constant 1.000000e-01 : f32
    %138 = vector.broadcast %cst_98 : f32 to vector<8x64xf32>
    %139 = arith.mulf %138, %135 : vector<8x64xf32>
    %140 = arith.select %137, %135, %139 : vector<8x64xi1>, vector<8x64xf32>
    %c0_99 = arith.constant 0 : index
    %c0_100 = arith.constant 0 : index
    %141 = vector.load %arg38[%c0_99, %c0_100] : memref<1x64xf32, #tpu.memory_space<vmem>>, vector<1x64xf32>
    %142 = vector.broadcast %141 : vector<1x64xf32> to vector<8x64xf32>
    %143 = arith.mulf %140, %142 : vector<8x64xf32>
    %c0_101 = arith.constant 0 : index
    %c0_102 = arith.constant 0 : index
    %144 = vector.load %arg39[%c0_101, %c0_102] : memref<1x64xf32, #tpu.memory_space<vmem>>, vector<1x64xf32>
    %145 = vector.broadcast %144 : vector<1x64xf32> to vector<8x64xf32>
    %146 = arith.addf %143, %145 : vector<8x64xf32>
    %c0_103 = arith.constant 0 : index
    %c0_104 = arith.constant 0 : index
    %147 = vector.load %arg40[%c0_103, %c0_104] : memref<64x32xf32, #tpu.memory_space<vmem>>, vector<64x32xf32>
    %cst_105 = arith.constant dense<0.000000e+00> : vector<8x32xf32>
    %148 = tpu.matmul %146, %147, %cst_105 {dimension_numbers = #tpu.dot_dimension_numbers<[1], [0], [0], [1], [0, 0, 1, 1], [], []>} : vector<8x64xf32>, vector<64x32xf32>, vector<8x32xf32> -> vector<8x32xf32>
    %c0_106 = arith.constant 0 : index
    %c0_107 = arith.constant 0 : index
    %149 = vector.load %arg41[%c0_106, %c0_107] : memref<1x32xf32, #tpu.memory_space<vmem>>, vector<1x32xf32>
    %150 = vector.broadcast %149 : vector<1x32xf32> to vector<8x32xf32>
    %151 = arith.addf %148, %150 : vector<8x32xf32>
    %cst_108 = arith.constant 0.000000e+00 : f32
    %152 = vector.broadcast %cst_108 : f32 to vector<8x32xf32>
    %153 = arith.cmpf oge, %151, %152 : vector<8x32xf32>
    %cst_109 = arith.constant 1.000000e-01 : f32
    %154 = vector.broadcast %cst_109 : f32 to vector<8x32xf32>
    %155 = arith.mulf %154, %151 : vector<8x32xf32>
    %156 = arith.select %153, %151, %155 : vector<8x32xi1>, vector<8x32xf32>
    %c0_110 = arith.constant 0 : index
    %c0_111 = arith.constant 0 : index
    %157 = vector.load %arg42[%c0_110, %c0_111] : memref<32x1xf32, #tpu.memory_space<vmem>>, vector<32x1xf32>
    %cst_112 = arith.constant dense<0.000000e+00> : vector<8x1xf32>
    %158 = tpu.matmul %156, %157, %cst_112 {dimension_numbers = #tpu.dot_dimension_numbers<[1], [0], [0], [1], [0, 0, 1, 1], [], []>} : vector<8x32xf32>, vector<32x1xf32>, vector<8x1xf32> -> vector<8x1xf32>
    %c0_113 = arith.constant 0 : index
    %c0_114 = arith.constant 0 : index
    %159 = vector.load %arg43[%c0_113, %c0_114] : memref<1x1xf32, #tpu.memory_space<vmem>>, vector<1x1xf32>
    %160 = vector.broadcast %159 : vector<1x1xf32> to vector<8x1xf32>
    %161 = arith.addf %158, %160 : vector<8x1xf32>
    %c0_115 = arith.constant 0 : index
    %c0_116 = arith.constant 0 : index
    %162 = vector.load %arg44[%c0_115, %c0_116] : memref<8x1xf32, #tpu.memory_space<vmem>>, vector<8x1xf32>
    tpu.vector_store %arg44[%c0_115, %c0_116], %161 {strides = array<i32>} : memref<8x1xf32, #tpu.memory_space<vmem>>, vector<8x1xf32>,
    return
  }
  func.func @transform_0(%arg0: i32) -> (i32, i32) {
    %c0_i32 = arith.constant 0 : i32
    %c0_i32_0 = arith.constant 0 : i32
    return %arg0, %c0_i32 : i32, i32
  }
  func.func @transform_1(%arg0: i32) -> (i32, i32) {
    %c0_i32 = arith.constant 0 : i32
    %c0_i32_0 = arith.constant 0 : i32
    %c0_i32_1 = arith.constant 0 : i32
    return %c0_i32, %c0_i32_0 : i32, i32
  }
  func.func @transform_2(%arg0: i32) -> (i32, i32) {
    %c0_i32 = arith.constant 0 : i32
    %c0_i32_0 = arith.constant 0 : i32
    %c0_i32_1 = arith.constant 0 : i32
    return %c0_i32, %c0_i32_0 : i32, i32
  }
  func.func @transform_3(%arg0: i32) -> (i32, i32) {
    %c0_i32 = arith.constant 0 : i32
    %c0_i32_0 = arith.constant 0 : i32
    %c0_i32_1 = arith.constant 0 : i32
    return %c0_i32, %c0_i32_0 : i32, i32
  }
  func.func @transform_4(%arg0: i32) -> (i32, i32) {
    %c0_i32 = arith.constant 0 : i32
    %c0_i32_0 = arith.constant 0 : i32
    %c0_i32_1 = arith.constant 0 : i32
    return %c0_i32, %c0_i32_0 : i32, i32
  }
  func.func @transform_5(%arg0: i32) -> (i32, i32) {
    %c0_i32 = arith.constant 0 : i32
    %c0_i32_0 = arith.constant 0 : i32
    %c0_i32_1 = arith.constant 0 : i32
    return %c0_i32, %c0_i32_0 : i32, i32
  }
  func.func @transform_6(%arg0: i32) -> (i32, i32) {
    %c0_i32 = arith.constant 0 : i32
    %c0_i32_0 = arith.constant 0 : i32
    %c0_i32_1 = arith.constant 0 : i32
    return %c0_i32, %c0_i32_0 : i32, i32
  }
  func.func @transform_7(%arg0: i32) -> (i32, i32) {
    %c0_i32 = arith.constant 0 : i32
    %c0_i32_0 = arith.constant 0 : i32
    %c0_i32_1 = arith.constant 0 : i32
    return %c0_i32, %c0_i32_0 : i32, i32
  }
  func.func @transform_8(%arg0: i32) -> (i32, i32) {
    %c0_i32 = arith.constant 0 : i32
    %c0_i32_0 = arith.constant 0 : i32
    %c0_i32_1 = arith.constant 0 : i32
    return %c0_i32, %c0_i32_0 : i32, i32
  }
  func.func @transform_9(%arg0: i32) -> (i32, i32) {
    %c0_i32 = arith.constant 0 : i32
    %c0_i32_0 = arith.constant 0 : i32
    %c0_i32_1 = arith.constant 0 : i32
    return %c0_i32, %c0_i32_0 : i32, i32
  }
  func.func @transform_10(%arg0: i32) -> (i32, i32) {
    %c0_i32 = arith.constant 0 : i32
    %c0_i32_0 = arith.constant 0 : i32
    %c0_i32_1 = arith.constant 0 : i32
    return %c0_i32, %c0_i32_0 : i32, i32
  }
  func.func @transform_11(%arg0: i32) -> (i32, i32) {
    %c0_i32 = arith.constant 0 : i32
    %c0_i32_0 = arith.constant 0 : i32
    %c0_i32_1 = arith.constant 0 : i32
    return %c0_i32, %c0_i32_0 : i32, i32
  }
  func.func @transform_12(%arg0: i32) -> (i32, i32) {
    %c0_i32 = arith.constant 0 : i32
    %c0_i32_0 = arith.constant 0 : i32
    %c0_i32_1 = arith.constant 0 : i32
    return %c0_i32, %c0_i32_0 : i32, i32
  }
  func.func @transform_13(%arg0: i32) -> (i32, i32) {
    %c0_i32 = arith.constant 0 : i32
    %c0_i32_0 = arith.constant 0 : i32
    %c0_i32_1 = arith.constant 0 : i32
    return %c0_i32, %c0_i32_0 : i32, i32
  }
  func.func @transform_14(%arg0: i32) -> (i32, i32) {
    %c0_i32 = arith.constant 0 : i32
    %c0_i32_0 = arith.constant 0 : i32
    %c0_i32_1 = arith.constant 0 : i32
    return %c0_i32, %c0_i32_0 : i32, i32
  }
  func.func @transform_15(%arg0: i32) -> (i32, i32) {
    %c0_i32 = arith.constant 0 : i32
    %c0_i32_0 = arith.constant 0 : i32
    %c0_i32_1 = arith.constant 0 : i32
    return %c0_i32, %c0_i32_0 : i32, i32
  }
  func.func @transform_16(%arg0: i32) -> (i32, i32) {
    %c0_i32 = arith.constant 0 : i32
    %c0_i32_0 = arith.constant 0 : i32
    %c0_i32_1 = arith.constant 0 : i32
    return %c0_i32, %c0_i32_0 : i32, i32
  }
  func.func @transform_17(%arg0: i32) -> (i32, i32) {
    %c0_i32 = arith.constant 0 : i32
    %c0_i32_0 = arith.constant 0 : i32
    %c0_i32_1 = arith.constant 0 : i32
    return %c0_i32, %c0_i32_0 : i32, i32
  }
  func.func @transform_18(%arg0: i32) -> (i32, i32) {
    %c0_i32 = arith.constant 0 : i32
    %c0_i32_0 = arith.constant 0 : i32
    %c0_i32_1 = arith.constant 0 : i32
    return %c0_i32, %c0_i32_0 : i32, i32
  }
  func.func @transform_19(%arg0: i32) -> (i32, i32) {
    %c0_i32 = arith.constant 0 : i32
    %c0_i32_0 = arith.constant 0 : i32
    %c0_i32_1 = arith.constant 0 : i32
    return %c0_i32, %c0_i32_0 : i32, i32
  }
  func.func @transform_20(%arg0: i32) -> (i32, i32) {
    %c0_i32 = arith.constant 0 : i32
    %c0_i32_0 = arith.constant 0 : i32
    %c0_i32_1 = arith.constant 0 : i32
    return %c0_i32, %c0_i32_0 : i32, i32
  }
  func.func @transform_21(%arg0: i32) -> (i32, i32) {
    %c0_i32 = arith.constant 0 : i32
    %c0_i32_0 = arith.constant 0 : i32
    %c0_i32_1 = arith.constant 0 : i32
    return %c0_i32, %c0_i32_0 : i32, i32
  }
  func.func @transform_22(%arg0: i32) -> (i32, i32) {
    %c0_i32 = arith.constant 0 : i32
    %c0_i32_0 = arith.constant 0 : i32
    %c0_i32_1 = arith.constant 0 : i32
    return %c0_i32, %c0_i32_0 : i32, i32
  }
  func.func @transform_23(%arg0: i32) -> (i32, i32) {
    %c0_i32 = arith.constant 0 : i32
    %c0_i32_0 = arith.constant 0 : i32
    %c0_i32_1 = arith.constant 0 : i32
    return %c0_i32, %c0_i32_0 : i32, i32
  }
  func.func @transform_24(%arg0: i32) -> (i32, i32) {
    %c0_i32 = arith.constant 0 : i32
    %c0_i32_0 = arith.constant 0 : i32
    %c0_i32_1 = arith.constant 0 : i32
    return %c0_i32, %c0_i32_0 : i32, i32
  }
  func.func @transform_25(%arg0: i32) -> (i32, i32) {
    %c0_i32 = arith.constant 0 : i32
    %c0_i32_0 = arith.constant 0 : i32
    %c0_i32_1 = arith.constant 0 : i32
    return %c0_i32, %c0_i32_0 : i32, i32
  }
  func.func @transform_26(%arg0: i32) -> (i32, i32) {
    %c0_i32 = arith.constant 0 : i32
    %c0_i32_0 = arith.constant 0 : i32
    %c0_i32_1 = arith.constant 0 : i32
    return %c0_i32, %c0_i32_0 : i32, i32
  }
  func.func @transform_27(%arg0: i32) -> (i32, i32) {
    %c0_i32 = arith.constant 0 : i32
    %c0_i32_0 = arith.constant 0 : i32
    %c0_i32_1 = arith.constant 0 : i32
    return %c0_i32, %c0_i32_0 : i32, i32
  }
  func.func @transform_28(%arg0: i32) -> (i32, i32) {
    %c0_i32 = arith.constant 0 : i32
    %c0_i32_0 = arith.constant 0 : i32
    %c0_i32_1 = arith.constant 0 : i32
    return %c0_i32, %c0_i32_0 : i32, i32
  }
  func.func @transform_29(%arg0: i32) -> (i32, i32) {
    %c0_i32 = arith.constant 0 : i32
    %c0_i32_0 = arith.constant 0 : i32
    %c0_i32_1 = arith.constant 0 : i32
    return %c0_i32, %c0_i32_0 : i32, i32
  }
  func.func @transform_30(%arg0: i32) -> (i32, i32) {
    %c0_i32 = arith.constant 0 : i32
    %c0_i32_0 = arith.constant 0 : i32
    %c0_i32_1 = arith.constant 0 : i32
    return %c0_i32, %c0_i32_0 : i32, i32
  }
  func.func @transform_31(%arg0: i32) -> (i32, i32) {
    %c0_i32 = arith.constant 0 : i32
    %c0_i32_0 = arith.constant 0 : i32
    %c0_i32_1 = arith.constant 0 : i32
    return %c0_i32, %c0_i32_0 : i32, i32
  }
  func.func @transform_32(%arg0: i32) -> (i32, i32) {
    %c0_i32 = arith.constant 0 : i32
    %c0_i32_0 = arith.constant 0 : i32
    %c0_i32_1 = arith.constant 0 : i32
    return %c0_i32, %c0_i32_0 : i32, i32
  }
  func.func @transform_33(%arg0: i32) -> (i32, i32) {
    %c0_i32 = arith.constant 0 : i32
    %c0_i32_0 = arith.constant 0 : i32
    %c0_i32_1 = arith.constant 0 : i32
    return %c0_i32, %c0_i32_0 : i32, i32
  }
  func.func @transform_34(%arg0: i32) -> (i32, i32) {
    %c0_i32 = arith.constant 0 : i32
    %c0_i32_0 = arith.constant 0 : i32
    %c0_i32_1 = arith.constant 0 : i32
    return %c0_i32, %c0_i32_0 : i32, i32
  }
  func.func @transform_35(%arg0: i32) -> (i32, i32) {
    %c0_i32 = arith.constant 0 : i32
    %c0_i32_0 = arith.constant 0 : i32
    %c0_i32_1 = arith.constant 0 : i32
    return %c0_i32, %c0_i32_0 : i32, i32
  }
  func.func @transform_36(%arg0: i32) -> (i32, i32) {
    %c0_i32 = arith.constant 0 : i32
    %c0_i32_0 = arith.constant 0 : i32
    %c0_i32_1 = arith.constant 0 : i32
    return %c0_i32, %c0_i32_0 : i32, i32
  }
  func.func @transform_37(%arg0: i32) -> (i32, i32) {
    %c0_i32 = arith.constant 0 : i32
    %c0_i32_0 = arith.constant 0 : i32
    %c0_i32_1 = arith.constant 0 : i32
    return %c0_i32, %c0_i32_0 : i32, i32
  }
  func.func @transform_38(%arg0: i32) -> (i32, i32) {
    %c0_i32 = arith.constant 0 : i32
    %c0_i32_0 = arith.constant 0 : i32
    %c0_i32_1 = arith.constant 0 : i32
    return %c0_i32, %c0_i32_0 : i32, i32
  }
  func.func @transform_39(%arg0: i32) -> (i32, i32) {
    %c0_i32 = arith.constant 0 : i32
    %c0_i32_0 = arith.constant 0 : i32
    %c0_i32_1 = arith.constant 0 : i32
    return %c0_i32, %c0_i32_0 : i32, i32
  }
  func.func @transform_40(%arg0: i32) -> (i32, i32) {
    %c0_i32 = arith.constant 0 : i32
    %c0_i32_0 = arith.constant 0 : i32
    %c0_i32_1 = arith.constant 0 : i32
    return %c0_i32, %c0_i32_0 : i32, i32
  }
  func.func @transform_41(%arg0: i32) -> (i32, i32) {
    %c0_i32 = arith.constant 0 : i32
    %c0_i32_0 = arith.constant 0 : i32
    %c0_i32_1 = arith.constant 0 : i32
    return %c0_i32, %c0_i32_0 : i32, i32
  }
  func.func @transform_42(%arg0: i32) -> (i32, i32) {
    %c0_i32 = arith.constant 0 : i32
    %c0_i32_0 = arith.constant 0 : i32
    %c0_i32_1 = arith.constant 0 : i32
    return %c0_i32, %c0_i32_0 : i32, i32
  }
  func.func @transform_43(%arg0: i32) -> (i32, i32) {
    %c0_i32 = arith.constant 0 : i32
    %c0_i32_0 = arith.constant 0 : i32
    return %arg0, %c0_i32 : i32, i32
  }
}

</mosaic_0001>

<bundles_post_ra>
// kernel: tpu_custom_call.1
= control target key start
LH: loop header
LB: loop body
LE: loop exit
PB: predicated region body
PF: predicated region fallthrough
CT: control target
= control target key end

     0   :  { %s10707_s6 = smov 1   ;;  %s10708_s10 = smov 2   ;;  %s12027_s0 = inlined_call_operand.smem [shape: u32[44], index: -1, kind: input, shape index: {}] }
   0x1   :  { %s10808_s5 = sld [smem:[%s12027_s0]]   ;;  %s10709_s14 = smov 3  }
   0x2   :  { %s10813_s9 = sld [smem:[%s12027_s0 + %s10707_s6]]   ;;  %s10710_s18 = smov 4  }
   0x3   :  { %s10818_s13 = sld [smem:[%s12027_s0 + %s10708_s10]]   ;;  %s10711_s22 = smov 5  }
   0x4   :  { %s10823_s17 = sld [smem:[%s12027_s0 + %s10709_s14]]   ;;  %s10712_s26 = smov 6  }
   0x5   :  { %s10828_s21 = sld [smem:[%s12027_s0 + %s10710_s18]]   ;;  %s10713_s30 = smov 7  }
   0x6   :  { %s10833_s25 = sld [smem:[%s12027_s0 + %s10711_s22]]   ;;  %s10714_s4 = smov 8  }
   0x7   :  { %12083 = sst [smem:[#allocation82_spill]] %s10808_s5  ;;  %s10715_s10 = smov 9  }
   0x8   :  { %12084 = sst [smem:[#allocation83_spill]] %s10813_s9  ;;  %s10716_s15 = smov 10  }
   0x9   :  { %12085 = sst [smem:[#allocation84_spill]] %s10818_s13  ;;  %s10717_s20 = smov 11  }
   0xa   :  { %s10838_s29 = sld [smem:[%s12027_s0 + %s10712_s26]]   ;;  %s10718_s26 = smov 12  }
   0xb   :  { %12086 = sst [smem:[#allocation85_spill]] %s10828_s21  ;;  %s10719_s1 = smov 13  }
   0xc   :  { %s10843_s3 = sld [smem:[%s12027_s0 + %s10713_s30]]   ;;  %s10720_s7 = smov 14  }
   0xd   :  { %s10848_s8 = sld [smem:[%s12027_s0 + %s10714_s4]]   ;;  %s10722_s22 = smov 16  }
   0xe   :  { %s10853_s14 = sld [smem:[%s12027_s0 + %s10715_s10]]   ;;  %s10723_s28 = smov 17  }
   0xf   :  { %s10858_s19 = sld [smem:[%s12027_s0 + %s10716_s15]]   ;;  %s10721_s15 = smov 15  }
  0x10   :  { %12087 = sst [smem:[#allocation86_spill]] %s10838_s29  ;;  %s10749_s16 = smov 43  }
  0x11   :  { %s10863_s24 = sld [smem:[%s12027_s0 + %s10717_s20]]  }
  0x12   :  { %12088 = sst [smem:[#allocation87_spill]] %s10843_s3 }
  0x13   :  { %12089 = sst [smem:[#allocation88_spill]] %s10848_s8 }
  0x14   :  { %s10868_s30 = sld [smem:[%s12027_s0 + %s10718_s26]]  }
  0x15   :  { %12090 = sst [smem:[#allocation89_spill]] %s10858_s19 }
  0x16   :  { %s10873_s6 = sld [smem:[%s12027_s0 + %s10719_s1]]  }
  0x17   :  { %s10878_s12 = sld [smem:[%s12027_s0 + %s10720_s7]]   ;;  %s10724_s7 = smov 18  }
  0x18   :  { %s10883_s20 = sld [smem:[%s12027_s0 + %s10721_s15]]   ;;  %s10725_s15 = smov 19  }
  0x19   :  { %s10888_s27 = sld [smem:[%s12027_s0 + %s10722_s22]]   ;;  %s10726_s22 = smov 20  }
  0x1a   :  { %12091 = sst [smem:[#allocation90_spill]] %s10868_s30 }
  0x1b   :  { %s10893_s4 = sld [smem:[%s12027_s0 + %s10723_s28]]   ;;  %s10727_s28 = smov 21  }
  0x1c   :  { %12092 = sst [smem:[#allocation91_spill]] %s10873_s6 }
  0x1d   :  { %12093 = sst [smem:[#allocation92_spill]] %s10878_s12 }
  0x1e   :  { %s10898_s5 = sld [smem:[%s12027_s0 + %s10724_s7]]   ;;  %s10728_s7 = smov 22  }
  0x1f   :  { %12094 = sst [smem:[#allocation93_spill]] %s10888_s27 }
  0x20   :  { %s10903_s12 = sld [smem:[%s12027_s0 + %s10725_s15]]   ;;  %s10729_s15 = smov 23  }
  0x21   :  { %12095 = sst [smem:[#allocation94_spill]] %s10893_s4 }
  0x22   :  { %s10908_s27 = sld [smem:[%s12027_s0 + %s10726_s22]]   ;;  %s10730_s22 = smov 24  }
  0x23   :  { %s10913_s30 = sld [smem:[%s12027_s0 + %s10727_s28]]   ;;  %s10731_s28 = smov 25  }
  0x24   :  { %12096 = sst [smem:[#allocation95_spill]] %s10898_s5 }
  0x25   :  { %s10918_s5 = sld [smem:[%s12027_s0 + %s10728_s7]]   ;;  %s10732_s7 = smov 26  }
  0x26   :  { %12097 = sst [smem:[#allocation96_spill]] %s10903_s12 }
  0x27   :  { %s10923_s19 = sld [smem:[%s12027_s0 + %s10729_s15]]   ;;  %s10733_s15 = smov 27  }
  0x28   :  { %12098 = sst [smem:[#allocation97_spill]] %s10908_s27 }
  0x29   :  { %s10928_s27 = sld [smem:[%s12027_s0 + %s10730_s22]]   ;;  %s10734_s22 = smov 28  }
  0x2a   :  { %s10933_s8 = sld [smem:[%s12027_s0 + %s10731_s28]]   ;;  %s10735_s28 = smov 29  }
  0x2b   :  { %12099 = sst [smem:[#allocation98_spill]] %s10918_s5 }
  0x2c   :  { %s10938_s5 = sld [smem:[%s12027_s0 + %s10732_s7]]   ;;  %s10736_s7 = smov 30  }
  0x2d   :  { %s10943_s29 = sld [smem:[%s12027_s0 + %s10733_s15]]   ;;  %s10737_s15 = smov 31  }
  0x2e   :  { %s10953_s21 = sld [smem:[%s12027_s0 + %s10735_s28]]   ;;  %s10739_s28 = smov 33  }
  0x2f   :  { %12100 = sst [smem:[#allocation99_spill]] %s10928_s27 }
  0x30   :  { %12101 = sst [smem:[#allocation100_spill]] %s10933_s8 }
  0x31   :  { %s10948_s27 = sld [smem:[%s12027_s0 + %s10734_s22]]   ;;  %s10738_s22 = smov 32  }
  0x32   :  { %12102 = sst [smem:[#allocation101_spill]] %s10938_s5 }
  0x33   :  { %s10958_s5 = sld [smem:[%s12027_s0 + %s10736_s7]]   ;;  %s10740_s7 = smov 34  }
  0x34   :  { %12104 = sst [smem:[#allocation103_spill]] %s10953_s21 }
  0x35   :  { %s10963_s13 = sld [smem:[%s12027_s0 + %s10737_s15]]   ;;  %s10741_s15 = smov 35  }
  0x36   :  { %s10973_s21 = sld [smem:[%s12027_s0 + %s10739_s28]]   ;;  %s10743_s28 = smov 37  }
  0x37   :  { %12103 = sst [smem:[#allocation102_spill]] %s10948_s27 }
  0x38   :  { %s10968_s27 = sld [smem:[%s12027_s0 + %s10738_s22]]   ;;  %s10742_s22 = smov 36  }
  0x39   :  { %12105 = sst [smem:[#allocation104_spill]] %s10958_s5 }
  0x3a   :  { %s10978_s5 = sld [smem:[%s12027_s0 + %s10740_s7]]   ;;  %s10744_s7 = smov 38  }
  0x3b   :  { %12106 = sst [smem:[#allocation105_spill]] %s10963_s13 }
  0x3c   :  { %12108 = sst [smem:[#allocation107_spill]] %s10973_s21 }
  0x3d   :  { %s10983_s13 = sld [smem:[%s12027_s0 + %s10741_s15]]   ;;  %s10745_s15 = smov 39  }
  0x3e   :  { %12107 = sst [smem:[#allocation106_spill]] %s10968_s27 }
  0x3f   :  { %s10988_s27 = sld [smem:[%s12027_s0 + %s10742_s22]]   ;;  %s10746_s22 = smov 40  }
  0x40   :  { %12109 = sst [smem:[#allocation108_spill]] %s10978_s5 }
  0x41   :  { %s10993_s21 = sld [smem:[%s12027_s0 + %s10743_s28]]   ;;  %s10747_s28 = smov 41  }
  0x42   :  { %s10998_s5 = sld [smem:[%s12027_s0 + %s10744_s7]]   ;;  %s10748_s7 = smov 42  }
  0x43   :  { %12110 = sst [smem:[#allocation109_spill]] %s10983_s13 }
  0x44   :  { %s11003_s13 = sld [smem:[%s12027_s0 + %s10745_s15]]  }
  0x45   :  { %12111 = sst [smem:[#allocation110_spill]] %s10988_s27 }
  0x46   :  { %s11008_s27 = sld [smem:[%s12027_s0 + %s10746_s22]]  }
  0x47   :  { %12112 = sst [smem:[#allocation111_spill]] %s10993_s21 }
  0x48   :  { %12113 = sst [smem:[#allocation112_spill]] %s10998_s5 }
  0x49   :  { %s11013_s21 = sld [smem:[%s12027_s0 + %s10747_s28]]  }
  0x4a   :  { %12114 = sst [smem:[#allocation113_spill]] %s11003_s13 }
  0x4b   :  { %s7079_s5 = sld [smem:[%s12027_s0 + %s10748_s7]]  }
  0x4c   :  { %s11021_s13 = sld [smem:[%s12027_s0 + %s10749_s16]]  }
  0x4f   :  { %12115 = sst [smem:[#allocation114_spill]] %s11013_s21 }
  0x51   :  { %v92_v0 = vstv %s7079_s5 }
  0x52   :  { %12116 = sst [smem:[#allocation115_spill]] %s11021_s13  ;;  %93 = vst [vmem:[#allocation2] sm:$0x1] %v92_v0 }
  0x53   :  { %94 = vsyncpa [#allocation4], 0 }
  0x54   :  { %96 = vsyncpa [#allocation4 + $0x1], 0 }
  0x55   :  { %97 = vsyncpa [#allocation6], 0 }
  0x56   :  { %98 = vsyncpa [#allocation9], 0 }
  0x57   :  { %99 = vsyncpa [#allocation12], 0 }
  0x58   :  { %100 = vsyncpa [#allocation15], 0 }
  0x59   :  { %101 = vsyncpa [#allocation18], 0 }
  0x5a   :  { %102 = vsyncpa [#allocation21], 0 }
  0x5b   :  { %103 = vsyncpa [#allocation24], 0 }
  0x5c   :  { %104 = vsyncpa [#allocation27], 0 }
  0x5d   :  { %105 = vsyncpa [#allocation30], 0 }
  0x5e   :  { %106 = vsyncpa [#allocation33], 0 }
  0x5f   :  { %107 = vsyncpa [#allocation36], 0 }
  0x60   :  { %108 = vsyncpa [#allocation39], 0 }
  0x61   :  { %109 = vsyncpa [#allocation42], 0 }
  0x62   :  { %110 = vsyncpa [#allocation45], 0 }
  0x63   :  { %111 = vsyncpa [#allocation48], 0 }
  0x64   :  { %112 = vsyncpa [#allocation51], 0 }
  0x65   :  { %113 = vsyncpa [#allocation54], 0 }
  0x66   :  { %114 = vsyncpa [#allocation57], 0 }
  0x67   :  { %115 = vsyncpa [#allocation60], 0  ;;  %s11023_s0 = smov 0   ;;  %s11025_s5 = smov 0  }
  0x68   :  { %s11027_s22 = smov 0   ;;  %s11029_s23 = smov 0  }
  0x69 LB: > { %s12117_s12 = sld [smem:[#allocation96_spill]]  ;;  %s12118_s9 = sld [smem:[#allocation83_spill]]  ;;  %s10697_s5 = sphi %s11025_s5, %s12205_s5   ;;  %s10693_s0 = sphi %s11023_s0, %s12204_s0   ;;  %s10705_s23 = sphi %s11029_s23, %s12202_s23   ;;  %s10701_s22 = sphi %s11027_s22, %s12206_s22  }
  0x6a   : > { %s12119_s8 = sld [smem:[#allocation100_spill]]  ;;  %s12120_s6 = sld [smem:[#allocation91_spill]] }
  0x6b   : > { %s12121_s4 = sld [smem:[#allocation94_spill]]  ;;  %s12122_s3 = sld [smem:[#allocation87_spill]] }
  0x6c   : > { %s11042_s26 = sadd.s32 4294967295, %s10705_s23   ;;  %s11045_s28 = sadd.s32 1, %s10705_s23  }
  0x6d   : > { %12123 = sst [smem:[#allocation116_spill]] %s11045_s28  ;;  %s125_s1 = ssub.s32 %s10705_s23, %s11045_s28 }
  0x6e   : > { %s128_s2 = sadd.s32 1, %s10701_s22  ;;  %p126_p0 = scmp.eq.s32.totalorder %s125_s1, 0 }
  0x6f   : > { %p135_p1 = scmp.ne.s32.totalorder %s10701_s22, %s10697_s5  ;;  %p136_p2 = scmp.eq.s32.totalorder %s10705_s23, 0 }
  0x70   : > { %p141_p3 = scmp.ne.s32.totalorder %s10697_s5, %s10693_s0  ;;  %p12082_p5 = scmp.eq.s32.totalorder %s11042_s26, 0 }
  0x71   : > { %s11055_s7 = scalar_select %p126_p0, %s10701_s22, %s128_s2  }
  0x72   : > { %p11057_p4 = por %p136_p2, %p135_p1  ;;  %p7083_p6 = scmp.ge.s32.totalorder %s10705_s23, 1 }
  0x73   : > { %12124 = sst [smem:[#allocation117_spill]] %s11055_s7  ;;  %p1060_p7 = scmp.lt.s32.totalorder %s10705_s23, 3 }
  0x74   : > { %p11066_p8 = por %p12082_p5, %p141_p3 }
  0x75   : > { %p11070_p9 = pnand %p7083_p6, %p1060_p7 }
  0x76   : > { %s12126_s11 = scalar_select %p11066_p8, 1, 0 }
  0x77   : > { %s12127_s16 = scalar_select %p11070_p9, 1, 0 }
  0x78   : > { %1064 = sbr.rel (%p11070_p9) target bundleno = 1050 (0x41a), region = 12  ;;  %s10750_s15 = smov (!%p11070_p9), [#allocation5]  }
  0x79   : > { %s1072_s18 = sshll.u32 (!%p11070_p9), %s10750_s15, 4  ;;  %s9577_s0 = scalar_lea.hbm (!%p11070_p9), %s12118_s9, 4096  ;;  %s1073_s18 = int_to_ptr.vmem [resolvable:$true] %s1072_s18 }
  0x7a   : > { %p9578_p10 = scmp.ne.s32.totalorder (!%p11070_p9), %s12118_s9, %s9577_s0  ;;  %p9583_p13 = scmp.lt.u32.totalorder (!%p11070_p9), %s9577_s0, %s12118_s9 }
  0x7c   : > { %p9579_p11 = pnand (!%p11070_p9), %p9578_p10, %p12082_p5 }
  0x7e   : > { %p9580_p12 = pneg (!%p11070_p9), %p9579_p11 }
  0x80   : > { %p9585_p0 = pnand %p9583_p13, %p9580_p12 }
  0x82   : > { %9588 = shalt.err (!%p9585_p0)
}
  0x83   : > { %s9589_s1 = scalar_lea.vmem %s1073_s18, 4096  ;;  %p9596_p6 = scmp.lt.s32.totalorder %s1073_s18, %s1073_s18 }
  0x84   : > { %p9590_p1 = scmp.ne.s32.totalorder %s1073_s18, %s9589_s1  ;;  %p9597_p7 = scmp.lt.s32.totalorder %s9589_s1, %s9589_s1 }
  0x86   : > { %p9591_p2 = pnand %p9590_p1, %p12082_p5  ;;  %p9598_p8 = por %p9597_p7, %p9596_p6 }
  0x88   : > { %p9592_p3 = pneg %p9591_p2 }
  0x8a   : > { %p9599_p9 = pnand %p9598_p8, %p9592_p3 }
  0x8c   : > { %9602 = shalt.err (!%p9599_p9)
}
  0x8d   : > { %s10751_s2 = smov 1024   ;;  %s10752_s15 = smov 64  }
  0x8e   : > { %9215 = dma.hbm_to_vmem [thread:$0]  (%p12082_p5), %s12118_s9, 4096, %s1073_s18, [#allocation6], %s10751_s2, %s10751_s2, %s10752_s15  }
  0x8f   : > { %s10753_s0 = smov [#allocation8]   ;;  %s10754_s28 = smov [#allocation11]  }
  0x90   : > { %s1097_s7 = sshll.u32 %s10753_s0, 4  ;;  %s1118_s13 = sshll.u32 %s10754_s28, 4  ;;  %s1098_s7 = int_to_ptr.vmem [resolvable:$true] %s1097_s7  ;;  %s11086_s13 = int_to_ptr.vmem [resolvable:$true] %s1118_s13 }
  0x91   : > { %s9603_s1 = scalar_lea.hbm %s10823_s17, 128 }
  0x92   : > { %p9604_p8 = scmp.ne.s32.totalorder %s10823_s17, %s9603_s1  ;;  %p9609_p11 = scmp.lt.u32.totalorder %s9603_s1, %s10823_s17 }
  0x94   : > { %p9605_p9 = pnand %p9604_p8, %p12082_p5 }
  0x96   : > { %p9606_p10 = pneg %p9605_p9 }
  0x98   : > { %p9611_p12 = pnand %p9609_p11, %p9606_p10 }
  0x9a   : > { %9614 = shalt.err (!%p9611_p12)
}
  0x9b   : > { %s9615_s21 = scalar_lea.vmem %s1098_s7, 128  ;;  %p9622_p2 = scmp.lt.s32.totalorder %s1098_s7, %s1098_s7 }
  0x9c   : > { %p9616_p13 = scmp.ne.s32.totalorder %s1098_s7, %s9615_s21  ;;  %p9623_p3 = scmp.lt.s32.totalorder %s9615_s21, %s9615_s21 }
  0x9e   : > { %p9617_p0 = pnand %p9616_p13, %p12082_p5  ;;  %p9624_p6 = por %p9623_p3, %p9622_p2 }
  0xa0   : > { %p9618_p1 = pneg %p9617_p0 }
  0xa2   : > { %p9625_p7 = pnand %p9624_p6, %p9618_p1 }
  0xa4   : > { %9628 = shalt.err (!%p9625_p7)
}
  0xa5   : > { %9219 = dma.hbm_to_vmem [thread:$0]  (%p12082_p5), %s10823_s17, 128, %s1098_s7, [#allocation9]  }
  0xa6   : > { %s9629_s28 = scalar_lea.hbm %s10833_s25, 65536 }
  0xa7   : > { %p9630_p8 = scmp.ne.s32.totalorder %s10833_s25, %s9629_s28  ;;  %p9635_p11 = scmp.lt.u32.totalorder %s9629_s28, %s10833_s25 }
  0xa9   : > { %p9631_p9 = pnand %p9630_p8, %p12082_p5 }
  0xab   : > { %p9632_p10 = pneg %p9631_p9 }
  0xad   : > { %p9637_p12 = pnand %p9635_p11, %p9632_p10 }
  0xaf   : > { %9640 = shalt.err (!%p9637_p12)
}
  0xb0   : > { %s9641_s21 = scalar_lea.vmem %s11086_s13, 65536  ;;  %p9648_p2 = scmp.lt.s32.totalorder %s11086_s13, %s11086_s13 }
  0xb1   : > { %p9642_p13 = scmp.ne.s32.totalorder %s11086_s13, %s9641_s21  ;;  %p9649_p3 = scmp.lt.s32.totalorder %s9641_s21, %s9641_s21 }
  0xb3   : > { %p9643_p0 = pnand %p9642_p13, %p12082_p5  ;;  %p9650_p6 = por %p9649_p3, %p9648_p2 }
  0xb5   : > { %p9644_p1 = pneg %p9643_p0 }
  0xb7   : > { %p9651_p7 = pnand %p9650_p6, %p9644_p1 }
  0xb9   : > { %9654 = shalt.err (!%p9651_p7)
}
  0xba   : > { %s10755_s7 = smov 512   ;;  %s10756_s18 = smov 32  }
  0xbb   : > { %9223 = dma.hbm_to_vmem [thread:$0]  (%p12082_p5), %s10833_s25, 65536, %s11086_s13, [#allocation12], %s10755_s7, %s10755_s7, %s10756_s18  }
  0xbc   : > { %s10757_s2 = smov [#allocation14]   ;;  %s10758_s0 = smov [#allocation17]  }
  0xbd   : > { %s1143_s15 = sshll.u32 %s10757_s2, 4  ;;  %s1164_s1 = sshll.u32 %s10758_s0, 4  ;;  %s1144_s15 = int_to_ptr.vmem [resolvable:$true] %s1143_s15  ;;  %s11116_s1 = int_to_ptr.vmem [resolvable:$true] %s1164_s1 }
  0xbe   : > { %s9655_s28 = scalar_lea.hbm %s12122_s3, 64 }
  0xbf   : > { %p9656_p8 = scmp.ne.s32.totalorder %s12122_s3, %s9655_s28  ;;  %p9661_p11 = scmp.lt.u32.totalorder %s9655_s28, %s12122_s3 }
  0xc1   : > { %p9657_p9 = pnand %p9656_p8, %p12082_p5 }
  0xc3   : > { %p9658_p10 = pneg %p9657_p9 }
  0xc5   : > { %p9663_p12 = pnand %p9661_p11, %p9658_p10 }
  0xc7   : > { %9666 = shalt.err (!%p9663_p12)
}
  0xc8   : > { %s9667_s21 = scalar_lea.vmem %s1144_s15, 64  ;;  %p9674_p2 = scmp.lt.s32.totalorder %s1144_s15, %s1144_s15 }
  0xc9   : > { %p9668_p13 = scmp.ne.s32.totalorder %s1144_s15, %s9667_s21  ;;  %p9675_p3 = scmp.lt.s32.totalorder %s9667_s21, %s9667_s21 }
  0xcb   : > { %p9669_p0 = pnand %p9668_p13, %p12082_p5  ;;  %p9676_p6 = por %p9675_p3, %p9674_p2 }
  0xcd   : > { %p9670_p1 = pneg %p9669_p0 }
  0xcf   : > { %p9677_p7 = pnand %p9676_p6, %p9670_p1 }
  0xd1   : > { %9680 = shalt.err (!%p9677_p7)
}
  0xd2   : > { %9227 = dma.hbm_to_vmem [thread:$0]  (%p12082_p5), %s12122_s3, 64, %s1144_s15, [#allocation15]  }
  0xd3   : > { %s9681_s13 = scalar_lea.hbm %s10853_s14, 32768 }
  0xd4   : > { %p9682_p8 = scmp.ne.s32.totalorder %s10853_s14, %s9681_s13  ;;  %p9687_p11 = scmp.lt.u32.totalorder %s9681_s13, %s10853_s14 }
  0xd6   : > { %p9683_p9 = pnand %p9682_p8, %p12082_p5 }
  0xd8   : > { %p9684_p10 = pneg %p9683_p9 }
  0xda   : > { %p9689_p12 = pnand %p9687_p11, %p9684_p10 }
  0xdc   : > { %9692 = shalt.err (!%p9689_p12)
}
  0xdd   : > { %s9693_s2 = scalar_lea.vmem %s11116_s1, 32768  ;;  %p9700_p2 = scmp.lt.s32.totalorder %s11116_s1, %s11116_s1 }
  0xde   : > { %p9694_p13 = scmp.ne.s32.totalorder %s11116_s1, %s9693_s2  ;;  %p9701_p3 = scmp.lt.s32.totalorder %s9693_s2, %s9693_s2 }
  0xe0   : > { %p9695_p0 = pnand %p9694_p13, %p12082_p5  ;;  %p9702_p6 = por %p9701_p3, %p9700_p2 }
  0xe2   : > { %p9696_p1 = pneg %p9695_p0 }
  0xe4   : > { %p9703_p7 = pnand %p9702_p6, %p9696_p1 }
  0xe6   : > { %9706 = shalt.err (!%p9703_p7)
}
  0xe7   : > { %9231 = dma.hbm_to_vmem [thread:$0]  (%p12082_p5), %s10853_s14, 32768, %s11116_s1, [#allocation18], %s10755_s7, %s10755_s7, %s10756_s18  }
  0xe8   : > { %s10759_s15 = smov [#allocation20]   ;;  %s10760_s28 = smov [#allocation23]  }
  0xe9   : > { %s1189_s0 = sshll.u32 %s10759_s15, 4  ;;  %s1210_s21 = sshll.u32 %s10760_s28, 4  ;;  %s1190_s0 = int_to_ptr.vmem [resolvable:$true] %s1189_s0  ;;  %s11146_s21 = int_to_ptr.vmem [resolvable:$true] %s1210_s21 }
  0xea   : > { %s9707_s13 = scalar_lea.hbm %s10863_s24, 64 }
  0xeb   : > { %p9708_p8 = scmp.ne.s32.totalorder %s10863_s24, %s9707_s13  ;;  %p9713_p11 = scmp.lt.u32.totalorder %s9707_s13, %s10863_s24 }
  0xed   : > { %p9709_p9 = pnand %p9708_p8, %p12082_p5 }
  0xef   : > { %p9710_p10 = pneg %p9709_p9 }
  0xf1   : > { %p9715_p12 = pnand %p9713_p11, %p9710_p10 }
  0xf3   : > { %9718 = shalt.err (!%p9715_p12)
}
  0xf4   : > { %s9719_s2 = scalar_lea.vmem %s1190_s0, 64  ;;  %p9726_p2 = scmp.lt.s32.totalorder %s1190_s0, %s1190_s0 }
  0xf5   : > { %p9720_p13 = scmp.ne.s32.totalorder %s1190_s0, %s9719_s2  ;;  %p9727_p3 = scmp.lt.s32.totalorder %s9719_s2, %s9719_s2 }
  0xf7   : > { %p9721_p0 = pnand %p9720_p13, %p12082_p5  ;;  %p9728_p6 = por %p9727_p3, %p9726_p2 }
  0xf9   : > { %p9722_p1 = pneg %p9721_p0 }
  0xfb   : > { %p9729_p7 = pnand %p9728_p6, %p9722_p1 }
  0xfd   : > { %9732 = shalt.err (!%p9729_p7)
}
  0xfe   : > { %9235 = dma.hbm_to_vmem [thread:$0]  (%p12082_p5), %s10863_s24, 64, %s1190_s0, [#allocation21]  }
  0xff   : > { %s9733_s1 = scalar_lea.hbm %s12120_s6, 65536 }
 0x100   : > { %p9734_p8 = scmp.ne.s32.totalorder %s12120_s6, %s9733_s1  ;;  %p9739_p11 = scmp.lt.u32.totalorder %s9733_s1, %s12120_s6 }
 0x102   : > { %p9735_p9 = pnand %p9734_p8, %p12082_p5 }
 0x104   : > { %p9736_p10 = pneg %p9735_p9 }
 0x106   : > { %p9741_p12 = pnand %p9739_p11, %p9736_p10 }
 0x108   : > { %9744 = shalt.err (!%p9741_p12)
}
 0x109   : > { %s9745_s15 = scalar_lea.vmem %s11146_s21, 65536  ;;  %p9752_p2 = scmp.lt.s32.totalorder %s11146_s21, %s11146_s21 }
 0x10a   : > { %p9746_p13 = scmp.ne.s32.totalorder %s11146_s21, %s9745_s15  ;;  %p9753_p3 = scmp.lt.s32.totalorder %s9745_s15, %s9745_s15 }
 0x10c   : > { %p9747_p0 = pnand %p9746_p13, %p12082_p5  ;;  %p9754_p6 = por %p9753_p3, %p9752_p2 }
 0x10e   : > { %p9748_p1 = pneg %p9747_p0 }
 0x110   : > { %p9755_p7 = pnand %p9754_p6, %p9748_p1 }
 0x112   : > { %9758 = shalt.err (!%p9755_p7)
}
 0x113   : > { %9239 = dma.hbm_to_vmem [thread:$0]  (%p12082_p5), %s12120_s6, 65536, %s11146_s21, [#allocation24], %s10755_s7, %s10755_s7, %s10756_s18  }
 0x114   : > { %s10761_s0 = smov [#allocation26]   ;;  %s9759_s13 = scalar_lea.hbm %s10883_s20, 16384 }
 0x115   : > { %s1234_s28 = sshll.u32 %s10761_s0, 4  ;;  %p9760_p8 = scmp.ne.s32.totalorder %s10883_s20, %s9759_s13  ;;  %s1235_s28 = int_to_ptr.vmem [resolvable:$true] %s1234_s28 }
 0x116   : > { %p9765_p11 = scmp.lt.u32.totalorder %s9759_s13, %s10883_s20 }
 0x117   : > { %p9761_p9 = pnand %p9760_p8, %p12082_p5 }
 0x119   : > { %p9762_p10 = pneg %p9761_p9 }
 0x11b   : > { %p9767_p12 = pnand %p9765_p11, %p9762_p10 }
 0x11d   : > { %9770 = shalt.err (!%p9767_p12)
}
 0x11e   : > { %s9771_s2 = scalar_lea.vmem %s1235_s28, 16384  ;;  %p9778_p2 = scmp.lt.s32.totalorder %s1235_s28, %s1235_s28 }
 0x11f   : > { %p9772_p13 = scmp.ne.s32.totalorder %s1235_s28, %s9771_s2  ;;  %p9779_p3 = scmp.lt.s32.totalorder %s9771_s2, %s9771_s2 }
 0x121   : > { %p9773_p0 = pnand %p9772_p13, %p12082_p5  ;;  %p9780_p6 = por %p9779_p3, %p9778_p2 }
 0x123   : > { %p9774_p1 = pneg %p9773_p0 }
 0x125   : > { %p9781_p7 = pnand %p9780_p6, %p9774_p1 }
 0x127   : > { %9784 = shalt.err (!%p9781_p7)
}
 0x128   : > { %s10762_s7 = smov 256   ;;  %s10763_s18 = smov 16  }
 0x129   : > { %9243 = dma.hbm_to_vmem [thread:$0]  (%p12082_p5), %s10883_s20, 16384, %s1235_s28, [#allocation27], %s10762_s7, %s10762_s7, %s10763_s18  }
 0x12a   : > { %s10764_s21 = smov [#allocation29]   ;;  %s10765_s15 = smov [#allocation32]  }
 0x12b   : > { %s1259_s1 = sshll.u32 %s10764_s21, 4  ;;  %s1280_s0 = sshll.u32 %s10765_s15, 4  ;;  %s1260_s1 = int_to_ptr.vmem [resolvable:$true] %s1259_s1  ;;  %s1281_s0 = int_to_ptr.vmem [resolvable:$true] %s1280_s0 }
 0x12c   : > { %s9785_s13 = scalar_lea.hbm %s12121_s4, 32 }
 0x12d   : > { %p9786_p8 = scmp.ne.s32.totalorder %s12121_s4, %s9785_s13  ;;  %p9791_p11 = scmp.lt.u32.totalorder %s9785_s13, %s12121_s4 }
 0x12f   : > { %p9787_p9 = pnand %p9786_p8, %p12082_p5 }
 0x131   : > { %p9788_p10 = pneg %p9787_p9 }
 0x133   : > { %p9793_p12 = pnand %p9791_p11, %p9788_p10 }
 0x135   : > { %9796 = shalt.err (!%p9793_p12)
}
 0x136   : > { %s9797_s2 = scalar_lea.vmem %s1260_s1, 32  ;;  %p9804_p2 = scmp.lt.s32.totalorder %s1260_s1, %s1260_s1 }
 0x137   : > { %p9798_p13 = scmp.ne.s32.totalorder %s1260_s1, %s9797_s2  ;;  %p9805_p3 = scmp.lt.s32.totalorder %s9797_s2, %s9797_s2 }
 0x139   : > { %p9799_p0 = pnand %p9798_p13, %p12082_p5  ;;  %p9806_p6 = por %p9805_p3, %p9804_p2 }
 0x13b   : > { %p9800_p1 = pneg %p9799_p0 }
 0x13d   : > { %p9807_p7 = pnand %p9806_p6, %p9800_p1 }
 0x13f   : > { %9810 = shalt.err (!%p9807_p7)
}
 0x140   : > { %9247 = dma.hbm_to_vmem [thread:$0]  (%p12082_p5), %s12121_s4, 32, %s1260_s1, [#allocation30]  }
 0x141   : > { %s9811_s28 = scalar_lea.hbm %s12117_s12, 8192 }
 0x142   : > { %p9812_p8 = scmp.ne.s32.totalorder %s12117_s12, %s9811_s28  ;;  %p9817_p11 = scmp.lt.u32.totalorder %s9811_s28, %s12117_s12 }
 0x144   : > { %p9813_p9 = pnand %p9812_p8, %p12082_p5 }
 0x146   : > { %p9814_p10 = pneg %p9813_p9 }
 0x148   : > { %p9819_p12 = pnand %p9817_p11, %p9814_p10 }
 0x14a   : > { %9822 = shalt.err (!%p9819_p12)
}
 0x14b   : > { %s9823_s21 = scalar_lea.vmem %s1281_s0, 8192  ;;  %p9830_p2 = scmp.lt.s32.totalorder %s1281_s0, %s1281_s0 }
 0x14c   : > { %p9824_p13 = scmp.ne.s32.totalorder %s1281_s0, %s9823_s21  ;;  %p9831_p3 = scmp.lt.s32.totalorder %s9823_s21, %s9823_s21 }
 0x14e   : > { %p9825_p0 = pnand %p9824_p13, %p12082_p5  ;;  %p9832_p6 = por %p9831_p3, %p9830_p2 }
 0x150   : > { %p9826_p1 = pneg %p9825_p0 }
 0x152   : > { %p9833_p7 = pnand %p9832_p6, %p9826_p1 }
 0x154   : > { %9836 = shalt.err (!%p9833_p7)
}
 0x155   : > { %9251 = dma.hbm_to_vmem [thread:$0]  (%p12082_p5), %s12117_s12, 8192, %s1281_s0, [#allocation33], %s10762_s7, %s10762_s7, %s10763_s18  }
 0x156   : > { %s10766_s1 = smov [#allocation35]   ;;  %s10767_s13 = smov [#allocation38]  }
 0x157   : > { %s1305_s15 = sshll.u32 %s10766_s1, 4  ;;  %s1326_s2 = sshll.u32 %s10767_s13, 4  ;;  %s1306_s15 = int_to_ptr.vmem [resolvable:$true] %s1305_s15  ;;  %s1327_s2 = int_to_ptr.vmem [resolvable:$true] %s1326_s2 }
 0x158   : > { %s9837_s28 = scalar_lea.hbm %s10913_s30, 32 }
 0x159   : > { %p9838_p8 = scmp.ne.s32.totalorder %s10913_s30, %s9837_s28  ;;  %p9843_p11 = scmp.lt.u32.totalorder %s9837_s28, %s10913_s30 }
 0x15b   : > { %p9839_p9 = pnand %p9838_p8, %p12082_p5 }
 0x15d   : > { %p9840_p10 = pneg %p9839_p9 }
 0x15f   : > { %p9845_p12 = pnand %p9843_p11, %p9840_p10 }
 0x161   : > { %9848 = shalt.err (!%p9845_p12)
}
 0x162   : > { %s9849_s21 = scalar_lea.vmem %s1306_s15, 32  ;;  %p9856_p2 = scmp.lt.s32.totalorder %s1306_s15, %s1306_s15 }
 0x163   : > { %p9850_p13 = scmp.ne.s32.totalorder %s1306_s15, %s9849_s21  ;;  %p9857_p3 = scmp.lt.s32.totalorder %s9849_s21, %s9849_s21 }
 0x165   : > { %p9851_p0 = pnand %p9850_p13, %p12082_p5  ;;  %p9858_p6 = por %p9857_p3, %p9856_p2 }
 0x167   : > { %p9852_p1 = pneg %p9851_p0 }
 0x169   : > { %p9859_p7 = pnand %p9858_p6, %p9852_p1 }
 0x16b   : > { %9862 = shalt.err (!%p9859_p7)
}
 0x16c   : > { %9255 = dma.hbm_to_vmem [thread:$0]  (%p12082_p5), %s10913_s30, 32, %s1306_s15, [#allocation36]  }
 0x16d   : > { %s9863_s0 = scalar_lea.hbm %s10923_s19, 16384 }
 0x16e   : > { %p9864_p8 = scmp.ne.s32.totalorder %s10923_s19, %s9863_s0  ;;  %p9869_p11 = scmp.lt.u32.totalorder %s9863_s0, %s10923_s19 }
 0x170   : > { %p9865_p9 = pnand %p9864_p8, %p12082_p5 }
 0x172   : > { %p9866_p10 = pneg %p9865_p9 }
 0x174   : > { %p9871_p12 = pnand %p9869_p11, %p9866_p10 }
 0x176   : > { %9874 = shalt.err (!%p9871_p12)
}
 0x177   : > { %s9875_s1 = scalar_lea.vmem %s1327_s2, 16384  ;;  %p9882_p2 = scmp.lt.s32.totalorder %s1327_s2, %s1327_s2 }
 0x178   : > { %p9876_p13 = scmp.ne.s32.totalorder %s1327_s2, %s9875_s1  ;;  %p9883_p3 = scmp.lt.s32.totalorder %s9875_s1, %s9875_s1 }
 0x17a   : > { %p9877_p0 = pnand %p9876_p13, %p12082_p5  ;;  %p9884_p6 = por %p9883_p3, %p9882_p2 }
 0x17c   : > { %p9878_p1 = pneg %p9877_p0 }
 0x17e   : > { %p9885_p7 = pnand %p9884_p6, %p9878_p1 }
 0x180   : > { %9888 = shalt.err (!%p9885_p7)
}
 0x181   : > { %9259 = dma.hbm_to_vmem [thread:$0]  (%p12082_p5), %s10923_s19, 16384, %s1327_s2, [#allocation39], %s10762_s7, %s10762_s7, %s10763_s18  }
 0x182   : > { %s10768_s15 = smov [#allocation41]   ;;  %s9889_s28 = scalar_lea.hbm %s12119_s8, 4096 }
 0x183   : > { %s1350_s13 = sshll.u32 %s10768_s15, 4  ;;  %p9890_p8 = scmp.ne.s32.totalorder %s12119_s8, %s9889_s28  ;;  %s1351_s13 = int_to_ptr.vmem [resolvable:$true] %s1350_s13 }
 0x184   : > { %p9895_p11 = scmp.lt.u32.totalorder %s9889_s28, %s12119_s8 }
 0x185   : > { %p9891_p9 = pnand %p9890_p8, %p12082_p5 }
 0x187   : > { %p9892_p10 = pneg %p9891_p9 }
 0x189   : > { %p9897_p12 = pnand %p9895_p11, %p9892_p10 }
 0x18b   : > { %9900 = shalt.err (!%p9897_p12)
}
 0x18c   : > { %s9901_s21 = scalar_lea.vmem %s1351_s13, 4096  ;;  %p9908_p2 = scmp.lt.s32.totalorder %s1351_s13, %s1351_s13 }
 0x18d   : > { %p9902_p13 = scmp.ne.s32.totalorder %s1351_s13, %s9901_s21  ;;  %p9909_p3 = scmp.lt.s32.totalorder %s9901_s21, %s9901_s21 }
 0x18f   : > { %p9903_p0 = pnand %p9902_p13, %p12082_p5  ;;  %p9910_p6 = por %p9909_p3, %p9908_p2 }
 0x191   : > { %p9904_p1 = pneg %p9903_p0 }
 0x193   : > { %p9911_p7 = pnand %p9910_p6, %p9904_p1 }
 0x195   : > { %9914 = shalt.err (!%p9911_p7)
}
 0x196   : > { %s10769_s7 = smov 128   ;;  %s10770_s18 = smov 8  }
 0x197   : > { %9263 = dma.hbm_to_vmem [thread:$0]  (%p12082_p5), %s12119_s8, 4096, %s1351_s13, [#allocation42], %s10769_s7, %s10769_s7, %s10770_s18  }
 0x198   : > { %s10771_s2 = smov [#allocation44]   ;;  %s10772_s1 = smov [#allocation47]  }
 0x199   : > { %s1375_s0 = sshll.u32 %s10771_s2, 4  ;;  %s1396_s15 = sshll.u32 %s10772_s1, 4  ;;  %s1376_s0 = int_to_ptr.vmem [resolvable:$true] %s1375_s0  ;;  %s11248_s15 = int_to_ptr.vmem [resolvable:$true] %s1396_s15 }
 0x19a   : > { %s9915_s28 = scalar_lea.hbm %s10943_s29, 16 }
 0x19b   : > { %p9916_p8 = scmp.ne.s32.totalorder %s10943_s29, %s9915_s28  ;;  %p9921_p11 = scmp.lt.u32.totalorder %s9915_s28, %s10943_s29 }
 0x19d   : > { %p9917_p9 = pnand %p9916_p8, %p12082_p5 }
 0x19f   : > { %p9918_p10 = pneg %p9917_p9 }
 0x1a1   : > { %p9923_p12 = pnand %p9921_p11, %p9918_p10 }
 0x1a3   : > { %9926 = shalt.err (!%p9923_p12)
}
 0x1a4   : > { %s9927_s21 = scalar_lea.vmem %s1376_s0, 16  ;;  %s9933_s13 = scalar_lea.vmem %s1376_s0, 32 }
 0x1a5   : > { %p9928_p13 = scmp.ne.s32.totalorder %s1376_s0, %s9927_s21  ;;  %p9934_p2 = scmp.lt.s32.totalorder %s1376_s0, %s1376_s0 }
 0x1a6   : > { %p9935_p3 = scmp.lt.s32.totalorder %s9933_s13, %s9927_s21 }
 0x1a7   : > { %p9929_p0 = pnand %p9928_p13, %p12082_p5 }
 0x1a8   : > { %p9936_p6 = por %p9935_p3, %p9934_p2 }
 0x1a9   : > { %p9930_p1 = pneg %p9929_p0 }
 0x1ab   : > { %p9937_p7 = pnand %p9936_p6, %p9930_p1 }
 0x1ad   : > { %9940 = shalt.err (!%p9937_p7)
}
 0x1ae   : > { %s12128_s2 = sld [smem:[#allocation103_spill]] }
 0x1af   : > { %9267 = dma.hbm_to_vmem [thread:$0]  (%p12082_p5), %s10943_s29, 16, %s1376_s0, [#allocation45]  }
 0x1b4   : > { %s9941_s1 = scalar_lea.hbm %s12128_s2, 2048 }
 0x1b5   : > { %p9942_p8 = scmp.ne.s32.totalorder %s12128_s2, %s9941_s1  ;;  %p9947_p11 = scmp.lt.u32.totalorder %s9941_s1, %s12128_s2 }
 0x1b7   : > { %p9943_p9 = pnand %p9942_p8, %p12082_p5 }
 0x1b9   : > { %p9944_p10 = pneg %p9943_p9 }
 0x1bb   : > { %p9949_p12 = pnand %p9947_p11, %p9944_p10 }
 0x1bd   : > { %9952 = shalt.err (!%p9949_p12)
}
 0x1be   : > { %s9953_s28 = scalar_lea.vmem %s11248_s15, 2048  ;;  %p9960_p2 = scmp.lt.s32.totalorder %s11248_s15, %s11248_s15 }
 0x1bf   : > { %p9954_p13 = scmp.ne.s32.totalorder %s11248_s15, %s9953_s28  ;;  %p9961_p3 = scmp.lt.s32.totalorder %s9953_s28, %s9953_s28 }
 0x1c1   : > { %p9955_p0 = pnand %p9954_p13, %p12082_p5  ;;  %p9962_p6 = por %p9961_p3, %p9960_p2 }
 0x1c3   : > { %p9956_p1 = pneg %p9955_p0 }
 0x1c5   : > { %p9963_p7 = pnand %p9962_p6, %p9956_p1 }
 0x1c7   : > { %9966 = shalt.err (!%p9963_p7)
}
 0x1c8   : > { %s12129_s0 = sld [smem:[#allocation105_spill]]  ;;  %s10773_s13 = smov [#allocation50]  }
 0x1c9   : > { %9271 = dma.hbm_to_vmem [thread:$0]  (%p12082_p5), %s12128_s2, 2048, %s11248_s15, [#allocation48], %s10769_s7, %s10769_s7, %s10770_s18  }
 0x1ca   : > { %s1421_s1 = sshll.u32 %s10773_s13, 4  ;;  %s10774_s3 = smov [#allocation53]   ;;  %s1422_s1 = int_to_ptr.vmem [resolvable:$true] %s1421_s1 }
 0x1cb   : > { %s1442_s4 = sshll.u32 %s10774_s3, 4  ;;  %s11278_s4 = int_to_ptr.vmem [resolvable:$true] %s1442_s4 }
 0x1ce   : > { %s12130_s21 = smov %s12129_s0  ;;  %s9967_s28 = scalar_lea.hbm %s12129_s0, 16 }
 0x1cf   : > { %p9968_p8 = scmp.ne.s32.totalorder %s12130_s21, %s9967_s28  ;;  %p9973_p11 = scmp.lt.u32.totalorder %s9967_s28, %s12130_s21 }
 0x1d1   : > { %p9969_p9 = pnand %p9968_p8, %p12082_p5 }
 0x1d3   : > { %p9970_p10 = pneg %p9969_p9 }
 0x1d5   : > { %p9975_p12 = pnand %p9973_p11, %p9970_p10 }
 0x1d7   : > { %9978 = shalt.err (!%p9975_p12)
}
 0x1d8   : > { %s9979_s6 = scalar_lea.vmem %s1422_s1, 16  ;;  %s9985_s15 = scalar_lea.vmem %s1422_s1, 32 }
 0x1d9   : > { %p9980_p13 = scmp.ne.s32.totalorder %s1422_s1, %s9979_s6  ;;  %p9986_p2 = scmp.lt.s32.totalorder %s1422_s1, %s1422_s1 }
 0x1da   : > { %p9987_p3 = scmp.lt.s32.totalorder %s9985_s15, %s9979_s6 }
 0x1db   : > { %p9981_p0 = pnand %p9980_p13, %p12082_p5 }
 0x1dc   : > { %p9988_p6 = por %p9987_p3, %p9986_p2 }
 0x1dd   : > { %p9982_p1 = pneg %p9981_p0 }
 0x1df   : > { %p9989_p7 = pnand %p9988_p6, %p9982_p1 }
 0x1e1   : > { %9992 = shalt.err (!%p9989_p7)
}
 0x1e2   : > { %s12131_s3 = sld [smem:[#allocation107_spill]] }
 0x1e3   : > { %9275 = dma.hbm_to_vmem [thread:$0]  (%p12082_p5), %s12130_s21, 16, %s1422_s1, [#allocation51]  }
 0x1e8   : > { %s9993_s0 = scalar_lea.hbm %s12131_s3, 4096 }
 0x1e9   : > { %p9994_p8 = scmp.ne.s32.totalorder %s12131_s3, %s9993_s0  ;;  %p9999_p11 = scmp.lt.u32.totalorder %s9993_s0, %s12131_s3 }
 0x1eb   : > { %p9995_p9 = pnand %p9994_p8, %p12082_p5 }
 0x1ed   : > { %p9996_p10 = pneg %p9995_p9 }
 0x1ef   : > { %p10001_p12 = pnand %p9999_p11, %p9996_p10 }
 0x1f1   : > { %10004 = shalt.err (!%p10001_p12)
}
 0x1f2   : > { %s10005_s6 = scalar_lea.vmem %s11278_s4, 4096  ;;  %p10012_p2 = scmp.lt.s32.totalorder %s11278_s4, %s11278_s4 }
 0x1f3   : > { %p10006_p13 = scmp.ne.s32.totalorder %s11278_s4, %s10005_s6  ;;  %p10013_p3 = scmp.lt.s32.totalorder %s10005_s6, %s10005_s6 }
 0x1f5   : > { %p10007_p0 = pnand %p10006_p13, %p12082_p5  ;;  %p10014_p6 = por %p10013_p3, %p10012_p2 }
 0x1f7   : > { %p10008_p1 = pneg %p10007_p0 }
 0x1f9   : > { %p10015_p7 = pnand %p10014_p6, %p10008_p1 }
 0x1fb   : > { %10018 = shalt.err (!%p10015_p7)
}
 0x1fc   : > { %s12132_s13 = sld [smem:[#allocation110_spill]]  ;;  %s10775_s1 = smov [#allocation56]  }
 0x1fd   : > { %9279 = dma.hbm_to_vmem [thread:$0]  (%p12082_p5), %s12131_s3, 4096, %s11278_s4, [#allocation54], %s10769_s7, %s10769_s7, %s10770_s18  }
 0x1fe   : > { %s1470_s28 = sshll.u32 %s10775_s1, 4  ;;  %s10776_s15 = smov [#allocation59]   ;;  %s1471_s28 = int_to_ptr.vmem [resolvable:$true] %s1470_s28 }
 0x1ff   : > { %s1492_s0 = sshll.u32 %s10776_s15, 4  ;;  %s11308_s0 = int_to_ptr.vmem [resolvable:$true] %s1492_s0 }
 0x202   : > { %s10019_s6 = scalar_lea.hbm %s12132_s13, 16 }
 0x203   : > { %p10020_p8 = scmp.ne.s32.totalorder %s12132_s13, %s10019_s6  ;;  %p10025_p11 = scmp.lt.u32.totalorder %s10019_s6, %s12132_s13 }
 0x205   : > { %p10021_p9 = pnand %p10020_p8, %p12082_p5 }
 0x207   : > { %p10022_p10 = pneg %p10021_p9 }
 0x209   : > { %p10027_p12 = pnand %p10025_p11, %p10022_p10 }
 0x20b   : > { %10030 = shalt.err (!%p10027_p12)
}
 0x20c   : > { %s10031_s2 = scalar_lea.vmem %s1471_s28, 16  ;;  %s10037_s4 = scalar_lea.vmem %s1471_s28, 32 }
 0x20d   : > { %p10032_p13 = scmp.ne.s32.totalorder %s1471_s28, %s10031_s2  ;;  %p10038_p2 = scmp.lt.s32.totalorder %s1471_s28, %s1471_s28 }
 0x20e   : > { %p10039_p3 = scmp.lt.s32.totalorder %s10037_s4, %s10031_s2 }
 0x20f   : > { %p10033_p0 = pnand %p10032_p13, %p12082_p5 }
 0x210   : > { %p10040_p6 = por %p10039_p3, %p10038_p2 }
 0x211   : > { %p10034_p1 = pneg %p10033_p0 }
 0x213   : > { %p10041_p7 = pnand %p10040_p6, %p10034_p1 }
 0x215   : > { %10044 = shalt.err (!%p10041_p7)
}
 0x216   : > { %s12133_s7 = sld [smem:[#allocation112_spill]] }
 0x217   : > { %9283 = dma.hbm_to_vmem [thread:$0]  (%p12082_p5), %s12132_s13, 16, %s1471_s28, [#allocation57]  }
 0x21c   : > { %s10045_s18 = scalar_lea.hbm %s12133_s7, 16 }
 0x21d   : > { %p10046_p8 = scmp.ne.s32.totalorder %s12133_s7, %s10045_s18  ;;  %p10051_p11 = scmp.lt.u32.totalorder %s10045_s18, %s12133_s7 }
 0x21f   : > { %p10047_p9 = pnand %p10046_p8, %p12082_p5 }
 0x221   : > { %p10048_p10 = pneg %p10047_p9 }
 0x223   : > { %p10053_p12 = pnand %p10051_p11, %p10048_p10 }
 0x225   : > { %10056 = shalt.err (!%p10053_p12)
}
 0x226   : > { %s10057_s2 = scalar_lea.vmem %s11308_s0, 16  ;;  %s10063_s1 = scalar_lea.vmem %s11308_s0, 32 }
 0x227   : > { %p10058_p13 = scmp.ne.s32.totalorder %s11308_s0, %s10057_s2  ;;  %p10064_p2 = scmp.lt.s32.totalorder %s11308_s0, %s11308_s0 }
 0x228   : > { %p10065_p3 = scmp.lt.s32.totalorder %s10063_s1, %s10057_s2 }
 0x229   : > { %p10059_p0 = pnand %p10058_p13, %p12082_p5 }
 0x22a   : > { %p10066_p6 = por %p10065_p3, %p10064_p2 }
 0x22b   : > { %p10060_p1 = pneg %p10059_p0 }
 0x22d   : > { %p10067_p7 = pnand %p10066_p6, %p10060_p1 }
 0x22f   : > { %10070 = shalt.err (!%p10067_p7)
}
 0x230   : > { %s12134_s28 = sld [smem:[#allocation84_spill]]  ;;  %s10777_s15 = smov [#allocation7]  }
 0x231   : > { %9287 = dma.hbm_to_vmem [thread:$0]  (%p12082_p5), %s12133_s7, 16, %s11308_s0, [#allocation60]  }
 0x232   : > { %s1086_s6 = sshll.u32 %s10777_s15, 4  ;;  %s10778_s4 = smov [#allocation10]   ;;  %s1087_s6 = int_to_ptr.vmem [resolvable:$true] %s1086_s6 }
 0x233   : > { %s1108_s18 = sshll.u32 %s10778_s4, 4  ;;  %s11336_s18 = int_to_ptr.vmem [resolvable:$true] %s1108_s18 }
 0x236   : > { %s10071_s2 = scalar_lea.hbm %s12134_s28, 128 }
 0x237   : > { %p10072_p8 = scmp.ne.s32.totalorder %s12134_s28, %s10071_s2  ;;  %p10077_p11 = scmp.lt.u32.totalorder %s10071_s2, %s12134_s28 }
 0x239   : > { %p10073_p9 = pnand %p10072_p8, %p12082_p5 }
 0x23b   : > { %p10074_p10 = pneg %p10073_p9 }
 0x23d   : > { %p10079_p12 = pnand %p10077_p11, %p10074_p10 }
 0x23f   : > { %10082 = shalt.err (!%p10079_p12)
}
 0x240   : > { %s10083_s1 = scalar_lea.vmem %s1087_s6, 128  ;;  %p10090_p2 = scmp.lt.s32.totalorder %s1087_s6, %s1087_s6 }
 0x241   : > { %p10084_p13 = scmp.ne.s32.totalorder %s1087_s6, %s10083_s1  ;;  %p10091_p3 = scmp.lt.s32.totalorder %s10083_s1, %s10083_s1 }
 0x243   : > { %p10085_p0 = pnand %p10084_p13, %p12082_p5  ;;  %p10092_p6 = por %p10091_p3, %p10090_p2 }
 0x245   : > { %p10086_p1 = pneg %p10085_p0 }
 0x247   : > { %p10093_p7 = pnand %p10092_p6, %p10086_p1 }
 0x249   : > { %10096 = shalt.err (!%p10093_p7)
}
 0x24a   : > { %s12135_s0 = sld [smem:[#allocation85_spill]] }
 0x24b   : > { %9217 = dma.hbm_to_vmem [thread:$0]  (%p12082_p5), %s12134_s28, 128, %s1087_s6, [#allocation6]  }
 0x250   : > { %s12136_s15 = smov %s12135_s0  ;;  %s10097_s4 = scalar_lea.hbm %s12135_s0, 128 }
 0x251   : > { %p10098_p8 = scmp.ne.s32.totalorder %s12136_s15, %s10097_s4  ;;  %p10103_p11 = scmp.lt.u32.totalorder %s10097_s4, %s12136_s15 }
 0x253   : > { %p10099_p9 = pnand %p10098_p8, %p12082_p5 }
 0x255   : > { %p10100_p10 = pneg %p10099_p9 }
 0x257   : > { %p10105_p12 = pnand %p10103_p11, %p10100_p10 }
 0x259   : > { %10108 = shalt.err (!%p10105_p12)
}
 0x25a   : > { %s10109_s2 = scalar_lea.vmem %s11336_s18, 128  ;;  %p10116_p2 = scmp.lt.s32.totalorder %s11336_s18, %s11336_s18 }
 0x25b   : > { %p10110_p13 = scmp.ne.s32.totalorder %s11336_s18, %s10109_s2  ;;  %p10117_p3 = scmp.lt.s32.totalorder %s10109_s2, %s10109_s2 }
 0x25d   : > { %p10111_p0 = pnand %p10110_p13, %p12082_p5  ;;  %p10118_p6 = por %p10117_p3, %p10116_p2 }
 0x25f   : > { %p10112_p1 = pneg %p10111_p0 }
 0x261   : > { %p10119_p7 = pnand %p10118_p6, %p10112_p1 }
 0x263   : > { %10122 = shalt.err (!%p10119_p7)
}
 0x264   : > { %s12137_s6 = sld [smem:[#allocation86_spill]]  ;;  %s10779_s1 = smov [#allocation13]  }
 0x265   : > { %9221 = dma.hbm_to_vmem [thread:$0]  (%p12082_p5), %s12136_s15, 128, %s11336_s18, [#allocation9]  }
 0x266   : > { %s1132_s0 = sshll.u32 %s10779_s1, 4  ;;  %s10780_s4 = smov [#allocation16]   ;;  %s1133_s0 = int_to_ptr.vmem [resolvable:$true] %s1132_s0 }
 0x267   : > { %s1154_s3 = sshll.u32 %s10780_s4, 4  ;;  %s11363_s3 = int_to_ptr.vmem [resolvable:$true] %s1154_s3 }
 0x26a   : > { %s10123_s2 = scalar_lea.hbm %s12137_s6, 64 }
 0x26b   : > { %p10124_p8 = scmp.ne.s32.totalorder %s12137_s6, %s10123_s2  ;;  %p10129_p11 = scmp.lt.u32.totalorder %s10123_s2, %s12137_s6 }
 0x26d   : > { %p10125_p9 = pnand %p10124_p8, %p12082_p5 }
 0x26f   : > { %p10126_p10 = pneg %p10125_p9 }
 0x271   : > { %p10131_p12 = pnand %p10129_p11, %p10126_p10 }
 0x273   : > { %10134 = shalt.err (!%p10131_p12)
}
 0x274   : > { %s10135_s7 = scalar_lea.vmem %s1133_s0, 64  ;;  %p10142_p2 = scmp.lt.s32.totalorder %s1133_s0, %s1133_s0 }
 0x275   : > { %p10136_p13 = scmp.ne.s32.totalorder %s1133_s0, %s10135_s7  ;;  %p10143_p3 = scmp.lt.s32.totalorder %s10135_s7, %s10135_s7 }
 0x277   : > { %p10137_p0 = pnand %p10136_p13, %p12082_p5  ;;  %p10144_p6 = por %p10143_p3, %p10142_p2 }
 0x279   : > { %p10138_p1 = pneg %p10137_p0 }
 0x27b   : > { %p10145_p7 = pnand %p10144_p6, %p10138_p1 }
 0x27d   : > { %10148 = shalt.err (!%p10145_p7)
}
 0x27e   : > { %s12138_s18 = sld [smem:[#allocation88_spill]] }
 0x27f   : > { %9225 = dma.hbm_to_vmem [thread:$0]  (%p12082_p5), %s12137_s6, 64, %s1133_s0, [#allocation12]  }
 0x284   : > { %s10149_s1 = scalar_lea.hbm %s12138_s18, 64 }
 0x285   : > { %p10150_p8 = scmp.ne.s32.totalorder %s12138_s18, %s10149_s1  ;;  %p10155_p11 = scmp.lt.u32.totalorder %s10149_s1, %s12138_s18 }
 0x287   : > { %p10151_p9 = pnand %p10150_p8, %p12082_p5 }
 0x289   : > { %p10152_p10 = pneg %p10151_p9 }
 0x28b   : > { %p10157_p12 = pnand %p10155_p11, %p10152_p10 }
 0x28d   : > { %10160 = shalt.err (!%p10157_p12)
}
 0x28e   : > { %s10161_s7 = scalar_lea.vmem %s11363_s3, 64  ;;  %p10168_p2 = scmp.lt.s32.totalorder %s11363_s3, %s11363_s3 }
 0x28f   : > { %p10162_p13 = scmp.ne.s32.totalorder %s11363_s3, %s10161_s7  ;;  %p10169_p3 = scmp.lt.s32.totalorder %s10161_s7, %s10161_s7 }
 0x291   : > { %p10163_p0 = pnand %p10162_p13, %p12082_p5  ;;  %p10170_p6 = por %p10169_p3, %p10168_p2 }
 0x293   : > { %p10164_p1 = pneg %p10163_p0 }
 0x295   : > { %p10171_p7 = pnand %p10170_p6, %p10164_p1 }
 0x297   : > { %10174 = shalt.err (!%p10171_p7)
}
 0x298   : > { %s12139_s0 = sld [smem:[#allocation89_spill]]  ;;  %s10781_s2 = smov [#allocation19]  }
 0x299   : > { %9229 = dma.hbm_to_vmem [thread:$0]  (%p12082_p5), %s12138_s18, 64, %s11363_s3, [#allocation15]  }
 0x29a   : > { %s1178_s1 = sshll.u32 %s10781_s2, 4  ;;  %s10782_s6 = smov [#allocation22]   ;;  %s1179_s1 = int_to_ptr.vmem [resolvable:$true] %s1178_s1 }
 0x29b   : > { %s1200_s8 = sshll.u32 %s10782_s6, 4  ;;  %s11390_s8 = int_to_ptr.vmem [resolvable:$true] %s1200_s8 }
 0x29e   : > { %s12140_s4 = smov %s12139_s0  ;;  %s10175_s7 = scalar_lea.hbm %s12139_s0, 64 }
 0x29f   : > { %p10176_p8 = scmp.ne.s32.totalorder %s12140_s4, %s10175_s7  ;;  %p10181_p11 = scmp.lt.u32.totalorder %s10175_s7, %s12140_s4 }
 0x2a1   : > { %p10177_p9 = pnand %p10176_p8, %p12082_p5 }
 0x2a3   : > { %p10178_p10 = pneg %p10177_p9 }
 0x2a5   : > { %p10183_p12 = pnand %p10181_p11, %p10178_p10 }
 0x2a7   : > { %10186 = shalt.err (!%p10183_p12)
}
 0x2a8   : > { %s10187_s9 = scalar_lea.vmem %s1179_s1, 64  ;;  %p10194_p2 = scmp.lt.s32.totalorder %s1179_s1, %s1179_s1 }
 0x2a9   : > { %p10188_p13 = scmp.ne.s32.totalorder %s1179_s1, %s10187_s9  ;;  %p10195_p3 = scmp.lt.s32.totalorder %s10187_s9, %s10187_s9 }
 0x2ab   : > { %p10189_p0 = pnand %p10188_p13, %p12082_p5  ;;  %p10196_p6 = por %p10195_p3, %p10194_p2 }
 0x2ad   : > { %p10190_p1 = pneg %p10189_p0 }
 0x2af   : > { %p10197_p7 = pnand %p10196_p6, %p10190_p1 }
 0x2b1   : > { %10200 = shalt.err (!%p10197_p7)
}
 0x2b2   : > { %s12141_s3 = sld [smem:[#allocation90_spill]] }
 0x2b3   : > { %9233 = dma.hbm_to_vmem [thread:$0]  (%p12082_p5), %s12140_s4, 64, %s1179_s1, [#allocation18]  }
 0x2b8   : > { %s10201_s6 = scalar_lea.hbm %s12141_s3, 64 }
 0x2b9   : > { %p10202_p8 = scmp.ne.s32.totalorder %s12141_s3, %s10201_s6  ;;  %p10207_p11 = scmp.lt.u32.totalorder %s10201_s6, %s12141_s3 }
 0x2bb   : > { %p10203_p9 = pnand %p10202_p8, %p12082_p5 }
 0x2bd   : > { %p10204_p10 = pneg %p10203_p9 }
 0x2bf   : > { %p10209_p12 = pnand %p10207_p11, %p10204_p10 }
 0x2c1   : > { %10212 = shalt.err (!%p10209_p12)
}
 0x2c2   : > { %s10213_s9 = scalar_lea.vmem %s11390_s8, 64  ;;  %p10220_p2 = scmp.lt.s32.totalorder %s11390_s8, %s11390_s8 }
 0x2c3   : > { %p10214_p13 = scmp.ne.s32.totalorder %s11390_s8, %s10213_s9  ;;  %p10221_p3 = scmp.lt.s32.totalorder %s10213_s9, %s10213_s9 }
 0x2c5   : > { %p10215_p0 = pnand %p10214_p13, %p12082_p5  ;;  %p10222_p6 = por %p10221_p3, %p10220_p2 }
 0x2c7   : > { %p10216_p1 = pneg %p10215_p0 }
 0x2c9   : > { %p10223_p7 = pnand %p10222_p6, %p10216_p1 }
 0x2cb   : > { %10226 = shalt.err (!%p10223_p7)
}
 0x2cc   : > { %s12142_s0 = sld [smem:[#allocation92_spill]]  ;;  %s10783_s1 = smov [#allocation25]  }
 0x2cd   : > { %9237 = dma.hbm_to_vmem [thread:$0]  (%p12082_p5), %s12141_s3, 64, %s11390_s8, [#allocation21]  }
 0x2ce   : > { %s1224_s7 = sshll.u32 %s10783_s1, 4  ;;  %s10784_s6 = smov [#allocation28]   ;;  %s1225_s7 = int_to_ptr.vmem [resolvable:$true] %s1224_s7 }
 0x2cf   : > { %s1248_s4 = sshll.u32 %s10784_s6, 4  ;;  %s11417_s4 = int_to_ptr.vmem [resolvable:$true] %s1248_s4 }
 0x2d2   : > { %s12143_s2 = smov %s12142_s0  ;;  %s10227_s9 = scalar_lea.hbm %s12142_s0, 64 }
 0x2d3   : > { %p10228_p8 = scmp.ne.s32.totalorder %s12143_s2, %s10227_s9  ;;  %p10233_p11 = scmp.lt.u32.totalorder %s10227_s9, %s12143_s2 }
 0x2d5   : > { %p10229_p9 = pnand %p10228_p8, %p12082_p5 }
 0x2d7   : > { %p10230_p10 = pneg %p10229_p9 }
 0x2d9   : > { %p10235_p12 = pnand %p10233_p11, %p10230_p10 }
 0x2db   : > { %10238 = shalt.err (!%p10235_p12)
}
 0x2dc   : > { %s10239_s12 = scalar_lea.vmem %s1225_s7, 64  ;;  %p10246_p2 = scmp.lt.s32.totalorder %s1225_s7, %s1225_s7 }
 0x2dd   : > { %p10240_p13 = scmp.ne.s32.totalorder %s1225_s7, %s10239_s12  ;;  %p10247_p3 = scmp.lt.s32.totalorder %s10239_s12, %s10239_s12 }
 0x2df   : > { %p10241_p0 = pnand %p10240_p13, %p12082_p5  ;;  %p10248_p6 = por %p10247_p3, %p10246_p2 }
 0x2e1   : > { %p10242_p1 = pneg %p10241_p0 }
 0x2e3   : > { %p10249_p7 = pnand %p10248_p6, %p10242_p1 }
 0x2e5   : > { %10252 = shalt.err (!%p10249_p7)
}
 0x2e6   : > { %s12144_s8 = sld [smem:[#allocation93_spill]] }
 0x2e7   : > { %9241 = dma.hbm_to_vmem [thread:$0]  (%p12082_p5), %s12143_s2, 64, %s1225_s7, [#allocation24]  }
 0x2ec   : > { %s10253_s0 = scalar_lea.hbm %s12144_s8, 32 }
 0x2ed   : > { %p10254_p8 = scmp.ne.s32.totalorder %s12144_s8, %s10253_s0  ;;  %p10259_p11 = scmp.lt.u32.totalorder %s10253_s0, %s12144_s8 }
 0x2ef   : > { %p10255_p9 = pnand %p10254_p8, %p12082_p5 }
 0x2f1   : > { %p10256_p10 = pneg %p10255_p9 }
 0x2f3   : > { %p10261_p12 = pnand %p10259_p11, %p10256_p10 }
 0x2f5   : > { %10264 = shalt.err (!%p10261_p12)
}
 0x2f6   : > { %s10265_s12 = scalar_lea.vmem %s11417_s4, 32  ;;  %p10272_p2 = scmp.lt.s32.totalorder %s11417_s4, %s11417_s4 }
 0x2f7   : > { %p10266_p13 = scmp.ne.s32.totalorder %s11417_s4, %s10265_s12  ;;  %p10273_p3 = scmp.lt.s32.totalorder %s10265_s12, %s10265_s12 }
 0x2f9   : > { %p10267_p0 = pnand %p10266_p13, %p12082_p5  ;;  %p10274_p6 = por %p10273_p3, %p10272_p2 }
 0x2fb   : > { %p10268_p1 = pneg %p10267_p0 }
 0x2fd   : > { %p10275_p7 = pnand %p10274_p6, %p10268_p1 }
 0x2ff   : > { %10278 = shalt.err (!%p10275_p7)
}
 0x300   : > { %s12145_s1 = sld [smem:[#allocation95_spill]]  ;;  %s10785_s7 = smov [#allocation31]  }
 0x301   : > { %9245 = dma.hbm_to_vmem [thread:$0]  (%p12082_p5), %s12144_s8, 32, %s11417_s4, [#allocation27]  }
 0x302   : > { %s1270_s6 = sshll.u32 %s10785_s7, 4  ;;  %s10786_s9 = smov [#allocation34]   ;;  %s1271_s6 = int_to_ptr.vmem [resolvable:$true] %s1270_s6 }
 0x303   : > { %s1294_s0 = sshll.u32 %s10786_s9, 4  ;;  %s11444_s0 = int_to_ptr.vmem [resolvable:$true] %s1294_s0 }
 0x306   : > { %s10279_s12 = scalar_lea.hbm %s12145_s1, 32 }
 0x307   : > { %p10280_p8 = scmp.ne.s32.totalorder %s12145_s1, %s10279_s12  ;;  %p10285_p11 = scmp.lt.u32.totalorder %s10279_s12, %s12145_s1 }
 0x309   : > { %p10281_p9 = pnand %p10280_p8, %p12082_p5 }
 0x30b   : > { %p10282_p10 = pneg %p10281_p9 }
 0x30d   : > { %p10287_p12 = pnand %p10285_p11, %p10282_p10 }
 0x30f   : > { %10290 = shalt.err (!%p10287_p12)
}
 0x310   : > { %s10291_s2 = scalar_lea.vmem %s1271_s6, 32  ;;  %p10298_p2 = scmp.lt.s32.totalorder %s1271_s6, %s1271_s6 }
 0x311   : > { %p10292_p13 = scmp.ne.s32.totalorder %s1271_s6, %s10291_s2  ;;  %p10299_p3 = scmp.lt.s32.totalorder %s10291_s2, %s10291_s2 }
 0x313   : > { %p10293_p0 = pnand %p10292_p13, %p12082_p5  ;;  %p10300_p6 = por %p10299_p3, %p10298_p2 }
 0x315   : > { %p10294_p1 = pneg %p10293_p0 }
 0x317   : > { %p10301_p7 = pnand %p10300_p6, %p10294_p1 }
 0x319   : > { %10304 = shalt.err (!%p10301_p7)
}
 0x31a   : > { %s12146_s4 = sld [smem:[#allocation97_spill]] }
 0x31b   : > { %9249 = dma.hbm_to_vmem [thread:$0]  (%p12082_p5), %s12145_s1, 32, %s1271_s6, [#allocation30]  }
 0x320   : > { %s10305_s7 = scalar_lea.hbm %s12146_s4, 32 }
 0x321   : > { %p10306_p8 = scmp.ne.s32.totalorder %s12146_s4, %s10305_s7  ;;  %p10311_p11 = scmp.lt.u32.totalorder %s10305_s7, %s12146_s4 }
 0x323   : > { %p10307_p9 = pnand %p10306_p8, %p12082_p5 }
 0x325   : > { %p10308_p10 = pneg %p10307_p9 }
 0x327   : > { %p10313_p12 = pnand %p10311_p11, %p10308_p10 }
 0x329   : > { %10316 = shalt.err (!%p10313_p12)
}
 0x32a   : > { %s10317_s2 = scalar_lea.vmem %s11444_s0, 32  ;;  %p10324_p2 = scmp.lt.s32.totalorder %s11444_s0, %s11444_s0 }
 0x32b   : > { %p10318_p13 = scmp.ne.s32.totalorder %s11444_s0, %s10317_s2  ;;  %p10325_p3 = scmp.lt.s32.totalorder %s10317_s2, %s10317_s2 }
 0x32d   : > { %p10319_p0 = pnand %p10318_p13, %p12082_p5  ;;  %p10326_p6 = por %p10325_p3, %p10324_p2 }
 0x32f   : > { %p10320_p1 = pneg %p10319_p0 }
 0x331   : > { %p10327_p7 = pnand %p10326_p6, %p10320_p1 }
 0x333   : > { %10330 = shalt.err (!%p10327_p7)
}
 0x334   : > { %s12147_s6 = sld [smem:[#allocation98_spill]]  ;;  %s10787_s9 = smov [#allocation37]  }
 0x335   : > { %9253 = dma.hbm_to_vmem [thread:$0]  (%p12082_p5), %s12146_s4, 32, %s11444_s0, [#allocation33]  }
 0x336   : > { %s1316_s12 = sshll.u32 %s10787_s9, 4  ;;  %s10788_s7 = smov [#allocation40]   ;;  %s1317_s12 = int_to_ptr.vmem [resolvable:$true] %s1316_s12 }
 0x337   : > { %s1340_s1 = sshll.u32 %s10788_s7, 4  ;;  %s11471_s1 = int_to_ptr.vmem [resolvable:$true] %s1340_s1 }
 0x33a   : > { %s10331_s2 = scalar_lea.hbm %s12147_s6, 32 }
 0x33b   : > { %p10332_p8 = scmp.ne.s32.totalorder %s12147_s6, %s10331_s2  ;;  %p10337_p11 = scmp.lt.u32.totalorder %s10331_s2, %s12147_s6 }
 0x33d   : > { %p10333_p9 = pnand %p10332_p8, %p12082_p5 }
 0x33f   : > { %p10334_p10 = pneg %p10333_p9 }
 0x341   : > { %p10339_p12 = pnand %p10337_p11, %p10334_p10 }
 0x343   : > { %10342 = shalt.err (!%p10339_p12)
}
 0x344   : > { %s10343_s3 = scalar_lea.vmem %s1317_s12, 32  ;;  %p10350_p2 = scmp.lt.s32.totalorder %s1317_s12, %s1317_s12 }
 0x345   : > { %p10344_p13 = scmp.ne.s32.totalorder %s1317_s12, %s10343_s3  ;;  %p10351_p3 = scmp.lt.s32.totalorder %s10343_s3, %s10343_s3 }
 0x347   : > { %p10345_p0 = pnand %p10344_p13, %p12082_p5  ;;  %p10352_p6 = por %p10351_p3, %p10350_p2 }
 0x349   : > { %p10346_p1 = pneg %p10345_p0 }
 0x34b   : > { %p10353_p7 = pnand %p10352_p6, %p10346_p1 }
 0x34d   : > { %10356 = shalt.err (!%p10353_p7)
}
 0x34e   : > { %s12148_s0 = sld [smem:[#allocation99_spill]] }
 0x34f   : > { %9257 = dma.hbm_to_vmem [thread:$0]  (%p12082_p5), %s12147_s6, 32, %s1317_s12, [#allocation36]  }
 0x354   : > { %s12149_s9 = smov %s12148_s0  ;;  %s10357_s7 = scalar_lea.hbm %s12148_s0, 32 }
 0x355   : > { %p10358_p8 = scmp.ne.s32.totalorder %s12149_s9, %s10357_s7  ;;  %p10363_p11 = scmp.lt.u32.totalorder %s10357_s7, %s12149_s9 }
 0x357   : > { %p10359_p9 = pnand %p10358_p8, %p12082_p5 }
 0x359   : > { %p10360_p10 = pneg %p10359_p9 }
 0x35b   : > { %p10365_p12 = pnand %p10363_p11, %p10360_p10 }
 0x35d   : > { %10368 = shalt.err (!%p10365_p12)
}
 0x35e   : > { %s10369_s3 = scalar_lea.vmem %s11471_s1, 32  ;;  %p10376_p2 = scmp.lt.s32.totalorder %s11471_s1, %s11471_s1 }
 0x35f   : > { %p10370_p13 = scmp.ne.s32.totalorder %s11471_s1, %s10369_s3  ;;  %p10377_p3 = scmp.lt.s32.totalorder %s10369_s3, %s10369_s3 }
 0x361   : > { %p10371_p0 = pnand %p10370_p13, %p12082_p5  ;;  %p10378_p6 = por %p10377_p3, %p10376_p2 }
 0x363   : > { %p10372_p1 = pneg %p10371_p0 }
 0x365   : > { %p10379_p7 = pnand %p10378_p6, %p10372_p1 }
 0x367   : > { %10382 = shalt.err (!%p10379_p7)
}
 0x368   : > { %s12150_s12 = sld [smem:[#allocation101_spill]]  ;;  %s10789_s2 = smov [#allocation43]  }
 0x369   : > { %9261 = dma.hbm_to_vmem [thread:$0]  (%p12082_p5), %s12149_s9, 32, %s11471_s1, [#allocation39]  }
 0x36a   : > { %s1364_s0 = sshll.u32 %s10789_s2, 4  ;;  %s10790_s7 = smov [#allocation46]   ;;  %s1365_s0 = int_to_ptr.vmem [resolvable:$true] %s1364_s0 }
 0x36b   : > { %s1386_s4 = sshll.u32 %s10790_s7, 4  ;;  %s11498_s4 = int_to_ptr.vmem [resolvable:$true] %s1386_s4 }
 0x36e   : > { %s10383_s3 = scalar_lea.hbm %s12150_s12, 16 }
 0x36f   : > { %p10384_p8 = scmp.ne.s32.totalorder %s12150_s12, %s10383_s3  ;;  %p10389_p11 = scmp.lt.u32.totalorder %s10383_s3, %s12150_s12 }
 0x371   : > { %p10385_p9 = pnand %p10384_p8, %p12082_p5 }
 0x373   : > { %p10386_p10 = pneg %p10385_p9 }
 0x375   : > { %p10391_p12 = pnand %p10389_p11, %p10386_p10 }
 0x377   : > { %10394 = shalt.err (!%p10391_p12)
}
 0x378   : > { %s10395_s6 = scalar_lea.vmem %s1365_s0, 16  ;;  %s10401_s1 = scalar_lea.vmem %s1365_s0, 32 }
 0x379   : > { %p10396_p13 = scmp.ne.s32.totalorder %s1365_s0, %s10395_s6  ;;  %p10402_p2 = scmp.lt.s32.totalorder %s1365_s0, %s1365_s0 }
 0x37a   : > { %p10403_p3 = scmp.lt.s32.totalorder %s10401_s1, %s10395_s6 }
 0x37b   : > { %p10397_p0 = pnand %p10396_p13, %p12082_p5 }
 0x37c   : > { %p10404_p6 = por %p10403_p3, %p10402_p2 }
 0x37d   : > { %p10398_p1 = pneg %p10397_p0 }
 0x37f   : > { %p10405_p7 = pnand %p10404_p6, %p10398_p1 }
 0x381   : > { %10408 = shalt.err (!%p10405_p7)
}
 0x382   : > { %s12151_s2 = sld [smem:[#allocation102_spill]] }
 0x383   : > { %9265 = dma.hbm_to_vmem [thread:$0]  (%p12082_p5), %s12150_s12, 16, %s1365_s0, [#allocation42]  }
 0x388   : > { %s10409_s7 = scalar_lea.hbm %s12151_s2, 16 }
 0x389   : > { %p10410_p8 = scmp.ne.s32.totalorder %s12151_s2, %s10409_s7  ;;  %p10415_p11 = scmp.lt.u32.totalorder %s10409_s7, %s12151_s2 }
 0x38b   : > { %p10411_p9 = pnand %p10410_p8, %p12082_p5 }
 0x38d   : > { %p10412_p10 = pneg %p10411_p9 }
 0x38f   : > { %p10417_p12 = pnand %p10415_p11, %p10412_p10 }
 0x391   : > { %10420 = shalt.err (!%p10417_p12)
}
 0x392   : > { %s10421_s6 = scalar_lea.vmem %s11498_s4, 16  ;;  %s10427_s3 = scalar_lea.vmem %s11498_s4, 32 }
 0x393   : > { %p10422_p13 = scmp.ne.s32.totalorder %s11498_s4, %s10421_s6  ;;  %p10428_p2 = scmp.lt.s32.totalorder %s11498_s4, %s11498_s4 }
 0x394   : > { %p10429_p3 = scmp.lt.s32.totalorder %s10427_s3, %s10421_s6 }
 0x395   : > { %p10423_p0 = pnand %p10422_p13, %p12082_p5 }
 0x396   : > { %p10430_p6 = por %p10429_p3, %p10428_p2 }
 0x397   : > { %p10424_p1 = pneg %p10423_p0 }
 0x399   : > { %p10431_p7 = pnand %p10430_p6, %p10424_p1 }
 0x39b   : > { %10434 = shalt.err (!%p10431_p7)
}
 0x39c   : > { %s12152_s0 = sld [smem:[#allocation104_spill]]  ;;  %s10791_s7 = smov [#allocation49]  }
 0x39d   : > { %9269 = dma.hbm_to_vmem [thread:$0]  (%p12082_p5), %s12151_s2, 16, %s11498_s4, [#allocation45]  }
 0x39e   : > { %s1410_s8 = sshll.u32 %s10791_s7, 4  ;;  %s10792_s9 = smov [#allocation52]   ;;  %s1411_s8 = int_to_ptr.vmem [resolvable:$true] %s1410_s8 }
 0x39f   : > { %s1432_s12 = sshll.u32 %s10792_s9, 4  ;;  %s11526_s12 = int_to_ptr.vmem [resolvable:$true] %s1432_s12 }
 0x3a2   : > { %s12153_s1 = smov %s12152_s0  ;;  %s10435_s6 = scalar_lea.hbm %s12152_s0, 16 }
 0x3a3   : > { %p10436_p8 = scmp.ne.s32.totalorder %s12153_s1, %s10435_s6  ;;  %p10441_p11 = scmp.lt.u32.totalorder %s10435_s6, %s12153_s1 }
 0x3a5   : > { %p10437_p9 = pnand %p10436_p8, %p12082_p5 }
 0x3a7   : > { %p10438_p10 = pneg %p10437_p9 }
 0x3a9   : > { %p10443_p12 = pnand %p10441_p11, %p10438_p10 }
 0x3ab   : > { %10446 = shalt.err (!%p10443_p12)
}
 0x3ac   : > { %s10447_s3 = scalar_lea.vmem %s1411_s8, 16  ;;  %s10453_s4 = scalar_lea.vmem %s1411_s8, 32 }
 0x3ad   : > { %p10448_p13 = scmp.ne.s32.totalorder %s1411_s8, %s10447_s3  ;;  %p10454_p2 = scmp.lt.s32.totalorder %s1411_s8, %s1411_s8 }
 0x3ae   : > { %p10455_p3 = scmp.lt.s32.totalorder %s10453_s4, %s10447_s3 }
 0x3af   : > { %p10449_p0 = pnand %p10448_p13, %p12082_p5 }
 0x3b0   : > { %p10456_p6 = por %p10455_p3, %p10454_p2 }
 0x3b1   : > { %p10450_p1 = pneg %p10449_p0 }
 0x3b3   : > { %p10457_p7 = pnand %p10456_p6, %p10450_p1 }
 0x3b5   : > { %10460 = shalt.err (!%p10457_p7)
}
 0x3b6   : > { %s12154_s9 = sld [smem:[#allocation106_spill]] }
 0x3b7   : > { %9273 = dma.hbm_to_vmem [thread:$0]  (%p12082_p5), %s12153_s1, 16, %s1411_s8, [#allocation48]  }
 0x3bc   : > { %s10461_s0 = scalar_lea.hbm %s12154_s9, 16 }
 0x3bd   : > { %p10462_p8 = scmp.ne.s32.totalorder %s12154_s9, %s10461_s0  ;;  %p10467_p11 = scmp.lt.u32.totalorder %s10461_s0, %s12154_s9 }
 0x3bf   : > { %p10463_p9 = pnand %p10462_p8, %p12082_p5 }
 0x3c1   : > { %p10464_p10 = pneg %p10463_p9 }
 0x3c3   : > { %p10469_p12 = pnand %p10467_p11, %p10464_p10 }
 0x3c5   : > { %10472 = shalt.err (!%p10469_p12)
}
 0x3c6   : > { %s10473_s7 = scalar_lea.vmem %s11526_s12, 16  ;;  %s10479_s6 = scalar_lea.vmem %s11526_s12, 32 }
 0x3c7   : > { %p10474_p13 = scmp.ne.s32.totalorder %s11526_s12, %s10473_s7  ;;  %p10480_p2 = scmp.lt.s32.totalorder %s11526_s12, %s11526_s12 }
 0x3c8   : > { %p10481_p3 = scmp.lt.s32.totalorder %s10479_s6, %s10473_s7 }
 0x3c9   : > { %p10475_p0 = pnand %p10474_p13, %p12082_p5 }
 0x3ca   : > { %p10482_p6 = por %p10481_p3, %p10480_p2 }
 0x3cb   : > { %p10476_p1 = pneg %p10475_p0 }
 0x3cd   : > { %p10483_p7 = pnand %p10482_p6, %p10476_p1 }
 0x3cf   : > { %10486 = shalt.err (!%p10483_p7)
}
 0x3d0   : > { %s12155_s8 = sld [smem:[#allocation108_spill]]  ;;  %s10793_s3 = smov [#allocation55]  }
 0x3d1   : > { %9277 = dma.hbm_to_vmem [thread:$0]  (%p12082_p5), %s12154_s9, 16, %s11526_s12, [#allocation51]  }
 0x3d2   : > { %s1456_s4 = sshll.u32 %s10793_s3, 4  ;;  %s10794_s0 = smov [#allocation58]   ;;  %s1457_s4 = int_to_ptr.vmem [resolvable:$true] %s1456_s4 }
 0x3d3   : > { %s1481_s1 = sshll.u32 %s10794_s0, 4  ;;  %s11554_s1 = int_to_ptr.vmem [resolvable:$true] %s1481_s1 }
 0x3d6   : > { %s10487_s7 = scalar_lea.hbm %s12155_s8, 16 }
 0x3d7   : > { %p10488_p8 = scmp.ne.s32.totalorder %s12155_s8, %s10487_s7  ;;  %p10493_p11 = scmp.lt.u32.totalorder %s10487_s7, %s12155_s8 }
 0x3d9   : > { %p10489_p9 = pnand %p10488_p8, %p12082_p5 }
 0x3db   : > { %p10490_p10 = pneg %p10489_p9 }
 0x3dd   : > { %p10495_p12 = pnand %p10493_p11, %p10490_p10 }
 0x3df   : > { %10498 = shalt.err (!%p10495_p12)
}
 0x3e0   : > { %s10499_s6 = scalar_lea.vmem %s1457_s4, 16  ;;  %s10505_s12 = scalar_lea.vmem %s1457_s4, 32 }
 0x3e1   : > { %p10500_p13 = scmp.ne.s32.totalorder %s1457_s4, %s10499_s6  ;;  %p10506_p2 = scmp.lt.s32.totalorder %s1457_s4, %s1457_s4 }
 0x3e2   : > { %p10507_p3 = scmp.lt.s32.totalorder %s10505_s12, %s10499_s6 }
 0x3e3   : > { %p10501_p0 = pnand %p10500_p13, %p12082_p5 }
 0x3e4   : > { %p10508_p6 = por %p10507_p3, %p10506_p2 }
 0x3e5   : > { %p10502_p1 = pneg %p10501_p0 }
 0x3e7   : > { %p10509_p7 = pnand %p10508_p6, %p10502_p1 }
 0x3e9   : > { %10512 = shalt.err (!%p10509_p7)
}
 0x3ea   : > { %s12156_s3 = sld [smem:[#allocation111_spill]] }
 0x3eb   : > { %9281 = dma.hbm_to_vmem [thread:$0]  (%p12082_p5), %s12155_s8, 16, %s1457_s4, [#allocation54]  }
 0x3f0   : > { %s10513_s0 = scalar_lea.hbm %s12156_s3, 16 }
 0x3f1   : > { %p10514_p8 = scmp.ne.s32.totalorder %s12156_s3, %s10513_s0  ;;  %p10519_p11 = scmp.lt.u32.totalorder %s10513_s0, %s12156_s3 }
 0x3f3   : > { %p10515_p9 = pnand %p10514_p8, %p12082_p5 }
 0x3f5   : > { %p10516_p10 = pneg %p10515_p9 }
 0x3f7   : > { %p10521_p12 = pnand %p10519_p11, %p10516_p10 }
 0x3f9   : > { %10524 = shalt.err (!%p10521_p12)
}
 0x3fa   : > { %s10525_s7 = scalar_lea.vmem %s11554_s1, 16  ;;  %s10531_s6 = scalar_lea.vmem %s11554_s1, 32 }
 0x3fb   : > { %p10526_p13 = scmp.ne.s32.totalorder %s11554_s1, %s10525_s7  ;;  %p10532_p2 = scmp.lt.s32.totalorder %s11554_s1, %s11554_s1 }
 0x3fc   : > { %p10533_p3 = scmp.lt.s32.totalorder %s10531_s6, %s10525_s7 }
 0x3fd   : > { %p10527_p0 = pnand %p10526_p13, %p12082_p5 }
 0x3fe   : > { %p10534_p6 = por %p10533_p3, %p10532_p2 }
 0x3ff   : > { %p10528_p1 = pneg %p10527_p0 }
 0x401   : > { %p10535_p7 = pnand %p10534_p6, %p10528_p1 }
 0x403   : > { %10538 = shalt.err (!%p10535_p7)
}
 0x404   : > { %9285 = dma.hbm_to_vmem [thread:$0]  (%p12082_p5), %s12156_s3, 16, %s11554_s1, [#allocation57]  }
 0x405   : > { %s10795_s4 = smov [#allocation61]   ;;  %s10539_s0 = scalar_lea.hbm %s11008_s27, 16 }
 0x406   : > { %s1506_s12 = sshll.u32 %s10795_s4, 4  ;;  %p10540_p8 = scmp.ne.s32.totalorder %s11008_s27, %s10539_s0  ;;  %s1507_s12 = int_to_ptr.vmem [resolvable:$true] %s1506_s12 }
 0x407   : > { %p10545_p11 = scmp.lt.u32.totalorder %s10539_s0, %s11008_s27 }
 0x408   : > { %p10541_p9 = pnand %p10540_p8, %p12082_p5 }
 0x40a   : > { %p10542_p10 = pneg %p10541_p9 }
 0x40c   : > { %p10547_p12 = pnand %p10545_p11, %p10542_p10 }
 0x40e   : > { %10550 = shalt.err (!%p10547_p12)
}
 0x40f   : > { %s10551_s7 = scalar_lea.vmem %s1507_s12, 16  ;;  %s10557_s6 = scalar_lea.vmem %s1507_s12, 32 }
 0x410   : > { %p10552_p13 = scmp.ne.s32.totalorder %s1507_s12, %s10551_s7  ;;  %p10558_p2 = scmp.lt.s32.totalorder %s1507_s12, %s1507_s12 }
 0x411   : > { %p10559_p3 = scmp.lt.s32.totalorder %s10557_s6, %s10551_s7 }
 0x412   : > { %p10553_p0 = pnand %p10552_p13, %p12082_p5 }
 0x413   : > { %p10560_p6 = por %p10559_p3, %p10558_p2 }
 0x414   : > { %p10554_p1 = pneg %p10553_p0 }
 0x416   : > { %p10561_p7 = pnand %p10560_p6, %p10554_p1 }
 0x418   : > { %10564 = shalt.err (!%p10561_p7)
}
 0x419   : > { %9289 = dma.hbm_to_vmem [thread:$0]  (%p12082_p5), %s11008_s27, 16, %s1507_s12, [#allocation60]  }
 0x41a PF: > { %s12157_s1 = sld [smem:[#allocation82_spill]]  ;;  %p9410_p8 = scmp.lt.s32.totalorder %s10705_s23, 2 }
 0x41b   : > { %s1523_s4 = sand.u32 1, %s10701_s22   ;;  %s7124_s0 = sshll.u32 %s10705_s23, 7 }
 0x41c   : > { %s7123_s2 = sshll.u32 %s1523_s4, 3  ;;  %p11600_p9 = pnand %p9410_p8, %p11057_p4 }
 0x41d   : > { %s1527_s6 = scalar_lea.vmem [#allocation3], %s7123_s2  ;;  %s1524_s8 = scalar_lea.sflag [#allocation4], %s1523_s4 }
 0x41e   : > { %s1534_s12 = sshll.u32 %s1527_s6, 4  ;;  %p10567_p11 = pneg %p11600_p9  ;;  %s11604_s12 = int_to_ptr.vmem [resolvable:$true] %s1534_s12 }
 0x420   : > { %s11596_s7 = scalar_lea.hbm %s12157_s1, %s7124_s0  ;;  %s10570_s2 = scalar_lea.hbm %s12157_s1, 256 }
 0x421   : > { %s10565_s23 = scalar_lea.hbm %s11596_s7, 128  ;;  %p10571_p0 = scmp.lt.u32.totalorder %s11596_s7, %s12157_s1 }
 0x422   : > { %p10566_p10 = scmp.ne.s32.totalorder %s11596_s7, %s10565_s23  ;;  %p10572_p1 = scmp.lt.u32.totalorder %s10570_s2, %s10565_s23 }
 0x423   : > { %p10574_p2 = scmp.lt.u32.totalorder %s10565_s23, %s11596_s7 }
 0x424   : > { %p10568_p12 = pnand %p10567_p11, %p10566_p10  ;;  %p10573_p4 = por %p10572_p1, %p10571_p0 }
 0x426   : > { %p10569_p13 = pneg %p10568_p12  ;;  %p10575_p3 = por %p10574_p2, %p10573_p4 }
 0x428   : > { %p10576_p6 = pnand %p10575_p3, %p10569_p13 }
 0x42a   : > { %10579 = shalt.err (!%p10576_p6)
}
 0x42b   : > { %s10580_s10 = scalar_lea.vmem %s11604_s12, 128  ;;  %s10796_s4 = smov [#allocation3]  }
 0x42c   : > { %p10581_p7 = scmp.ne.s32.totalorder %s11604_s12, %s10580_s10  ;;  %s10585_s0 = sshll.u32 %s10796_s4, 4  ;;  %s10586_s0 = int_to_ptr.vmem [resolvable:$false] %s10585_s0 }
 0x42d   : > { %s10587_s6 = scalar_lea.vmem %s10586_s0, 256  ;;  %p10588_p10 = scmp.lt.s32.totalorder %s11604_s12, %s10586_s0 }
 0x42e   : > { %p10583_p8 = pnand %p10581_p7, %p10567_p11  ;;  %p10589_p12 = scmp.lt.s32.totalorder %s10587_s6, %s10580_s10 }
 0x430   : > { %p10584_p5 = pneg %p10583_p8  ;;  %p10590_p0 = por %p10589_p12, %p10588_p10 }
 0x432   : > { %p10591_p1 = pnand %p10590_p0, %p10584_p5 }
 0x434   : > { %10594 = shalt.err (!%p10591_p1)
}
 0x435   : > { %9371 = dma.hbm_to_vmem [thread:$0]  (!%p11600_p9), %s11596_s7, 128, %s11604_s12, %s1524_s8  }
 0x436   : > { %p12159_p13 = scmp.ne.s32.totalorder %s12127_s16, 0 }
 0x437   : > { %s1545_s23 = sand.u32 (!%p12159_p13), 1, %s10697_s5   ;;  %p12160_p11 = scmp.ne.s32.totalorder (!%p12159_p13), %s12126_s11, 0 }
 0x438   : > { %1543 = sbr.rel (%p12159_p13) target bundleno = 3985 (0xf91), region = 192  ;;  %s11630_s2 = sshll.u32 (!%p12159_p13), %s1545_s23, 3 }
 0x439   : > { %s1546_s4 = scalar_lea.sflag (!%p12159_p13), [#allocation4], %s1545_s23  ;;  %s1549_s0 = scalar_lea.vmem (!%p12159_p13), [#allocation3], %s11630_s2 }
 0x43f   : > { %10612 = dma.done.wait (%p12160_p11), %s1546_s4, 128  }
 0x440   : > { %10614 = vsyncadd (%p12160_p11), %s1546_s4, 4294967168  ;;  %p12161_p5 = scmp.eq.s32.totalorder %s11042_s26, 0 }
 0x442   : > { %10616 = dma.done.wait (%p12161_p5), [#allocation6], 4224   ;;  %p12162_p9 = pmov %p12161_p5 }
 0x443   : > { %p12163_p4 = pmov %p12161_p5 }
 0x444   : > { %10618 = vsyncadd (%p12162_p9), [#allocation6], 4294963072 }
 0x445   : > { %10620 = dma.done.wait (%p12163_p4), [#allocation9], 256   ;;  %p12164_p2 = pmov %p12163_p4 }
 0x447   : > { %10622 = vsyncadd (%p12164_p2), [#allocation9], 4294967040  ;;  %p12165_p3 = pmov %p12164_p2 }
 0x448   : > { %p12166_p6 = pmov %p12164_p2 }
 0x449   : > { %10624 = dma.done.wait (%p12165_p3), [#allocation12], 65600  }
 0x44a   : > { %10626 = vsyncadd (%p12166_p6), [#allocation12], 4294901696  ;;  %p12167_p7 = pmov %p12164_p2 }
 0x44b   : > { %p12168_p8 = pmov %p12164_p2 }
 0x44c   : > { %10628 = dma.done.wait (%p12167_p7), [#allocation15], 128  }
 0x44d   : > { %10630 = vsyncadd (%p12168_p8), [#allocation15], 4294967168  ;;  %p12169_p10 = pmov %p12164_p2 }
 0x44e   : > { %p12170_p12 = pmov %p12164_p2 }
 0x44f   : > { %10632 = dma.done.wait (%p12169_p10), [#allocation18], 32832  }
 0x450   : > { %10634 = vsyncadd (%p12170_p12), [#allocation18], 4294934464  ;;  %p12171_p0 = pmov %p12164_p2 }
 0x452   : > { %10636 = dma.done.wait (%p12171_p0), [#allocation21], 128   ;;  %p12172_p1 = pmov %p12171_p0 }
 0x453   : > { %p12173_p13 = pmov %p12171_p0 }
 0x454   : > { %10638 = vsyncadd (%p12172_p1), [#allocation21], 4294967168 }
 0x455   : > { %10640 = dma.done.wait (%p12173_p13), [#allocation24], 65600   ;;  %p12174_p11 = pmov %p12171_p0 }
 0x456   : > { %p12175_p5 = pmov %p12171_p0 }
 0x457   : > { %10642 = vsyncadd (%p12174_p11), [#allocation24], 4294901696 }
 0x458   : > { %10644 = dma.done.wait (%p12175_p5), [#allocation27], 16416   ;;  %p12176_p9 = pmov %p12171_p0 }
 0x459   : > { %p12177_p4 = pmov %p12171_p0 }
 0x45a   : > { %10646 = vsyncadd (%p12176_p9), [#allocation27], 4294950880 }
 0x45b   : > { %10648 = dma.done.wait (%p12177_p4), [#allocation30], 64   ;;  %p12178_p2 = pmov %p12171_p0 }
 0x45c   : > { %p12179_p3 = pmov %p12171_p0 }
 0x45d   : > { %10650 = vsyncadd (%p12178_p2), [#allocation30], 4294967232 }
 0x45e   : > { %10652 = dma.done.wait (%p12179_p3), [#allocation33], 8224   ;;  %p12180_p6 = pmov %p12171_p0 }
 0x45f   : > { %p12181_p7 = pmov %p12171_p0 }
 0x460   : > { %10654 = vsyncadd (%p12180_p6), [#allocation33], 4294959072 }
 0x461   : > { %10656 = dma.done.wait (%p12181_p7), [#allocation36], 64   ;;  %p12182_p8 = pmov %p12171_p0 }
 0x462   : > { %p12183_p10 = pmov %p12171_p0 }
 0x463   : > { %10658 = vsyncadd (%p12182_p8), [#allocation36], 4294967232 }
 0x464   : > { %10660 = dma.done.wait (%p12183_p10), [#allocation39], 16416   ;;  %p12184_p12 = pmov %p12171_p0 }
 0x466   : > { %10662 = vsyncadd (%p12184_p12), [#allocation39], 4294950880 }
 0x467   : > { %10664 = dma.done.wait (%p12171_p0), [#allocation42], 4112   ;;  %p12185_p1 = pmov %p12171_p0 }
 0x468   : > { %p12186_p13 = pmov %p12171_p0 }
 0x469   : > { %10666 = vsyncadd (%p12185_p1), [#allocation42], 4294963184 }
 0x46a   : > { %10668 = dma.done.wait (%p12186_p13), [#allocation45], 32   ;;  %p12187_p11 = pmov %p12171_p0 }
 0x46b   : > { %p12188_p5 = pmov %p12171_p0 }
 0x46c   : > { %10670 = vsyncadd (%p12187_p11), [#allocation45], 4294967264 }
 0x46d   : > { %10672 = dma.done.wait (%p12188_p5), [#allocation48], 2064   ;;  %p12189_p9 = pmov %p12171_p0 }
 0x46e   : > { %p12190_p4 = pmov %p12171_p0 }
 0x46f   : > { %10674 = vsyncadd (%p12189_p9), [#allocation48], 4294965232 }
 0x470   : > { %10676 = dma.done.wait (%p12190_p4), [#allocation51], 32   ;;  %p12191_p2 = pmov %p12171_p0 }
 0x471   : > { %p12192_p3 = pmov %p12171_p0 }
 0x472   : > { %10678 = vsyncadd (%p12191_p2), [#allocation51], 4294967264 }
 0x473   : > { %10680 = dma.done.wait (%p12192_p3), [#allocation54], 4112   ;;  %p12193_p6 = pmov %p12171_p0 }
 0x474   : > { %p12194_p7 = pmov %p12171_p0 }
 0x475   : > { %10682 = vsyncadd (%p12193_p6), [#allocation54], 4294963184 }
 0x476   : > { %10684 = dma.done.wait (%p12194_p7), [#allocation57], 32   ;;  %p12195_p8 = pmov %p12171_p0 }
 0x477   : > { %p12196_p10 = pmov %p12171_p0 }
 0x478   : > { %10686 = vsyncadd (%p12195_p8), [#allocation57], 4294967264 }
 0x479   : > { %10688 = dma.done.wait (%p12196_p10), [#allocation60], 32   ;;  %p12197_p12 = pmov %p12171_p0 }
 0x47a   : > { %v10797_v1 = vmov 0.0   ;;  %v1809_v2 = vld [vmem:[#allocation5 + $0x8] sm:$0xff]  ;;  %v1808_v4 = vld [vmem:[#allocation5] sm:$0xff]  ;;  %v1811_v13 = vld [vmem:[#allocation5 + $0x18] sm:$0xff]  ;;  %vm1882_vm0 = vcmask 261120   ;;  %s12198_s11 = sld [smem:[#allocation109_spill]] }
 0x47b   : > { %10690 = vsyncadd (%p12197_p12), [#allocation60], 4294967264  ;;  %1950 = vmatprep.mubr.f32.mxu0 %v10797_v1  ;;  %2021 = vmatprep.mubr.f32.mxu1 %v10797_v1  ;;  %v1817_v3 = vld [vmem:[#allocation5 + $0x48] sm:$0xff]  ;;  %v1816_v6 = vld [vmem:[#allocation5 + $0x40] sm:$0xff]  ;;  %s12199_s16 = sld [smem:[#allocation113_spill]]  ;;  %s12200_s8 = sld [smem:[#allocation114_spill]] }
 0x47c   : > { %v7404_v5 = vpack.c.bf16 %v1817_v3, %v1809_v2  ;;  %v1825_v7 = vld [vmem:[#allocation5 + $0x88] sm:$0xff]  ;;  %v7406_v9 = vpack.c.bf16 %v1816_v6, %v1808_v4  ;;  %v1824_v11 = vld [vmem:[#allocation5 + $0x80] sm:$0xff]  ;;  %v1819_v14 = vld [vmem:[#allocation5 + $0x58] sm:$0xff]  ;;  %s12201_s3 = sld [smem:[#allocation115_spill]]  ;;  %p1803_p0 = scmp.lt.s32.totalorder %s11042_s26, 1 }
 0x47d   : > { %v1833_v8 = vld [vmem:[#allocation5 + $0xc8] sm:$0xff]  ;;  %v1832_v12 = vld [vmem:[#allocation5 + $0xc0] sm:$0xff]  ;;  %v1810_v15 = vld [vmem:[#allocation5 + $0x10] sm:$0xff]  ;;  %v7412_v17 = vpack.c.bf16 %v1819_v14, %v1811_v13 }
 0x47e   : > { %v7408_v10 = vpack.c.bf16 %v1833_v8, %v1825_v7  ;;  %7405 = vmatprep.subr.bf16.mxu0 %v7404_v5  ;;  %v7410_v16 = vpack.c.bf16 %v1832_v12, %v1824_v11  ;;  %v1818_v18 = vld [vmem:[#allocation5 + $0x50] sm:$0xff]  ;;  %v1827_v19 = vld [vmem:[#allocation5 + $0x98] sm:$0xff]  ;;  %v1813_v25 = vld [vmem:[#allocation5 + $0x28] sm:$0xff]  ;;  %s12208_s26 = smov (!%p1803_p0, %s11042_s26), 1 }
 0x47f   : > { %7407 = vmatpush1.bf16.msra.mxu0 %v7406_v9  ;;  %v1835_v20 = vld [vmem:[#allocation5 + $0xd8] sm:$0xff]  ;;  %v7414_v21 = vpack.c.bf16 %v1818_v18, %v1810_v15  ;;  %v1826_v23 = vld [vmem:[#allocation5 + $0x90] sm:$0xff]  ;;  %7413 = vmatprep.subr.bf16.mxu1 %v7412_v17  ;;  %v1821_v27 = vld [vmem:[#allocation5 + $0x68] sm:$0xff]  ;;  %s7165_s7 = sshll.u32 %s12208_s26, 3 }
 0x480   : > { %7409 = vmatprep.subr.bf16.mxu0 %v7408_v10  ;;  %v7416_v22 = vpack.c.bf16 %v1835_v20, %v1827_v19  ;;  %v1834_v24 = vld [vmem:[#allocation5 + $0xd0] sm:$0xff]  ;;  %v1812_v28 = vld [vmem:[#allocation5 + $0x20] sm:$0xff]  ;;  %v7420_v31 = vpack.c.bf16 %v1821_v27, %v1813_v25  ;;  %v1829_v32 = vld [vmem:[#allocation5 + $0xa8] sm:$0xff] }
 0x481   : > { %v11717_v26 = vld [vmem:[%s1549_s0] sm:$0xff]  ;;  %v1820_v29 = vld [vmem:[#allocation5 + $0x60] sm:$0xff]  ;;  %7415 = vmatpush1.bf16.msra.mxu1 %v7414_v21  ;;  %v7418_v30 = vpack.c.bf16 %v1834_v24, %v1826_v23  ;;  %v1837_v33 = vld [vmem:[#allocation5 + $0xe8] sm:$0xff] }
 0x482   : > { %v1828_v34 = vld [vmem:[#allocation5 + $0xa0] sm:$0xff]  ;;  %7417 = vmatprep.subr.bf16.mxu1 %v7416_v22  ;;  %v7422_v35 = vpack.c.bf16 %v1820_v29, %v1812_v28  ;;  %v1815_v37 = vld [vmem:[#allocation5 + $0x38] sm:$0xff]  ;;  %v7424_v39 = vpack.c.bf16 %v1837_v33, %v1829_v32  ;;  %v1814_v41 = vld [vmem:[#allocation5 + $0x30] sm:$0xff]  ;;  %s1806_s12 = scalar_lea.vmem %s12201_s3, %s7165_s7 }
 0x483   : > { %7411 = vmatpush1.bf16.msra.mxu0 %v7410_v16  ;;  %v1836_v36 = vld [vmem:[#allocation5 + $0xe0] sm:$0xff]  ;;  %v1823_v38 = vld [vmem:[#allocation5 + $0x78] sm:$0xff]  ;;  %v1822_v42 = vld [vmem:[#allocation5 + $0x70] sm:$0xff] }
 0x484   : > { %7421 = vmatprep.subr.bf16.mxu0 %v7420_v31  ;;  %v7428_v40 = vpack.c.bf16 %v1823_v38, %v1815_v37  ;;  %v1831_v43 = vld [vmem:[#allocation5 + $0xb8] sm:$0xff]  ;;  %v7430_v45 = vpack.c.bf16 %v1822_v42, %v1814_v41  ;;  %v7426_v48 = vpack.c.bf16 %v1836_v36, %v1828_v34  ;;  %v1830_v50 = vld [vmem:[#allocation5 + $0xb0] sm:$0xff]  ;;  %v2297_v52 = vld [vmem:[#allocation23 + $0x18] sm:$0xff] }
 0x485   : > { %v1839_v44 = vld [vmem:[#allocation5 + $0xf8] sm:$0xff]  ;;  %7419 = vmatpush1.bf16.msra.mxu1 %v7418_v30  ;;  %v1838_v51 = vld [vmem:[#allocation5 + $0xf0] sm:$0xff]  ;;  %v2301_v54 = vld [vmem:[#allocation23 + $0x38] sm:$0xff] }
 0x486   : > { %7166 = vmatmul.mubr.msk.f32.vlgmr.msra.gmra.mrb[0].mxu0 %vm1882_vm0, %v11717_v26  ;;  %v2295_v46 = vld [vmem:[#allocation23 + $0x8] sm:$0xff]  ;;  %v7432_v49 = vpack.c.bf16 %v1839_v44, %v1831_v43  ;;  %7429 = vmatprep.subr.bf16.mxu1 %v7428_v40  ;;  %v2294_v55 = vld [vmem:[#allocation23] sm:$0xff]  ;;  %v7434_v59 = vpack.c.bf16 %v1838_v51, %v1830_v50  ;;  %v7692_v60 = vpack.c.bf16 %v2301_v54, %v2297_v52  ;;  %v2296_v62 = vld [vmem:[#allocation23 + $0x10] sm:$0xff] }
 0x487   : > { %v2299_v47 = vld [vmem:[#allocation23 + $0x28] sm:$0xff]  ;;  %7423 = vmatpush1.bf16.msra.mxu0 %v7422_v35  ;;  %2092 = vmatprep.mubr.f32.mxu0 %v10797_v1  ;;  %v2298_v56 = vld [vmem:[#allocation23 + $0x20] sm:$0xff]  ;;  %v2300_v63 = vld [vmem:[#allocation23 + $0x30] sm:$0xff] }
 0x488   : > { %7425 = vmatprep.subr.bf16.mxu0 %v7424_v39  ;;  %v7436_v53 = vpack.c.bf16 %v2299_v47, %v2295_v46  ;;  %7167 = vmatmul.mubr.msk.f32.vlgmr.msra.gmra.mrb[0].mxu1 %vm1882_vm0, %v11717_v26  ;;  %v2303_v57 = vld [vmem:[#allocation23 + $0x48] sm:$0xff]  ;;  %v7438_v61 = vpack.c.bf16 %v2298_v56, %v2294_v55  ;;  %v2305_v0 = vld [vmem:[#allocation23 + $0x58] sm:$0xff]  ;;  %v2302_v4 = vld [vmem:[#allocation23 + $0x40] sm:$0xff]  ;;  %v7694_v8 = vpack.c.bf16 %v2300_v63, %v2296_v62 }
 0x489   : > { %v2307_v58 = vld [vmem:[#allocation23 + $0x68] sm:$0xff]  ;;  %7431 = vmatpush1.bf16.msra.mxu1 %v7430_v45  ;;  %2163 = vmatprep.mubr.f32.mxu1 %v10797_v1  ;;  %v2309_v3 = vld [vmem:[#allocation23 + $0x78] sm:$0xff]  ;;  %v2306_v5 = vld [vmem:[#allocation23 + $0x60] sm:$0xff] }
 0x48a   : > { %7433 = vmatprep.subr.bf16.mxu1 %v7432_v49  ;;  %v7440_v2 = vpack.c.bf16 %v2307_v58, %v2303_v57  ;;  %v2311_v6 = vld [vmem:[#allocation23 + $0x88] sm:$0xff]  ;;  %v7696_v9 = vpack.c.bf16 %v2309_v3, %v2305_v0  ;;  %v7442_v10 = vpack.c.bf16 %v2306_v5, %v2302_v4  ;;  %v2304_v11 = vld [vmem:[#allocation23 + $0x50] sm:$0xff]  ;;  %v2313_v13 = vld [vmem:[#allocation23 + $0x98] sm:$0xff] }
 0x48b   : > { %7427 = vmatpush1.bf16.msra.mxu0 %v7426_v48  ;;  %v2315_v7 = vld [vmem:[#allocation23 + $0xa8] sm:$0xff]  ;;  %v2308_v12 = vld [vmem:[#allocation23 + $0x70] sm:$0xff]  ;;  %v2317_v15 = vld [vmem:[#allocation23 + $0xb8] sm:$0xff] }
 0x48c   : > { %7437 = vmatprep.subr.bf16.mxu0 %v7436_v53  ;;  %v7444_v14 = vpack.c.bf16 %v2315_v7, %v2311_v6  ;;  %v2310_v16 = vld [vmem:[#allocation23 + $0x80] sm:$0xff]  ;;  %v2319_v18 = vld [vmem:[#allocation23 + $0xc8] sm:$0xff]  ;;  %v7698_v20 = vpack.c.bf16 %v2308_v12, %v2304_v11  ;;  %v7700_v21 = vpack.c.bf16 %v2317_v15, %v2313_v13  ;;  %v2312_v23 = vld [vmem:[#allocation23 + $0x90] sm:$0xff] }
 0x48d   : > { %7435 = vmatpush1.bf16.msra.mxu1 %v7434_v59  ;;  %v2314_v17 = vld [vmem:[#allocation23 + $0xa0] sm:$0xff]  ;;  %v2323_v19 = vld [vmem:[#allocation23 + $0xe8] sm:$0xff]  ;;  %v2316_v24 = vld [vmem:[#allocation23 + $0xb0] sm:$0xff] }
 0x48e   : > { %7168 = vmatmul.mubr.msk.f32.vlgmr.msra.gmra.mrb[2].mxu0 %vm1882_vm0, %v11717_v26  ;;  %7693 = vmatprep.subr.bf16.mxu1 %v7692_v60  ;;  %v7446_v22 = vpack.c.bf16 %v2314_v17, %v2310_v16  ;;  %v2321_v25 = vld [vmem:[#allocation23 + $0xd8] sm:$0xff]  ;;  %v7448_v27 = vpack.c.bf16 %v2323_v19, %v2319_v18  ;;  %v2318_v29 = vld [vmem:[#allocation23 + $0xc0] sm:$0xff]  ;;  %v2327_v31 = vld [vmem:[#allocation23 + $0x108] sm:$0xff] }
 0x48f   : > { %7439 = vmatpush1.bf16.msra.mxu0 %v7438_v61  ;;  %v2325_v28 = vld [vmem:[#allocation23 + $0xf8] sm:$0xff]  ;;  %v2322_v30 = vld [vmem:[#allocation23 + $0xe0] sm:$0xff]  ;;  %v2331_v32 = vld [vmem:[#allocation23 + $0x128] sm:$0xff] }
 0x490   : > { %7441 = vmatprep.subr.bf16.mxu0 %v7440_v2  ;;  %7169 = vmatmul.mubr.msk.f32.vlgmr.msra.gmra.mrb[2].mxu1 %vm1882_vm0, %v11717_v26  ;;  %v7702_v26 = vpack.c.bf16 %v2316_v24, %v2312_v23  ;;  %v7704_v33 = vpack.c.bf16 %v2325_v28, %v2321_v25  ;;  %v7450_v34 = vpack.c.bf16 %v2322_v30, %v2318_v29  ;;  %v2320_v35 = vld [vmem:[#allocation23 + $0xd0] sm:$0xff]  ;;  %v2329_v37 = vld [vmem:[#allocation23 + $0x118] sm:$0xff]  ;;  %v2326_v40 = vld [vmem:[#allocation23 + $0x100] sm:$0xff] }
 0x491   : > { %7695 = vmatpush1.bf16.msra.mxu1 %v7694_v8  ;;  %v2324_v36 = vld [vmem:[#allocation23 + $0xf0] sm:$0xff]  ;;  %v7452_v38 = vpack.c.bf16 %v2331_v32, %v2327_v31  ;;  %v2333_v39 = vld [vmem:[#allocation23 + $0x138] sm:$0xff]  ;;  %v2330_v41 = vld [vmem:[#allocation23 + $0x120] sm:$0xff] }
 0x492   : > { %7697 = vmatprep.subr.bf16.mxu1 %v7696_v9  ;;  %v2335_v42 = vld [vmem:[#allocation23 + $0x148] sm:$0xff]  ;;  %v7706_v44 = vpack.c.bf16 %v2324_v36, %v2320_v35  ;;  %v7708_v45 = vpack.c.bf16 %v2333_v39, %v2329_v37  ;;  %v7454_v46 = vpack.c.bf16 %v2330_v41, %v2326_v40  ;;  %v2328_v47 = vld [vmem:[#allocation23 + $0x110] sm:$0xff]  ;;  %v2337_v49 = vld [vmem:[#allocation23 + $0x158] sm:$0xff] }
 0x493   : > { %7443 = vmatpush1.bf16.msra.mxu0 %v7442_v10  ;;  %v2339_v43 = vld [vmem:[#allocation23 + $0x168] sm:$0xff]  ;;  %v2332_v48 = vld [vmem:[#allocation23 + $0x130] sm:$0xff]  ;;  %v2341_v51 = vld [vmem:[#allocation23 + $0x178] sm:$0xff] }
 0x494   : > { %7445 = vmatprep.subr.bf16.mxu0 %v7444_v14  ;;  %v7456_v50 = vpack.c.bf16 %v2339_v43, %v2335_v42  ;;  %v2334_v52 = vld [vmem:[#allocation23 + $0x140] sm:$0xff]  ;;  %v2343_v54 = vld [vmem:[#allocation23 + $0x188] sm:$0xff]  ;;  %v7710_v56 = vpack.c.bf16 %v2332_v48, %v2328_v47  ;;  %v7712_v57 = vpack.c.bf16 %v2341_v51, %v2337_v49  ;;  %v2336_v59 = vld [vmem:[#allocation23 + $0x150] sm:$0xff] }
 0x495   : > { %7699 = vmatpush1.bf16.msra.mxu1 %v7698_v20  ;;  %v2338_v53 = vld [vmem:[#allocation23 + $0x160] sm:$0xff]  ;;  %v2347_v55 = vld [vmem:[#allocation23 + $0x1a8] sm:$0xff]  ;;  %v2340_v60 = vld [vmem:[#allocation23 + $0x170] sm:$0xff] }
 0x496   : > { %7701 = vmatprep.subr.bf16.mxu1 %v7700_v21  ;;  %v7458_v58 = vpack.c.bf16 %v2338_v53, %v2334_v52  ;;  %v2345_v61 = vld [vmem:[#allocation23 + $0x198] sm:$0xff]  ;;  %v7460_v62 = vpack.c.bf16 %v2347_v55, %v2343_v54  ;;  %v2342_v0 = vld [vmem:[#allocation23 + $0x180] sm:$0xff]  ;;  %v2351_v3 = vld [vmem:[#allocation23 + $0x1c8] sm:$0xff]  ;;  %v7714_v5 = vpack.c.bf16 %v2340_v60, %v2336_v59 }
 0x497   : > { %7447 = vmatpush1.bf16.msra.mxu0 %v7446_v22  ;;  %v2349_v63 = vld [vmem:[#allocation23 + $0x1b8] sm:$0xff]  ;;  %v2346_v2 = vld [vmem:[#allocation23 + $0x1a0] sm:$0xff]  ;;  %v2355_v4 = vld [vmem:[#allocation23 + $0x1e8] sm:$0xff] }
 0x498   : > { %7449 = vmatprep.subr.bf16.mxu0 %v7448_v27  ;;  %v7716_v6 = vpack.c.bf16 %v2349_v63, %v2345_v61  ;;  %v7462_v7 = vpack.c.bf16 %v2346_v2, %v2342_v0  ;;  %v2344_v8 = vld [vmem:[#allocation23 + $0x190] sm:$0xff]  ;;  %v2353_v10 = vld [vmem:[#allocation23 + $0x1d8] sm:$0xff]  ;;  %v7464_v11 = vpack.c.bf16 %v2355_v4, %v2351_v3  ;;  %v2350_v13 = vld [vmem:[#allocation23 + $0x1c0] sm:$0xff] }
 0x499   : > { %7703 = vmatpush1.bf16.msra.mxu1 %v7702_v26  ;;  %v2348_v9 = vld [vmem:[#allocation23 + $0x1b0] sm:$0xff]  ;;  %v2357_v12 = vld [vmem:[#allocation23 + $0x1f8] sm:$0xff]  ;;  %v2354_v14 = vld [vmem:[#allocation23 + $0x1e0] sm:$0xff] }
 0x49a   : > { %7705 = vmatprep.subr.bf16.mxu1 %v7704_v33  ;;  %v2359_v15 = vld [vmem:[#allocation23 + $0x208] sm:$0xff]  ;;  %v7718_v17 = vpack.c.bf16 %v2348_v9, %v2344_v8  ;;  %v7720_v18 = vpack.c.bf16 %v2357_v12, %v2353_v10  ;;  %v7466_v19 = vpack.c.bf16 %v2354_v14, %v2350_v13  ;;  %v2352_v20 = vld [vmem:[#allocation23 + $0x1d0] sm:$0xff]  ;;  %v2361_v22 = vld [vmem:[#allocation23 + $0x218] sm:$0xff] }
 0x49b   : > { %7451 = vmatpush1.bf16.msra.mxu0 %v7450_v34  ;;  %v2363_v16 = vld [vmem:[#allocation23 + $0x228] sm:$0xff]  ;;  %v2356_v21 = vld [vmem:[#allocation23 + $0x1f0] sm:$0xff]  ;;  %v2365_v24 = vld [vmem:[#allocation23 + $0x238] sm:$0xff] }
 0x49c   : > { %7453 = vmatprep.subr.bf16.mxu0 %v7452_v38  ;;  %v7468_v23 = vpack.c.bf16 %v2363_v16, %v2359_v15  ;;  %v2358_v25 = vld [vmem:[#allocation23 + $0x200] sm:$0xff]  ;;  %v2367_v28 = vld [vmem:[#allocation23 + $0x248] sm:$0xff]  ;;  %v7722_v30 = vpack.c.bf16 %v2356_v21, %v2352_v20  ;;  %v7724_v31 = vpack.c.bf16 %v2365_v24, %v2361_v22  ;;  %v2360_v26 = vld [vmem:[#allocation23 + $0x210] sm:$0xff] }
 0x49d   : > { %7707 = vmatpush1.bf16.msra.mxu1 %v7706_v44  ;;  %v2362_v27 = vld [vmem:[#allocation23 + $0x220] sm:$0xff]  ;;  %v2371_v29 = vld [vmem:[#allocation23 + $0x268] sm:$0xff]  ;;  %v2364_v33 = vld [vmem:[#allocation23 + $0x230] sm:$0xff] }
 0x49e   : > { %7709 = vmatprep.subr.bf16.mxu1 %v7708_v45  ;;  %v7470_v32 = vpack.c.bf16 %v2362_v27, %v2358_v25  ;;  %v2369_v34 = vld [vmem:[#allocation23 + $0x258] sm:$0xff]  ;;  %v7472_v35 = vpack.c.bf16 %v2371_v29, %v2367_v28  ;;  %v2366_v37 = vld [vmem:[#allocation23 + $0x240] sm:$0xff]  ;;  %v2375_v39 = vld [vmem:[#allocation23 + $0x288] sm:$0xff]  ;;  %v7726_v41 = vpack.c.bf16 %v2364_v33, %v2360_v26 }
 0x49f   : > { %7455 = vmatpush1.bf16.msra.mxu0 %v7454_v46  ;;  %v2373_v36 = vld [vmem:[#allocation23 + $0x278] sm:$0xff]  ;;  %v2370_v38 = vld [vmem:[#allocation23 + $0x260] sm:$0xff]  ;;  %v2379_v40 = vld [vmem:[#allocation23 + $0x2a8] sm:$0xff] }
 0x4a0   : > { %7457 = vmatprep.subr.bf16.mxu0 %v7456_v50  ;;  %v7728_v42 = vpack.c.bf16 %v2373_v36, %v2369_v34  ;;  %v7474_v43 = vpack.c.bf16 %v2370_v38, %v2366_v37  ;;  %v2368_v44 = vld [vmem:[#allocation23 + $0x250] sm:$0xff]  ;;  %v2377_v46 = vld [vmem:[#allocation23 + $0x298] sm:$0xff]  ;;  %v7476_v47 = vpack.c.bf16 %v2379_v40, %v2375_v39  ;;  %v2374_v49 = vld [vmem:[#allocation23 + $0x280] sm:$0xff] }
 0x4a1   : > { %7711 = vmatpush1.bf16.msra.mxu1 %v7710_v56  ;;  %v2372_v45 = vld [vmem:[#allocation23 + $0x270] sm:$0xff]  ;;  %v2381_v48 = vld [vmem:[#allocation23 + $0x2b8] sm:$0xff]  ;;  %v2378_v50 = vld [vmem:[#allocation23 + $0x2a0] sm:$0xff] }
 0x4a2   : > { %7713 = vmatprep.subr.bf16.mxu1 %v7712_v57  ;;  %v2383_v51 = vld [vmem:[#allocation23 + $0x2c8] sm:$0xff]  ;;  %v7730_v53 = vpack.c.bf16 %v2372_v45, %v2368_v44  ;;  %v7732_v54 = vpack.c.bf16 %v2381_v48, %v2377_v46  ;;  %v7478_v55 = vpack.c.bf16 %v2378_v50, %v2374_v49  ;;  %v2376_v56 = vld [vmem:[#allocation23 + $0x290] sm:$0xff]  ;;  %v2389_v60 = vld [vmem:[#allocation23 + $0x2f8] sm:$0xff] }
 0x4a3   : > { %7459 = vmatpush1.bf16.msra.mxu0 %v7458_v58  ;;  %v2387_v52 = vld [vmem:[#allocation23 + $0x2e8] sm:$0xff]  ;;  %v2380_v57 = vld [vmem:[#allocation23 + $0x2b0] sm:$0xff]  ;;  %v2385_v58 = vld [vmem:[#allocation23 + $0x2d8] sm:$0xff] }
 0x4a4   : > { %7461 = vmatprep.subr.bf16.mxu0 %v7460_v62  ;;  %v7480_v59 = vpack.c.bf16 %v2387_v52, %v2383_v51  ;;  %v2382_v61 = vld [vmem:[#allocation23 + $0x2c0] sm:$0xff]  ;;  %v2391_v63 = vld [vmem:[#allocation23 + $0x308] sm:$0xff]  ;;  %v7734_v2 = vpack.c.bf16 %v2380_v57, %v2376_v56  ;;  %v7736_v3 = vpack.c.bf16 %v2389_v60, %v2385_v58  ;;  %v2397_v9 = vld [vmem:[#allocation23 + $0x338] sm:$0xff]  ;;  %v1842_v60 = vlaneseq }
 0x4a5   : > { %7715 = vmatpush1.bf16.msra.mxu1 %v7714_v5  ;;  %v2386_v62 = vld [vmem:[#allocation23 + $0x2e0] sm:$0xff]  ;;  %v2395_v0 = vld [vmem:[#allocation23 + $0x328] sm:$0xff]  ;;  %v2384_v5 = vld [vmem:[#allocation23 + $0x2d0] sm:$0xff] }
 0x4a6   : > { %7717 = vmatprep.subr.bf16.mxu1 %v7716_v6  ;;  %v7482_v4 = vpack.c.bf16 %v2386_v62, %v2382_v61  ;;  %v2388_v6 = vld [vmem:[#allocation23 + $0x2f0] sm:$0xff]  ;;  %v7484_v8 = vpack.c.bf16 %v2395_v0, %v2391_v63  ;;  %v2390_v10 = vld [vmem:[#allocation23 + $0x300] sm:$0xff]  ;;  %v2399_v12 = vld [vmem:[#allocation23 + $0x348] sm:$0xff]  ;;  %v11729_v61 = vshrl.u32 %v1842_v60, 7 }
 0x4a7   : > { %7463 = vmatpush1.bf16.msra.mxu0 %v7462_v7  ;;  %v2393_v7 = vld [vmem:[#allocation23 + $0x318] sm:$0xff]  ;;  %v2403_v13 = vld [vmem:[#allocation23 + $0x368] sm:$0xff]  ;;  %v7738_v14 = vpack.c.bf16 %v2388_v6, %v2384_v5  ;;  %v2398_v24 = vld [vmem:[#allocation23 + $0x340] sm:$0xff] }
 0x4a8   : > { %7465 = vmatprep.subr.bf16.mxu0 %v7464_v11  ;;  %v2394_v11 = vld [vmem:[#allocation23 + $0x320] sm:$0xff]  ;;  %v7740_v15 = vpack.c.bf16 %v2397_v9, %v2393_v7  ;;  %v2401_v20 = vld [vmem:[#allocation23 + $0x358] sm:$0xff]  ;;  %v2400_v27 = vld [vmem:[#allocation23 + $0x350] sm:$0xff]  ;;  %v11732_v62 = vsub.s32 0, %v11729_v61  ;;  %v11737_v0 = vsub.s32 1, %v11729_v61 }
 0x4a9   : > { %7719 = vmatpush1.bf16.msra.mxu1 %v7718_v17  ;;  %v7486_v16 = vpack.c.bf16 %v2394_v11, %v2390_v10  ;;  %v2392_v17 = vld [vmem:[#allocation23 + $0x310] sm:$0xff]  ;;  %v2405_v21 = vld [vmem:[#allocation23 + $0x378] sm:$0xff]  ;;  %v2402_v25 = vld [vmem:[#allocation23 + $0x360] sm:$0xff] }
 0x4aa   : > { %7721 = vmatprep.subr.bf16.mxu1 %v7720_v18  ;;  %v2396_v18 = vld [vmem:[#allocation23 + $0x330] sm:$0xff]  ;;  %v7490_v28 = vpack.c.bf16 %v2402_v25, %v2398_v24  ;;  %v2409_v26 = vld [vmem:[#allocation23 + $0x398] sm:$0xff]  ;;  %v2410_v36 = vld [vmem:[#allocation23 + $0x3a0] sm:$0xff] }
 0x4ab   : > { %7467 = vmatpush1.bf16.msra.mxu0 %v7466_v19  ;;  %v7488_v19 = vpack.c.bf16 %v2403_v13, %v2399_v12  ;;  %v7742_v22 = vpack.c.bf16 %v2396_v18, %v2392_v17  ;;  %v2404_v29 = vld [vmem:[#allocation23 + $0x370] sm:$0xff]  ;;  %v2413_v34 = vld [vmem:[#allocation23 + $0x3b8] sm:$0xff]  ;;  %v2418_v48 = vld [vmem:[#allocation23 + $0x3e0] sm:$0xff] }
 0x4ac   : > { %7469 = vmatprep.subr.bf16.mxu0 %v7468_v23  ;;  %v7744_v23 = vpack.c.bf16 %v2405_v21, %v2401_v20  ;;  %v7748_v37 = vpack.c.bf16 %v2413_v34, %v2409_v26  ;;  %v2408_v39 = vld [vmem:[#allocation23 + $0x390] sm:$0xff]  ;;  %v2417_v44 = vld [vmem:[#allocation23 + $0x3d8] sm:$0xff]  ;;  %v11752_v12 = vld [vmem:[#allocation10] sm:$0xff] }
 0x4ad   : > { %7723 = vmatpush1.bf16.msra.mxu1 %v7722_v30  ;;  %v7746_v30 = vpack.c.bf16 %v2404_v29, %v2400_v27  ;;  %v2412_v40 = vld [vmem:[#allocation23 + $0x3b0] sm:$0xff]  ;;  %v2421_v46 = vld [vmem:[#allocation23 + $0x3f8] sm:$0xff]  ;;  %v2422_v20 = vld [vmem:[#allocation23 + $0x400] sm:$0xff]  ;;  %v2249_v25 = vrot.slane %v11752_v12, %v11732_v62 }
 0x4ae   : > { %7725 = vmatprep.subr.bf16.mxu1 %v7724_v31  ;;  %v2407_v31 = vld [vmem:[#allocation23 + $0x388] sm:$0xff]  ;;  %v7752_v49 = vpack.c.bf16 %v2421_v46, %v2417_v44  ;;  %v2416_v51 = vld [vmem:[#allocation23 + $0x3d0] sm:$0xff]  ;;  %v2425_v56 = vld [vmem:[#allocation23 + $0x418] sm:$0xff] }
 0x4af   : > { %7471 = vmatpush1.bf16.msra.mxu0 %v7470_v32  ;;  %v2411_v32 = vld [vmem:[#allocation23 + $0x3a8] sm:$0xff]  ;;  %v2420_v52 = vld [vmem:[#allocation23 + $0x3f0] sm:$0xff]  ;;  %v2429_v58 = vld [vmem:[#allocation23 + $0x438] sm:$0xff] }
 0x4b0   : > { %7473 = vmatprep.subr.bf16.mxu0 %v7472_v35  ;;  %v7492_v33 = vpack.c.bf16 %v2411_v32, %v2407_v31  ;;  %v2406_v35 = vld [vmem:[#allocation23 + $0x380] sm:$0xff]  ;;  %v11734_v63 = vld [vmem:[#allocation7] sm:$0xff]  ;;  %v11746_v5 = vld [vmem:[#allocation8] sm:$0xff] }
 0x4b1   : > { %7727 = vmatpush1.bf16.msra.mxu1 %v7726_v41  ;;  %v7494_v38 = vpack.c.bf16 %v2410_v36, %v2406_v35  ;;  %v7750_v41 = vpack.c.bf16 %v2412_v40, %v2408_v39  ;;  %v2199_v10 = vrot.slane %v11746_v5, %v11732_v62  ;;  %v2426_v21 = vld [vmem:[#allocation23 + $0x420] sm:$0xff]  ;;  %v2424_v27 = vld [vmem:[#allocation23 + $0x410] sm:$0xff]  ;;  %v2431_v29 = vld [vmem:[#allocation23 + $0x448] sm:$0xff] }
 0x4b2   : > { %7729 = vmatprep.subr.bf16.mxu1 %v7728_v42  ;;  %v2415_v42 = vld [vmem:[#allocation23 + $0x3c8] sm:$0xff]  ;;  %v2433_v26 = vld [vmem:[#allocation23 + $0x458] sm:$0xff]  ;;  %v2430_v40 = vld [vmem:[#allocation23 + $0x440] sm:$0xff] }
 0x4b3   : > { %7475 = vmatpush1.bf16.msra.mxu0 %v7474_v43  ;;  %v2419_v43 = vld [vmem:[#allocation23 + $0x3e8] sm:$0xff] }
 0x4b4   : > { %7477 = vmatprep.subr.bf16.mxu0 %v7476_v47  ;;  %v7496_v45 = vpack.c.bf16 %v2419_v43, %v2415_v42  ;;  %v2414_v47 = vld [vmem:[#allocation23 + $0x3c0] sm:$0xff]  ;;  %v2435_v32 = vld [vmem:[#allocation23 + $0x468] sm:$0xff] }
 0x4b5   : > { %7731 = vmatpush1.bf16.msra.mxu1 %v7730_v53  ;;  %v7498_v50 = vpack.c.bf16 %v2418_v48, %v2414_v47  ;;  %v7754_v53 = vpack.c.bf16 %v2420_v52, %v2416_v51  ;;  %v2432_v47 = vld [vmem:[#allocation23 + $0x450] sm:$0xff]  ;;  %v2443_v51 = vld [vmem:[#allocation23 + $0x4a8] sm:$0xff]  ;;  %v2441_v52 = vld [vmem:[#allocation23 + $0x498] sm:$0xff] }
 0x4b6   : > { %7733 = vmatprep.subr.bf16.mxu1 %v7732_v54  ;;  %v2423_v54 = vld [vmem:[#allocation23 + $0x408] sm:$0xff]  ;;  %v2436_v48 = vld [vmem:[#allocation23 + $0x470] sm:$0xff] }
 0x4b7   : > { %7479 = vmatpush1.bf16.msra.mxu0 %v7478_v55  ;;  %v2427_v55 = vld [vmem:[#allocation23 + $0x428] sm:$0xff] }
 0x4b8   : > { %7481 = vmatprep.subr.bf16.mxu0 %v7480_v59  ;;  %v7500_v57 = vpack.c.bf16 %v2427_v55, %v2423_v54  ;;  %v7756_v59 = vpack.c.bf16 %v2429_v58, %v2425_v56  ;;  %v7762_v56 = vpack.c.bf16 %v2436_v48, %v2432_v47  ;;  %v2442_v58 = vld [vmem:[#allocation23 + $0x4a0] sm:$0xff]  ;;  %v2468_v47 = vld [vmem:[#allocation23 + $0x570] sm:$0xff]  ;;  %v2471_v48 = vld [vmem:[#allocation23 + $0x588] sm:$0xff] }
 0x4b9   : > { %7735 = vmatpush1.bf16.msra.mxu1 %v7734_v2  ;;  %v1845_v2 = vrot.slane %v11734_v63, %v11732_v62 }
 0x4ba   : > { %7737 = vmatprep.subr.bf16.mxu1 %v7736_v3  ;;  %v11742_v3 = vsub.s32 3, %v11729_v61 }
 0x4bb   : > { %7483 = vmatpush1.bf16.msra.mxu0 %v7482_v4  ;;  %v1849_v4 = vrot.slane %v11734_v63, %v11737_v0 }
 0x4bc   : > { %7485 = vmatprep.subr.bf16.mxu0 %v7484_v8  ;;  %v1857_v9 = vrot.slane %v11734_v63, %v11742_v3  ;;  %v2261_v35 = vrot.slane %v11752_v12, %v11742_v3 }
 0x4bd   : > { %7739 = vmatpush1.bf16.msra.mxu1 %v7738_v14  ;;  %v2203_v14 = vrot.slane %v11746_v5, %v11737_v0 }
 0x4be   : > { %7741 = vmatprep.subr.bf16.mxu1 %v7740_v15 }
 0x4bf   : > { %7487 = vmatpush1.bf16.msra.mxu0 %v7486_v16 }
 0x4c0   : > { %7489 = vmatprep.subr.bf16.mxu0 %v7488_v19  ;;  %v2253_v19 = vrot.slane %v11752_v12, %v11737_v0 }
 0x4c1   : > { %7743 = vmatpush1.bf16.msra.mxu1 %v7742_v22 }
 0x4c2   : > { %7745 = vmatprep.subr.bf16.mxu1 %v7744_v23 }
 0x4c3   : > { %7491 = vmatpush1.bf16.msra.mxu0 %v7490_v28  ;;  %v2428_v28 = vld [vmem:[#allocation23 + $0x430] sm:$0xff] }
 0x4c4   : > { %7493 = vmatprep.subr.bf16.mxu0 %v7492_v33  ;;  %v2437_v33 = vld [vmem:[#allocation23 + $0x478] sm:$0xff]  ;;  %v7758_v39 = vpack.c.bf16 %v2428_v28, %v2424_v27  ;;  %v2454_v27 = vld [vmem:[#allocation23 + $0x500] sm:$0xff] }
 0x4c5   : > { %7747 = vmatpush1.bf16.msra.mxu1 %v7746_v30  ;;  %v2211_v30 = vrot.slane %v11746_v5, %v11742_v3  ;;  %v7760_v46 = vpack.c.bf16 %v2437_v33, %v2433_v26  ;;  %v2458_v28 = vld [vmem:[#allocation23 + $0x520] sm:$0xff]  ;;  %v2463_v26 = vld [vmem:[#allocation23 + $0x548] sm:$0xff] }
 0x4c6   : > { %7749 = vmatprep.subr.bf16.mxu1 %v7748_v37  ;;  %v2467_v33 = vld [vmem:[#allocation23 + $0x568] sm:$0xff] }
 0x4c7   : > { %7495 = vmatpush1.bf16.msra.mxu0 %v7494_v38  ;;  %v7502_v38 = vpack.c.bf16 %v2426_v21, %v2422_v20  ;;  %v2455_v20 = vld [vmem:[#allocation23 + $0x508] sm:$0xff] }
 0x4c8   : > { %7497 = vmatprep.subr.bf16.mxu0 %v7496_v45  ;;  %v7504_v45 = vpack.c.bf16 %v2435_v32, %v2431_v29  ;;  %v2459_v21 = vld [vmem:[#allocation23 + $0x528] sm:$0xff]  ;;  %v2460_v32 = vld [vmem:[#allocation23 + $0x530] sm:$0xff] }
 0x4c9   : > { %7751 = vmatpush1.bf16.msra.mxu1 %v7750_v41  ;;  %v2434_v41 = vld [vmem:[#allocation23 + $0x460] sm:$0xff]  ;;  %v7516_v29 = vpack.c.bf16 %v2459_v21, %v2455_v20  ;;  %v2489_v20 = vld [vmem:[#allocation23 + $0x618] sm:$0xff] }
 0x4ca   : > { %7753 = vmatprep.subr.bf16.mxu1 %v7752_v49  ;;  %v2439_v49 = vld [vmem:[#allocation23 + $0x488] sm:$0xff]  ;;  %v7506_v55 = vpack.c.bf16 %v2434_v41, %v2430_v40  ;;  %v2462_v40 = vld [vmem:[#allocation23 + $0x540] sm:$0xff]  ;;  %v2493_v21 = vld [vmem:[#allocation23 + $0x638] sm:$0xff] }
 0x4cb   : > { %7499 = vmatpush1.bf16.msra.mxu0 %v7498_v50  ;;  %v2466_v41 = vld [vmem:[#allocation23 + $0x560] sm:$0xff] }
 0x4cc   : > { %7501 = vmatprep.subr.bf16.mxu0 %v7500_v57  ;;  %v2438_v57 = vld [vmem:[#allocation23 + $0x480] sm:$0xff] }
 0x4cd   : > { %7755 = vmatpush1.bf16.msra.mxu1 %v7754_v53  ;;  %v2445_v53 = vld [vmem:[#allocation23 + $0x4b8] sm:$0xff] }
 0x4ce   : > { %7757 = vmatprep.subr.bf16.mxu1 %v7756_v59  ;;  %v7508_v59 = vpack.c.bf16 %v2443_v51, %v2439_v49  ;;  %v7764_v60 = vpack.c.bf16 %v2445_v53, %v2441_v52  ;;  %v2475_v49 = vld [vmem:[#allocation23 + $0x5a8] sm:$0xff]  ;;  %v2477_v51 = vld [vmem:[#allocation23 + $0x5b8] sm:$0xff]  ;;  %v7522_v52 = vpack.c.bf16 %v2466_v41, %v2462_v40 }
 0x559   : > { %v1952_v6 = vpop.f32.mrb[0].mxu0 }
 0x55a   : > { %v1953_v7 = vadd.f32 %v1952_v6, %v1845_v2  ;;  %v1954_v8 = vpop.f32.mrb[1].mxu0  ;;  %v2440_v2 = vld [vmem:[#allocation23 + $0x490] sm:$0xff]  ;;  %v2447_v6 = vld [vmem:[#allocation23 + $0x4c8] sm:$0xff] }
 0x55b   : > { %v1955_v11 = vadd.f32 %v1954_v8, %v1849_v4  ;;  %v11756_v15 = vpop.f32.mrb[0].mxu1  ;;  %v2444_v4 = vld [vmem:[#allocation23 + $0x4b0] sm:$0xff]  ;;  %v2449_v8 = vld [vmem:[#allocation23 + $0x4d8] sm:$0xff] }
 0x55c   : > { %vm2170_vm1 = vcmp.ge.f32.partialorder %v1953_v7, 0.0  ;;  %v2178_v13 = vmul.f32 0.1, %v1953_v7  ;;  %v2025_v17 = vpop.f32.mrb[1].mxu1 }
 0x55d   : > { %vm2171_vm2 = vcmp.ge.f32.partialorder %v1955_v11, 0.0  ;;  %v2179_v16 = vmul.f32 0.1, %v1955_v11  ;;  %v2026_v22 = vadd.f32 %v2025_v17, %v1857_v9  ;;  %v2453_v9 = vld [vmem:[#allocation23 + $0x4f8] sm:$0xff] }
 0x55e   : > { %v2186_v18 = vsel %vm2170_vm1, %v1953_v7, %v2178_v13  ;;  %v2451_v7 = vld [vmem:[#allocation23 + $0x4e8] sm:$0xff]  ;;  %v2446_v13 = vld [vmem:[#allocation23 + $0x4c0] sm:$0xff]  ;;  %v7768_v17 = vpack.c.bf16 %v2453_v9, %v2449_v8 }
 0x55f   : > { %v2236_v23 = vmul.f32 %v2199_v10, %v2186_v18  ;;  %v2187_v24 = vsel %vm2171_vm2, %v1955_v11, %v2179_v16  ;;  %vm2173_vm3 = vcmp.ge.f32.partialorder %v2026_v22, 0.0  ;;  %v2181_v34 = vmul.f32 0.1, %v2026_v22  ;;  %v2448_v18 = vld [vmem:[#allocation23 + $0x4d0] sm:$0xff] }
 0x560   : > { %v2237_v31 = vmul.f32 %v2203_v14, %v2187_v24  ;;  %v7510_v10 = vpack.c.bf16 %v2442_v58, %v2438_v57  ;;  %v7766_v11 = vpack.c.bf16 %v2444_v4, %v2440_v2  ;;  %v2450_v14 = vld [vmem:[#allocation23 + $0x4e0] sm:$0xff]  ;;  %v7512_v16 = vpack.c.bf16 %v2451_v7, %v2447_v6  ;;  %v2479_v2 = vld [vmem:[#allocation23 + $0x5c8] sm:$0xff]  ;;  %v2481_v6 = vld [vmem:[#allocation23 + $0x5d8] sm:$0xff] }
 0x561   : > { %v11766_v36 = vpop.f32.mrb[2].mxu0  ;;  %v2189_v42 = vsel %vm2173_vm3, %v2026_v22, %v2181_v34  ;;  %v11772_v44 = vadd.f32 %v2249_v25, %v2236_v23  ;;  %v2457_v22 = vld [vmem:[#allocation23 + $0x518] sm:$0xff]  ;;  %v7514_v24 = vpack.c.bf16 %v2450_v14, %v2446_v13  ;;  %v7524_v57 = vpack.c.bf16 %v2475_v49, %v2471_v48  ;;  %v2483_v4 = vld [vmem:[#allocation23 + $0x5e8] sm:$0xff] }
 0x562   : > { %v11768_v37 = vadd.f32 %v2253_v19, %v2237_v31  ;;  %v11770_v43 = vpop.f32.mrb[3].mxu0  ;;  %v2239_v50 = vmul.f32 %v2211_v30, %v2189_v42  ;;  %v2452_v19 = vld [vmem:[#allocation23 + $0x4f0] sm:$0xff]  ;;  %v2461_v23 = vld [vmem:[#allocation23 + $0x538] sm:$0xff]  ;;  %v7520_v42 = vpack.c.bf16 %v2467_v33, %v2463_v26  ;;  %v7528_v13 = vpack.c.bf16 %v2483_v4, %v2479_v2 }
 0x563   : > { %v7770_v25 = vpack.c.bf16 %v2452_v19, %v2448_v18  ;;  %v7772_v30 = vpack.c.bf16 %v2461_v23, %v2457_v22  ;;  %v2456_v31 = vld [vmem:[#allocation23 + $0x510] sm:$0xff]  ;;  %v2465_v34 = vld [vmem:[#allocation23 + $0x558] sm:$0xff]  ;;  %v2487_v18 = vld [vmem:[#allocation23 + $0x608] sm:$0xff] }
 0x564   : > { %2892 = vmatprep.mubr.f32.mxu0 %v11768_v37  ;;  %3176 = vmatprep.mubr.f32.mxu1 %v11768_v37  ;;  %v11778_v54 = vadd.f32 %v2261_v35, %v2239_v50  ;;  %v2469_v35 = vld [vmem:[#allocation23 + $0x578] sm:$0xff]  ;;  %v2491_v19 = vld [vmem:[#allocation23 + $0x628] sm:$0xff] }
 0x565   : > { %2893 = vmatmul.mubr.f32.vlgmr.msra.gmra.mrb[4].mxu0 %v11772_v44  ;;  %3177 = vmatmul.mubr.f32.vlgmr.msra.gmra.mrb[4].mxu1 %v11772_v44  ;;  %v2473_v50 = vld [vmem:[#allocation23 + $0x598] sm:$0xff] }
 0x566   : > { %7503 = vmatpush1.bf16.msra.mxu0 %v7502_v38  ;;  %7759 = vmatpush1.bf16.msra.mxu1 %v7758_v39  ;;  %v7518_v38 = vpack.c.bf16 %v2458_v28, %v2454_v27  ;;  %v7774_v39 = vpack.c.bf16 %v2460_v32, %v2456_v31  ;;  %v7780_v58 = vpack.c.bf16 %v2477_v51, %v2473_v50  ;;  %v2485_v7 = vld [vmem:[#allocation23 + $0x5f8] sm:$0xff]  ;;  %v2495_v31 = vld [vmem:[#allocation23 + $0x648] sm:$0xff] }
 0x567   : > { %7505 = vmatprep.subr.bf16.mxu0 %v7504_v45  ;;  %7761 = vmatprep.subr.bf16.mxu1 %v7760_v46  ;;  %v7776_v45 = vpack.c.bf16 %v2469_v35, %v2465_v34  ;;  %v2464_v46 = vld [vmem:[#allocation23 + $0x550] sm:$0xff]  ;;  %v7784_v14 = vpack.c.bf16 %v2485_v7, %v2481_v6  ;;  %v7532_v27 = vpack.c.bf16 %v2491_v19, %v2487_v18  ;;  %v2499_v32 = vld [vmem:[#allocation23 + $0x668] sm:$0xff]  ;;  %v2497_v26 = vld [vmem:[#allocation23 + $0x658] sm:$0xff] }
 0x568   : > { %2963 = vmatprep.mubr.f32.mxu0 %v11778_v54  ;;  %3247 = vmatprep.mubr.f32.mxu1 %v11778_v54  ;;  %v7778_v53 = vpack.c.bf16 %v2468_v47, %v2464_v46  ;;  %v7788_v28 = vpack.c.bf16 %v2493_v21, %v2489_v20  ;;  %v2501_v33 = vld [vmem:[#allocation23 + $0x678] sm:$0xff]  ;;  %v7536_v40 = vpack.c.bf16 %v2499_v32, %v2495_v31  ;;  %v2503_v46 = vld [vmem:[#allocation23 + $0x688] sm:$0xff]  ;;  %v11783_v20 = vsub.s32 2, %v11729_v61 }
 0x569   : > { %v7792_v41 = vpack.c.bf16 %v2501_v33, %v2497_v26  ;;  %v2507_v47 = vld [vmem:[#allocation23 + $0x6a8] sm:$0xff]  ;;  %v2505_v48 = vld [vmem:[#allocation23 + $0x698] sm:$0xff]  ;;  %v11786_v21 = vsub.s32 5, %v11729_v61 }
 0x56a   : > { %7507 = vmatpush1.bf16.msra.mxu0 %v7506_v55  ;;  %7763 = vmatpush1.bf16.msra.mxu1 %v7762_v56  ;;  %v2470_v55 = vld [vmem:[#allocation23 + $0x580] sm:$0xff]  ;;  %v2509_v49 = vld [vmem:[#allocation23 + $0x6b8] sm:$0xff]  ;;  %v2527_v31 = vld [vmem:[#allocation23 + $0x748] sm:$0xff]  ;;  %v1853_v32 = vrot.slane %v11734_v63, %v11783_v20 }
 0x56b   : > { %7509 = vmatprep.subr.bf16.mxu0 %v7508_v59  ;;  %7765 = vmatprep.subr.bf16.mxu1 %v7764_v60  ;;  %v2474_v56 = vld [vmem:[#allocation23 + $0x5a0] sm:$0xff]  ;;  %v2472_v59 = vld [vmem:[#allocation23 + $0x590] sm:$0xff]  ;;  %v2513_v2 = vld [vmem:[#allocation23 + $0x6d8] sm:$0xff] }
 0x56c   : > { %v2476_v60 = vld [vmem:[#allocation23 + $0x5b0] sm:$0xff]  ;;  %v7526_v8 = vpack.c.bf16 %v2474_v56, %v2470_v55  ;;  %v7540_v55 = vpack.c.bf16 %v2507_v47, %v2503_v46  ;;  %v7796_v56 = vpack.c.bf16 %v2509_v49, %v2505_v48  ;;  %v2517_v4 = vld [vmem:[#allocation23 + $0x6f8] sm:$0xff]  ;;  %v2531_v26 = vld [vmem:[#allocation23 + $0x768] sm:$0xff]  ;;  %v2024_v49 = vadd.f32 %v11756_v15, %v1853_v32 }
 0x56d   : > { %v7782_v9 = vpack.c.bf16 %v2476_v60, %v2472_v59  ;;  %v2511_v59 = vld [vmem:[#allocation23 + $0x6c8] sm:$0xff]  ;;  %v2521_v18 = vld [vmem:[#allocation23 + $0x718] sm:$0xff]  ;;  %v2528_v46 = vld [vmem:[#allocation23 + $0x750] sm:$0xff] }
 0x56e   : > { %7511 = vmatpush1.bf16.msra.mxu0 %v7510_v10  ;;  %7767 = vmatpush1.bf16.msra.mxu1 %v7766_v11  ;;  %v2478_v10 = vld [vmem:[#allocation23 + $0x5c0] sm:$0xff]  ;;  %v2515_v60 = vld [vmem:[#allocation23 + $0x6e8] sm:$0xff]  ;;  %v2525_v19 = vld [vmem:[#allocation23 + $0x738] sm:$0xff]  ;;  %vm2172_vm4 = vcmp.ge.f32.partialorder %v2024_v49, 0.0 }
 0x56f   : > { %7513 = vmatprep.subr.bf16.mxu0 %v7512_v16  ;;  %7769 = vmatprep.subr.bf16.mxu1 %v7768_v17  ;;  %v2482_v11 = vld [vmem:[#allocation23 + $0x5e0] sm:$0xff]  ;;  %v2480_v16 = vld [vmem:[#allocation23 + $0x5d0] sm:$0xff]  ;;  %v2529_v33 = vld [vmem:[#allocation23 + $0x758] sm:$0xff] }
 0x570   : > { %v2484_v17 = vld [vmem:[#allocation23 + $0x5f0] sm:$0xff]  ;;  %v7530_v22 = vpack.c.bf16 %v2482_v11, %v2478_v10  ;;  %v7544_v10 = vpack.c.bf16 %v2515_v60, %v2511_v59  ;;  %v7800_v11 = vpack.c.bf16 %v2517_v4, %v2513_v2  ;;  %v2535_v48 = vld [vmem:[#allocation23 + $0x788] sm:$0xff] }
 0x571   : > { %v7786_v23 = vpack.c.bf16 %v2484_v17, %v2480_v16  ;;  %v2519_v16 = vld [vmem:[#allocation23 + $0x708] sm:$0xff]  ;;  %v2532_v47 = vld [vmem:[#allocation23 + $0x770] sm:$0xff] }
 0x572   : > { %7515 = vmatpush1.bf16.msra.mxu0 %v7514_v24  ;;  %7771 = vmatpush1.bf16.msra.mxu1 %v7770_v25  ;;  %v2486_v24 = vld [vmem:[#allocation23 + $0x600] sm:$0xff]  ;;  %v2523_v17 = vld [vmem:[#allocation23 + $0x728] sm:$0xff]  ;;  %v2536_v2 = vld [vmem:[#allocation23 + $0x790] sm:$0xff] }
 0x573   : > { %7517 = vmatprep.subr.bf16.mxu0 %v7516_v29  ;;  %7773 = vmatprep.subr.bf16.mxu1 %v7772_v30  ;;  %v2490_v25 = vld [vmem:[#allocation23 + $0x620] sm:$0xff]  ;;  %v2488_v29 = vld [vmem:[#allocation23 + $0x610] sm:$0xff]  ;;  %v2543_v15 = vld [vmem:[#allocation23 + $0x7c8] sm:$0xff] }
 0x574   : > { %v2492_v30 = vld [vmem:[#allocation23 + $0x630] sm:$0xff]  ;;  %v7534_v34 = vpack.c.bf16 %v2490_v25, %v2486_v24  ;;  %v2518_v24 = vld [vmem:[#allocation23 + $0x700] sm:$0xff] }
 0x575   : > { %v7790_v35 = vpack.c.bf16 %v2492_v30, %v2488_v29  ;;  %v2522_v25 = vld [vmem:[#allocation23 + $0x720] sm:$0xff]  ;;  %v2520_v29 = vld [vmem:[#allocation23 + $0x710] sm:$0xff] }
 0x576   : > { %7519 = vmatpush1.bf16.msra.mxu0 %v7518_v38  ;;  %7775 = vmatpush1.bf16.msra.mxu1 %v7774_v39  ;;  %v2494_v38 = vld [vmem:[#allocation23 + $0x640] sm:$0xff]  ;;  %v2524_v30 = vld [vmem:[#allocation23 + $0x730] sm:$0xff] }
 0x577   : > { %7521 = vmatprep.subr.bf16.mxu0 %v7520_v42  ;;  %7777 = vmatprep.subr.bf16.mxu1 %v7776_v45  ;;  %v2498_v39 = vld [vmem:[#allocation23 + $0x660] sm:$0xff]  ;;  %v2496_v42 = vld [vmem:[#allocation23 + $0x650] sm:$0xff] }
 0x578   : > { %v2500_v45 = vld [vmem:[#allocation23 + $0x670] sm:$0xff]  ;;  %v7538_v50 = vpack.c.bf16 %v2498_v39, %v2494_v38  ;;  %v7550_v38 = vpack.c.bf16 %v2522_v25, %v2518_v24  ;;  %v7806_v39 = vpack.c.bf16 %v2524_v30, %v2520_v29  ;;  %v2551_v24 = vld [vmem:[#allocation23 + $0x808] sm:$0xff]  ;;  %v2557_v29 = vld [vmem:[#allocation23 + $0x838] sm:$0xff]  ;;  %v2219_v30 = vrot.slane %v11746_v5, %v11786_v21 }
 0x579   : > { %v7794_v51 = vpack.c.bf16 %v2500_v45, %v2496_v42  ;;  %v7552_v42 = vpack.c.bf16 %v2531_v26, %v2527_v31  ;;  %v2540_v4 = vld [vmem:[#allocation23 + $0x7b0] sm:$0xff] }
 0x57a   : > { %7523 = vmatpush1.bf16.msra.mxu0 %v7522_v52  ;;  %7779 = vmatpush1.bf16.msra.mxu1 %v7778_v53  ;;  %v2502_v52 = vld [vmem:[#allocation23 + $0x680] sm:$0xff] }
 0x57b   : > { %7525 = vmatprep.subr.bf16.mxu0 %v7524_v57  ;;  %7781 = vmatprep.subr.bf16.mxu1 %v7780_v58  ;;  %v2506_v53 = vld [vmem:[#allocation23 + $0x6a0] sm:$0xff]  ;;  %v2504_v57 = vld [vmem:[#allocation23 + $0x690] sm:$0xff] }
 0x57c   : > { %v2508_v58 = vld [vmem:[#allocation23 + $0x6b0] sm:$0xff]  ;;  %v7542_v6 = vpack.c.bf16 %v2506_v53, %v2502_v52  ;;  %v2541_v52 = vld [vmem:[#allocation23 + $0x7b8] sm:$0xff] }
 0x57d   : > { %v7798_v7 = vpack.c.bf16 %v2508_v58, %v2504_v57  ;;  %v2538_v57 = vld [vmem:[#allocation23 + $0x7a0] sm:$0xff]  ;;  %v11794_v58 = vpop.f32.mrb[2].mxu1 }
 0x57e   : > { %7527 = vmatpush1.bf16.msra.mxu0 %v7526_v8  ;;  %7783 = vmatpush1.bf16.msra.mxu1 %v7782_v9  ;;  %v2510_v8 = vld [vmem:[#allocation23 + $0x6c0] sm:$0xff] }
 0x57f   : > { %7529 = vmatprep.subr.bf16.mxu0 %v7528_v13  ;;  %7785 = vmatprep.subr.bf16.mxu1 %v7784_v14  ;;  %v2514_v9 = vld [vmem:[#allocation23 + $0x6e0] sm:$0xff]  ;;  %v2512_v13 = vld [vmem:[#allocation23 + $0x6d0] sm:$0xff] }
 0x580   : > { %v2516_v14 = vld [vmem:[#allocation23 + $0x6f0] sm:$0xff] }
 0x582   : > { %7531 = vmatpush1.bf16.msra.mxu0 %v7530_v22  ;;  %7787 = vmatpush1.bf16.msra.mxu1 %v7786_v23  ;;  %v7546_v22 = vpack.c.bf16 %v2514_v9, %v2510_v8  ;;  %v7802_v23 = vpack.c.bf16 %v2516_v14, %v2512_v13  ;;  %v2547_v8 = vld [vmem:[#allocation23 + $0x7e8] sm:$0xff]  ;;  %v2549_v9 = vld [vmem:[#allocation23 + $0x7f8] sm:$0xff]  ;;  %v7814_v13 = vpack.c.bf16 %v2540_v4, %v2536_v2  ;;  %v2542_v14 = vld [vmem:[#allocation23 + $0x7c0] sm:$0xff] }
 0x583   : > { %7533 = vmatprep.subr.bf16.mxu0 %v7532_v27  ;;  %7789 = vmatprep.subr.bf16.mxu1 %v7788_v28  ;;  %v7548_v27 = vpack.c.bf16 %v2523_v17, %v2519_v16  ;;  %v7804_v28 = vpack.c.bf16 %v2525_v19, %v2521_v18  ;;  %v2546_v16 = vld [vmem:[#allocation23 + $0x7e0] sm:$0xff]  ;;  %v2207_v17 = vrot.slane %v11746_v5, %v11783_v20  ;;  %v2561_v5 = vld [vmem:[#allocation23 + $0x858] sm:$0xff]  ;;  %v2571_v2 = vld [vmem:[#allocation23 + $0x8a8] sm:$0xff] }
 0x584   : > { %v7560_v18 = vpack.c.bf16 %v2547_v8, %v2543_v15  ;;  %v7562_v32 = vpack.c.bf16 %v2546_v16, %v2542_v14  ;;  %v2569_v4 = vld [vmem:[#allocation23 + $0x898] sm:$0xff]  ;;  %v2566_v8 = vld [vmem:[#allocation23 + $0x880] sm:$0xff]  ;;  %v2575_v14 = vld [vmem:[#allocation23 + $0x8c8] sm:$0xff] }
 0x585   : > { %v2573_v15 = vld [vmem:[#allocation23 + $0x8b8] sm:$0xff]  ;;  %v2579_v16 = vld [vmem:[#allocation23 + $0x8e8] sm:$0xff] }
 0x586   : > { %7535 = vmatpush1.bf16.msra.mxu0 %v7534_v34  ;;  %7791 = vmatpush1.bf16.msra.mxu1 %v7790_v35  ;;  %v2533_v34 = vld [vmem:[#allocation23 + $0x778] sm:$0xff]  ;;  %v1865_v35 = vrot.slane %v11734_v63, %v11786_v21 }
 0x587   : > { %7537 = vmatprep.subr.bf16.mxu0 %v7536_v40  ;;  %7793 = vmatprep.subr.bf16.mxu1 %v7792_v41  ;;  %v2526_v40 = vld [vmem:[#allocation23 + $0x740] sm:$0xff]  ;;  %v7808_v45 = vpack.c.bf16 %v2533_v34, %v2529_v33  ;;  %v2257_v33 = vrot.slane %v11752_v12, %v11783_v20 }
 0x588   : > { %v2530_v41 = vld [vmem:[#allocation23 + $0x760] sm:$0xff]  ;;  %v2097_v63 = vadd.f32 %v11770_v43, %v1865_v35  ;;  %v2545_v43 = vld [vmem:[#allocation23 + $0x7d8] sm:$0xff] }
 0x589   : > { %v7554_v53 = vpack.c.bf16 %v2530_v41, %v2526_v40  ;;  %v7816_v19 = vpack.c.bf16 %v2549_v9, %v2545_v43  ;;  %v2550_v34 = vld [vmem:[#allocation23 + $0x800] sm:$0xff]  ;;  %v2552_v41 = vld [vmem:[#allocation23 + $0x810] sm:$0xff] }
 0x58a   : > { %7539 = vmatpush1.bf16.msra.mxu0 %v7538_v50  ;;  %7795 = vmatpush1.bf16.msra.mxu1 %v7794_v51  ;;  %v2539_v50 = vld [vmem:[#allocation23 + $0x7a8] sm:$0xff]  ;;  %v2537_v51 = vld [vmem:[#allocation23 + $0x798] sm:$0xff]  ;;  %vm2175_vm5 = vcmp.ge.f32.partialorder %v2097_v63, 0.0  ;;  %v2554_v35 = vld [vmem:[#allocation23 + $0x820] sm:$0xff] }
 0x58b   : > { %7541 = vmatprep.subr.bf16.mxu0 %v7540_v55  ;;  %7797 = vmatprep.subr.bf16.mxu1 %v7796_v56  ;;  %v7810_v55 = vpack.c.bf16 %v2532_v47, %v2528_v46  ;;  %v2534_v56 = vld [vmem:[#allocation23 + $0x780] sm:$0xff]  ;;  %v7556_v59 = vpack.c.bf16 %v2539_v50, %v2535_v48  ;;  %v7812_v60 = vpack.c.bf16 %v2541_v52, %v2537_v51  ;;  %v2563_v46 = vld [vmem:[#allocation23 + $0x868] sm:$0xff]  ;;  %v2565_v47 = vld [vmem:[#allocation23 + $0x878] sm:$0xff] }
 0x58c   : > { %v7566_v50 = vpack.c.bf16 %v2554_v35, %v2550_v34  ;;  %v2558_v52 = vld [vmem:[#allocation23 + $0x840] sm:$0xff] }
 0x58d   : > { %v2570_v43 = vld [vmem:[#allocation23 + $0x8a0] sm:$0xff] }
 0x58e   : > { %7543 = vmatpush1.bf16.msra.mxu0 %v7542_v6  ;;  %7799 = vmatpush1.bf16.msra.mxu1 %v7798_v7  ;;  %v11796_v6 = vpop.f32.mrb[3].mxu1  ;;  %v2180_v7 = vmul.f32 0.1, %v2024_v49  ;;  %v2582_v35 = vld [vmem:[#allocation23 + $0x900] sm:$0xff] }
 0x58f   : > { %7545 = vmatprep.subr.bf16.mxu0 %v7544_v10  ;;  %7801 = vmatprep.subr.bf16.mxu1 %v7800_v11  ;;  %v2183_v10 = vmul.f32 0.1, %v2097_v63  ;;  %v7558_v11 = vpack.c.bf16 %v2538_v57, %v2534_v56  ;;  %v7824_v56 = vpack.c.bf16 %v2565_v47, %v2561_v5  ;;  %v2560_v57 = vld [vmem:[#allocation23 + $0x850] sm:$0xff]  ;;  %v2593_v5 = vld [vmem:[#allocation23 + $0x958] sm:$0xff] }
 0x590   : > { %v2188_v25 = vsel %vm2172_vm4, %v2024_v49, %v2180_v7  ;;  %v2269_v49 = vrot.slane %v11752_v12, %v11786_v21  ;;  %v2597_v47 = vld [vmem:[#allocation23 + $0x978] sm:$0xff] }
 0x591   : > { %v2191_v31 = vsel %vm2175_vm5, %v2097_v63, %v2183_v10  ;;  %v2562_v63 = vld [vmem:[#allocation23 + $0x860] sm:$0xff]  ;;  %v7828_v10 = vpack.c.bf16 %v2573_v15, %v2569_v4 }
 0x592   : > { %7547 = vmatpush1.bf16.msra.mxu0 %v7546_v22  ;;  %7803 = vmatpush1.bf16.msra.mxu1 %v7802_v23  ;;  %v2544_v22 = vld [vmem:[#allocation23 + $0x7d0] sm:$0xff]  ;;  %v2241_v48 = vmul.f32 %v2219_v30, %v2191_v31  ;;  %v7570_v12 = vpack.c.bf16 %v2562_v63, %v2558_v52  ;;  %v2583_v30 = vld [vmem:[#allocation23 + $0x908] sm:$0xff]  ;;  %v7840_v63 = vpack.c.bf16 %v2597_v47, %v2593_v5 }
 0x593   : > { %7549 = vmatprep.subr.bf16.mxu0 %v7548_v27  ;;  %7805 = vmatprep.subr.bf16.mxu1 %v7804_v28  ;;  %v2548_v23 = vld [vmem:[#allocation23 + $0x7f0] sm:$0xff]  ;;  %v2555_v27 = vld [vmem:[#allocation23 + $0x828] sm:$0xff]  ;;  %v2553_v28 = vld [vmem:[#allocation23 + $0x818] sm:$0xff] }
 0x594   : > { %v7818_v26 = vpack.c.bf16 %v2548_v23, %v2544_v22  ;;  %v7820_v40 = vpack.c.bf16 %v2557_v29, %v2553_v28  ;;  %v11809_v7 = vadd.f32 %v2269_v49, %v2241_v48  ;;  %v2574_v23 = vld [vmem:[#allocation23 + $0x8c0] sm:$0xff]  ;;  %v2576_v28 = vld [vmem:[#allocation23 + $0x8d0] sm:$0xff]  ;;  %v2587_v31 = vld [vmem:[#allocation23 + $0x928] sm:$0xff] }
 0x595   : > { %v2580_v29 = vld [vmem:[#allocation23 + $0x8f0] sm:$0xff] }
 0x596   : > { %7551 = vmatpush1.bf16.msra.mxu0 %v7550_v38  ;;  %7807 = vmatpush1.bf16.msra.mxu1 %v7806_v39  ;;  %v2238_v38 = vmul.f32 %v2207_v17, %v2188_v25  ;;  %v7564_v39 = vpack.c.bf16 %v2555_v27, %v2551_v24  ;;  %v2577_v17 = vld [vmem:[#allocation23 + $0x8d8] sm:$0xff]  ;;  %v2578_v24 = vld [vmem:[#allocation23 + $0x8e0] sm:$0xff]  ;;  %v7576_v25 = vpack.c.bf16 %v2579_v16, %v2575_v14 }
 0x597   : > { %7553 = vmatprep.subr.bf16.mxu0 %v7552_v42  ;;  %7809 = vmatprep.subr.bf16.mxu1 %v7808_v45  ;;  %v2556_v42 = vld [vmem:[#allocation23 + $0x830] sm:$0xff]  ;;  %v2559_v45 = vld [vmem:[#allocation23 + $0x848] sm:$0xff]  ;;  %v7834_v34 = vpack.c.bf16 %v2580_v29, %v2576_v28  ;;  %v2609_v14 = vld [vmem:[#allocation23 + $0x9d8] sm:$0xff] }
 0x598   : > { %v7822_v51 = vpack.c.bf16 %v2556_v42, %v2552_v41  ;;  %v2584_v41 = vld [vmem:[#allocation23 + $0x910] sm:$0xff]  ;;  %v2613_v16 = vld [vmem:[#allocation23 + $0x9f8] sm:$0xff]  ;;  %v2615_v28 = vld [vmem:[#allocation23 + $0xa08] sm:$0xff] }
 0x599   : > { %v2588_v42 = vld [vmem:[#allocation23 + $0x930] sm:$0xff]  ;;  %v2619_v29 = vld [vmem:[#allocation23 + $0xa28] sm:$0xff] }
 0x59a   : > { %7555 = vmatpush1.bf16.msra.mxu0 %v7554_v53  ;;  %7811 = vmatpush1.bf16.msra.mxu1 %v7810_v55  ;;  %v11807_v53 = vadd.f32 %v2257_v33, %v2238_v38  ;;  %v7568_v55 = vpack.c.bf16 %v2563_v46, %v2559_v45  ;;  %v7578_v33 = vpack.c.bf16 %v2578_v24, %v2574_v23  ;;  %v2586_v38 = vld [vmem:[#allocation23 + $0x920] sm:$0xff]  ;;  %v2591_v45 = vld [vmem:[#allocation23 + $0x948] sm:$0xff] }
 0x59b   : > { %7557 = vmatprep.subr.bf16.mxu0 %v7556_v59  ;;  %7813 = vmatprep.subr.bf16.mxu1 %v7812_v60  ;;  %v2564_v59 = vld [vmem:[#allocation23 + $0x870] sm:$0xff]  ;;  %v2567_v60 = vld [vmem:[#allocation23 + $0x888] sm:$0xff]  ;;  %v7582_v48 = vpack.c.bf16 %v2586_v38, %v2582_v35  ;;  %v7838_v49 = vpack.c.bf16 %v2588_v42, %v2584_v41  ;;  %v7848_v24 = vpack.c.bf16 %v2613_v16, %v2609_v14 }
 0x59c   : > { %v7826_v21 = vpack.c.bf16 %v2564_v59, %v2560_v57  ;;  %v7572_v9 = vpack.c.bf16 %v2571_v2, %v2567_v60  ;;  %v2595_v46 = vld [vmem:[#allocation23 + $0x968] sm:$0xff]  ;;  %v2601_v60 = vld [vmem:[#allocation23 + $0x998] sm:$0xff]  ;;  %v7596_v35 = vpack.c.bf16 %v2619_v29, %v2615_v28 }
 0x59d   : > { %v7584_v52 = vpack.c.bf16 %v2595_v46, %v2591_v45  ;;  %v2599_v57 = vld [vmem:[#allocation23 + $0x988] sm:$0xff]  ;;  %v2605_v2 = vld [vmem:[#allocation23 + $0x9b8] sm:$0xff] }
 0x59e   : > { %7559 = vmatpush1.bf16.msra.mxu0 %v7558_v11  ;;  %7815 = vmatpush1.bf16.msra.mxu1 %v7814_v13  ;;  %v2568_v11 = vld [vmem:[#allocation23 + $0x890] sm:$0xff]  ;;  %v2603_v59 = vld [vmem:[#allocation23 + $0x9a8] sm:$0xff]  ;;  %v2625_v45 = vld [vmem:[#allocation23 + $0xa58] sm:$0xff] }
 0x59f   : > { %7561 = vmatprep.subr.bf16.mxu0 %v7560_v18  ;;  %7817 = vmatprep.subr.bf16.mxu1 %v7816_v19  ;;  %v2572_v13 = vld [vmem:[#allocation23 + $0x8b0] sm:$0xff]  ;;  %v2581_v18 = vld [vmem:[#allocation23 + $0x8f8] sm:$0xff]  ;;  %v7574_v19 = vpack.c.bf16 %v2570_v43, %v2566_v8  ;;  %v7588_v8 = vpack.c.bf16 %v2603_v59, %v2599_v57  ;;  %v7844_v43 = vpack.c.bf16 %v2605_v2, %v2601_v60  ;;  %v2623_v41 = vld [vmem:[#allocation23 + $0xa48] sm:$0xff] }
 0x5a0   : > { %v7830_v22 = vpack.c.bf16 %v2572_v13, %v2568_v11  ;;  %v7832_v27 = vpack.c.bf16 %v2581_v18, %v2577_v17  ;;  %v2607_v11 = vld [vmem:[#allocation23 + $0x9c8] sm:$0xff]  ;;  %v2629_v46 = vld [vmem:[#allocation23 + $0xa78] sm:$0xff] }
 0x5a1   : > { %v2611_v13 = vld [vmem:[#allocation23 + $0x9e8] sm:$0xff]  ;;  %v2633_v57 = vld [vmem:[#allocation23 + $0xa98] sm:$0xff] }
 0x5a2   : > { %7563 = vmatpush1.bf16.msra.mxu0 %v7562_v32  ;;  %7819 = vmatpush1.bf16.msra.mxu1 %v7818_v26  ;;  %v2585_v32 = vld [vmem:[#allocation23 + $0x918] sm:$0xff]  ;;  %v7592_v23 = vpack.c.bf16 %v2611_v13, %v2607_v11  ;;  %v2627_v42 = vld [vmem:[#allocation23 + $0xa68] sm:$0xff] }
 0x5a3   : > { %7565 = vmatprep.subr.bf16.mxu0 %v7564_v39  ;;  %7821 = vmatprep.subr.bf16.mxu1 %v7820_v40  ;;  %v2589_v26 = vld [vmem:[#allocation23 + $0x938] sm:$0xff]  ;;  %v7580_v39 = vpack.c.bf16 %v2587_v31, %v2583_v30 }
 0x5a4   : > { %v7836_v40 = vpack.c.bf16 %v2589_v26, %v2585_v32  ;;  %v2617_v30 = vld [vmem:[#allocation23 + $0xa18] sm:$0xff] }
 0x5a5   : > { %2964 = vmatmul.mubr.f32.vlgmr.msra.gmra.mrb[4].mxu0 %v11807_v53  ;;  %3248 = vmatmul.mubr.f32.vlgmr.msra.gmra.mrb[4].mxu1 %v11807_v53  ;;  %v2621_v31 = vld [vmem:[#allocation23 + $0xa38] sm:$0xff] }
 0x5a6   : > { %7567 = vmatpush1.bf16.msra.mxu0 %v7566_v50  ;;  %7823 = vmatpush1.bf16.msra.mxu1 %v7822_v51  ;;  %v2590_v50 = vld [vmem:[#allocation23 + $0x940] sm:$0xff]  ;;  %v7852_v38 = vpack.c.bf16 %v2621_v31, %v2617_v30  ;;  %v2637_v59 = vld [vmem:[#allocation23 + $0xab8] sm:$0xff]  ;;  %v11816_v30 = vsub.s32 4, %v11729_v61  ;;  %v11819_v31 = vsub.s32 7, %v11729_v61 }
 0x5a7   : > { %7569 = vmatprep.subr.bf16.mxu0 %v7568_v55  ;;  %7825 = vmatprep.subr.bf16.mxu1 %v7824_v56  ;;  %v2594_v51 = vld [vmem:[#allocation23 + $0x960] sm:$0xff]  ;;  %v2592_v55 = vld [vmem:[#allocation23 + $0x950] sm:$0xff]  ;;  %v2641_v11 = vld [vmem:[#allocation23 + $0xad8] sm:$0xff] }
 0x5a8   : > { %3034 = vmatprep.mubr.f32.mxu0 %v11809_v7  ;;  %3318 = vmatprep.mubr.f32.mxu1 %v11809_v7  ;;  %v2596_v56 = vld [vmem:[#allocation23 + $0x970] sm:$0xff]  ;;  %v7586_v4 = vpack.c.bf16 %v2594_v51, %v2590_v50  ;;  %v7600_v50 = vpack.c.bf16 %v2627_v42, %v2623_v41  ;;  %v7856_v51 = vpack.c.bf16 %v2629_v46, %v2625_v45  ;;  %v2645_v13 = vld [vmem:[#allocation23 + $0xaf8] sm:$0xff]  ;;  %v2655_v41 = vld [vmem:[#allocation23 + $0xb48] sm:$0xff] }
 0x5a9   : > { %v7842_v15 = vpack.c.bf16 %v2596_v56, %v2592_v55  ;;  %v2631_v55 = vld [vmem:[#allocation23 + $0xa88] sm:$0xff]  ;;  %v2649_v28 = vld [vmem:[#allocation23 + $0xb18] sm:$0xff]  ;;  %v11821_v42 = vld [vmem:[#allocation7] sm:$0xff] }
 0x5aa   : > { %7571 = vmatpush1.bf16.msra.mxu0 %v7570_v12  ;;  %7827 = vmatpush1.bf16.msra.mxu1 %v7826_v21  ;;  %v2598_v12 = vld [vmem:[#allocation23 + $0x980] sm:$0xff]  ;;  %v2635_v56 = vld [vmem:[#allocation23 + $0xaa8] sm:$0xff]  ;;  %v2653_v29 = vld [vmem:[#allocation23 + $0xb38] sm:$0xff]  ;;  %v1861_v45 = vrot.slane %v11821_v42, %v11816_v30 }
 0x5ab   : > { %7573 = vmatprep.subr.bf16.mxu0 %v7572_v9  ;;  %7829 = vmatprep.subr.bf16.mxu1 %v7828_v10  ;;  %v2602_v21 = vld [vmem:[#allocation23 + $0x9a0] sm:$0xff]  ;;  %v2600_v9 = vld [vmem:[#allocation23 + $0x990] sm:$0xff]  ;;  %v2659_v46 = vld [vmem:[#allocation23 + $0xb68] sm:$0xff] }
 0x5ac   : > { %v2604_v10 = vld [vmem:[#allocation23 + $0x9b0] sm:$0xff]  ;;  %v7590_v17 = vpack.c.bf16 %v2602_v21, %v2598_v12  ;;  %v7604_v12 = vpack.c.bf16 %v2635_v56, %v2631_v55  ;;  %v7860_v21 = vpack.c.bf16 %v2637_v59, %v2633_v57  ;;  %v2663_v59 = vld [vmem:[#allocation23 + $0xb88] sm:$0xff] }
 0x5ad   : > { %v7846_v18 = vpack.c.bf16 %v2604_v10, %v2600_v9  ;;  %v2639_v9 = vld [vmem:[#allocation23 + $0xac8] sm:$0xff]  ;;  %v2656_v56 = vld [vmem:[#allocation23 + $0xb50] sm:$0xff] }
 0x5ae   : > { %7575 = vmatpush1.bf16.msra.mxu0 %v7574_v19  ;;  %7831 = vmatpush1.bf16.msra.mxu1 %v7830_v22  ;;  %v2606_v19 = vld [vmem:[#allocation23 + $0x9c0] sm:$0xff]  ;;  %v2643_v10 = vld [vmem:[#allocation23 + $0xae8] sm:$0xff]  ;;  %v2660_v57 = vld [vmem:[#allocation23 + $0xb70] sm:$0xff] }
 0x5af   : > { %7577 = vmatprep.subr.bf16.mxu0 %v7576_v25  ;;  %7833 = vmatprep.subr.bf16.mxu1 %v7832_v27  ;;  %v2610_v22 = vld [vmem:[#allocation23 + $0x9e0] sm:$0xff]  ;;  %v2608_v25 = vld [vmem:[#allocation23 + $0x9d0] sm:$0xff] }
 0x5b0   : > { %v2612_v27 = vld [vmem:[#allocation23 + $0x9f0] sm:$0xff]  ;;  %v7594_v32 = vpack.c.bf16 %v2610_v22, %v2606_v19  ;;  %v7608_v19 = vpack.c.bf16 %v2643_v10, %v2639_v9  ;;  %v7864_v22 = vpack.c.bf16 %v2645_v13, %v2641_v11  ;;  %v2666_v9 = vld [vmem:[#allocation23 + $0xba0] sm:$0xff] }
 0x5b1   : > { %v7850_v26 = vpack.c.bf16 %v2612_v27, %v2608_v25  ;;  %v2647_v25 = vld [vmem:[#allocation23 + $0xb08] sm:$0xff]  ;;  %v2664_v13 = vld [vmem:[#allocation23 + $0xb90] sm:$0xff] }
 0x5b2   : > { %7579 = vmatpush1.bf16.msra.mxu0 %v7578_v33  ;;  %7835 = vmatpush1.bf16.msra.mxu1 %v7834_v34  ;;  %v2614_v33 = vld [vmem:[#allocation23 + $0xa00] sm:$0xff]  ;;  %v2651_v27 = vld [vmem:[#allocation23 + $0xb28] sm:$0xff] }
 0x5b3   : > { %7581 = vmatprep.subr.bf16.mxu0 %v7580_v39  ;;  %7837 = vmatprep.subr.bf16.mxu1 %v7836_v40  ;;  %v2618_v34 = vld [vmem:[#allocation23 + $0xa20] sm:$0xff]  ;;  %v2616_v39 = vld [vmem:[#allocation23 + $0xa10] sm:$0xff] }
 0x5b4   : > { %v2620_v40 = vld [vmem:[#allocation23 + $0xa30] sm:$0xff]  ;;  %v7598_v5 = vpack.c.bf16 %v2618_v34, %v2614_v33  ;;  %v2646_v33 = vld [vmem:[#allocation23 + $0xb00] sm:$0xff] }
 0x5b5   : > { %v7854_v47 = vpack.c.bf16 %v2620_v40, %v2616_v39  ;;  %v2650_v34 = vld [vmem:[#allocation23 + $0xb20] sm:$0xff]  ;;  %v2648_v39 = vld [vmem:[#allocation23 + $0xb10] sm:$0xff] }
 0x5b6   : > { %7583 = vmatpush1.bf16.msra.mxu0 %v7582_v48  ;;  %7839 = vmatpush1.bf16.msra.mxu1 %v7838_v49  ;;  %v2622_v48 = vld [vmem:[#allocation23 + $0xa40] sm:$0xff]  ;;  %v2652_v40 = vld [vmem:[#allocation23 + $0xb30] sm:$0xff] }
 0x5b7   : > { %7585 = vmatprep.subr.bf16.mxu0 %v7584_v52  ;;  %7841 = vmatprep.subr.bf16.mxu1 %v7840_v63  ;;  %v2626_v49 = vld [vmem:[#allocation23 + $0xa60] sm:$0xff]  ;;  %v2624_v52 = vld [vmem:[#allocation23 + $0xa50] sm:$0xff] }
 0x5b8   : > { %v2628_v63 = vld [vmem:[#allocation23 + $0xa70] sm:$0xff]  ;;  %v7602_v60 = vpack.c.bf16 %v2626_v49, %v2622_v48  ;;  %v1873_v48 = vrot.slane %v11821_v42, %v11819_v31  ;;  %v7614_v49 = vpack.c.bf16 %v2650_v34, %v2646_v33  ;;  %v2679_v34 = vld [vmem:[#allocation23 + $0xc08] sm:$0xff] }
 0x5b9   : > { %v7858_v2 = vpack.c.bf16 %v2628_v63, %v2624_v52  ;;  %v2658_v52 = vld [vmem:[#allocation23 + $0xb60] sm:$0xff]  ;;  %v7616_v63 = vpack.c.bf16 %v2659_v46, %v2655_v41  ;;  %v2676_v33 = vld [vmem:[#allocation23 + $0xbf0] sm:$0xff] }
 0x5ba   : > { %7587 = vmatpush1.bf16.msra.mxu0 %v7586_v4  ;;  %7843 = vmatpush1.bf16.msra.mxu1 %v7842_v15  ;;  %v2630_v4 = vld [vmem:[#allocation23 + $0xa80] sm:$0xff] }
 0x5bb   : > { %7589 = vmatprep.subr.bf16.mxu0 %v7588_v8  ;;  %7845 = vmatprep.subr.bf16.mxu1 %v7844_v43  ;;  %v2634_v15 = vld [vmem:[#allocation23 + $0xaa0] sm:$0xff]  ;;  %v2632_v8 = vld [vmem:[#allocation23 + $0xa90] sm:$0xff] }
 0x5bc   : > { %v2636_v43 = vld [vmem:[#allocation23 + $0xab0] sm:$0xff]  ;;  %v7606_v14 = vpack.c.bf16 %v2634_v15, %v2630_v4  ;;  %v2665_v4 = vld [vmem:[#allocation23 + $0xb98] sm:$0xff] }
 0x5bd   : > { %v7862_v16 = vpack.c.bf16 %v2636_v43, %v2632_v8  ;;  %v2669_v15 = vld [vmem:[#allocation23 + $0xbb8] sm:$0xff]  ;;  %v7874_v8 = vpack.c.bf16 %v2660_v57, %v2656_v56  ;;  %v2662_v43 = vld [vmem:[#allocation23 + $0xb80] sm:$0xff]  ;;  %v2684_v56 = vld [vmem:[#allocation23 + $0xc30] sm:$0xff] }
 0x5be   : > { %7591 = vmatpush1.bf16.msra.mxu0 %v7590_v17  ;;  %7847 = vmatpush1.bf16.msra.mxu1 %v7846_v18  ;;  %v2638_v17 = vld [vmem:[#allocation23 + $0xac0] sm:$0xff]  ;;  %v7876_v11 = vpack.c.bf16 %v2669_v15, %v2665_v4  ;;  %v2687_v57 = vld [vmem:[#allocation23 + $0xc48] sm:$0xff] }
 0x5bf   : > { %7593 = vmatprep.subr.bf16.mxu0 %v7592_v23  ;;  %7849 = vmatprep.subr.bf16.mxu1 %v7848_v24  ;;  %v2642_v18 = vld [vmem:[#allocation23 + $0xae0] sm:$0xff]  ;;  %v2640_v23 = vld [vmem:[#allocation23 + $0xad0] sm:$0xff] }
 0x5c0   : > { %v2644_v24 = vld [vmem:[#allocation23 + $0xaf0] sm:$0xff] }
 0x5c2   : > { %7595 = vmatpush1.bf16.msra.mxu0 %v7594_v32  ;;  %7851 = vmatpush1.bf16.msra.mxu1 %v7850_v26  ;;  %v7610_v32 = vpack.c.bf16 %v2642_v18, %v2638_v17  ;;  %v7866_v26 = vpack.c.bf16 %v2644_v24, %v2640_v23  ;;  %v2673_v18 = vld [vmem:[#allocation23 + $0xbd8] sm:$0xff]  ;;  %v2670_v24 = vld [vmem:[#allocation23 + $0xbc0] sm:$0xff] }
 0x5c3   : > { %7597 = vmatprep.subr.bf16.mxu0 %v7596_v35  ;;  %7853 = vmatprep.subr.bf16.mxu1 %v7852_v38  ;;  %v7612_v35 = vpack.c.bf16 %v2651_v27, %v2647_v25  ;;  %v7868_v38 = vpack.c.bf16 %v2653_v29, %v2649_v28  ;;  %v2674_v25 = vld [vmem:[#allocation23 + $0xbe0] sm:$0xff]  ;;  %v11829_v27 = vld [vmem:[#allocation8] sm:$0xff] }
 0x5c4   : > { %v2215_v28 = vrot.slane %v11829_v27, %v11816_v30  ;;  %v2227_v41 = vrot.slane %v11829_v27, %v11819_v31  ;;  %v7626_v46 = vpack.c.bf16 %v2674_v25, %v2670_v24  ;;  %v2696_v25 = vld [vmem:[#allocation23 + $0xc90] sm:$0xff] }
 0x5c6   : > { %7599 = vmatpush1.bf16.msra.mxu0 %v7598_v5  ;;  %7855 = vmatpush1.bf16.msra.mxu1 %v7854_v47  ;;  %v2657_v5 = vld [vmem:[#allocation23 + $0xb58] sm:$0xff] }
 0x5c7   : > { %7601 = vmatprep.subr.bf16.mxu0 %v7600_v50  ;;  %7857 = vmatprep.subr.bf16.mxu1 %v7856_v51  ;;  %v2661_v47 = vld [vmem:[#allocation23 + $0xb78] sm:$0xff]  ;;  %v7870_v50 = vpack.c.bf16 %v2652_v40, %v2648_v39  ;;  %v2654_v51 = vld [vmem:[#allocation23 + $0xb40] sm:$0xff] }
 0x5c8   : > { %v7872_v55 = vpack.c.bf16 %v2661_v47, %v2657_v5  ;;  %v2681_v39 = vld [vmem:[#allocation23 + $0xc18] sm:$0xff]  ;;  %v11836_v47 = vld [vmem:[#allocation10] sm:$0xff] }
 0x5c9   : > { %v2685_v40 = vld [vmem:[#allocation23 + $0xc38] sm:$0xff]  ;;  %v2277_v15 = vrot.slane %v11836_v47, %v11819_v31 }
 0x5ca   : > { %7603 = vmatpush1.bf16.msra.mxu0 %v7602_v60  ;;  %7859 = vmatpush1.bf16.msra.mxu1 %v7858_v2  ;;  %v2095_v60 = vadd.f32 %v11766_v36, %v1861_v45  ;;  %v2667_v2 = vld [vmem:[#allocation23 + $0xba8] sm:$0xff] }
 0x5cb   : > { %7605 = vmatprep.subr.bf16.mxu0 %v7604_v12  ;;  %7861 = vmatprep.subr.bf16.mxu1 %v7860_v21  ;;  %v2168_v12 = vadd.f32 %v11796_v6, %v1873_v48  ;;  %v7618_v21 = vpack.c.bf16 %v2658_v52, %v2654_v51  ;;  %v7620_v10 = vpack.c.bf16 %v2667_v2, %v2663_v59  ;;  %v2675_v36 = vld [vmem:[#allocation23 + $0xbe8] sm:$0xff]  ;;  %v2693_v2 = vld [vmem:[#allocation23 + $0xc78] sm:$0xff] }
 0x5cc   : > { %v2182_v17 = vmul.f32 0.1, %v2095_v60  ;;  %vm2174_vm6 = vcmp.ge.f32.partialorder %v2095_v60, 0.0  ;;  %v7622_v6 = vpack.c.bf16 %v2666_v9, %v2662_v43  ;;  %v2265_v48 = vrot.slane %v11836_v47, %v11816_v30  ;;  %v2691_v59 = vld [vmem:[#allocation23 + $0xc68] sm:$0xff] }
 0x5cd   : > { %vm2177_vm7 = vcmp.ge.f32.partialorder %v2168_v12, 0.0  ;;  %v7632_v9 = vpack.c.bf16 %v2691_v59, %v2687_v57  ;;  %v2712_v59 = vld [vmem:[#allocation23 + $0xd10] sm:$0xff] }
 0x5ce   : > { %7607 = vmatpush1.bf16.msra.mxu0 %v7606_v14  ;;  %7863 = vmatpush1.bf16.msra.mxu1 %v7862_v16  ;;  %v2668_v14 = vld [vmem:[#allocation23 + $0xbb0] sm:$0xff]  ;;  %v2671_v16 = vld [vmem:[#allocation23 + $0xbc8] sm:$0xff] }
 0x5cf   : > { %7609 = vmatprep.subr.bf16.mxu0 %v7608_v19  ;;  %7865 = vmatprep.subr.bf16.mxu1 %v7864_v22  ;;  %v2677_v19 = vld [vmem:[#allocation23 + $0xbf8] sm:$0xff]  ;;  %v2185_v22 = vmul.f32 0.1, %v2168_v12  ;;  %v7878_v23 = vpack.c.bf16 %v2668_v14, %v2664_v13  ;;  %v7624_v29 = vpack.c.bf16 %v2675_v36, %v2671_v16  ;;  %v2692_v13 = vld [vmem:[#allocation23 + $0xc70] sm:$0xff]  ;;  %v2695_v14 = vld [vmem:[#allocation23 + $0xc88] sm:$0xff] }
 0x5d0   : > { %v2699_v16 = vld [vmem:[#allocation23 + $0xca8] sm:$0xff]  ;;  %v2701_v36 = vld [vmem:[#allocation23 + $0xcb8] sm:$0xff] }
 0x5d1   : > { %v2193_v45 = vsel %vm2177_vm7, %v2168_v12, %v2185_v22  ;;  %v2694_v22 = vld [vmem:[#allocation23 + $0xc80] sm:$0xff] }
 0x5d2   : > { %7611 = vmatpush1.bf16.msra.mxu0 %v7610_v32  ;;  %7867 = vmatpush1.bf16.msra.mxu1 %v7866_v26  ;;  %v7880_v32 = vpack.c.bf16 %v2677_v19, %v2673_v18  ;;  %v2672_v26 = vld [vmem:[#allocation23 + $0xbd0] sm:$0xff]  ;;  %v2243_v4 = vmul.f32 %v2227_v41, %v2193_v45 }
 0x5d3   : > { %7613 = vmatprep.subr.bf16.mxu0 %v7612_v35  ;;  %7869 = vmatprep.subr.bf16.mxu1 %v7868_v38  ;;  %v2190_v35 = vsel %vm2174_vm6, %v2095_v60, %v2182_v17  ;;  %v2683_v38 = vld [vmem:[#allocation23 + $0xc28] sm:$0xff]  ;;  %v7882_v5 = vpack.c.bf16 %v2676_v33, %v2672_v26  ;;  %v2689_v60 = vld [vmem:[#allocation23 + $0xc58] sm:$0xff]  ;;  %v2704_v45 = vld [vmem:[#allocation23 + $0xcd0] sm:$0xff]  ;;  %vm10799_vm6 = vmmov 0  }
 0x5d4   : > { %v2240_v51 = vmul.f32 %v2215_v28, %v2190_v35  ;;  %v7628_v52 = vpack.c.bf16 %v2683_v38, %v2679_v34  ;;  %v2697_v17 = vld [vmem:[#allocation23 + $0xc98] sm:$0xff]  ;;  %v11844_v18 = vadd.f32 %v2277_v15, %v2243_v4  ;;  %v2700_v28 = vld [vmem:[#allocation23 + $0xcb0] sm:$0xff]  ;;  %v2702_v38 = vld [vmem:[#allocation23 + $0xcc0] sm:$0xff] }
 0x5d5   : > { %v7892_v24 = vpack.c.bf16 %v2701_v36, %v2697_v17  ;;  %v2705_v26 = vld [vmem:[#allocation23 + $0xcd8] sm:$0xff]  ;;  %v7894_v35 = vpack.c.bf16 %v2700_v28, %v2696_v25  ;;  %v2723_v4 = vld [vmem:[#allocation23 + $0xd68] sm:$0xff]  ;;  %v2728_v28 = vld [vmem:[#allocation23 + $0xd90] sm:$0xff] }
 0x5d6   : > { %7615 = vmatpush1.bf16.msra.mxu0 %v7614_v49  ;;  %7871 = vmatpush1.bf16.msra.mxu1 %v7870_v50  ;;  %v2678_v49 = vld [vmem:[#allocation23 + $0xc00] sm:$0xff]  ;;  %v11842_v43 = vadd.f32 %v2265_v48, %v2240_v51  ;;  %v2709_v33 = vld [vmem:[#allocation23 + $0xcf8] sm:$0xff]  ;;  %v2715_v48 = vld [vmem:[#allocation23 + $0xd28] sm:$0xff] }
 0x5d7   : > { %7617 = vmatprep.subr.bf16.mxu0 %v7616_v63  ;;  %7873 = vmatprep.subr.bf16.mxu1 %v7872_v55  ;;  %v2682_v50 = vld [vmem:[#allocation23 + $0xc20] sm:$0xff]  ;;  %v7884_v63 = vpack.c.bf16 %v2685_v40, %v2681_v39  ;;  %v2680_v55 = vld [vmem:[#allocation23 + $0xc10] sm:$0xff]  ;;  %v7896_v41 = vpack.c.bf16 %v2709_v33, %v2705_v26  ;;  %v2721_v15 = vld [vmem:[#allocation23 + $0xd58] sm:$0xff] }
 0x5d8   : > { %v7630_v30 = vpack.c.bf16 %v2682_v50, %v2678_v49  ;;  %v7886_v12 = vpack.c.bf16 %v2684_v56, %v2680_v55  ;;  %v2706_v39 = vld [vmem:[#allocation23 + $0xce0] sm:$0xff]  ;;  %v2713_v49 = vld [vmem:[#allocation23 + $0xd18] sm:$0xff]  ;;  %v2731_v17 = vld [vmem:[#allocation23 + $0xda8] sm:$0xff] }
 0x5d9   : > { %v2717_v50 = vld [vmem:[#allocation23 + $0xd38] sm:$0xff]  ;;  %v7642_v51 = vpack.c.bf16 %v2706_v39, %v2702_v38  ;;  %v2714_v55 = vld [vmem:[#allocation23 + $0xd20] sm:$0xff]  ;;  %v2739_v26 = vld [vmem:[#allocation23 + $0xde8] sm:$0xff] }
 0x5da   : > { %7619 = vmatpush1.bf16.msra.mxu0 %v7618_v21  ;;  %7875 = vmatpush1.bf16.msra.mxu1 %v7874_v8  ;;  %v2686_v21 = vld [vmem:[#allocation23 + $0xc40] sm:$0xff]  ;;  %v7900_v57 = vpack.c.bf16 %v2717_v50, %v2713_v49  ;;  %v2729_v36 = vld [vmem:[#allocation23 + $0xd98] sm:$0xff]  ;;  %v2747_v49 = vld [vmem:[#allocation23 + $0xe28] sm:$0xff] }
 0x5db   : > { %7621 = vmatprep.subr.bf16.mxu0 %v7620_v10  ;;  %7877 = vmatprep.subr.bf16.mxu1 %v7876_v11  ;;  %v2690_v8 = vld [vmem:[#allocation23 + $0xc60] sm:$0xff]  ;;  %v7888_v10 = vpack.c.bf16 %v2693_v2, %v2689_v60  ;;  %v2688_v11 = vld [vmem:[#allocation23 + $0xc50] sm:$0xff]  ;;  %v2719_v2 = vld [vmem:[#allocation23 + $0xd48] sm:$0xff] }
 0x5dc   : > { %v7634_v31 = vpack.c.bf16 %v2690_v8, %v2686_v21  ;;  %v7890_v19 = vpack.c.bf16 %v2692_v13, %v2688_v11  ;;  %v2716_v60 = vld [vmem:[#allocation23 + $0xd30] sm:$0xff]  ;;  %v2718_v8 = vld [vmem:[#allocation23 + $0xd40] sm:$0xff]  ;;  %v2737_v33 = vld [vmem:[#allocation23 + $0xdd8] sm:$0xff] }
 0x5dd   : > { %v7902_v21 = vpack.c.bf16 %v2716_v60, %v2712_v59  ;;  %v2720_v13 = vld [vmem:[#allocation23 + $0xd50] sm:$0xff]  ;;  %v2734_v39 = vld [vmem:[#allocation23 + $0xdc0] sm:$0xff]  ;;  %v2745_v50 = vld [vmem:[#allocation23 + $0xe18] sm:$0xff] }
 0x5de   : > { %7623 = vmatpush1.bf16.msra.mxu0 %v7622_v6  ;;  %7879 = vmatpush1.bf16.msra.mxu1 %v7878_v23  ;;  %v2698_v6 = vld [vmem:[#allocation23 + $0xca0] sm:$0xff]  ;;  %v7636_v23 = vpack.c.bf16 %v2699_v16, %v2695_v14  ;;  %v2724_v14 = vld [vmem:[#allocation23 + $0xd70] sm:$0xff]  ;;  %v2727_v16 = vld [vmem:[#allocation23 + $0xd88] sm:$0xff] }
 0x5df   : > { %7625 = vmatprep.subr.bf16.mxu0 %v7624_v29  ;;  %7881 = vmatprep.subr.bf16.mxu1 %v7880_v32  ;;  %v2703_v29 = vld [vmem:[#allocation23 + $0xcc8] sm:$0xff]  ;;  %v7638_v34 = vpack.c.bf16 %v2698_v6, %v2694_v22  ;;  %v7906_v22 = vpack.c.bf16 %v2724_v14, %v2720_v13  ;;  %v2726_v6 = vld [vmem:[#allocation23 + $0xd80] sm:$0xff]  ;;  %v2744_v60 = vld [vmem:[#allocation23 + $0xe10] sm:$0xff] }
 0x5e0   : > { %v2707_v32 = vld [vmem:[#allocation23 + $0xce8] sm:$0xff]  ;;  %v2752_v14 = vld [vmem:[#allocation23 + $0xe50] sm:$0xff] }
 0x5e1   : > { %v7640_v40 = vpack.c.bf16 %v2707_v32, %v2703_v29  ;;  %v2732_v29 = vld [vmem:[#allocation23 + $0xdb0] sm:$0xff]  ;;  %v2735_v32 = vld [vmem:[#allocation23 + $0xdc8] sm:$0xff] }
 0x5e2   : > { %7627 = vmatpush1.bf16.msra.mxu0 %v7626_v46  ;;  %7883 = vmatpush1.bf16.msra.mxu1 %v7882_v5  ;;  %v2708_v46 = vld [vmem:[#allocation23 + $0xcf0] sm:$0xff]  ;;  %v2711_v5 = vld [vmem:[#allocation23 + $0xd08] sm:$0xff]  ;;  %v7910_v38 = vpack.c.bf16 %v2732_v29, %v2728_v28 }
 0x5e3   : > { %7629 = vmatprep.subr.bf16.mxu0 %v7628_v52  ;;  %7885 = vmatprep.subr.bf16.mxu1 %v7884_v63  ;;  %v7898_v52 = vpack.c.bf16 %v2708_v46, %v2704_v45  ;;  %v2710_v63 = vld [vmem:[#allocation23 + $0xd00] sm:$0xff]  ;;  %v7644_v56 = vpack.c.bf16 %v2715_v48, %v2711_v5  ;;  %v2736_v46 = vld [vmem:[#allocation23 + $0xdd0] sm:$0xff]  ;;  %v2743_v48 = vld [vmem:[#allocation23 + $0xe08] sm:$0xff] }
 0x5e4   : > { %v2740_v5 = vld [vmem:[#allocation23 + $0xdf0] sm:$0xff] }
 0x5e5   : > { %3035 = vmatmul.mubr.f32.vlgmr.msra.gmra.mrb[4].mxu0 %v11842_v43  ;;  %3319 = vmatmul.mubr.f32.vlgmr.msra.gmra.mrb[4].mxu1 %v11842_v43  ;;  %v2760_v29 = vld [vmem:[#allocation23 + $0xe90] sm:$0xff] }
 0x5e6   : > { %7631 = vmatpush1.bf16.msra.mxu0 %v7630_v30  ;;  %7887 = vmatpush1.bf16.msra.mxu1 %v7886_v12  ;;  %v2725_v30 = vld [vmem:[#allocation23 + $0xd78] sm:$0xff]  ;;  %v7646_v12 = vpack.c.bf16 %v2714_v55, %v2710_v63  ;;  %v7914_v63 = vpack.c.bf16 %v2740_v5, %v2736_v46  ;;  %v2742_v55 = vld [vmem:[#allocation23 + $0xe00] sm:$0xff]  ;;  %v2768_v5 = vld [vmem:[#allocation23 + $0xed0] sm:$0xff] }
 0x5e7   : > { %7633 = vmatprep.subr.bf16.mxu0 %v7632_v9  ;;  %7889 = vmatprep.subr.bf16.mxu1 %v7888_v10  ;;  %v2722_v9 = vld [vmem:[#allocation23 + $0xd60] sm:$0xff]  ;;  %v7648_v10 = vpack.c.bf16 %v2723_v4, %v2719_v2  ;;  %v7904_v11 = vpack.c.bf16 %v2725_v30, %v2721_v15  ;;  %v2748_v2 = vld [vmem:[#allocation23 + $0xe30] sm:$0xff]  ;;  %v2751_v4 = vld [vmem:[#allocation23 + $0xe48] sm:$0xff] }
 0x5e8   : > { %3105 = vmatprep.mubr.f32.mxu0 %v11844_v18  ;;  %3389 = vmatprep.mubr.f32.mxu1 %v11844_v18  ;;  %v2755_v15 = vld [vmem:[#allocation23 + $0xe68] sm:$0xff]  ;;  %v2753_v30 = vld [vmem:[#allocation23 + $0xe58] sm:$0xff] }
 0x5ea   : > { %7635 = vmatpush1.bf16.msra.mxu0 %v7634_v31  ;;  %7891 = vmatpush1.bf16.msra.mxu1 %v7890_v19  ;;  %v2733_v31 = vld [vmem:[#allocation23 + $0xdb8] sm:$0xff]  ;;  %v7650_v19 = vpack.c.bf16 %v2722_v9, %v2718_v8  ;;  %v7918_v8 = vpack.c.bf16 %v2748_v2, %v2744_v60  ;;  %v2750_v9 = vld [vmem:[#allocation23 + $0xe40] sm:$0xff] }
 0x5eb   : > { %7637 = vmatprep.subr.bf16.mxu0 %v7636_v23  ;;  %7893 = vmatprep.subr.bf16.mxu1 %v7892_v24  ;;  %v2730_v23 = vld [vmem:[#allocation23 + $0xda0] sm:$0xff]  ;;  %v7652_v24 = vpack.c.bf16 %v2731_v17, %v2727_v16  ;;  %v7908_v25 = vpack.c.bf16 %v2733_v31, %v2729_v36  ;;  %v2756_v16 = vld [vmem:[#allocation23 + $0xe70] sm:$0xff]  ;;  %v2759_v17 = vld [vmem:[#allocation23 + $0xe88] sm:$0xff] }
 0x5ec   : > { %v2763_v36 = vld [vmem:[#allocation23 + $0xea8] sm:$0xff]  ;;  %v2761_v31 = vld [vmem:[#allocation23 + $0xe98] sm:$0xff] }
 0x5ee   : > { %7639 = vmatpush1.bf16.msra.mxu0 %v7638_v34  ;;  %7895 = vmatpush1.bf16.msra.mxu1 %v7894_v35  ;;  %v2741_v34 = vld [vmem:[#allocation23 + $0xdf8] sm:$0xff]  ;;  %v7654_v35 = vpack.c.bf16 %v2730_v23, %v2726_v6  ;;  %v7922_v6 = vpack.c.bf16 %v2756_v16, %v2752_v14  ;;  %v2758_v23 = vld [vmem:[#allocation23 + $0xe80] sm:$0xff] }
 0x5ef   : > { %7641 = vmatprep.subr.bf16.mxu0 %v7640_v40  ;;  %7897 = vmatprep.subr.bf16.mxu1 %v7896_v41  ;;  %v2738_v40 = vld [vmem:[#allocation23 + $0xde0] sm:$0xff]  ;;  %v7656_v41 = vpack.c.bf16 %v2739_v26, %v2735_v32  ;;  %v7912_v45 = vpack.c.bf16 %v2741_v34, %v2737_v33  ;;  %v2764_v32 = vld [vmem:[#allocation23 + $0xeb0] sm:$0xff]  ;;  %v2767_v26 = vld [vmem:[#allocation23 + $0xec8] sm:$0xff] }
 0x5f0   : > { %v2771_v33 = vld [vmem:[#allocation23 + $0xee8] sm:$0xff]  ;;  %v2769_v34 = vld [vmem:[#allocation23 + $0xed8] sm:$0xff] }
 0x5f2   : > { %7643 = vmatpush1.bf16.msra.mxu0 %v7642_v51  ;;  %7899 = vmatpush1.bf16.msra.mxu1 %v7898_v52  ;;  %v2749_v51 = vld [vmem:[#allocation23 + $0xe38] sm:$0xff]  ;;  %v7658_v52 = vpack.c.bf16 %v2738_v40, %v2734_v39  ;;  %v7926_v39 = vpack.c.bf16 %v2764_v32, %v2760_v29  ;;  %v2766_v40 = vld [vmem:[#allocation23 + $0xec0] sm:$0xff] }
 0x5f3   : > { %7645 = vmatprep.subr.bf16.mxu0 %v7644_v56  ;;  %7901 = vmatprep.subr.bf16.mxu1 %v7900_v57  ;;  %v2746_v56 = vld [vmem:[#allocation23 + $0xe20] sm:$0xff]  ;;  %v7660_v57 = vpack.c.bf16 %v2747_v49, %v2743_v48  ;;  %v7916_v59 = vpack.c.bf16 %v2749_v51, %v2745_v50  ;;  %v2772_v48 = vld [vmem:[#allocation23 + $0xef0] sm:$0xff]  ;;  %v2775_v49 = vld [vmem:[#allocation23 + $0xf08] sm:$0xff]  ;;  %v11851_v50 = vsub.s32 6, %v11729_v61 }
 0x5f4   : > { %v2779_v51 = vld [vmem:[#allocation23 + $0xf28] sm:$0xff] }
 0x5f5   : > { %v7676_v60 = vpack.c.bf16 %v2779_v51, %v2775_v49  ;;  %v2783_v61 = vld [vmem:[#allocation23 + $0xf48] sm:$0xff] }
 0x5f6   : > { %7647 = vmatpush1.bf16.msra.mxu0 %v7646_v12  ;;  %7903 = vmatpush1.bf16.msra.mxu1 %v7902_v21  ;;  %v2757_v12 = vld [vmem:[#allocation23 + $0xe78] sm:$0xff]  ;;  %v7662_v21 = vpack.c.bf16 %v2746_v56, %v2742_v55  ;;  %v7930_v56 = vpack.c.bf16 %v2772_v48, %v2768_v5  ;;  %v2802_v5 = vld [vmem:[#allocation23 + $0xfe0] sm:$0xff] }
 0x5f7   : > { %7649 = vmatprep.subr.bf16.mxu0 %v7648_v10  ;;  %7905 = vmatprep.subr.bf16.mxu1 %v7904_v11  ;;  %v2754_v10 = vld [vmem:[#allocation23 + $0xe60] sm:$0xff]  ;;  %v7664_v11 = vpack.c.bf16 %v2755_v15, %v2751_v4  ;;  %v7920_v13 = vpack.c.bf16 %v2757_v12, %v2753_v30  ;;  %v2776_v4 = vld [vmem:[#allocation23 + $0xf10] sm:$0xff]  ;;  %v1869_v30 = vrot.slane %v11821_v42, %v11851_v50  ;;  %v2787_v12 = vld [vmem:[#allocation23 + $0xf68] sm:$0xff] }
 0x5f8   : > { %v2780_v15 = vld [vmem:[#allocation23 + $0xf30] sm:$0xff]  ;;  %v7680_v16 = vpack.c.bf16 %v2787_v12, %v2783_v61  ;;  %v2795_v42 = vld [vmem:[#allocation23 + $0xfa8] sm:$0xff] }
 0x5f9   : > { %v2166_v14 = vadd.f32 %v11794_v58, %v1869_v30  ;;  %v2792_v58 = vld [vmem:[#allocation23 + $0xf90] sm:$0xff]  ;;  %v3396_v61 = vld [vmem:[#allocation11] sm:$0xff] }
 0x5fa   : > { %7651 = vmatpush1.bf16.msra.mxu0 %v7650_v19  ;;  %7907 = vmatpush1.bf16.msra.mxu1 %v7906_v22  ;;  %v2765_v19 = vld [vmem:[#allocation23 + $0xeb8] sm:$0xff]  ;;  %v7666_v22 = vpack.c.bf16 %v2754_v10, %v2750_v9  ;;  %v7934_v10 = vpack.c.bf16 %v2780_v15, %v2776_v4  ;;  %v2273_v4 = vrot.slane %v11836_v47, %v11851_v50  ;;  %v3400_v12 = vld [vmem:[#allocation11 + $0x20] sm:$0xff] }
 0x5fb   : > { %7653 = vmatprep.subr.bf16.mxu0 %v7652_v24  ;;  %7909 = vmatprep.subr.bf16.mxu1 %v7908_v25  ;;  %v2762_v24 = vld [vmem:[#allocation23 + $0xea0] sm:$0xff]  ;;  %v7668_v25 = vpack.c.bf16 %v2763_v36, %v2759_v17  ;;  %v7924_v28 = vpack.c.bf16 %v2765_v19, %v2761_v31  ;;  %v2784_v36 = vld [vmem:[#allocation23 + $0xf50] sm:$0xff]  ;;  %v2791_v19 = vld [vmem:[#allocation23 + $0xf88] sm:$0xff]  ;;  %v2184_v29 = vmul.f32 0.1, %v2166_v14  ;;  %vm2176_vm8 = vcmp.ge.f32.partialorder %v2166_v14, 0.0 }
 0x5fc   : > { %v2788_v31 = vld [vmem:[#allocation23 + $0xf70] sm:$0xff]  ;;  %v7684_v32 = vpack.c.bf16 %v2795_v42, %v2791_v19  ;;  %v3408_v47 = vld [vmem:[#allocation11 + $0x60] sm:$0xff]  ;;  %v3410_v42 = vld [vmem:[#allocation11 + $0x70] sm:$0xff] }
 0x5fd   : > { %v2192_v48 = vsel %vm2176_vm8, %v2166_v14, %v2184_v29  ;;  %v7950_v14 = vpack.c.bf16 %v3400_v12, %v3396_v61  ;;  %v3437_v61 = vld [vmem:[#allocation11 + $0x148] sm:$0xff] }
 0x5fe   : > { %7655 = vmatpush1.bf16.msra.mxu0 %v7654_v35  ;;  %7911 = vmatpush1.bf16.msra.mxu1 %v7910_v38  ;;  %v2773_v35 = vld [vmem:[#allocation23 + $0xef8] sm:$0xff]  ;;  %v7670_v38 = vpack.c.bf16 %v2762_v24, %v2758_v23  ;;  %v7938_v24 = vpack.c.bf16 %v2788_v31, %v2784_v36  ;;  %v3404_v36 = vld [vmem:[#allocation11 + $0x40] sm:$0xff]  ;;  %v3441_v12 = vld [vmem:[#allocation11 + $0x168] sm:$0xff] }
 0x5ff   : > { %7657 = vmatprep.subr.bf16.mxu0 %v7656_v41  ;;  %7913 = vmatprep.subr.bf16.mxu1 %v7912_v45  ;;  %v2770_v41 = vld [vmem:[#allocation23 + $0xee0] sm:$0xff]  ;;  %v7672_v45 = vpack.c.bf16 %v2771_v33, %v2767_v26  ;;  %v7928_v46 = vpack.c.bf16 %v2773_v35, %v2769_v34  ;;  %v2796_v33 = vld [vmem:[#allocation23 + $0xfb0] sm:$0xff]  ;;  %v2799_v34 = vld [vmem:[#allocation23 + $0xfc8] sm:$0xff] }
 0x600   : > { %v7674_v55 = vpack.c.bf16 %v2770_v41, %v2766_v40  ;;  %v2803_v35 = vld [vmem:[#allocation23 + $0xfe8] sm:$0xff]  ;;  %v2223_v40 = vrot.slane %v11829_v27, %v11851_v50  ;;  %v3406_v50 = vld [vmem:[#allocation11 + $0x50] sm:$0xff] }
 0x601   : > { %v7688_v49 = vpack.c.bf16 %v2803_v35, %v2799_v34  ;;  %v3418_v34 = vld [vmem:[#allocation11 + $0xb0] sm:$0xff]  ;;  %v3421_v35 = vld [vmem:[#allocation11 + $0xc8] sm:$0xff] }
 0x602   : > { %7659 = vmatpush1.bf16.msra.mxu0 %v7658_v52  ;;  %7915 = vmatpush1.bf16.msra.mxu1 %v7914_v63  ;;  %v2777_v52 = vld [vmem:[#allocation23 + $0xf18] sm:$0xff] }
 0x603   : > { %7661 = vmatprep.subr.bf16.mxu0 %v7660_v57  ;;  %7917 = vmatprep.subr.bf16.mxu1 %v7916_v59  ;;  %v2781_v63 = vld [vmem:[#allocation23 + $0xf38] sm:$0xff]  ;;  %v2774_v57 = vld [vmem:[#allocation23 + $0xf00] sm:$0xff] }
 0x604   : > { %v2778_v59 = vld [vmem:[#allocation23 + $0xf20] sm:$0xff]  ;;  %v7932_v2 = vpack.c.bf16 %v2781_v63, %v2777_v52  ;;  %v2800_v52 = vld [vmem:[#allocation23 + $0xfd0] sm:$0xff] }
 0x605   : > { %v7678_v9 = vpack.c.bf16 %v2778_v59, %v2774_v57  ;;  %v2804_v63 = vld [vmem:[#allocation23 + $0xff0] sm:$0xff]  ;;  %v3399_v57 = vld [vmem:[#allocation11 + $0x18] sm:$0xff] }
 0x606   : > { %7663 = vmatpush1.bf16.msra.mxu0 %v7662_v21  ;;  %7919 = vmatpush1.bf16.msra.mxu1 %v7918_v8  ;;  %v2785_v21 = vld [vmem:[#allocation23 + $0xf58] sm:$0xff]  ;;  %v3403_v59 = vld [vmem:[#allocation11 + $0x38] sm:$0xff] }
 0x607   : > { %7665 = vmatprep.subr.bf16.mxu0 %v7664_v11  ;;  %7921 = vmatprep.subr.bf16.mxu1 %v7920_v13  ;;  %v2789_v8 = vld [vmem:[#allocation23 + $0xf78] sm:$0xff]  ;;  %v2782_v11 = vld [vmem:[#allocation23 + $0xf40] sm:$0xff]  ;;  %v8204_v30 = vpack.c.bf16 %v3403_v59, %v3399_v57 }
 0x608   : > { %v2786_v13 = vld [vmem:[#allocation23 + $0xf60] sm:$0xff]  ;;  %v7936_v17 = vpack.c.bf16 %v2789_v8, %v2785_v21  ;;  %v3398_v21 = vld [vmem:[#allocation11 + $0x10] sm:$0xff] }
 0x609   : > { %v7682_v23 = vpack.c.bf16 %v2786_v13, %v2782_v11  ;;  %v3402_v8 = vld [vmem:[#allocation11 + $0x30] sm:$0xff]  ;;  %v3407_v11 = vld [vmem:[#allocation11 + $0x58] sm:$0xff] }
 0x60a   : > { %7667 = vmatpush1.bf16.msra.mxu0 %v7666_v22  ;;  %7923 = vmatpush1.bf16.msra.mxu1 %v7922_v6  ;;  %v2793_v22 = vld [vmem:[#allocation23 + $0xf98] sm:$0xff]  ;;  %v3411_v13 = vld [vmem:[#allocation11 + $0x78] sm:$0xff] }
 0x60b   : > { %7669 = vmatprep.subr.bf16.mxu0 %v7668_v25  ;;  %7925 = vmatprep.subr.bf16.mxu1 %v7924_v28  ;;  %v2797_v6 = vld [vmem:[#allocation23 + $0xfb8] sm:$0xff]  ;;  %v2790_v25 = vld [vmem:[#allocation23 + $0xf80] sm:$0xff]  ;;  %v8208_v19 = vpack.c.bf16 %v3411_v13, %v3407_v11  ;;  %v7968_v11 = vpack.c.bf16 %v3441_v12, %v3437_v61  ;;  %v3436_v13 = vld [vmem:[#allocation11 + $0x140] sm:$0xff] }
 0x60c   : > { %v2794_v28 = vld [vmem:[#allocation23 + $0xfa0] sm:$0xff]  ;;  %v7940_v26 = vpack.c.bf16 %v2797_v6, %v2793_v22  ;;  %v3413_v22 = vld [vmem:[#allocation11 + $0x88] sm:$0xff] }
 0x60d   : > { %v7686_v41 = vpack.c.bf16 %v2794_v28, %v2790_v25  ;;  %v3417_v6 = vld [vmem:[#allocation11 + $0xa8] sm:$0xff]  ;;  %v7954_v25 = vpack.c.bf16 %v3408_v47, %v3404_v36  ;;  %v8210_v28 = vpack.c.bf16 %v3410_v42, %v3406_v50  ;;  %v3442_v47 = vld [vmem:[#allocation11 + $0x170] sm:$0xff]  ;;  %v3451_v42 = vld [vmem:[#allocation11 + $0x1b8] sm:$0xff] }
 0x60e   : > { %7671 = vmatpush1.bf16.msra.mxu0 %v7670_v38  ;;  %7927 = vmatpush1.bf16.msra.mxu1 %v7926_v39  ;;  %v2801_v38 = vld [vmem:[#allocation23 + $0xfd8] sm:$0xff]  ;;  %v7956_v29 = vpack.c.bf16 %v3417_v6, %v3413_v22  ;;  %v3445_v50 = vld [vmem:[#allocation11 + $0x188] sm:$0xff] }
 0x60f   : > { %7673 = vmatprep.subr.bf16.mxu0 %v7672_v45  ;;  %7929 = vmatprep.subr.bf16.mxu1 %v7928_v46  ;;  %v2805_v39 = vld [vmem:[#allocation23 + $0xff8] sm:$0xff]  ;;  %v7942_v45 = vpack.c.bf16 %v2796_v33, %v2792_v58  ;;  %v2798_v46 = vld [vmem:[#allocation23 + $0xfc0] sm:$0xff] }
 0x610   : > { %v7944_v51 = vpack.c.bf16 %v2805_v39, %v2801_v38  ;;  %v7690_v27 = vpack.c.bf16 %v2802_v5, %v2798_v46  ;;  %v3414_v58 = vld [vmem:[#allocation11 + $0x90] sm:$0xff]  ;;  %v3425_v38 = vld [vmem:[#allocation11 + $0xe8] sm:$0xff]  ;;  %v3423_v39 = vld [vmem:[#allocation11 + $0xd8] sm:$0xff] }
 0x611   : > { %v7960_v46 = vpack.c.bf16 %v3425_v38, %v3421_v35  ;;  %v3424_v5 = vld [vmem:[#allocation11 + $0xe0] sm:$0xff] }
 0x612   : > { %7675 = vmatpush1.bf16.msra.mxu0 %v7674_v55  ;;  %7931 = vmatpush1.bf16.msra.mxu1 %v7930_v56  ;;  %v3397_v55 = vld [vmem:[#allocation11 + $0x8] sm:$0xff] }
 0x613   : > { %7677 = vmatprep.subr.bf16.mxu0 %v7676_v60  ;;  %7933 = vmatprep.subr.bf16.mxu1 %v7932_v2  ;;  %v3401_v56 = vld [vmem:[#allocation11 + $0x28] sm:$0xff]  ;;  %v2242_v60 = vmul.f32 %v2223_v40, %v2192_v48  ;;  %v7946_v2 = vpack.c.bf16 %v2804_v63, %v2800_v52  ;;  %v3427_v40 = vld [vmem:[#allocation11 + $0xf8] sm:$0xff]  ;;  %v3422_v48 = vld [vmem:[#allocation11 + $0xd0] sm:$0xff] }
 0x614   : > { %v7948_v15 = vpack.c.bf16 %v3401_v56, %v3397_v55  ;;  %v3429_v52 = vld [vmem:[#allocation11 + $0x108] sm:$0xff]  ;;  %v3431_v55 = vld [vmem:[#allocation11 + $0x118] sm:$0xff] }
 0x615   : > { %v3433_v63 = vld [vmem:[#allocation11 + $0x128] sm:$0xff]  ;;  %v3435_v56 = vld [vmem:[#allocation11 + $0x138] sm:$0xff] }
 0x616   : > { %7679 = vmatpush1.bf16.msra.mxu0 %v7678_v9  ;;  %7935 = vmatpush1.bf16.msra.mxu1 %v7934_v10  ;;  %v3405_v9 = vld [vmem:[#allocation11 + $0x48] sm:$0xff] }
 0x617   : > { %7681 = vmatprep.subr.bf16.mxu0 %v7680_v16  ;;  %7937 = vmatprep.subr.bf16.mxu1 %v7936_v17  ;;  %v3409_v10 = vld [vmem:[#allocation11 + $0x68] sm:$0xff]  ;;  %v11860_v16 = vadd.f32 %v2273_v4, %v2242_v60  ;;  %v8206_v17 = vpack.c.bf16 %v3402_v8, %v3398_v21  ;;  %v7964_v60 = vpack.c.bf16 %v3433_v63, %v3429_v52  ;;  %v3430_v4 = vld [vmem:[#allocation11 + $0x110] sm:$0xff]  ;;  %v3439_v21 = vld [vmem:[#allocation11 + $0x158] sm:$0xff] }
 0x618   : > { %v7952_v31 = vpack.c.bf16 %v3409_v10, %v3405_v9  ;;  %v3443_v8 = vld [vmem:[#allocation11 + $0x178] sm:$0xff] }
 0x619   : > { %v8224_v36 = vpack.c.bf16 %v3443_v8, %v3439_v21  ;;  %v3468_v8 = vld [vmem:[#allocation11 + $0x240] sm:$0xff] }
 0x61a   : > { %7683 = vmatpush1.bf16.msra.mxu0 %v7682_v23  ;;  %7939 = vmatpush1.bf16.msra.mxu1 %v7938_v24  ;;  %v3415_v23 = vld [vmem:[#allocation11 + $0x98] sm:$0xff] }
 0x61b   : > { %7685 = vmatprep.subr.bf16.mxu0 %v7684_v32  ;;  %7941 = vmatprep.subr.bf16.mxu1 %v7940_v26  ;;  %v3419_v24 = vld [vmem:[#allocation11 + $0xb8] sm:$0xff]  ;;  %v3412_v32 = vld [vmem:[#allocation11 + $0x80] sm:$0xff] }
 0x61c   : > { %v3416_v26 = vld [vmem:[#allocation11 + $0xa0] sm:$0xff]  ;;  %v8212_v33 = vpack.c.bf16 %v3419_v24, %v3415_v23 }
 0x61d   : > { %v3444_v24 = vld [vmem:[#allocation11 + $0x180] sm:$0xff] }
 0x61e   : > { %7687 = vmatpush1.bf16.msra.mxu0 %v7686_v41  ;;  %7943 = vmatpush1.bf16.msra.mxu1 %v7942_v45  ;;  %v7958_v41 = vpack.c.bf16 %v3416_v26, %v3412_v32  ;;  %v8214_v45 = vpack.c.bf16 %v3418_v34, %v3414_v58  ;;  %v3450_v32 = vld [vmem:[#allocation11 + $0x1b0] sm:$0xff]  ;;  %v3453_v26 = vld [vmem:[#allocation11 + $0x1c8] sm:$0xff]  ;;  %v3459_v34 = vld [vmem:[#allocation11 + $0x1f8] sm:$0xff] }
 0x61f   : > { %7689 = vmatprep.subr.bf16.mxu0 %v7688_v49  ;;  %7945 = vmatprep.subr.bf16.mxu1 %v7944_v51  ;;  %v8216_v49 = vpack.c.bf16 %v3427_v40, %v3423_v39  ;;  %v3426_v51 = vld [vmem:[#allocation11 + $0xf0] sm:$0xff]  ;;  %v3457_v58 = vld [vmem:[#allocation11 + $0x1e8] sm:$0xff]  ;;  %v3452_v40 = vld [vmem:[#allocation11 + $0x1c0] sm:$0xff] }
 0x620   : > { %v8218_v59 = vpack.c.bf16 %v3426_v51, %v3422_v48  ;;  %v7976_v39 = vpack.c.bf16 %v3457_v58, %v3453_v26  ;;  %v3465_v48 = vld [vmem:[#allocation11 + $0x228] sm:$0xff]  ;;  %v3467_v51 = vld [vmem:[#allocation11 + $0x238] sm:$0xff] }
 0x622   : > { %7691 = vmatpush1.bf16.msra.mxu0 %v7690_v27  ;;  %7947 = vmatpush1.bf16.msra.mxu1 %v7946_v2  ;;  %v3428_v27 = vld [vmem:[#allocation11 + $0x100] sm:$0xff] }
 0x623   : > { %7949 = vmatprep.subr.bf16.mxu0 %v7948_v15  ;;  %8205 = vmatprep.subr.bf16.mxu1 %v8204_v30  ;;  %v3432_v2 = vld [vmem:[#allocation11 + $0x120] sm:$0xff]  ;;  %v8220_v15 = vpack.c.bf16 %v3435_v56, %v3431_v55  ;;  %v3434_v30 = vld [vmem:[#allocation11 + $0x130] sm:$0xff] }
 0x624   : > { %v7966_v9 = vpack.c.bf16 %v3432_v2, %v3428_v27  ;;  %v8222_v10 = vpack.c.bf16 %v3434_v30, %v3430_v4  ;;  %v3460_v56 = vld [vmem:[#allocation11 + $0x200] sm:$0xff]  ;;  %v3466_v27 = vld [vmem:[#allocation11 + $0x230] sm:$0xff]  ;;  %v3469_v2 = vld [vmem:[#allocation11 + $0x248] sm:$0xff] }
 0x625   : > { %3106 = vmatmul.mubr.f32.vlgmr.msra.gmra.mrb[4].mxu0 %v11860_v16  ;;  %3390 = vmatmul.mubr.f32.vlgmr.msra.gmra.mrb[4].mxu1 %v11860_v16  ;;  %v3473_v4 = vld [vmem:[#allocation11 + $0x268] sm:$0xff]  ;;  %v3475_v30 = vld [vmem:[#allocation11 + $0x278] sm:$0xff] }
 0x626   : > { %7951 = vmatpush1.bf16.msra.mxu0 %v7950_v14  ;;  %3994 = vmatprep.mubr.f32.mxu0 %v11768_v37  ;;  %v3440_v14 = vld [vmem:[#allocation11 + $0x160] sm:$0xff]  ;;  %v7984_v21 = vpack.c.bf16 %v3473_v4, %v3469_v2 }
 0x627   : > { %8207 = vmatpush1.bf16.msra.mxu1 %v8206_v17  ;;  %4278 = vmatprep.mubr.f32.mxu1 %v11768_v37  ;;  %v3420_v37 = vld [vmem:[#allocation11 + $0xc0] sm:$0xff]  ;;  %v3438_v17 = vld [vmem:[#allocation11 + $0x150] sm:$0xff]  ;;  %v7970_v22 = vpack.c.bf16 %v3440_v14, %v3436_v13  ;;  %v3477_v14 = vld [vmem:[#allocation11 + $0x288] sm:$0xff] }
 0x628   : > { %7953 = vmatprep.subr.bf16.mxu0 %v7952_v31  ;;  %8209 = vmatprep.subr.bf16.mxu1 %v8208_v19  ;;  %v7962_v57 = vpack.c.bf16 %v3424_v5, %v3420_v37  ;;  %v3449_v31 = vld [vmem:[#allocation11 + $0x1a8] sm:$0xff]  ;;  %v3447_v19 = vld [vmem:[#allocation11 + $0x198] sm:$0xff]  ;;  %v8226_v6 = vpack.c.bf16 %v3442_v47, %v3438_v17  ;;  %v3458_v37 = vld [vmem:[#allocation11 + $0x1f0] sm:$0xff] }
 0x629   : > { %v7972_v23 = vpack.c.bf16 %v3449_v31, %v3445_v50  ;;  %v3461_v5 = vld [vmem:[#allocation11 + $0x208] sm:$0xff]  ;;  %v3474_v13 = vld [vmem:[#allocation11 + $0x270] sm:$0xff]  ;;  %v3483_v47 = vld [vmem:[#allocation11 + $0x2b8] sm:$0xff] }
 0x62a   : > { %7955 = vmatpush1.bf16.msra.mxu0 %v7954_v25  ;;  %v3448_v25 = vld [vmem:[#allocation11 + $0x1a0] sm:$0xff]  ;;  %v7980_v55 = vpack.c.bf16 %v3465_v48, %v3461_v5  ;;  %v3481_v17 = vld [vmem:[#allocation11 + $0x2a8] sm:$0xff] }
 0x62b   : > { %8211 = vmatpush1.bf16.msra.mxu1 %v8210_v28  ;;  %7957 = vmatprep.subr.bf16.mxu0 %v7956_v29  ;;  %v3446_v28 = vld [vmem:[#allocation11 + $0x190] sm:$0xff]  ;;  %v8228_v29 = vpack.c.bf16 %v3451_v42, %v3447_v19  ;;  %v7974_v35 = vpack.c.bf16 %v3448_v25, %v3444_v24  ;;  %v7988_v19 = vpack.c.bf16 %v3481_v17, %v3477_v14  ;;  %v3476_v42 = vld [vmem:[#allocation11 + $0x280] sm:$0xff]  ;;  %v3485_v25 = vld [vmem:[#allocation11 + $0x2c8] sm:$0xff] }
 0x62c   : > { %8213 = vmatprep.subr.bf16.mxu1 %v8212_v33  ;;  %v3455_v33 = vld [vmem:[#allocation11 + $0x1d8] sm:$0xff]  ;;  %v8230_v38 = vpack.c.bf16 %v3450_v32, %v3446_v28  ;;  %v3482_v24 = vld [vmem:[#allocation11 + $0x2b0] sm:$0xff]  ;;  %v3489_v28 = vld [vmem:[#allocation11 + $0x2e8] sm:$0xff] }
 0x62d   : > { %v3491_v32 = vld [vmem:[#allocation11 + $0x2f8] sm:$0xff] }
 0x62e   : > { %7959 = vmatpush1.bf16.msra.mxu0 %v7958_v41  ;;  %v3456_v41 = vld [vmem:[#allocation11 + $0x1e0] sm:$0xff] }
 0x62f   : > { %8215 = vmatpush1.bf16.msra.mxu1 %v8214_v45  ;;  %7961 = vmatprep.subr.bf16.mxu0 %v7960_v46  ;;  %v3454_v45 = vld [vmem:[#allocation11 + $0x1d0] sm:$0xff]  ;;  %v8232_v46 = vpack.c.bf16 %v3459_v34, %v3455_v33  ;;  %v7978_v52 = vpack.c.bf16 %v3456_v41, %v3452_v40  ;;  %v7992_v33 = vpack.c.bf16 %v3489_v28, %v3485_v25  ;;  %v3484_v34 = vld [vmem:[#allocation11 + $0x2c0] sm:$0xff]  ;;  %v3493_v41 = vld [vmem:[#allocation11 + $0x308] sm:$0xff] }
 0x630   : > { %8217 = vmatprep.subr.bf16.mxu1 %v8216_v49  ;;  %v3463_v49 = vld [vmem:[#allocation11 + $0x218] sm:$0xff]  ;;  %v8234_v63 = vpack.c.bf16 %v3458_v37, %v3454_v45  ;;  %v3490_v40 = vld [vmem:[#allocation11 + $0x2f0] sm:$0xff]  ;;  %v3497_v45 = vld [vmem:[#allocation11 + $0x328] sm:$0xff] }
 0x631   : > { %v3499_v37 = vld [vmem:[#allocation11 + $0x338] sm:$0xff] }
 0x632   : > { %7963 = vmatpush1.bf16.msra.mxu0 %v7962_v57  ;;  %v3464_v57 = vld [vmem:[#allocation11 + $0x220] sm:$0xff] }
 0x633   : > { %8219 = vmatpush1.bf16.msra.mxu1 %v8218_v59  ;;  %7965 = vmatprep.subr.bf16.mxu0 %v7964_v60  ;;  %v3462_v59 = vld [vmem:[#allocation11 + $0x210] sm:$0xff]  ;;  %v8236_v60 = vpack.c.bf16 %v3467_v51, %v3463_v49  ;;  %v7982_v61 = vpack.c.bf16 %v3464_v57, %v3460_v56  ;;  %v7996_v49 = vpack.c.bf16 %v3497_v45, %v3493_v41  ;;  %v3492_v51 = vld [vmem:[#allocation11 + $0x300] sm:$0xff]  ;;  %v3501_v57 = vld [vmem:[#allocation11 + $0x348] sm:$0xff] }
 0x634   : > { %8221 = vmatprep.subr.bf16.mxu1 %v8220_v15  ;;  %v3471_v15 = vld [vmem:[#allocation11 + $0x258] sm:$0xff]  ;;  %v8238_v12 = vpack.c.bf16 %v3466_v27, %v3462_v59  ;;  %v3498_v56 = vld [vmem:[#allocation11 + $0x330] sm:$0xff]  ;;  %v3505_v59 = vld [vmem:[#allocation11 + $0x368] sm:$0xff] }
 0x635   : > { %v3507_v27 = vld [vmem:[#allocation11 + $0x378] sm:$0xff] }
 0x636   : > { %7967 = vmatpush1.bf16.msra.mxu0 %v7966_v9  ;;  %v3472_v9 = vld [vmem:[#allocation11 + $0x260] sm:$0xff] }
 0x637   : > { %8223 = vmatpush1.bf16.msra.mxu1 %v8222_v10  ;;  %7969 = vmatprep.subr.bf16.mxu0 %v7968_v11  ;;  %v3470_v10 = vld [vmem:[#allocation11 + $0x250] sm:$0xff]  ;;  %v8240_v11 = vpack.c.bf16 %v3475_v30, %v3471_v15  ;;  %v7986_v50 = vpack.c.bf16 %v3472_v9, %v3468_v8  ;;  %v8000_v15 = vpack.c.bf16 %v3505_v59, %v3501_v57  ;;  %v3500_v30 = vld [vmem:[#allocation11 + $0x340] sm:$0xff]  ;;  %v3509_v9 = vld [vmem:[#allocation11 + $0x388] sm:$0xff] }
 0x638   : > { %8225 = vmatprep.subr.bf16.mxu1 %v8224_v36  ;;  %v3479_v36 = vld [vmem:[#allocation11 + $0x298] sm:$0xff]  ;;  %v8242_v31 = vpack.c.bf16 %v3474_v13, %v3470_v10  ;;  %v3506_v8 = vld [vmem:[#allocation11 + $0x370] sm:$0xff]  ;;  %v3513_v10 = vld [vmem:[#allocation11 + $0x3a8] sm:$0xff] }
 0x639   : > { %v3515_v13 = vld [vmem:[#allocation11 + $0x3b8] sm:$0xff] }
 0x63a   : > { %7971 = vmatpush1.bf16.msra.mxu0 %v7970_v22  ;;  %v3480_v22 = vld [vmem:[#allocation11 + $0x2a0] sm:$0xff]  ;;  %v3539_v57 = vld [vmem:[#allocation11 + $0x478] sm:$0xff] }
 0x63b   : > { %8227 = vmatpush1.bf16.msra.mxu1 %v8226_v6  ;;  %7973 = vmatprep.subr.bf16.mxu0 %v7972_v23  ;;  %v3478_v6 = vld [vmem:[#allocation11 + $0x290] sm:$0xff]  ;;  %v8244_v23 = vpack.c.bf16 %v3483_v47, %v3479_v36  ;;  %v7990_v26 = vpack.c.bf16 %v3480_v22, %v3476_v42  ;;  %v8004_v36 = vpack.c.bf16 %v3513_v10, %v3509_v9  ;;  %v3508_v47 = vld [vmem:[#allocation11 + $0x380] sm:$0xff]  ;;  %v3517_v22 = vld [vmem:[#allocation11 + $0x3c8] sm:$0xff] }
 0x63c   : > { %8229 = vmatprep.subr.bf16.mxu1 %v8228_v29  ;;  %v3487_v29 = vld [vmem:[#allocation11 + $0x2d8] sm:$0xff]  ;;  %v8246_v58 = vpack.c.bf16 %v3482_v24, %v3478_v6  ;;  %v3514_v42 = vld [vmem:[#allocation11 + $0x3b0] sm:$0xff]  ;;  %v3521_v6 = vld [vmem:[#allocation11 + $0x3e8] sm:$0xff] }
 0x63d   : > { %v3523_v24 = vld [vmem:[#allocation11 + $0x3f8] sm:$0xff] }
 0x63e   : > { %7975 = vmatpush1.bf16.msra.mxu0 %v7974_v35  ;;  %v3488_v35 = vld [vmem:[#allocation11 + $0x2e0] sm:$0xff] }
 0x63f   : > { %8231 = vmatpush1.bf16.msra.mxu1 %v8230_v38  ;;  %7977 = vmatprep.subr.bf16.mxu0 %v7976_v39  ;;  %v3486_v38 = vld [vmem:[#allocation11 + $0x2d0] sm:$0xff]  ;;  %v8248_v39 = vpack.c.bf16 %v3491_v32, %v3487_v29  ;;  %v7994_v5 = vpack.c.bf16 %v3488_v35, %v3484_v34  ;;  %v8008_v29 = vpack.c.bf16 %v3521_v6, %v3517_v22  ;;  %v3516_v32 = vld [vmem:[#allocation11 + $0x3c0] sm:$0xff]  ;;  %v3525_v35 = vld [vmem:[#allocation11 + $0x408] sm:$0xff] }
 0x640   : > { %8233 = vmatprep.subr.bf16.mxu1 %v8232_v46  ;;  %v3495_v46 = vld [vmem:[#allocation11 + $0x318] sm:$0xff]  ;;  %v8250_v48 = vpack.c.bf16 %v3490_v40, %v3486_v38  ;;  %v3522_v34 = vld [vmem:[#allocation11 + $0x3f0] sm:$0xff]  ;;  %v3529_v38 = vld [vmem:[#allocation11 + $0x428] sm:$0xff] }
 0x641   : > { %v3531_v40 = vld [vmem:[#allocation11 + $0x438] sm:$0xff] }
 0x642   : > { %7979 = vmatpush1.bf16.msra.mxu0 %v7978_v52  ;;  %v3496_v52 = vld [vmem:[#allocation11 + $0x320] sm:$0xff] }
 0x643   : > { %8235 = vmatpush1.bf16.msra.mxu1 %v8234_v63  ;;  %7981 = vmatprep.subr.bf16.mxu0 %v7980_v55  ;;  %v3494_v63 = vld [vmem:[#allocation11 + $0x310] sm:$0xff]  ;;  %v8252_v55 = vpack.c.bf16 %v3499_v37, %v3495_v46  ;;  %v7998_v2 = vpack.c.bf16 %v3496_v52, %v3492_v51  ;;  %v8012_v46 = vpack.c.bf16 %v3529_v38, %v3525_v35  ;;  %v3524_v37 = vld [vmem:[#allocation11 + $0x400] sm:$0xff]  ;;  %v3533_v52 = vld [vmem:[#allocation11 + $0x448] sm:$0xff] }
 0x644   : > { %8237 = vmatprep.subr.bf16.mxu1 %v8236_v60  ;;  %v3503_v60 = vld [vmem:[#allocation11 + $0x358] sm:$0xff]  ;;  %v8254_v4 = vpack.c.bf16 %v3498_v56, %v3494_v63  ;;  %v3530_v51 = vld [vmem:[#allocation11 + $0x430] sm:$0xff]  ;;  %v3537_v63 = vld [vmem:[#allocation11 + $0x468] sm:$0xff] }
 0x645   : > { %v3535_v56 = vld [vmem:[#allocation11 + $0x458] sm:$0xff]  ;;  %v3556_v38 = vld [vmem:[#allocation11 + $0x500] sm:$0xff] }
 0x646   : > { %7983 = vmatpush1.bf16.msra.mxu0 %v7982_v61  ;;  %v3504_v61 = vld [vmem:[#allocation11 + $0x360] sm:$0xff] }
 0x647   : > { %8239 = vmatpush1.bf16.msra.mxu1 %v8238_v12  ;;  %7985 = vmatprep.subr.bf16.mxu0 %v7984_v21  ;;  %v3502_v12 = vld [vmem:[#allocation11 + $0x350] sm:$0xff]  ;;  %v8256_v21 = vpack.c.bf16 %v3507_v27, %v3503_v60  ;;  %v8002_v14 = vpack.c.bf16 %v3504_v61, %v3500_v30  ;;  %v3532_v60 = vld [vmem:[#allocation11 + $0x440] sm:$0xff]  ;;  %v3541_v30 = vld [vmem:[#allocation11 + $0x488] sm:$0xff] }
 0x648   : > { %8241 = vmatprep.subr.bf16.mxu1 %v8240_v11  ;;  %v3511_v11 = vld [vmem:[#allocation11 + $0x398] sm:$0xff]  ;;  %v8258_v17 = vpack.c.bf16 %v3506_v8, %v3502_v12  ;;  %v3536_v27 = vld [vmem:[#allocation11 + $0x460] sm:$0xff]  ;;  %v3545_v61 = vld [vmem:[#allocation11 + $0x4a8] sm:$0xff]  ;;  %v8272_v12 = vpack.c.bf16 %v3539_v57, %v3535_v56 }
 0x649   : > { %v3547_v8 = vld [vmem:[#allocation11 + $0x4b8] sm:$0xff]  ;;  %v8018_v9 = vpack.c.bf16 %v3536_v27, %v3532_v60  ;;  %v3566_v56 = vld [vmem:[#allocation11 + $0x550] sm:$0xff]  ;;  %v3573_v60 = vld [vmem:[#allocation11 + $0x588] sm:$0xff] }
 0x64a   : > { %7987 = vmatpush1.bf16.msra.mxu0 %v7986_v50  ;;  %v3512_v50 = vld [vmem:[#allocation11 + $0x3a0] sm:$0xff]  ;;  %v3577_v27 = vld [vmem:[#allocation11 + $0x5a8] sm:$0xff] }
 0x64b   : > { %8243 = vmatpush1.bf16.msra.mxu1 %v8242_v31  ;;  %7989 = vmatprep.subr.bf16.mxu0 %v7988_v19  ;;  %v3510_v31 = vld [vmem:[#allocation11 + $0x390] sm:$0xff]  ;;  %v8260_v19 = vpack.c.bf16 %v3515_v13, %v3511_v11  ;;  %v8006_v25 = vpack.c.bf16 %v3512_v50, %v3508_v47  ;;  %v8020_v11 = vpack.c.bf16 %v3545_v61, %v3541_v30  ;;  %v3540_v13 = vld [vmem:[#allocation11 + $0x480] sm:$0xff]  ;;  %v3549_v50 = vld [vmem:[#allocation11 + $0x4c8] sm:$0xff] }
 0x64c   : > { %8245 = vmatprep.subr.bf16.mxu1 %v8244_v23  ;;  %v3519_v23 = vld [vmem:[#allocation11 + $0x3d8] sm:$0xff]  ;;  %v8262_v28 = vpack.c.bf16 %v3514_v42, %v3510_v31  ;;  %v3546_v47 = vld [vmem:[#allocation11 + $0x4b0] sm:$0xff]  ;;  %v3553_v31 = vld [vmem:[#allocation11 + $0x4e8] sm:$0xff]  ;;  %v8036_v61 = vpack.c.bf16 %v3577_v27, %v3573_v60 }
 0x64d   : > { %v8024_v6 = vpack.c.bf16 %v3553_v31, %v3549_v50  ;;  %v3580_v31 = vld [vmem:[#allocation11 + $0x5c0] sm:$0xff] }
 0x64e   : > { %7991 = vmatpush1.bf16.msra.mxu0 %v7990_v26  ;;  %v3520_v26 = vld [vmem:[#allocation11 + $0x3e0] sm:$0xff] }
 0x64f   : > { %8247 = vmatpush1.bf16.msra.mxu1 %v8246_v58  ;;  %7993 = vmatprep.subr.bf16.mxu0 %v7992_v33  ;;  %v3518_v58 = vld [vmem:[#allocation11 + $0x3d0] sm:$0xff]  ;;  %v8264_v33 = vpack.c.bf16 %v3523_v24, %v3519_v23  ;;  %v8010_v41 = vpack.c.bf16 %v3520_v26, %v3516_v32  ;;  %v3548_v23 = vld [vmem:[#allocation11 + $0x4c0] sm:$0xff]  ;;  %v3561_v32 = vld [vmem:[#allocation11 + $0x528] sm:$0xff] }
 0x650   : > { %8249 = vmatprep.subr.bf16.mxu1 %v8248_v39  ;;  %v3527_v39 = vld [vmem:[#allocation11 + $0x418] sm:$0xff]  ;;  %v8266_v45 = vpack.c.bf16 %v3522_v34, %v3518_v58  ;;  %v3552_v24 = vld [vmem:[#allocation11 + $0x4e0] sm:$0xff] }
 0x651   : > { %v3559_v26 = vld [vmem:[#allocation11 + $0x518] sm:$0xff]  ;;  %v3604_v27 = vld [vmem:[#allocation11 + $0x680] sm:$0xff] }
 0x652   : > { %7995 = vmatpush1.bf16.msra.mxu0 %v7994_v5  ;;  %v3528_v5 = vld [vmem:[#allocation11 + $0x420] sm:$0xff]  ;;  %v3563_v58 = vld [vmem:[#allocation11 + $0x538] sm:$0xff] }
 0x653   : > { %8251 = vmatpush1.bf16.msra.mxu1 %v8250_v48  ;;  %7997 = vmatprep.subr.bf16.mxu0 %v7996_v49  ;;  %v8268_v48 = vpack.c.bf16 %v3531_v40, %v3527_v39  ;;  %v3526_v49 = vld [vmem:[#allocation11 + $0x410] sm:$0xff]  ;;  %v3560_v39 = vld [vmem:[#allocation11 + $0x520] sm:$0xff] }
 0x654   : > { %8253 = vmatprep.subr.bf16.mxu1 %v8252_v55  ;;  %v8014_v55 = vpack.c.bf16 %v3528_v5, %v3524_v37  ;;  %v8270_v59 = vpack.c.bf16 %v3530_v51, %v3526_v49  ;;  %v3558_v40 = vld [vmem:[#allocation11 + $0x510] sm:$0xff]  ;;  %v3569_v37 = vld [vmem:[#allocation11 + $0x568] sm:$0xff]  ;;  %v3567_v5 = vld [vmem:[#allocation11 + $0x558] sm:$0xff]  ;;  %v8030_v49 = vpack.c.bf16 %v3560_v39, %v3556_v38 }
 0x655   : > { %v3601_v38 = vld [vmem:[#allocation11 + $0x668] sm:$0xff]  ;;  %v3599_v39 = vld [vmem:[#allocation11 + $0x658] sm:$0xff] }
 0x656   : > { %7999 = vmatpush1.bf16.msra.mxu0 %v7998_v2  ;;  %v3534_v2 = vld [vmem:[#allocation11 + $0x450] sm:$0xff] }
 0x657   : > { %8255 = vmatpush1.bf16.msra.mxu1 %v8254_v4  ;;  %8001 = vmatprep.subr.bf16.mxu0 %v8000_v15  ;;  %v8016_v4 = vpack.c.bf16 %v3537_v63, %v3533_v52  ;;  %v3538_v15 = vld [vmem:[#allocation11 + $0x470] sm:$0xff]  ;;  %v3564_v63 = vld [vmem:[#allocation11 + $0x540] sm:$0xff] }
 0x658   : > { %8257 = vmatprep.subr.bf16.mxu1 %v8256_v21  ;;  %v3543_v21 = vld [vmem:[#allocation11 + $0x498] sm:$0xff]  ;;  %v8274_v10 = vpack.c.bf16 %v3538_v15, %v3534_v2 }
 0x659   : > { %v3575_v2 = vld [vmem:[#allocation11 + $0x598] sm:$0xff] }
 0x65a   : > { %8003 = vmatpush1.bf16.msra.mxu0 %v8002_v14  ;;  %v3544_v14 = vld [vmem:[#allocation11 + $0x4a0] sm:$0xff] }
 0x65b   : > { %8259 = vmatpush1.bf16.msra.mxu1 %v8258_v17  ;;  %8005 = vmatprep.subr.bf16.mxu0 %v8004_v36  ;;  %v3542_v17 = vld [vmem:[#allocation11 + $0x490] sm:$0xff]  ;;  %v8276_v36 = vpack.c.bf16 %v3547_v8, %v3543_v21  ;;  %v8022_v42 = vpack.c.bf16 %v3544_v14, %v3540_v13  ;;  %v3576_v21 = vld [vmem:[#allocation11 + $0x5a0] sm:$0xff]  ;;  %v3585_v13 = vld [vmem:[#allocation11 + $0x5e8] sm:$0xff] }
 0x65c   : > { %8261 = vmatprep.subr.bf16.mxu1 %v8260_v19  ;;  %v3551_v19 = vld [vmem:[#allocation11 + $0x4d8] sm:$0xff]  ;;  %v8278_v22 = vpack.c.bf16 %v3546_v47, %v3542_v17  ;;  %v3574_v8 = vld [vmem:[#allocation11 + $0x590] sm:$0xff] }
 0x65d   : > { %v3583_v14 = vld [vmem:[#allocation11 + $0x5d8] sm:$0xff] }
 0x65e   : > { %8007 = vmatpush1.bf16.msra.mxu0 %v8006_v25  ;;  %v3550_v25 = vld [vmem:[#allocation11 + $0x4d0] sm:$0xff]  ;;  %v3587_v17 = vld [vmem:[#allocation11 + $0x5f8] sm:$0xff] }
 0x65f   : > { %8263 = vmatpush1.bf16.msra.mxu1 %v8262_v28  ;;  %8009 = vmatprep.subr.bf16.mxu0 %v8008_v29  ;;  %v3557_v29 = vld [vmem:[#allocation11 + $0x508] sm:$0xff] }
 0x660   : > { %8265 = vmatprep.subr.bf16.mxu1 %v8264_v33  ;;  %v8026_v33 = vpack.c.bf16 %v3552_v24, %v3548_v23  ;;  %v8028_v35 = vpack.c.bf16 %v3561_v32, %v3557_v29  ;;  %v3593_v23 = vld [vmem:[#allocation11 + $0x628] sm:$0xff]  ;;  %v3591_v24 = vld [vmem:[#allocation11 + $0x618] sm:$0xff]  ;;  %v3588_v32 = vld [vmem:[#allocation11 + $0x600] sm:$0xff] }
 0x662   : > { %8011 = vmatpush1.bf16.msra.mxu0 %v8010_v41  ;;  %v8284_v41 = vpack.c.bf16 %v3563_v58, %v3559_v26  ;;  %v3592_v26 = vld [vmem:[#allocation11 + $0x620] sm:$0xff]  ;;  %v3590_v58 = vld [vmem:[#allocation11 + $0x610] sm:$0xff] }
 0x663   : > { %8267 = vmatpush1.bf16.msra.mxu1 %v8266_v45  ;;  %8013 = vmatprep.subr.bf16.mxu0 %v8012_v46  ;;  %v3562_v45 = vld [vmem:[#allocation11 + $0x530] sm:$0xff]  ;;  %v3565_v46 = vld [vmem:[#allocation11 + $0x548] sm:$0xff] }
 0x664   : > { %8269 = vmatprep.subr.bf16.mxu1 %v8268_v48  ;;  %v3571_v48 = vld [vmem:[#allocation11 + $0x578] sm:$0xff]  ;;  %v8286_v51 = vpack.c.bf16 %v3562_v45, %v3558_v40  ;;  %v8032_v52 = vpack.c.bf16 %v3569_v37, %v3565_v46  ;;  %v3596_v37 = vld [vmem:[#allocation11 + $0x640] sm:$0xff] }
 0x665   : > { %3995 = vmatmul.mubr.f32.vlgmr.msra.gmra.mrb[6].mxu0 %v11772_v44  ;;  %v8288_v57 = vpack.c.bf16 %v3571_v48, %v3567_v5  ;;  %v3603_v40 = vld [vmem:[#allocation11 + $0x678] sm:$0xff]  ;;  %v3600_v5 = vld [vmem:[#allocation11 + $0x660] sm:$0xff]  ;;  %v3598_v48 = vld [vmem:[#allocation11 + $0x650] sm:$0xff] }
 0x666   : > { %4279 = vmatmul.mubr.f32.vlgmr.msra.gmra.mrb[6].mxu1 %v11772_v44  ;;  %8015 = vmatpush1.bf16.msra.mxu0 %v8014_v55  ;;  %v3555_v44 = vld [vmem:[#allocation11 + $0x4f8] sm:$0xff]  ;;  %v3568_v55 = vld [vmem:[#allocation11 + $0x560] sm:$0xff] }
 0x667   : > { %4065 = vmatprep.mubr.f32.mxu0 %v11778_v54  ;;  %8271 = vmatpush1.bf16.msra.mxu1 %v8270_v59  ;;  %v8280_v28 = vpack.c.bf16 %v3555_v44, %v3551_v19  ;;  %v3570_v59 = vld [vmem:[#allocation11 + $0x570] sm:$0xff]  ;;  %v8034_v15 = vpack.c.bf16 %v3568_v55, %v3564_v63  ;;  %v3584_v19 = vld [vmem:[#allocation11 + $0x5e0] sm:$0xff]  ;;  %v3609_v63 = vld [vmem:[#allocation11 + $0x6a8] sm:$0xff] }
 0x668   : > { %4349 = vmatprep.mubr.f32.mxu1 %v11778_v54  ;;  %8017 = vmatprep.subr.bf16.mxu0 %v8016_v4  ;;  %v3554_v54 = vld [vmem:[#allocation11 + $0x4f0] sm:$0xff]  ;;  %v3579_v4 = vld [vmem:[#allocation11 + $0x5b8] sm:$0xff]  ;;  %v8290_v30 = vpack.c.bf16 %v3570_v59, %v3566_v56 }
 0x669   : > { %8273 = vmatprep.subr.bf16.mxu1 %v8272_v12  ;;  %v8282_v34 = vpack.c.bf16 %v3554_v54, %v3550_v25  ;;  %v3572_v12 = vld [vmem:[#allocation11 + $0x580] sm:$0xff]  ;;  %v3582_v44 = vld [vmem:[#allocation11 + $0x5d0] sm:$0xff]  ;;  %v3595_v25 = vld [vmem:[#allocation11 + $0x638] sm:$0xff] }
 0x66a   : > { %8019 = vmatpush1.bf16.msra.mxu0 %v8018_v9  ;;  %v8292_v9 = vpack.c.bf16 %v3579_v4, %v3575_v2  ;;  %v3607_v55 = vld [vmem:[#allocation11 + $0x698] sm:$0xff]  ;;  %v3608_v2 = vld [vmem:[#allocation11 + $0x6a0] sm:$0xff]  ;;  %v3606_v4 = vld [vmem:[#allocation11 + $0x690] sm:$0xff] }
 0x66b   : > { %8275 = vmatpush1.bf16.msra.mxu1 %v8274_v10  ;;  %8021 = vmatprep.subr.bf16.mxu0 %v8020_v11  ;;  %v3578_v10 = vld [vmem:[#allocation11 + $0x5b0] sm:$0xff]  ;;  %v3581_v11 = vld [vmem:[#allocation11 + $0x5c8] sm:$0xff]  ;;  %v3611_v56 = vld [vmem:[#allocation11 + $0x6b8] sm:$0xff] }
 0x66c   : > { %8277 = vmatprep.subr.bf16.mxu1 %v8276_v36  ;;  %v8038_v36 = vpack.c.bf16 %v3576_v21, %v3572_v12  ;;  %v8294_v47 = vpack.c.bf16 %v3578_v10, %v3574_v8  ;;  %v8040_v50 = vpack.c.bf16 %v3585_v13, %v3581_v11  ;;  %v3617_v12 = vld [vmem:[#allocation11 + $0x6e8] sm:$0xff]  ;;  %v3615_v21 = vld [vmem:[#allocation11 + $0x6d8] sm:$0xff]  ;;  %v3612_v13 = vld [vmem:[#allocation11 + $0x6c0] sm:$0xff] }
 0x66d   : > { %v3619_v8 = vld [vmem:[#allocation11 + $0x6f8] sm:$0xff] }
 0x66e   : > { %8023 = vmatpush1.bf16.msra.mxu0 %v8022_v42  ;;  %v8296_v42 = vpack.c.bf16 %v3587_v17, %v3583_v14  ;;  %v3616_v14 = vld [vmem:[#allocation11 + $0x6e0] sm:$0xff]  ;;  %v3614_v17 = vld [vmem:[#allocation11 + $0x6d0] sm:$0xff] }
 0x66f   : > { %8279 = vmatpush1.bf16.msra.mxu1 %v8278_v22  ;;  %8025 = vmatprep.subr.bf16.mxu0 %v8024_v6  ;;  %v3586_v22 = vld [vmem:[#allocation11 + $0x5f0] sm:$0xff]  ;;  %v3589_v6 = vld [vmem:[#allocation11 + $0x608] sm:$0xff] }
 0x670   : > { %8281 = vmatprep.subr.bf16.mxu1 %v8280_v28  ;;  %v8042_v28 = vpack.c.bf16 %v3584_v19, %v3580_v31  ;;  %v8298_v54 = vpack.c.bf16 %v3586_v22, %v3582_v44  ;;  %v8044_v29 = vpack.c.bf16 %v3593_v23, %v3589_v6  ;;  %v3625_v31 = vld [vmem:[#allocation11 + $0x728] sm:$0xff]  ;;  %v3623_v19 = vld [vmem:[#allocation11 + $0x718] sm:$0xff]  ;;  %v3620_v23 = vld [vmem:[#allocation11 + $0x700] sm:$0xff] }
 0x671   : > { %v3627_v44 = vld [vmem:[#allocation11 + $0x738] sm:$0xff] }
 0x672   : > { %8027 = vmatpush1.bf16.msra.mxu0 %v8026_v33  ;;  %v8300_v33 = vpack.c.bf16 %v3595_v25, %v3591_v24  ;;  %v3624_v24 = vld [vmem:[#allocation11 + $0x720] sm:$0xff]  ;;  %v3622_v25 = vld [vmem:[#allocation11 + $0x710] sm:$0xff] }
 0x673   : > { %8283 = vmatpush1.bf16.msra.mxu1 %v8282_v34  ;;  %8029 = vmatprep.subr.bf16.mxu0 %v8028_v35  ;;  %v3594_v34 = vld [vmem:[#allocation11 + $0x630] sm:$0xff]  ;;  %v3597_v35 = vld [vmem:[#allocation11 + $0x648] sm:$0xff] }
 0x674   : > { %8285 = vmatprep.subr.bf16.mxu1 %v8284_v41  ;;  %v8046_v41 = vpack.c.bf16 %v3592_v26, %v3588_v32  ;;  %v8302_v45 = vpack.c.bf16 %v3594_v34, %v3590_v58  ;;  %v8048_v46 = vpack.c.bf16 %v3601_v38, %v3597_v35  ;;  %v3633_v32 = vld [vmem:[#allocation11 + $0x768] sm:$0xff]  ;;  %v3631_v26 = vld [vmem:[#allocation11 + $0x758] sm:$0xff]  ;;  %v3628_v38 = vld [vmem:[#allocation11 + $0x740] sm:$0xff] }
 0x675   : > { %v3635_v58 = vld [vmem:[#allocation11 + $0x778] sm:$0xff] }
 0x676   : > { %8031 = vmatpush1.bf16.msra.mxu0 %v8030_v49  ;;  %v8304_v49 = vpack.c.bf16 %v3603_v40, %v3599_v39  ;;  %v3632_v39 = vld [vmem:[#allocation11 + $0x760] sm:$0xff]  ;;  %v3630_v40 = vld [vmem:[#allocation11 + $0x750] sm:$0xff] }
 0x677   : > { %8287 = vmatpush1.bf16.msra.mxu1 %v8286_v51  ;;  %8033 = vmatprep.subr.bf16.mxu0 %v8032_v52  ;;  %v3602_v51 = vld [vmem:[#allocation11 + $0x670] sm:$0xff]  ;;  %v3605_v52 = vld [vmem:[#allocation11 + $0x688] sm:$0xff] }
 0x678   : > { %8289 = vmatprep.subr.bf16.mxu1 %v8288_v57  ;;  %v8050_v57 = vpack.c.bf16 %v3600_v5, %v3596_v37  ;;  %v8306_v59 = vpack.c.bf16 %v3602_v51, %v3598_v48  ;;  %v8052_v60 = vpack.c.bf16 %v3609_v63, %v3605_v52  ;;  %v3641_v37 = vld [vmem:[#allocation11 + $0x7a8] sm:$0xff]  ;;  %v3639_v5 = vld [vmem:[#allocation11 + $0x798] sm:$0xff]  ;;  %v3636_v63 = vld [vmem:[#allocation11 + $0x780] sm:$0xff] }
 0x679   : > { %v3643_v48 = vld [vmem:[#allocation11 + $0x7b8] sm:$0xff] }
 0x67a   : > { %8035 = vmatpush1.bf16.msra.mxu0 %v8034_v15  ;;  %v8308_v15 = vpack.c.bf16 %v3611_v56, %v3607_v55  ;;  %v3640_v55 = vld [vmem:[#allocation11 + $0x7a0] sm:$0xff]  ;;  %v3638_v56 = vld [vmem:[#allocation11 + $0x790] sm:$0xff] }
 0x67b   : > { %8291 = vmatpush1.bf16.msra.mxu1 %v8290_v30  ;;  %8037 = vmatprep.subr.bf16.mxu0 %v8036_v61  ;;  %v3610_v30 = vld [vmem:[#allocation11 + $0x6b0] sm:$0xff]  ;;  %v3613_v61 = vld [vmem:[#allocation11 + $0x6c8] sm:$0xff] }
 0x67c   : > { %8293 = vmatprep.subr.bf16.mxu1 %v8292_v9  ;;  %v8054_v9 = vpack.c.bf16 %v3608_v2, %v3604_v27  ;;  %v8310_v10 = vpack.c.bf16 %v3610_v30, %v3606_v4  ;;  %v8056_v11 = vpack.c.bf16 %v3617_v12, %v3613_v61  ;;  %v3649_v27 = vld [vmem:[#allocation11 + $0x7e8] sm:$0xff]  ;;  %v3647_v2 = vld [vmem:[#allocation11 + $0x7d8] sm:$0xff]  ;;  %v3644_v12 = vld [vmem:[#allocation11 + $0x7c0] sm:$0xff] }
 0x67d   : > { %v3651_v4 = vld [vmem:[#allocation11 + $0x7f8] sm:$0xff] }
 0x67e   : > { %8039 = vmatpush1.bf16.msra.mxu0 %v8038_v36  ;;  %v8312_v36 = vpack.c.bf16 %v3619_v8, %v3615_v21  ;;  %v3648_v21 = vld [vmem:[#allocation11 + $0x7e0] sm:$0xff]  ;;  %v3646_v8 = vld [vmem:[#allocation11 + $0x7d0] sm:$0xff] }
 0x67f   : > { %8295 = vmatpush1.bf16.msra.mxu1 %v8294_v47  ;;  %8041 = vmatprep.subr.bf16.mxu0 %v8040_v50  ;;  %v3618_v47 = vld [vmem:[#allocation11 + $0x6f0] sm:$0xff]  ;;  %v3621_v50 = vld [vmem:[#allocation11 + $0x708] sm:$0xff] }
 0x680   : > { %8297 = vmatprep.subr.bf16.mxu1 %v8296_v42  ;;  %v8058_v42 = vpack.c.bf16 %v3616_v14, %v3612_v13  ;;  %v8314_v22 = vpack.c.bf16 %v3618_v47, %v3614_v17  ;;  %v8060_v6 = vpack.c.bf16 %v3625_v31, %v3621_v50  ;;  %v3657_v13 = vld [vmem:[#allocation11 + $0x828] sm:$0xff]  ;;  %v3655_v14 = vld [vmem:[#allocation11 + $0x818] sm:$0xff]  ;;  %v3652_v31 = vld [vmem:[#allocation11 + $0x800] sm:$0xff] }
 0x681   : > { %v3659_v17 = vld [vmem:[#allocation11 + $0x838] sm:$0xff] }
 0x682   : > { %8043 = vmatpush1.bf16.msra.mxu0 %v8042_v28  ;;  %v8316_v28 = vpack.c.bf16 %v3627_v44, %v3623_v19  ;;  %v3656_v19 = vld [vmem:[#allocation11 + $0x820] sm:$0xff]  ;;  %v8332_v44 = vpack.c.bf16 %v3659_v17, %v3655_v14  ;;  %v3690_v17 = vld [vmem:[#allocation11 + $0x930] sm:$0xff] }
 0x683   : > { %8299 = vmatpush1.bf16.msra.mxu1 %v8298_v54  ;;  %8045 = vmatprep.subr.bf16.mxu0 %v8044_v29  ;;  %v3626_v54 = vld [vmem:[#allocation11 + $0x730] sm:$0xff]  ;;  %v3629_v29 = vld [vmem:[#allocation11 + $0x748] sm:$0xff] }
 0x684   : > { %8301 = vmatprep.subr.bf16.mxu1 %v8300_v33  ;;  %v8062_v33 = vpack.c.bf16 %v3624_v24, %v3620_v23  ;;  %v8318_v34 = vpack.c.bf16 %v3626_v54, %v3622_v25  ;;  %v8064_v35 = vpack.c.bf16 %v3633_v32, %v3629_v29  ;;  %v3665_v23 = vld [vmem:[#allocation11 + $0x868] sm:$0xff]  ;;  %v8078_v24 = vpack.c.bf16 %v3656_v19, %v3652_v31  ;;  %v3663_v25 = vld [vmem:[#allocation11 + $0x858] sm:$0xff]  ;;  %v3660_v29 = vld [vmem:[#allocation11 + $0x840] sm:$0xff] }
 0x685   : > { %v3664_v32 = vld [vmem:[#allocation11 + $0x860] sm:$0xff]  ;;  %v3699_v31 = vld [vmem:[#allocation11 + $0x978] sm:$0xff] }
 0x686   : > { %8047 = vmatpush1.bf16.msra.mxu0 %v8046_v41  ;;  %v8320_v41 = vpack.c.bf16 %v3635_v58, %v3631_v26  ;;  %v3662_v26 = vld [vmem:[#allocation11 + $0x850] sm:$0xff] }
 0x687   : > { %8303 = vmatpush1.bf16.msra.mxu1 %v8302_v45  ;;  %8049 = vmatprep.subr.bf16.mxu0 %v8048_v46  ;;  %v3634_v45 = vld [vmem:[#allocation11 + $0x770] sm:$0xff]  ;;  %v3637_v46 = vld [vmem:[#allocation11 + $0x788] sm:$0xff] }
 0x688   : > { %8305 = vmatprep.subr.bf16.mxu1 %v8304_v49  ;;  %v8066_v49 = vpack.c.bf16 %v3632_v39, %v3628_v38  ;;  %v8322_v51 = vpack.c.bf16 %v3634_v45, %v3630_v40  ;;  %v8068_v52 = vpack.c.bf16 %v3641_v37, %v3637_v46  ;;  %v3671_v39 = vld [vmem:[#allocation11 + $0x898] sm:$0xff]  ;;  %v3668_v37 = vld [vmem:[#allocation11 + $0x880] sm:$0xff] }
 0x689   : > { %v3675_v40 = vld [vmem:[#allocation11 + $0x8b8] sm:$0xff] }
 0x68a   : > { %8051 = vmatpush1.bf16.msra.mxu0 %v8050_v57  ;;  %v8324_v57 = vpack.c.bf16 %v3643_v48, %v3639_v5  ;;  %v3672_v5 = vld [vmem:[#allocation11 + $0x8a0] sm:$0xff]  ;;  %v3670_v48 = vld [vmem:[#allocation11 + $0x890] sm:$0xff] }
 0x68b   : > { %8307 = vmatpush1.bf16.msra.mxu1 %v8306_v59  ;;  %8053 = vmatprep.subr.bf16.mxu0 %v8052_v60  ;;  %v3642_v59 = vld [vmem:[#allocation11 + $0x7b0] sm:$0xff]  ;;  %v3645_v60 = vld [vmem:[#allocation11 + $0x7c8] sm:$0xff] }
 0x68c   : > { %8309 = vmatprep.subr.bf16.mxu1 %v8308_v15  ;;  %v8070_v15 = vpack.c.bf16 %v3640_v55, %v3636_v63  ;;  %v8326_v30 = vpack.c.bf16 %v3642_v59, %v3638_v56  ;;  %v8072_v61 = vpack.c.bf16 %v3649_v27, %v3645_v60  ;;  %v3681_v63 = vld [vmem:[#allocation11 + $0x8e8] sm:$0xff]  ;;  %v3679_v55 = vld [vmem:[#allocation11 + $0x8d8] sm:$0xff]  ;;  %v8086_v56 = vpack.c.bf16 %v3672_v5, %v3668_v37  ;;  %v3676_v60 = vld [vmem:[#allocation11 + $0x8c0] sm:$0xff] }
 0x68d   : > { %v3680_v27 = vld [vmem:[#allocation11 + $0x8e0] sm:$0xff]  ;;  %v3715_v37 = vld [vmem:[#allocation11 + $0x9f8] sm:$0xff] }
 0x68e   : > { %8055 = vmatpush1.bf16.msra.mxu0 %v8054_v9  ;;  %v8328_v9 = vpack.c.bf16 %v3651_v4, %v3647_v2  ;;  %v3678_v2 = vld [vmem:[#allocation11 + $0x8d0] sm:$0xff] }
 0x68f   : > { %8311 = vmatpush1.bf16.msra.mxu1 %v8310_v10  ;;  %8057 = vmatprep.subr.bf16.mxu0 %v8056_v11  ;;  %v3650_v10 = vld [vmem:[#allocation11 + $0x7f0] sm:$0xff]  ;;  %v3653_v11 = vld [vmem:[#allocation11 + $0x808] sm:$0xff] }
 0x690   : > { %8313 = vmatprep.subr.bf16.mxu1 %v8312_v36  ;;  %v8074_v36 = vpack.c.bf16 %v3648_v21, %v3644_v12  ;;  %v8330_v47 = vpack.c.bf16 %v3650_v10, %v3646_v8  ;;  %v8076_v50 = vpack.c.bf16 %v3657_v13, %v3653_v11  ;;  %v3691_v12 = vld [vmem:[#allocation11 + $0x938] sm:$0xff]  ;;  %v8090_v21 = vpack.c.bf16 %v3680_v27, %v3676_v60  ;;  %v3684_v10 = vld [vmem:[#allocation11 + $0x900] sm:$0xff]  ;;  %v3686_v13 = vld [vmem:[#allocation11 + $0x910] sm:$0xff] }
 0x691   : > { %v3688_v11 = vld [vmem:[#allocation11 + $0x920] sm:$0xff]  ;;  %v3723_v60 = vld [vmem:[#allocation11 + $0xa38] sm:$0xff] }
 0x692   : > { %8059 = vmatpush1.bf16.msra.mxu0 %v8058_v42  ;;  %v3654_v42 = vld [vmem:[#allocation11 + $0x810] sm:$0xff]  ;;  %v8094_v19 = vpack.c.bf16 %v3688_v11, %v3684_v10  ;;  %v3731_v10 = vld [vmem:[#allocation11 + $0xa78] sm:$0xff] }
 0x693   : > { %8315 = vmatpush1.bf16.msra.mxu1 %v8314_v22  ;;  %8061 = vmatprep.subr.bf16.mxu0 %v8060_v6  ;;  %v3658_v22 = vld [vmem:[#allocation11 + $0x830] sm:$0xff]  ;;  %v3661_v6 = vld [vmem:[#allocation11 + $0x848] sm:$0xff] }
 0x694   : > { %8317 = vmatprep.subr.bf16.mxu1 %v8316_v28  ;;  %v3667_v28 = vld [vmem:[#allocation11 + $0x878] sm:$0xff]  ;;  %v8334_v54 = vpack.c.bf16 %v3658_v22, %v3654_v42  ;;  %v8080_v58 = vpack.c.bf16 %v3665_v23, %v3661_v6  ;;  %v3692_v22 = vld [vmem:[#allocation11 + $0x940] sm:$0xff]  ;;  %v3694_v23 = vld [vmem:[#allocation11 + $0x950] sm:$0xff] }
 0x695   : > { %v8336_v38 = vpack.c.bf16 %v3667_v28, %v3663_v25  ;;  %v3696_v6 = vld [vmem:[#allocation11 + $0x960] sm:$0xff]  ;;  %v3698_v25 = vld [vmem:[#allocation11 + $0x970] sm:$0xff]  ;;  %v3701_v28 = vld [vmem:[#allocation11 + $0x988] sm:$0xff] }
 0x696   : > { %8063 = vmatpush1.bf16.msra.mxu0 %v8062_v33  ;;  %v3666_v33 = vld [vmem:[#allocation11 + $0x870] sm:$0xff] }
 0x697   : > { %8319 = vmatpush1.bf16.msra.mxu1 %v8318_v34  ;;  %8065 = vmatprep.subr.bf16.mxu0 %v8064_v35  ;;  %v3669_v34 = vld [vmem:[#allocation11 + $0x888] sm:$0xff]  ;;  %v8338_v45 = vpack.c.bf16 %v3666_v33, %v3662_v26  ;;  %v8098_v26 = vpack.c.bf16 %v3696_v6, %v3692_v22  ;;  %v3739_v22 = vld [vmem:[#allocation11 + $0xab8] sm:$0xff] }
 0x698   : > { %8321 = vmatprep.subr.bf16.mxu1 %v8320_v41  ;;  %v3673_v35 = vld [vmem:[#allocation11 + $0x8a8] sm:$0xff]  ;;  %v8082_v41 = vpack.c.bf16 %v3664_v32, %v3660_v29  ;;  %v3703_v29 = vld [vmem:[#allocation11 + $0x998] sm:$0xff] }
 0x699   : > { %v8084_v46 = vpack.c.bf16 %v3673_v35, %v3669_v34  ;;  %v3707_v32 = vld [vmem:[#allocation11 + $0x9b8] sm:$0xff]  ;;  %v3700_v34 = vld [vmem:[#allocation11 + $0x980] sm:$0xff] }
 0x69a   : > { %8067 = vmatpush1.bf16.msra.mxu0 %v8066_v49  ;;  %v8340_v49 = vpack.c.bf16 %v3675_v40, %v3671_v39  ;;  %v3704_v35 = vld [vmem:[#allocation11 + $0x9a0] sm:$0xff]  ;;  %v8356_v39 = vpack.c.bf16 %v3707_v32, %v3703_v29  ;;  %v3706_v40 = vld [vmem:[#allocation11 + $0x9b0] sm:$0xff] }
 0x69b   : > { %8323 = vmatpush1.bf16.msra.mxu1 %v8322_v51  ;;  %8069 = vmatprep.subr.bf16.mxu0 %v8068_v52  ;;  %v3674_v51 = vld [vmem:[#allocation11 + $0x8b0] sm:$0xff]  ;;  %v3677_v52 = vld [vmem:[#allocation11 + $0x8c8] sm:$0xff]  ;;  %v8102_v5 = vpack.c.bf16 %v3704_v35, %v3700_v34  ;;  %v3747_v34 = vld [vmem:[#allocation11 + $0xaf8] sm:$0xff] }
 0x69c   : > { %8325 = vmatprep.subr.bf16.mxu1 %v8324_v57  ;;  %v8342_v57 = vpack.c.bf16 %v3674_v51, %v3670_v48  ;;  %v8088_v59 = vpack.c.bf16 %v3681_v63, %v3677_v52  ;;  %v3708_v51 = vld [vmem:[#allocation11 + $0x9c0] sm:$0xff]  ;;  %v3710_v63 = vld [vmem:[#allocation11 + $0x9d0] sm:$0xff] }
 0x69d   : > { %v3712_v52 = vld [vmem:[#allocation11 + $0x9e0] sm:$0xff]  ;;  %v3738_v32 = vld [vmem:[#allocation11 + $0xab0] sm:$0xff] }
 0x69e   : > { %8071 = vmatpush1.bf16.msra.mxu0 %v8070_v15  ;;  %v3685_v15 = vld [vmem:[#allocation11 + $0x908] sm:$0xff]  ;;  %v8106_v27 = vpack.c.bf16 %v3712_v52, %v3708_v51  ;;  %v3755_v51 = vld [vmem:[#allocation11 + $0xb38] sm:$0xff] }
 0x69f   : > { %8327 = vmatpush1.bf16.msra.mxu1 %v8326_v30  ;;  %8073 = vmatprep.subr.bf16.mxu0 %v8072_v61  ;;  %v3689_v30 = vld [vmem:[#allocation11 + $0x928] sm:$0xff]  ;;  %v3687_v61 = vld [vmem:[#allocation11 + $0x918] sm:$0xff] }
 0x6a0   : > { %8329 = vmatprep.subr.bf16.mxu1 %v8328_v9  ;;  %v8092_v9 = vpack.c.bf16 %v3689_v30, %v3685_v15  ;;  %v8348_v14 = vpack.c.bf16 %v3691_v12, %v3687_v61  ;;  %v3720_v15 = vld [vmem:[#allocation11 + $0xa20] sm:$0xff]  ;;  %v3718_v30 = vld [vmem:[#allocation11 + $0xa10] sm:$0xff] }
 0x6a1   : > { %v3722_v12 = vld [vmem:[#allocation11 + $0xa30] sm:$0xff] }
 0x6a2   : > { %8075 = vmatpush1.bf16.msra.mxu0 %v8074_v36  ;;  %v3693_v36 = vld [vmem:[#allocation11 + $0x948] sm:$0xff] }
 0x6a3   : > { %8331 = vmatpush1.bf16.msra.mxu1 %v8330_v47  ;;  %8077 = vmatprep.subr.bf16.mxu0 %v8076_v50  ;;  %v3697_v47 = vld [vmem:[#allocation11 + $0x968] sm:$0xff]  ;;  %v3695_v50 = vld [vmem:[#allocation11 + $0x958] sm:$0xff] }
 0x6a4   : > { %8333 = vmatprep.subr.bf16.mxu1 %v8332_v44  ;;  %v8350_v44 = vpack.c.bf16 %v3690_v17, %v3686_v13  ;;  %v8096_v42 = vpack.c.bf16 %v3697_v47, %v3693_v36  ;;  %v8366_v13 = vpack.c.bf16 %v3722_v12, %v3718_v30  ;;  %v3724_v17 = vld [vmem:[#allocation11 + $0xa40] sm:$0xff]  ;;  %v3726_v47 = vld [vmem:[#allocation11 + $0xa50] sm:$0xff] }
 0x6a5   : > { %4066 = vmatmul.mubr.f32.vlgmr.msra.gmra.mrb[6].mxu0 %v11807_v53  ;;  %v3728_v36 = vld [vmem:[#allocation11 + $0xa60] sm:$0xff] }
 0x6a6   : > { %4350 = vmatmul.mubr.f32.vlgmr.msra.gmra.mrb[6].mxu1 %v11807_v53  ;;  %8079 = vmatpush1.bf16.msra.mxu0 %v8078_v24  ;;  %v3683_v53 = vld [vmem:[#allocation11 + $0x8f8] sm:$0xff]  ;;  %v8352_v24 = vpack.c.bf16 %v3699_v31, %v3695_v50  ;;  %v3730_v31 = vld [vmem:[#allocation11 + $0xa70] sm:$0xff]  ;;  %v8114_v6 = vpack.c.bf16 %v3728_v36, %v3724_v17  ;;  %v3756_v12 = vld [vmem:[#allocation11 + $0xb40] sm:$0xff] }
 0x6a7   : > { %4136 = vmatprep.mubr.f32.mxu0 %v11809_v7  ;;  %8335 = vmatpush1.bf16.msra.mxu1 %v8334_v54  ;;  %v8344_v4 = vpack.c.bf16 %v3683_v53, %v3679_v55  ;;  %v3705_v54 = vld [vmem:[#allocation11 + $0x9a8] sm:$0xff]  ;;  %v3714_v53 = vld [vmem:[#allocation11 + $0x9f0] sm:$0xff]  ;;  %v3771_v17 = vld [vmem:[#allocation11 + $0xbb8] sm:$0xff] }
 0x6a8   : > { %4420 = vmatprep.mubr.f32.mxu1 %v11809_v7  ;;  %8081 = vmatprep.subr.bf16.mxu0 %v8080_v58  ;;  %v3682_v7 = vld [vmem:[#allocation11 + $0x8f0] sm:$0xff]  ;;  %v8354_v58 = vpack.c.bf16 %v3698_v25, %v3694_v23  ;;  %v8100_v33 = vpack.c.bf16 %v3705_v54, %v3701_v28  ;;  %v8370_v23 = vpack.c.bf16 %v3730_v31, %v3726_v47  ;;  %v3732_v25 = vld [vmem:[#allocation11 + $0xa80] sm:$0xff] }
 0x6a9   : > { %8337 = vmatprep.subr.bf16.mxu1 %v8336_v38  ;;  %v8346_v8 = vpack.c.bf16 %v3682_v7, %v3678_v2  ;;  %v3702_v38 = vld [vmem:[#allocation11 + $0x990] sm:$0xff]  ;;  %v8362_v2 = vpack.c.bf16 %v3714_v53, %v3710_v63  ;;  %v3716_v7 = vld [vmem:[#allocation11 + $0xa00] sm:$0xff] }
 0x6aa   : > { %8083 = vmatpush1.bf16.msra.mxu0 %v8082_v41  ;;  %v3709_v41 = vld [vmem:[#allocation11 + $0x9c8] sm:$0xff]  ;;  %v8358_v48 = vpack.c.bf16 %v3706_v40, %v3702_v38  ;;  %v8110_v11 = vpack.c.bf16 %v3720_v15, %v3716_v7  ;;  %v3736_v28 = vld [vmem:[#allocation11 + $0xaa0] sm:$0xff]  ;;  %v3734_v54 = vld [vmem:[#allocation11 + $0xa90] sm:$0xff] }
 0x6ab   : > { %8339 = vmatpush1.bf16.msra.mxu1 %v8338_v45  ;;  %8085 = vmatprep.subr.bf16.mxu0 %v8084_v46  ;;  %v3713_v45 = vld [vmem:[#allocation11 + $0x9e8] sm:$0xff]  ;;  %v3711_v46 = vld [vmem:[#allocation11 + $0x9d8] sm:$0xff]  ;;  %v8118_v35 = vpack.c.bf16 %v3736_v28, %v3732_v25  ;;  %v8374_v38 = vpack.c.bf16 %v3738_v32, %v3734_v54  ;;  %v3740_v40 = vld [vmem:[#allocation11 + $0xac0] sm:$0xff] }
 0x6ac   : > { %8341 = vmatprep.subr.bf16.mxu1 %v8340_v49  ;;  %v8104_v49 = vpack.c.bf16 %v3713_v45, %v3709_v41  ;;  %v8360_v55 = vpack.c.bf16 %v3715_v37, %v3711_v46  ;;  %v3744_v41 = vld [vmem:[#allocation11 + $0xae0] sm:$0xff]  ;;  %v3742_v45 = vld [vmem:[#allocation11 + $0xad0] sm:$0xff]  ;;  %v3763_v7 = vld [vmem:[#allocation11 + $0xb78] sm:$0xff] }
 0x6ad   : > { %v3746_v37 = vld [vmem:[#allocation11 + $0xaf0] sm:$0xff]  ;;  %v8122_v52 = vpack.c.bf16 %v3744_v41, %v3740_v40  ;;  %v3748_v53 = vld [vmem:[#allocation11 + $0xb00] sm:$0xff]  ;;  %v3779_v25 = vld [vmem:[#allocation11 + $0xbf8] sm:$0xff] }
 0x6ae   : > { %8087 = vmatpush1.bf16.msra.mxu0 %v8086_v56  ;;  %v3717_v56 = vld [vmem:[#allocation11 + $0xa08] sm:$0xff]  ;;  %v8378_v63 = vpack.c.bf16 %v3746_v37, %v3742_v45  ;;  %v3764_v31 = vld [vmem:[#allocation11 + $0xb80] sm:$0xff]  ;;  %v3787_v40 = vld [vmem:[#allocation11 + $0xc38] sm:$0xff] }
 0x6af   : > { %8343 = vmatpush1.bf16.msra.mxu1 %v8342_v57  ;;  %8089 = vmatprep.subr.bf16.mxu0 %v8088_v59  ;;  %v3721_v57 = vld [vmem:[#allocation11 + $0xa28] sm:$0xff]  ;;  %v3719_v59 = vld [vmem:[#allocation11 + $0xa18] sm:$0xff]  ;;  %v3772_v32 = vld [vmem:[#allocation11 + $0xbc0] sm:$0xff] }
 0x6b0   : > { %8345 = vmatprep.subr.bf16.mxu1 %v8344_v4  ;;  %v8108_v4 = vpack.c.bf16 %v3721_v57, %v3717_v56  ;;  %v8364_v61 = vpack.c.bf16 %v3723_v60, %v3719_v59  ;;  %v3752_v56 = vld [vmem:[#allocation11 + $0xb20] sm:$0xff]  ;;  %v3750_v57 = vld [vmem:[#allocation11 + $0xb10] sm:$0xff] }
 0x6b1   : > { %v3754_v60 = vld [vmem:[#allocation11 + $0xb30] sm:$0xff]  ;;  %v8126_v15 = vpack.c.bf16 %v3752_v56, %v3748_v53  ;;  %v3780_v37 = vld [vmem:[#allocation11 + $0xc00] sm:$0xff]  ;;  %v3791_v53 = vld [vmem:[#allocation11 + $0xc58] sm:$0xff] }
 0x6b2   : > { %8091 = vmatpush1.bf16.msra.mxu0 %v8090_v21  ;;  %v3725_v21 = vld [vmem:[#allocation11 + $0xa48] sm:$0xff]  ;;  %v8382_v30 = vpack.c.bf16 %v3754_v60, %v3750_v57  ;;  %v3795_v56 = vld [vmem:[#allocation11 + $0xc78] sm:$0xff]  ;;  %v3792_v60 = vld [vmem:[#allocation11 + $0xc60] sm:$0xff] }
 0x6b3   : > { %8347 = vmatpush1.bf16.msra.mxu1 %v8346_v8  ;;  %8093 = vmatprep.subr.bf16.mxu0 %v8092_v9  ;;  %v3729_v8 = vld [vmem:[#allocation11 + $0xa68] sm:$0xff]  ;;  %v3727_v9 = vld [vmem:[#allocation11 + $0xa58] sm:$0xff] }
 0x6b4   : > { %8349 = vmatprep.subr.bf16.mxu1 %v8348_v14  ;;  %v8112_v14 = vpack.c.bf16 %v3729_v8, %v3725_v21  ;;  %v8368_v50 = vpack.c.bf16 %v3731_v10, %v3727_v9  ;;  %v3760_v21 = vld [vmem:[#allocation11 + $0xb60] sm:$0xff]  ;;  %v3758_v8 = vld [vmem:[#allocation11 + $0xb50] sm:$0xff] }
 0x6b5   : > { %v3762_v10 = vld [vmem:[#allocation11 + $0xb70] sm:$0xff]  ;;  %v8130_v36 = vpack.c.bf16 %v3760_v21, %v3756_v12  ;;  %v3803_v12 = vld [vmem:[#allocation11 + $0xcb8] sm:$0xff] }
 0x6b6   : > { %8095 = vmatpush1.bf16.msra.mxu0 %v8094_v19  ;;  %v3733_v19 = vld [vmem:[#allocation11 + $0xa88] sm:$0xff]  ;;  %v8386_v47 = vpack.c.bf16 %v3762_v10, %v3758_v8  ;;  %v3796_v10 = vld [vmem:[#allocation11 + $0xc80] sm:$0xff] }
 0x6b7   : > { %8351 = vmatpush1.bf16.msra.mxu1 %v8350_v44  ;;  %8097 = vmatprep.subr.bf16.mxu0 %v8096_v42  ;;  %v3737_v44 = vld [vmem:[#allocation11 + $0xaa8] sm:$0xff]  ;;  %v3735_v42 = vld [vmem:[#allocation11 + $0xa98] sm:$0xff] }
 0x6b8   : > { %8353 = vmatprep.subr.bf16.mxu1 %v8352_v24  ;;  %v8116_v24 = vpack.c.bf16 %v3737_v44, %v3733_v19  ;;  %v8372_v29 = vpack.c.bf16 %v3739_v22, %v3735_v42  ;;  %v3768_v19 = vld [vmem:[#allocation11 + $0xba0] sm:$0xff]  ;;  %v3766_v44 = vld [vmem:[#allocation11 + $0xb90] sm:$0xff] }
 0x6b9   : > { %v3770_v22 = vld [vmem:[#allocation11 + $0xbb0] sm:$0xff]  ;;  %v8134_v28 = vpack.c.bf16 %v3768_v19, %v3764_v31 }
 0x6ba   : > { %8099 = vmatpush1.bf16.msra.mxu0 %v8098_v26  ;;  %v3741_v26 = vld [vmem:[#allocation11 + $0xac8] sm:$0xff]  ;;  %v8390_v54 = vpack.c.bf16 %v3770_v22, %v3766_v44  ;;  %v3808_v22 = vld [vmem:[#allocation11 + $0xce0] sm:$0xff] }
 0x6bb   : > { %8355 = vmatpush1.bf16.msra.mxu1 %v8354_v58  ;;  %8101 = vmatprep.subr.bf16.mxu0 %v8100_v33  ;;  %v3745_v58 = vld [vmem:[#allocation11 + $0xae8] sm:$0xff]  ;;  %v3743_v33 = vld [vmem:[#allocation11 + $0xad8] sm:$0xff] }
 0x6bc   : > { %8357 = vmatprep.subr.bf16.mxu1 %v8356_v39  ;;  %v8120_v39 = vpack.c.bf16 %v3745_v58, %v3741_v26  ;;  %v8376_v46 = vpack.c.bf16 %v3747_v34, %v3743_v33  ;;  %v3776_v26 = vld [vmem:[#allocation11 + $0xbe0] sm:$0xff]  ;;  %v3774_v58 = vld [vmem:[#allocation11 + $0xbd0] sm:$0xff] }
 0x6bd   : > { %v3778_v34 = vld [vmem:[#allocation11 + $0xbf0] sm:$0xff]  ;;  %v8138_v41 = vpack.c.bf16 %v3776_v26, %v3772_v32 }
 0x6be   : > { %8103 = vmatpush1.bf16.msra.mxu0 %v8102_v5  ;;  %v3749_v5 = vld [vmem:[#allocation11 + $0xb08] sm:$0xff]  ;;  %v8394_v45 = vpack.c.bf16 %v3778_v34, %v3774_v58  ;;  %v3812_v58 = vld [vmem:[#allocation11 + $0xd00] sm:$0xff]  ;;  %v3814_v34 = vld [vmem:[#allocation11 + $0xd10] sm:$0xff] }
 0x6bf   : > { %8359 = vmatpush1.bf16.msra.mxu1 %v8358_v48  ;;  %8105 = vmatprep.subr.bf16.mxu0 %v8104_v49  ;;  %v3753_v48 = vld [vmem:[#allocation11 + $0xb28] sm:$0xff]  ;;  %v3751_v49 = vld [vmem:[#allocation11 + $0xb18] sm:$0xff] }
 0x6c0   : > { %8361 = vmatprep.subr.bf16.mxu1 %v8360_v55  ;;  %v8124_v55 = vpack.c.bf16 %v3753_v48, %v3749_v5  ;;  %v8380_v59 = vpack.c.bf16 %v3755_v51, %v3751_v49  ;;  %v3784_v5 = vld [vmem:[#allocation11 + $0xc20] sm:$0xff]  ;;  %v3782_v49 = vld [vmem:[#allocation11 + $0xc10] sm:$0xff] }
 0x6c1   : > { %v3786_v51 = vld [vmem:[#allocation11 + $0xc30] sm:$0xff] }
 0x6c2   : > { %8107 = vmatpush1.bf16.msra.mxu0 %v8106_v27  ;;  %v3757_v27 = vld [vmem:[#allocation11 + $0xb48] sm:$0xff]  ;;  %v8398_v57 = vpack.c.bf16 %v3786_v51, %v3782_v49  ;;  %v3820_v49 = vld [vmem:[#allocation11 + $0xd40] sm:$0xff] }
 0x6c3   : > { %8363 = vmatpush1.bf16.msra.mxu1 %v8362_v2  ;;  %8109 = vmatprep.subr.bf16.mxu0 %v8108_v4  ;;  %v3761_v2 = vld [vmem:[#allocation11 + $0xb68] sm:$0xff]  ;;  %v3759_v4 = vld [vmem:[#allocation11 + $0xb58] sm:$0xff]  ;;  %v3824_v51 = vld [vmem:[#allocation11 + $0xd60] sm:$0xff] }
 0x6c4   : > { %8365 = vmatprep.subr.bf16.mxu1 %v8364_v61  ;;  %v8128_v61 = vpack.c.bf16 %v3761_v2, %v3757_v27  ;;  %v8384_v9 = vpack.c.bf16 %v3763_v7, %v3759_v4  ;;  %v3790_v27 = vld [vmem:[#allocation11 + $0xc50] sm:$0xff]  ;;  %v3797_v7 = vld [vmem:[#allocation11 + $0xc88] sm:$0xff] }
 0x6c5   : > { %v3794_v4 = vld [vmem:[#allocation11 + $0xc70] sm:$0xff] }
 0x6c6   : > { %8111 = vmatpush1.bf16.msra.mxu0 %v8110_v11  ;;  %v3765_v11 = vld [vmem:[#allocation11 + $0xb88] sm:$0xff]  ;;  %v8402_v8 = vpack.c.bf16 %v3794_v4, %v3790_v27  ;;  %v8162_v27 = vpack.c.bf16 %v3824_v51, %v3820_v49  ;;  %v3858_v49 = vld [vmem:[#allocation11 + $0xe70] sm:$0xff] }
 0x6c7   : > { %8367 = vmatpush1.bf16.msra.mxu1 %v8366_v13  ;;  %8113 = vmatprep.subr.bf16.mxu0 %v8112_v14  ;;  %v3769_v13 = vld [vmem:[#allocation11 + $0xba8] sm:$0xff]  ;;  %v3767_v14 = vld [vmem:[#allocation11 + $0xb98] sm:$0xff] }
 0x6c8   : > { %8369 = vmatprep.subr.bf16.mxu1 %v8368_v50  ;;  %v8132_v50 = vpack.c.bf16 %v3769_v13, %v3765_v11  ;;  %v8388_v42 = vpack.c.bf16 %v3771_v17, %v3767_v14  ;;  %v3800_v11 = vld [vmem:[#allocation11 + $0xca0] sm:$0xff]  ;;  %v3798_v13 = vld [vmem:[#allocation11 + $0xc90] sm:$0xff]  ;;  %v3861_v51 = vld [vmem:[#allocation11 + $0xe88] sm:$0xff] }
 0x6c9   : > { %v3802_v17 = vld [vmem:[#allocation11 + $0xcb0] sm:$0xff]  ;;  %v8150_v31 = vpack.c.bf16 %v3800_v11, %v3796_v10  ;;  %v3841_v10 = vld [vmem:[#allocation11 + $0xde8] sm:$0xff] }
 0x6ca   : > { %8115 = vmatpush1.bf16.msra.mxu0 %v8114_v6  ;;  %v3773_v6 = vld [vmem:[#allocation11 + $0xbc8] sm:$0xff]  ;;  %v8406_v19 = vpack.c.bf16 %v3802_v17, %v3798_v13  ;;  %v3839_v17 = vld [vmem:[#allocation11 + $0xdd8] sm:$0xff] }
 0x6cb   : > { %8371 = vmatpush1.bf16.msra.mxu1 %v8370_v23  ;;  %8117 = vmatprep.subr.bf16.mxu0 %v8116_v24  ;;  %v3777_v23 = vld [vmem:[#allocation11 + $0xbe8] sm:$0xff]  ;;  %v3775_v24 = vld [vmem:[#allocation11 + $0xbd8] sm:$0xff] }
 0x6cc   : > { %8373 = vmatprep.subr.bf16.mxu1 %v8372_v29  ;;  %v8136_v29 = vpack.c.bf16 %v3777_v23, %v3773_v6  ;;  %v8392_v33 = vpack.c.bf16 %v3779_v25, %v3775_v24  ;;  %v3806_v6 = vld [vmem:[#allocation11 + $0xcd0] sm:$0xff]  ;;  %v3813_v24 = vld [vmem:[#allocation11 + $0xd08] sm:$0xff] }
 0x6cd   : > { %v3817_v25 = vld [vmem:[#allocation11 + $0xd28] sm:$0xff] }
 0x6ce   : > { %8119 = vmatpush1.bf16.msra.mxu0 %v8118_v35  ;;  %v3781_v35 = vld [vmem:[#allocation11 + $0xc08] sm:$0xff]  ;;  %v8156_v26 = vpack.c.bf16 %v3817_v25, %v3813_v24  ;;  %v3851_v24 = vld [vmem:[#allocation11 + $0xe38] sm:$0xff] }
 0x6cf   : > { %8375 = vmatpush1.bf16.msra.mxu1 %v8374_v38  ;;  %8121 = vmatprep.subr.bf16.mxu0 %v8120_v39  ;;  %v3785_v38 = vld [vmem:[#allocation11 + $0xc28] sm:$0xff]  ;;  %v3783_v39 = vld [vmem:[#allocation11 + $0xc18] sm:$0xff] }
 0x6d0   : > { %8377 = vmatprep.subr.bf16.mxu1 %v8376_v46  ;;  %v8140_v46 = vpack.c.bf16 %v3785_v38, %v3781_v35  ;;  %v8396_v48 = vpack.c.bf16 %v3787_v40, %v3783_v39  ;;  %v3818_v38 = vld [vmem:[#allocation11 + $0xd30] sm:$0xff]  ;;  %v3821_v39 = vld [vmem:[#allocation11 + $0xd48] sm:$0xff] }
 0x6d1   : > { %v3825_v40 = vld [vmem:[#allocation11 + $0xd68] sm:$0xff] }
 0x6d2   : > { %8123 = vmatpush1.bf16.msra.mxu0 %v8122_v52  ;;  %v3789_v52 = vld [vmem:[#allocation11 + $0xc48] sm:$0xff] }
 0x6d3   : > { %8379 = vmatpush1.bf16.msra.mxu1 %v8378_v63  ;;  %8125 = vmatprep.subr.bf16.mxu0 %v8124_v55  ;;  %v3793_v63 = vld [vmem:[#allocation11 + $0xc68] sm:$0xff]  ;;  %v8142_v55 = vpack.c.bf16 %v3784_v5, %v3780_v37  ;;  %v2806_v37 = vld [vmem:[#allocation25] sm:$0xf]  ;;  %v8414_v5 = vpack.c.bf16 %v3818_v38, %v3814_v34 }
 0x6d4   : > { %8381 = vmatprep.subr.bf16.mxu1 %v8380_v59  ;;  %v3788_v59 = vld [vmem:[#allocation11 + $0xc40] sm:$0xff]  ;;  %v8144_v2 = vpack.c.bf16 %v3793_v63, %v3789_v52  ;;  %v3822_v52 = vld [vmem:[#allocation11 + $0xd50] sm:$0xff]  ;;  %v3853_v34 = vld [vmem:[#allocation11 + $0xe48] sm:$0xff] }
 0x6d5   : > { %v8146_v21 = vpack.c.bf16 %v3792_v60, %v3788_v59  ;;  %v3831_v59 = vld [vmem:[#allocation11 + $0xd98] sm:$0xff] }
 0x6d6   : > { %8127 = vmatpush1.bf16.msra.mxu0 %v8126_v15  ;;  %v3801_v15 = vld [vmem:[#allocation11 + $0xca8] sm:$0xff]  ;;  %v3835_v60 = vld [vmem:[#allocation11 + $0xdb8] sm:$0xff] }
 0x6d7   : > { %8383 = vmatpush1.bf16.msra.mxu1 %v8382_v30  ;;  %8129 = vmatprep.subr.bf16.mxu0 %v8128_v61  ;;  %v8400_v30 = vpack.c.bf16 %v3795_v56, %v3791_v53  ;;  %v3799_v61 = vld [vmem:[#allocation11 + $0xc98] sm:$0xff]  ;;  %v3829_v53 = vld [vmem:[#allocation11 + $0xd88] sm:$0xff] }
 0x6d8   : > { %8385 = vmatprep.subr.bf16.mxu1 %v8384_v9  ;;  %v8148_v9 = vpack.c.bf16 %v3801_v15, %v3797_v7  ;;  %v8404_v14 = vpack.c.bf16 %v3803_v12, %v3799_v61  ;;  %v3833_v56 = vld [vmem:[#allocation11 + $0xda8] sm:$0xff]  ;;  %v3828_v7 = vld [vmem:[#allocation11 + $0xd80] sm:$0xff]  ;;  %v3855_v38 = vld [vmem:[#allocation11 + $0xe58] sm:$0xff] }
 0x6d9   : > { %v8164_v4 = vpack.c.bf16 %v3833_v56, %v3829_v53  ;;  %v3832_v15 = vld [vmem:[#allocation11 + $0xda0] sm:$0xff] }
 0x6da   : > { %8131 = vmatpush1.bf16.msra.mxu0 %v8130_v36  ;;  %v3805_v36 = vld [vmem:[#allocation11 + $0xcc8] sm:$0xff] }
 0x6db   : > { %8387 = vmatpush1.bf16.msra.mxu1 %v8386_v47  ;;  %8133 = vmatprep.subr.bf16.mxu0 %v8132_v50  ;;  %v3809_v47 = vld [vmem:[#allocation11 + $0xce8] sm:$0xff]  ;;  %v3807_v50 = vld [vmem:[#allocation11 + $0xcd8] sm:$0xff] }
 0x6dc   : > { %8389 = vmatprep.subr.bf16.mxu1 %v8388_v42  ;;  %v8152_v44 = vpack.c.bf16 %v3809_v47, %v3805_v36  ;;  %v3804_v42 = vld [vmem:[#allocation11 + $0xcc0] sm:$0xff]  ;;  %v3843_v36 = vld [vmem:[#allocation11 + $0xdf8] sm:$0xff]  ;;  %v8166_v47 = vpack.c.bf16 %v3832_v15, %v3828_v7  ;;  %v3869_v7 = vld [vmem:[#allocation11 + $0xec8] sm:$0xff] }
 0x6dd   : > { %v3873_v15 = vld [vmem:[#allocation11 + $0xee8] sm:$0xff] }
 0x6de   : > { %8135 = vmatpush1.bf16.msra.mxu0 %v8134_v28  ;;  %v3815_v28 = vld [vmem:[#allocation11 + $0xd18] sm:$0xff] }
 0x6df   : > { %8391 = vmatpush1.bf16.msra.mxu1 %v8390_v54  ;;  %8137 = vmatprep.subr.bf16.mxu0 %v8136_v29  ;;  %v3819_v54 = vld [vmem:[#allocation11 + $0xd38] sm:$0xff]  ;;  %v8154_v29 = vpack.c.bf16 %v3808_v22, %v3804_v42  ;;  %v8424_v42 = vpack.c.bf16 %v3843_v36, %v3839_v17  ;;  %v3842_v22 = vld [vmem:[#allocation11 + $0xdf0] sm:$0xff]  ;;  %v3872_v17 = vld [vmem:[#allocation11 + $0xee0] sm:$0xff] }
 0x6e0   : > { %8393 = vmatprep.subr.bf16.mxu1 %v8392_v33  ;;  %v3816_v33 = vld [vmem:[#allocation11 + $0xd20] sm:$0xff]  ;;  %v8412_v35 = vpack.c.bf16 %v3819_v54, %v3815_v28  ;;  %v3870_v36 = vld [vmem:[#allocation11 + $0xed0] sm:$0xff] }
 0x6e2   : > { %8139 = vmatpush1.bf16.msra.mxu0 %v8138_v41  ;;  %v3823_v41 = vld [vmem:[#allocation11 + $0xd58] sm:$0xff] }
 0x6e3   : > { %8395 = vmatpush1.bf16.msra.mxu1 %v8394_v45  ;;  %8141 = vmatprep.subr.bf16.mxu0 %v8140_v46  ;;  %v3827_v45 = vld [vmem:[#allocation11 + $0xd78] sm:$0xff]  ;;  %v8158_v46 = vpack.c.bf16 %v3816_v33, %v3812_v58  ;;  %v3850_v33 = vld [vmem:[#allocation11 + $0xe30] sm:$0xff] }
 0x6e4   : > { %8397 = vmatprep.subr.bf16.mxu1 %v8396_v48  ;;  %v8160_v48 = vpack.c.bf16 %v3825_v40, %v3821_v39  ;;  %v8416_v63 = vpack.c.bf16 %v3827_v45, %v3823_v41  ;;  %v3859_v39 = vld [vmem:[#allocation11 + $0xe78] sm:$0xff] }
 0x6e5   : > { %4137 = vmatmul.mubr.f32.vlgmr.msra.gmra.mrb[6].mxu0 %v11842_v43 }
 0x6e6   : > { %4421 = vmatmul.mubr.f32.vlgmr.msra.gmra.mrb[6].mxu1 %v11842_v43  ;;  %8143 = vmatpush1.bf16.msra.mxu0 %v8142_v55  ;;  %v3811_v43 = vld [vmem:[#allocation11 + $0xcf8] sm:$0xff]  ;;  %v3826_v55 = vld [vmem:[#allocation11 + $0xd70] sm:$0xff] }
 0x6e7   : > { %4207 = vmatprep.mubr.f32.mxu0 %v11844_v18  ;;  %8399 = vmatpush1.bf16.msra.mxu1 %v8398_v57  ;;  %v8408_v23 = vpack.c.bf16 %v3811_v43, %v3807_v50  ;;  %v2819_v57 = vrot.slane %v2806_v37, %v11783_v20  ;;  %v3856_v37 = vld [vmem:[#allocation11 + $0xe60] sm:$0xff] }
 0x6e8   : > { %4491 = vmatprep.mubr.f32.mxu1 %v11844_v18  ;;  %8145 = vmatprep.subr.bf16.mxu0 %v8144_v2  ;;  %v3810_v18 = vld [vmem:[#allocation11 + $0xcf0] sm:$0xff]  ;;  %v8418_v2 = vpack.c.bf16 %v3826_v55, %v3822_v52  ;;  %v3865_v52 = vld [vmem:[#allocation11 + $0xea8] sm:$0xff]  ;;  %v3867_v55 = vld [vmem:[#allocation11 + $0xeb8] sm:$0xff] }
 0x6e9   : > { %8401 = vmatprep.subr.bf16.mxu1 %v8400_v30  ;;  %v8410_v32 = vpack.c.bf16 %v3810_v18, %v3806_v6  ;;  %v3830_v30 = vld [vmem:[#allocation11 + $0xd90] sm:$0xff]  ;;  %v3845_v6 = vld [vmem:[#allocation11 + $0xe08] sm:$0xff]  ;;  %v3847_v18 = vld [vmem:[#allocation11 + $0xe18] sm:$0xff] }
 0x6ea   : > { %8147 = vmatpush1.bf16.msra.mxu0 %v8146_v21  ;;  %v8420_v21 = vpack.c.bf16 %v3835_v60, %v3831_v59  ;;  %v8428_v58 = vpack.c.bf16 %v3851_v24, %v3847_v18  ;;  %v3860_v59 = vld [vmem:[#allocation11 + $0xe80] sm:$0xff]  ;;  %v3878_v24 = vld [vmem:[#allocation11 + $0xf10] sm:$0xff] }
 0x6eb   : > { %8403 = vmatpush1.bf16.msra.mxu1 %v8402_v8  ;;  %8149 = vmatprep.subr.bf16.mxu0 %v8148_v9  ;;  %v3834_v8 = vld [vmem:[#allocation11 + $0xdb0] sm:$0xff]  ;;  %v3837_v9 = vld [vmem:[#allocation11 + $0xdc8] sm:$0xff]  ;;  %v3864_v60 = vld [vmem:[#allocation11 + $0xea0] sm:$0xff] }
 0x6ec   : > { %8405 = vmatprep.subr.bf16.mxu1 %v8404_v14  ;;  %v8422_v50 = vpack.c.bf16 %v3834_v8, %v3830_v30  ;;  %v8168_v43 = vpack.c.bf16 %v3841_v10, %v3837_v9  ;;  %v3871_v30 = vld [vmem:[#allocation11 + $0xed8] sm:$0xff]  ;;  %v8184_v9 = vpack.c.bf16 %v3873_v15, %v3869_v7  ;;  %v3868_v10 = vld [vmem:[#allocation11 + $0xec0] sm:$0xff] }
 0x6ed   : > { %v3880_v18 = vld [vmem:[#allocation11 + $0xf20] sm:$0xff] }
 0x6ee   : > { %8151 = vmatpush1.bf16.msra.mxu0 %v8150_v31  ;;  %v3836_v31 = vld [vmem:[#allocation11 + $0xdc0] sm:$0xff] }
 0x6ef   : > { %8407 = vmatpush1.bf16.msra.mxu1 %v8406_v19  ;;  %8153 = vmatprep.subr.bf16.mxu0 %v8152_v44  ;;  %v3840_v19 = vld [vmem:[#allocation11 + $0xde0] sm:$0xff]  ;;  %v3838_v44 = vld [vmem:[#allocation11 + $0xdd0] sm:$0xff] }
 0x6f0   : > { %8409 = vmatprep.subr.bf16.mxu1 %v8408_v23  ;;  %v3849_v23 = vld [vmem:[#allocation11 + $0xe28] sm:$0xff]  ;;  %v8170_v25 = vpack.c.bf16 %v3840_v19, %v3836_v31  ;;  %v8426_v28 = vpack.c.bf16 %v3842_v22, %v3838_v44  ;;  %v3879_v19 = vld [vmem:[#allocation11 + $0xf18] sm:$0xff]  ;;  %v3900_v15 = vld [vmem:[#allocation11 + $0xfc0] sm:$0xff] }
 0x6f1   : > { %v8172_v54 = vpack.c.bf16 %v3849_v23, %v3845_v6  ;;  %v3881_v31 = vld [vmem:[#allocation11 + $0xf28] sm:$0xff]  ;;  %v3883_v44 = vld [vmem:[#allocation11 + $0xf38] sm:$0xff]  ;;  %v3876_v23 = vld [vmem:[#allocation11 + $0xf00] sm:$0xff] }
 0x6f2   : > { %8155 = vmatpush1.bf16.msra.mxu0 %v8154_v29  ;;  %v3844_v29 = vld [vmem:[#allocation11 + $0xe00] sm:$0xff] }
 0x6f3   : > { %8411 = vmatpush1.bf16.msra.mxu1 %v8410_v32  ;;  %8157 = vmatprep.subr.bf16.mxu0 %v8156_v26  ;;  %v3848_v32 = vld [vmem:[#allocation11 + $0xe20] sm:$0xff]  ;;  %v3846_v26 = vld [vmem:[#allocation11 + $0xe10] sm:$0xff] }
 0x6f4   : > { %8413 = vmatprep.subr.bf16.mxu1 %v8412_v35  ;;  %v3857_v35 = vld [vmem:[#allocation11 + $0xe68] sm:$0xff]  ;;  %v8174_v40 = vpack.c.bf16 %v3848_v32, %v3844_v29  ;;  %v8430_v41 = vpack.c.bf16 %v3850_v33, %v3846_v26  ;;  %v3887_v32 = vld [vmem:[#allocation11 + $0xf58] sm:$0xff] }
 0x6f5   : > { %v8176_v45 = vpack.c.bf16 %v3857_v35, %v3853_v34  ;;  %v3889_v29 = vld [vmem:[#allocation11 + $0xf68] sm:$0xff]  ;;  %v3891_v26 = vld [vmem:[#allocation11 + $0xf78] sm:$0xff]  ;;  %v3884_v35 = vld [vmem:[#allocation11 + $0xf40] sm:$0xff] }
 0x6f6   : > { %8159 = vmatpush1.bf16.msra.mxu0 %v8158_v46  ;;  %v3852_v46 = vld [vmem:[#allocation11 + $0xe40] sm:$0xff] }
 0x6f7   : > { %8415 = vmatpush1.bf16.msra.mxu1 %v8414_v5  ;;  %8161 = vmatprep.subr.bf16.mxu0 %v8160_v48  ;;  %v3854_v5 = vld [vmem:[#allocation11 + $0xe50] sm:$0xff]  ;;  %v8432_v48 = vpack.c.bf16 %v3859_v39, %v3855_v38  ;;  %v8178_v53 = vpack.c.bf16 %v3856_v37, %v3852_v46  ;;  %v3888_v38 = vld [vmem:[#allocation11 + $0xf60] sm:$0xff]  ;;  %v3897_v46 = vld [vmem:[#allocation11 + $0xfa8] sm:$0xff] }
 0x6f8   : > { %v11879_v61 = vpop.f32.mrb[4].mxu0  ;;  %v3391_v12 = vpop.f32.mrb[4].mxu1  ;;  %8417 = vmatprep.subr.bf16.mxu1 %v8416_v63  ;;  %v3863_v63 = vld [vmem:[#allocation11 + $0xe98] sm:$0xff]  ;;  %v8434_v56 = vpack.c.bf16 %v3858_v49, %v3854_v5  ;;  %v3886_v39 = vld [vmem:[#allocation11 + $0xf50] sm:$0xff] }
 0x6f9   : > { %v11881_v11 = vadd.f32 %v3391_v12, %v2819_v57  ;;  %v11883_v13 = vpop.f32.mrb[5].mxu0  ;;  %v11885_v14 = vpop.f32.mrb[5].mxu1  ;;  %v8180_v57 = vpack.c.bf16 %v3865_v52, %v3861_v51  ;;  %v3875_v12 = vld [vmem:[#allocation11 + $0xef8] sm:$0xff]  ;;  %v3892_v52 = vld [vmem:[#allocation11 + $0xf80] sm:$0xff] }
 0x6fa   : > { %8163 = vmatpush1.bf16.msra.mxu0 %v8162_v27  ;;  %v3862_v27 = vld [vmem:[#allocation11 + $0xe90] sm:$0xff]  ;;  %v3895_v37 = vld [vmem:[#allocation11 + $0xf98] sm:$0xff] }
 0x6fb   : > { %8419 = vmatpush1.bf16.msra.mxu1 %v8418_v2  ;;  %8165 = vmatprep.subr.bf16.mxu0 %v8164_v4  ;;  %v8436_v2 = vpack.c.bf16 %v3867_v55, %v3863_v63  ;;  %v3866_v4 = vld [vmem:[#allocation11 + $0xeb0] sm:$0xff]  ;;  %v3899_v5 = vld [vmem:[#allocation11 + $0xfb8] sm:$0xff]  ;;  %v3896_v63 = vld [vmem:[#allocation11 + $0xfa0] sm:$0xff] }
 0x6fc   : > { %8421 = vmatprep.subr.bf16.mxu1 %v8420_v21  ;;  %v8182_v21 = vpack.c.bf16 %v3864_v60, %v3860_v59  ;;  %v8438_v8 = vpack.c.bf16 %v3866_v4, %v3862_v27  ;;  %v3894_v55 = vld [vmem:[#allocation11 + $0xf90] sm:$0xff]  ;;  %v3905_v59 = vld [vmem:[#allocation11 + $0xfe8] sm:$0xff]  ;;  %v3903_v60 = vld [vmem:[#allocation11 + $0xfd8] sm:$0xff] }
 0x6fd   : > { %v3907_v27 = vld [vmem:[#allocation11 + $0xff8] sm:$0xff] }
 0x6fe   : > { %8167 = vmatpush1.bf16.msra.mxu0 %v8166_v47  ;;  %v8440_v47 = vpack.c.bf16 %v3875_v12, %v3871_v30  ;;  %v3904_v30 = vld [vmem:[#allocation11 + $0xfe0] sm:$0xff]  ;;  %v3902_v12 = vld [vmem:[#allocation11 + $0xfd0] sm:$0xff] }
 0x6ff   : > { %8423 = vmatpush1.bf16.msra.mxu1 %v8422_v50  ;;  %8169 = vmatprep.subr.bf16.mxu0 %v8168_v43  ;;  %v3874_v50 = vld [vmem:[#allocation11 + $0xef0] sm:$0xff]  ;;  %v3877_v43 = vld [vmem:[#allocation11 + $0xf08] sm:$0xff] }
 0x700   : > { %8425 = vmatprep.subr.bf16.mxu1 %v8424_v42  ;;  %v8186_v42 = vpack.c.bf16 %v3872_v17, %v3868_v10  ;;  %v8442_v22 = vpack.c.bf16 %v3874_v50, %v3870_v36  ;;  %v8188_v6 = vpack.c.bf16 %v3881_v31, %v3877_v43  ;;  %v4567_v10 = vld [vmem:[#allocation17 + $0x28] sm:$0xff]  ;;  %v4565_v17 = vld [vmem:[#allocation17 + $0x18] sm:$0xff]  ;;  %v4562_v31 = vld [vmem:[#allocation17] sm:$0xff] }
 0x701   : > { %v4569_v36 = vld [vmem:[#allocation17 + $0x38] sm:$0xff] }
 0x702   : > { %8171 = vmatpush1.bf16.msra.mxu0 %v8170_v25  ;;  %v8444_v25 = vpack.c.bf16 %v3883_v44, %v3879_v19  ;;  %v4566_v19 = vld [vmem:[#allocation17 + $0x20] sm:$0xff]  ;;  %v4564_v44 = vld [vmem:[#allocation17 + $0x10] sm:$0xff] }
 0x703   : > { %8427 = vmatpush1.bf16.msra.mxu1 %v8426_v28  ;;  %8173 = vmatprep.subr.bf16.mxu0 %v8172_v54  ;;  %v3882_v28 = vld [vmem:[#allocation11 + $0xf30] sm:$0xff]  ;;  %v3885_v54 = vld [vmem:[#allocation11 + $0xf48] sm:$0xff] }
 0x704   : > { %8429 = vmatprep.subr.bf16.mxu1 %v8428_v58  ;;  %v8190_v58 = vpack.c.bf16 %v3880_v18, %v3876_v23  ;;  %v8446_v33 = vpack.c.bf16 %v3882_v28, %v3878_v24  ;;  %v8192_v34 = vpack.c.bf16 %v3889_v29, %v3885_v54  ;;  %v4575_v23 = vld [vmem:[#allocation17 + $0x68] sm:$0xff]  ;;  %v4573_v18 = vld [vmem:[#allocation17 + $0x58] sm:$0xff]  ;;  %v4570_v29 = vld [vmem:[#allocation17 + $0x40] sm:$0xff] }
 0x705   : > { %v4577_v24 = vld [vmem:[#allocation17 + $0x78] sm:$0xff] }
 0x706   : > { %8175 = vmatpush1.bf16.msra.mxu0 %v8174_v40  ;;  %v8448_v40 = vpack.c.bf16 %v3891_v26, %v3887_v32  ;;  %v4574_v32 = vld [vmem:[#allocation17 + $0x60] sm:$0xff]  ;;  %v4572_v26 = vld [vmem:[#allocation17 + $0x50] sm:$0xff] }
 0x707   : > { %8431 = vmatpush1.bf16.msra.mxu1 %v8430_v41  ;;  %8177 = vmatprep.subr.bf16.mxu0 %v8176_v45  ;;  %v3890_v41 = vld [vmem:[#allocation11 + $0xf70] sm:$0xff]  ;;  %v3893_v45 = vld [vmem:[#allocation11 + $0xf88] sm:$0xff] }
 0x708   : > { %8433 = vmatprep.subr.bf16.mxu1 %v8432_v48  ;;  %v8194_v48 = vpack.c.bf16 %v3888_v38, %v3884_v35  ;;  %v8450_v49 = vpack.c.bf16 %v3890_v41, %v3886_v39  ;;  %v8196_v51 = vpack.c.bf16 %v3897_v46, %v3893_v45  ;;  %v4583_v35 = vld [vmem:[#allocation17 + $0xa8] sm:$0xff]  ;;  %v4581_v38 = vld [vmem:[#allocation17 + $0x98] sm:$0xff]  ;;  %v4578_v46 = vld [vmem:[#allocation17 + $0x80] sm:$0xff] }
 0x709   : > { %v4585_v39 = vld [vmem:[#allocation17 + $0xb8] sm:$0xff] }
 0x70a   : > { %8179 = vmatpush1.bf16.msra.mxu0 %v8178_v53  ;;  %v8452_v53 = vpack.c.bf16 %v3899_v5, %v3895_v37  ;;  %v4582_v37 = vld [vmem:[#allocation17 + $0xa0] sm:$0xff]  ;;  %v4580_v5 = vld [vmem:[#allocation17 + $0x90] sm:$0xff] }
 0x70b   : > { %8435 = vmatpush1.bf16.msra.mxu1 %v8434_v56  ;;  %8181 = vmatprep.subr.bf16.mxu0 %v8180_v57  ;;  %v3898_v56 = vld [vmem:[#allocation11 + $0xfb0] sm:$0xff]  ;;  %v3901_v57 = vld [vmem:[#allocation11 + $0xfc8] sm:$0xff] }
 0x70c   : > { %8437 = vmatprep.subr.bf16.mxu1 %v8436_v2  ;;  %v8198_v2 = vpack.c.bf16 %v3896_v63, %v3892_v52  ;;  %v8454_v4 = vpack.c.bf16 %v3898_v56, %v3894_v55  ;;  %v8200_v7 = vpack.c.bf16 %v3905_v59, %v3901_v57  ;;  %v4591_v52 = vld [vmem:[#allocation17 + $0xe8] sm:$0xff]  ;;  %v4589_v63 = vld [vmem:[#allocation17 + $0xd8] sm:$0xff]  ;;  %v4586_v57 = vld [vmem:[#allocation17 + $0xc0] sm:$0xff] }
 0x70d   : > { %v4593_v55 = vld [vmem:[#allocation17 + $0xf8] sm:$0xff]  ;;  %v4590_v59 = vld [vmem:[#allocation17 + $0xe0] sm:$0xff] }
 0x70e   : > { %8183 = vmatpush1.bf16.msra.mxu0 %v8182_v21  ;;  %v8456_v21 = vpack.c.bf16 %v3907_v27, %v3903_v60  ;;  %v4588_v60 = vld [vmem:[#allocation17 + $0xd0] sm:$0xff]  ;;  %v8600_v27 = vpack.c.bf16 %v4593_v55, %v4589_v63 }
 0x70f   : > { %8439 = vmatpush1.bf16.msra.mxu1 %v8438_v8  ;;  %8185 = vmatprep.subr.bf16.mxu0 %v8184_v9  ;;  %v3906_v8 = vld [vmem:[#allocation11 + $0xff0] sm:$0xff]  ;;  %v4620_v63 = vld [vmem:[#allocation17 + $0x1d0] sm:$0xff] }
 0x710   : > { %8441 = vmatprep.subr.bf16.mxu1 %v8440_v47  ;;  %v4563_v9 = vld [vmem:[#allocation17 + $0x8] sm:$0xff]  ;;  %v8202_v47 = vpack.c.bf16 %v3904_v30, %v3900_v15  ;;  %v8458_v50 = vpack.c.bf16 %v3906_v8, %v3902_v12  ;;  %v4597_v15 = vld [vmem:[#allocation17 + $0x118] sm:$0xff]  ;;  %v8474_v12 = vpack.c.bf16 %v4590_v59, %v4586_v57 }
 0x711   : > { %v8460_v43 = vpack.c.bf16 %v4567_v10, %v4563_v9  ;;  %v4601_v30 = vld [vmem:[#allocation17 + $0x138] sm:$0xff]  ;;  %v4594_v9 = vld [vmem:[#allocation17 + $0x100] sm:$0xff] }
 0x712   : > { %8187 = vmatpush1.bf16.msra.mxu0 %v8186_v42  ;;  %v8588_v42 = vpack.c.bf16 %v4569_v36, %v4565_v17  ;;  %v4598_v10 = vld [vmem:[#allocation17 + $0x120] sm:$0xff]  ;;  %v4596_v17 = vld [vmem:[#allocation17 + $0x110] sm:$0xff]  ;;  %v8604_v36 = vpack.c.bf16 %v4601_v30, %v4597_v15  ;;  %v4629_v57 = vld [vmem:[#allocation17 + $0x218] sm:$0xff] }
 0x713   : > { %8443 = vmatpush1.bf16.msra.mxu1 %v8442_v22  ;;  %8189 = vmatprep.subr.bf16.mxu0 %v8188_v6  ;;  %v4568_v22 = vld [vmem:[#allocation17 + $0x30] sm:$0xff]  ;;  %v4571_v6 = vld [vmem:[#allocation17 + $0x48] sm:$0xff]  ;;  %v4633_v59 = vld [vmem:[#allocation17 + $0x238] sm:$0xff] }
 0x714   : > { %8445 = vmatprep.subr.bf16.mxu1 %v8444_v25  ;;  %v8462_v25 = vpack.c.bf16 %v4566_v19, %v4562_v31  ;;  %v8590_v28 = vpack.c.bf16 %v4568_v22, %v4564_v44  ;;  %v8464_v54 = vpack.c.bf16 %v4575_v23, %v4571_v6  ;;  %v4605_v31 = vld [vmem:[#allocation17 + $0x158] sm:$0xff]  ;;  %v8478_v44 = vpack.c.bf16 %v4598_v10, %v4594_v9  ;;  %v4602_v6 = vld [vmem:[#allocation17 + $0x140] sm:$0xff]  ;;  %v4628_v15 = vld [vmem:[#allocation17 + $0x210] sm:$0xff] }
 0x715   : > { %v4609_v19 = vld [vmem:[#allocation17 + $0x178] sm:$0xff]  ;;  %v4606_v23 = vld [vmem:[#allocation17 + $0x160] sm:$0xff]  ;;  %v8620_v30 = vpack.c.bf16 %v4633_v59, %v4629_v57  ;;  %v4660_v57 = vld [vmem:[#allocation17 + $0x310] sm:$0xff] }
 0x716   : > { %8191 = vmatpush1.bf16.msra.mxu0 %v8190_v58  ;;  %v8592_v58 = vpack.c.bf16 %v4577_v24, %v4573_v18  ;;  %v4604_v18 = vld [vmem:[#allocation17 + $0x150] sm:$0xff]  ;;  %v8608_v24 = vpack.c.bf16 %v4609_v19, %v4605_v31  ;;  %v4637_v9 = vld [vmem:[#allocation17 + $0x258] sm:$0xff] }
 0x717   : > { %8447 = vmatpush1.bf16.msra.mxu1 %v8446_v33  ;;  %8193 = vmatprep.subr.bf16.mxu0 %v8192_v34  ;;  %v4576_v33 = vld [vmem:[#allocation17 + $0x70] sm:$0xff]  ;;  %v4579_v34 = vld [vmem:[#allocation17 + $0x88] sm:$0xff]  ;;  %v4641_v10 = vld [vmem:[#allocation17 + $0x278] sm:$0xff] }
 0x718   : > { %8449 = vmatprep.subr.bf16.mxu1 %v8448_v40  ;;  %v8466_v40 = vpack.c.bf16 %v4574_v32, %v4570_v29  ;;  %v8594_v41 = vpack.c.bf16 %v4576_v33, %v4572_v26  ;;  %v8468_v45 = vpack.c.bf16 %v4583_v35, %v4579_v34  ;;  %v4613_v29 = vld [vmem:[#allocation17 + $0x198] sm:$0xff]  ;;  %v8482_v26 = vpack.c.bf16 %v4606_v23, %v4602_v6  ;;  %v4610_v34 = vld [vmem:[#allocation17 + $0x180] sm:$0xff]  ;;  %v4636_v31 = vld [vmem:[#allocation17 + $0x250] sm:$0xff] }
 0x719   : > { %v4617_v32 = vld [vmem:[#allocation17 + $0x1b8] sm:$0xff]  ;;  %v4614_v35 = vld [vmem:[#allocation17 + $0x1a0] sm:$0xff]  ;;  %v8624_v19 = vpack.c.bf16 %v4641_v10, %v4637_v9  ;;  %v4668_v10 = vld [vmem:[#allocation17 + $0x350] sm:$0xff] }
 0x71a   : > { %8195 = vmatpush1.bf16.msra.mxu0 %v8194_v48  ;;  %v8596_v48 = vpack.c.bf16 %v4585_v39, %v4581_v38  ;;  %v4612_v38 = vld [vmem:[#allocation17 + $0x190] sm:$0xff]  ;;  %v8612_v39 = vpack.c.bf16 %v4617_v32, %v4613_v29  ;;  %v4645_v6 = vld [vmem:[#allocation17 + $0x298] sm:$0xff]  ;;  %v4670_v9 = vld [vmem:[#allocation17 + $0x360] sm:$0xff] }
 0x71b   : > { %8451 = vmatpush1.bf16.msra.mxu1 %v8450_v49  ;;  %8197 = vmatprep.subr.bf16.mxu0 %v8196_v51  ;;  %v4584_v49 = vld [vmem:[#allocation17 + $0xb0] sm:$0xff]  ;;  %v4587_v51 = vld [vmem:[#allocation17 + $0xc8] sm:$0xff]  ;;  %v4649_v23 = vld [vmem:[#allocation17 + $0x2b8] sm:$0xff] }
 0x71c   : > { %8453 = vmatprep.subr.bf16.mxu1 %v8452_v53  ;;  %v8470_v53 = vpack.c.bf16 %v4582_v37, %v4578_v46  ;;  %v8472_v56 = vpack.c.bf16 %v4591_v52, %v4587_v51  ;;  %v4621_v46 = vld [vmem:[#allocation17 + $0x1d8] sm:$0xff]  ;;  %v4618_v51 = vld [vmem:[#allocation17 + $0x1c0] sm:$0xff]  ;;  %v4644_v29 = vld [vmem:[#allocation17 + $0x290] sm:$0xff]  ;;  %v8628_v32 = vpack.c.bf16 %v4649_v23, %v4645_v6 }
 0x71d   : > { %v4625_v37 = vld [vmem:[#allocation17 + $0x1f8] sm:$0xff]  ;;  %v4622_v52 = vld [vmem:[#allocation17 + $0x1e0] sm:$0xff]  ;;  %v4676_v23 = vld [vmem:[#allocation17 + $0x390] sm:$0xff] }
 0x71e   : > { %8199 = vmatpush1.bf16.msra.mxu0 %v8198_v2  ;;  %v4592_v2 = vld [vmem:[#allocation17 + $0xf0] sm:$0xff]  ;;  %v8616_v55 = vpack.c.bf16 %v4625_v37, %v4621_v46  ;;  %v4678_v6 = vld [vmem:[#allocation17 + $0x3a0] sm:$0xff] }
 0x71f   : > { %8455 = vmatpush1.bf16.msra.mxu1 %v8454_v4  ;;  %8201 = vmatprep.subr.bf16.mxu0 %v8200_v7  ;;  %v4595_v4 = vld [vmem:[#allocation17 + $0x108] sm:$0xff]  ;;  %v4652_v46 = vld [vmem:[#allocation17 + $0x2d0] sm:$0xff] }
 0x720   : > { %8457 = vmatprep.subr.bf16.mxu1 %v8456_v21  ;;  %v4599_v7 = vld [vmem:[#allocation17 + $0x128] sm:$0xff]  ;;  %v8602_v21 = vpack.c.bf16 %v4592_v2, %v4588_v60  ;;  %v8490_v60 = vpack.c.bf16 %v4622_v52, %v4618_v51  ;;  %v4661_v51 = vld [vmem:[#allocation17 + $0x318] sm:$0xff] }
 0x721   : > { %v8476_v8 = vpack.c.bf16 %v4599_v7, %v4595_v4  ;;  %v4626_v4 = vld [vmem:[#allocation17 + $0x200] sm:$0xff]  ;;  %v4665_v52 = vld [vmem:[#allocation17 + $0x338] sm:$0xff] }
 0x722   : > { %8203 = vmatpush1.bf16.msra.mxu0 %v8202_v47  ;;  %v4600_v47 = vld [vmem:[#allocation17 + $0x130] sm:$0xff]  ;;  %v4630_v7 = vld [vmem:[#allocation17 + $0x220] sm:$0xff]  ;;  %v8636_v59 = vpack.c.bf16 %v4665_v52, %v4661_v51  ;;  %v4498_v51 = vld [vmem:[#allocation14] sm:$0xf] }
 0x723   : > { %8459 = vmatpush1.bf16.msra.mxu1 %v8458_v50  ;;  %8461 = vmatprep.subr.bf16.mxu0 %v8460_v43  ;;  %v4603_v50 = vld [vmem:[#allocation17 + $0x148] sm:$0xff] }
 0x724   : > { %8589 = vmatprep.subr.bf16.mxu1 %v8588_v42  ;;  %v4607_v43 = vld [vmem:[#allocation17 + $0x168] sm:$0xff]  ;;  %v8606_v42 = vpack.c.bf16 %v4600_v47, %v4596_v17  ;;  %v8494_v17 = vpack.c.bf16 %v4630_v7, %v4626_v4  ;;  %v4669_v4 = vld [vmem:[#allocation17 + $0x358] sm:$0xff] }
 0x725   : > { %4208 = vmatmul.mubr.f32.vlgmr.msra.gmra.mrb[6].mxu0 %v11860_v16  ;;  %v8480_v22 = vpack.c.bf16 %v4607_v43, %v4603_v50  ;;  %v4634_v50 = vld [vmem:[#allocation17 + $0x240] sm:$0xff]  ;;  %v4673_v7 = vld [vmem:[#allocation17 + $0x378] sm:$0xff] }
 0x726   : > { %4492 = vmatmul.mubr.f32.vlgmr.msra.gmra.mrb[6].mxu1 %v11860_v16  ;;  %8463 = vmatpush1.bf16.msra.mxu0 %v8462_v25  ;;  %v8598_v16 = vpack.c.bf16 %v4584_v49, %v4580_v5  ;;  %v4608_v25 = vld [vmem:[#allocation17 + $0x170] sm:$0xff]  ;;  %v8486_v5 = vpack.c.bf16 %v4614_v35, %v4610_v34  ;;  %v4638_v43 = vld [vmem:[#allocation17 + $0x260] sm:$0xff]  ;;  %v4653_v34 = vld [vmem:[#allocation17 + $0x2d8] sm:$0xff] }
 0x727   : > { %8591 = vmatpush1.bf16.msra.mxu1 %v8590_v28  ;;  %8465 = vmatprep.subr.bf16.mxu0 %v8464_v54  ;;  %v4611_v28 = vld [vmem:[#allocation17 + $0x188] sm:$0xff]  ;;  %v4657_v35 = vld [vmem:[#allocation17 + $0x2f8] sm:$0xff] }
 0x728   : > { %8593 = vmatprep.subr.bf16.mxu1 %v8592_v58  ;;  %v4615_v54 = vld [vmem:[#allocation17 + $0x1a8] sm:$0xff]  ;;  %v8610_v58 = vpack.c.bf16 %v4608_v25, %v4604_v18  ;;  %v8498_v18 = vpack.c.bf16 %v4638_v43, %v4634_v50  ;;  %v8632_v37 = vpack.c.bf16 %v4657_v35, %v4653_v34 }
 0x729   : > { %v8484_v33 = vpack.c.bf16 %v4615_v54, %v4611_v28  ;;  %v4642_v28 = vld [vmem:[#allocation17 + $0x280] sm:$0xff]  ;;  %v4675_v50 = vld [vmem:[#allocation17 + $0x388] sm:$0xff] }
 0x72a   : > { %8467 = vmatpush1.bf16.msra.mxu0 %v8466_v40  ;;  %v4616_v40 = vld [vmem:[#allocation17 + $0x1b0] sm:$0xff]  ;;  %v4646_v54 = vld [vmem:[#allocation17 + $0x2a0] sm:$0xff]  ;;  %v4679_v43 = vld [vmem:[#allocation17 + $0x3a8] sm:$0xff] }
 0x72b   : > { %8595 = vmatpush1.bf16.msra.mxu1 %v8594_v41  ;;  %8469 = vmatprep.subr.bf16.mxu0 %v8468_v45  ;;  %v4619_v41 = vld [vmem:[#allocation17 + $0x1c8] sm:$0xff] }
 0x72c   : > { %8597 = vmatprep.subr.bf16.mxu1 %v8596_v48  ;;  %v4623_v45 = vld [vmem:[#allocation17 + $0x1e8] sm:$0xff]  ;;  %v8614_v48 = vpack.c.bf16 %v4616_v40, %v4612_v38  ;;  %v8502_v38 = vpack.c.bf16 %v4646_v54, %v4642_v28 }
 0x72d   : > { %v8488_v49 = vpack.c.bf16 %v4623_v45, %v4619_v41  ;;  %v4650_v41 = vld [vmem:[#allocation17 + $0x2c0] sm:$0xff]  ;;  %v4683_v28 = vld [vmem:[#allocation17 + $0x3c8] sm:$0xff] }
 0x72e   : > { %8471 = vmatpush1.bf16.msra.mxu0 %v8470_v53  ;;  %v4624_v53 = vld [vmem:[#allocation17 + $0x1f0] sm:$0xff]  ;;  %v4654_v45 = vld [vmem:[#allocation17 + $0x2e0] sm:$0xff]  ;;  %v4687_v54 = vld [vmem:[#allocation17 + $0x3e8] sm:$0xff] }
 0x72f   : > { %8599 = vmatpush1.bf16.msra.mxu1 %v8598_v16  ;;  %8473 = vmatprep.subr.bf16.mxu0 %v8472_v56  ;;  %v4627_v16 = vld [vmem:[#allocation17 + $0x208] sm:$0xff] }
 0x730   : > { %8601 = vmatprep.subr.bf16.mxu1 %v8600_v27  ;;  %v4631_v56 = vld [vmem:[#allocation17 + $0x228] sm:$0xff]  ;;  %v8618_v27 = vpack.c.bf16 %v4624_v53, %v4620_v63  ;;  %v8506_v63 = vpack.c.bf16 %v4654_v45, %v4650_v41 }
 0x731   : > { %v8492_v2 = vpack.c.bf16 %v4631_v56, %v4627_v16  ;;  %v4658_v16 = vld [vmem:[#allocation17 + $0x300] sm:$0xff]  ;;  %v4691_v41 = vld [vmem:[#allocation17 + $0x408] sm:$0xff] }
 0x732   : > { %8475 = vmatpush1.bf16.msra.mxu0 %v8474_v12  ;;  %v4632_v12 = vld [vmem:[#allocation17 + $0x230] sm:$0xff]  ;;  %v4662_v56 = vld [vmem:[#allocation17 + $0x320] sm:$0xff]  ;;  %v4695_v45 = vld [vmem:[#allocation17 + $0x428] sm:$0xff] }
 0x733   : > { %8603 = vmatpush1.bf16.msra.mxu1 %v8602_v21  ;;  %8477 = vmatprep.subr.bf16.mxu0 %v8476_v8  ;;  %v4635_v21 = vld [vmem:[#allocation17 + $0x248] sm:$0xff] }
 0x734   : > { %8605 = vmatprep.subr.bf16.mxu1 %v8604_v36  ;;  %v4639_v8 = vld [vmem:[#allocation17 + $0x268] sm:$0xff]  ;;  %v8622_v36 = vpack.c.bf16 %v4632_v12, %v4628_v15  ;;  %v8510_v15 = vpack.c.bf16 %v4662_v56, %v4658_v16  ;;  %v4503_v16 = vrot.slane %v4498_v51, %v11732_v62 }
 0x735   : > { %v8496_v47 = vpack.c.bf16 %v4639_v8, %v4635_v21  ;;  %v8640_v21 = vpack.c.bf16 %v4673_v7, %v4669_v4  ;;  %v4666_v8 = vld [vmem:[#allocation17 + $0x340] sm:$0xff] }
 0x736   : > { %8479 = vmatpush1.bf16.msra.mxu0 %v8478_v44  ;;  %v4640_v44 = vld [vmem:[#allocation17 + $0x270] sm:$0xff] }
 0x737   : > { %8607 = vmatpush1.bf16.msra.mxu1 %v8606_v42  ;;  %8481 = vmatprep.subr.bf16.mxu0 %v8480_v22  ;;  %v4643_v42 = vld [vmem:[#allocation17 + $0x288] sm:$0xff] }
 0x738   : > { %8609 = vmatprep.subr.bf16.mxu1 %v8608_v24  ;;  %v4647_v22 = vld [vmem:[#allocation17 + $0x2a8] sm:$0xff]  ;;  %v8626_v24 = vpack.c.bf16 %v4640_v44, %v4636_v31  ;;  %v4677_v31 = vld [vmem:[#allocation17 + $0x398] sm:$0xff] }
 0x739   : > { %v8500_v25 = vpack.c.bf16 %v4647_v22, %v4643_v42  ;;  %v4681_v44 = vld [vmem:[#allocation17 + $0x3b8] sm:$0xff]  ;;  %v4674_v42 = vld [vmem:[#allocation17 + $0x380] sm:$0xff] }
 0x73a   : > { %8483 = vmatpush1.bf16.msra.mxu0 %v8482_v26  ;;  %v4648_v26 = vld [vmem:[#allocation17 + $0x2b0] sm:$0xff]  ;;  %v8644_v22 = vpack.c.bf16 %v4681_v44, %v4677_v31 }
 0x73b   : > { %8611 = vmatpush1.bf16.msra.mxu1 %v8610_v58  ;;  %8485 = vmatprep.subr.bf16.mxu0 %v8484_v33  ;;  %v4651_v58 = vld [vmem:[#allocation17 + $0x2c8] sm:$0xff] }
 0x73c   : > { %8613 = vmatprep.subr.bf16.mxu1 %v8612_v39  ;;  %v4655_v33 = vld [vmem:[#allocation17 + $0x2e8] sm:$0xff]  ;;  %v8630_v39 = vpack.c.bf16 %v4648_v26, %v4644_v29  ;;  %v4685_v29 = vld [vmem:[#allocation17 + $0x3d8] sm:$0xff] }
 0x73d   : > { %v8504_v40 = vpack.c.bf16 %v4655_v33, %v4651_v58  ;;  %v4689_v26 = vld [vmem:[#allocation17 + $0x3f8] sm:$0xff]  ;;  %v4682_v58 = vld [vmem:[#allocation17 + $0x3c0] sm:$0xff] }
 0x73e   : > { %8487 = vmatpush1.bf16.msra.mxu0 %v8486_v5  ;;  %v4656_v5 = vld [vmem:[#allocation17 + $0x2f0] sm:$0xff]  ;;  %v4686_v33 = vld [vmem:[#allocation17 + $0x3e0] sm:$0xff]  ;;  %v8648_v34 = vpack.c.bf16 %v4689_v26, %v4685_v29  ;;  %v4701_v29 = vld [vmem:[#allocation17 + $0x458] sm:$0xff] }
 0x73f   : > { %8615 = vmatpush1.bf16.msra.mxu1 %v8614_v48  ;;  %8489 = vmatprep.subr.bf16.mxu0 %v8488_v49  ;;  %v4659_v48 = vld [vmem:[#allocation17 + $0x308] sm:$0xff]  ;;  %v8522_v35 = vpack.c.bf16 %v4686_v33, %v4682_v58 }
 0x740   : > { %8617 = vmatprep.subr.bf16.mxu1 %v8616_v55  ;;  %v4663_v49 = vld [vmem:[#allocation17 + $0x328] sm:$0xff]  ;;  %v8634_v55 = vpack.c.bf16 %v4656_v5, %v4652_v46  ;;  %v4693_v46 = vld [vmem:[#allocation17 + $0x418] sm:$0xff] }
 0x741   : > { %v8508_v53 = vpack.c.bf16 %v4663_v49, %v4659_v48  ;;  %v4697_v5 = vld [vmem:[#allocation17 + $0x438] sm:$0xff]  ;;  %v3908_v49 = vld [vmem:[#allocation13] sm:$0xf] }
 0x742   : > { %8491 = vmatpush1.bf16.msra.mxu0 %v8490_v60  ;;  %v4664_v60 = vld [vmem:[#allocation17 + $0x330] sm:$0xff]  ;;  %v8652_v48 = vpack.c.bf16 %v4697_v5, %v4693_v46  ;;  %v3913_v52 = vrot.slane %v3908_v49, %v11732_v62  ;;  %v3925_v56 = vrot.slane %v3908_v49, %v11742_v3  ;;  %v4711_v5 = vld [vmem:[#allocation17 + $0x4a8] sm:$0xff] }
 0x743   : > { %8619 = vmatpush1.bf16.msra.mxu1 %v8618_v27  ;;  %8493 = vmatprep.subr.bf16.mxu0 %v8492_v2  ;;  %v4667_v27 = vld [vmem:[#allocation17 + $0x348] sm:$0xff] }
 0x744   : > { %8621 = vmatprep.subr.bf16.mxu1 %v8620_v30  ;;  %v4671_v2 = vld [vmem:[#allocation17 + $0x368] sm:$0xff]  ;;  %v8638_v30 = vpack.c.bf16 %v4664_v60, %v4660_v57  ;;  %v4507_v60 = vrot.slane %v4498_v51, %v11737_v0 }
 0x745   : > { %v8512_v12 = vpack.c.bf16 %v4671_v2, %v4667_v27 }
 0x746   : > { %8495 = vmatpush1.bf16.msra.mxu0 %v8494_v17  ;;  %v8514_v17 = vpack.c.bf16 %v4670_v9, %v4666_v8 }
 0x747   : > { %8623 = vmatpush1.bf16.msra.mxu1 %v8622_v36  ;;  %8497 = vmatprep.subr.bf16.mxu0 %v8496_v47  ;;  %v4672_v36 = vld [vmem:[#allocation17 + $0x370] sm:$0xff] }
 0x748   : > { %8625 = vmatprep.subr.bf16.mxu1 %v8624_v19  ;;  %v8642_v47 = vpack.c.bf16 %v4672_v36, %v4668_v10  ;;  %v8516_v19 = vpack.c.bf16 %v4679_v43, %v4675_v50 }
 0x74a   : > { %8499 = vmatpush1.bf16.msra.mxu0 %v8498_v18  ;;  %v4680_v18 = vld [vmem:[#allocation17 + $0x3b0] sm:$0xff] }
 0x74b   : > { %8627 = vmatpush1.bf16.msra.mxu1 %v8626_v24  ;;  %8501 = vmatprep.subr.bf16.mxu0 %v8500_v25  ;;  %v8518_v24 = vpack.c.bf16 %v4678_v6, %v4674_v42  ;;  %v8646_v25 = vpack.c.bf16 %v4680_v18, %v4676_v23  ;;  %v4692_v6 = vld [vmem:[#allocation17 + $0x410] sm:$0xff] }
 0x74c   : > { %8629 = vmatprep.subr.bf16.mxu1 %v8628_v32  ;;  %v8520_v32 = vpack.c.bf16 %v4687_v54, %v4683_v28  ;;  %v4696_v23 = vld [vmem:[#allocation17 + $0x430] sm:$0xff]  ;;  %v4703_v28 = vld [vmem:[#allocation17 + $0x468] sm:$0xff] }
 0x74d   : > { %v8654_v58 = vpack.c.bf16 %v4696_v23, %v4692_v6  ;;  %v4724_v23 = vld [vmem:[#allocation17 + $0x510] sm:$0xff] }
 0x74e   : > { %8503 = vmatpush1.bf16.msra.mxu0 %v8502_v38  ;;  %v4684_v38 = vld [vmem:[#allocation17 + $0x3d0] sm:$0xff] }
 0x74f   : > { %8631 = vmatpush1.bf16.msra.mxu1 %v8630_v39  ;;  %8505 = vmatprep.subr.bf16.mxu0 %v8504_v40  ;;  %v4688_v39 = vld [vmem:[#allocation17 + $0x3f0] sm:$0xff] }
 0x750   : > { %8633 = vmatprep.subr.bf16.mxu1 %v8632_v37  ;;  %v8650_v40 = vpack.c.bf16 %v4688_v39, %v4684_v38  ;;  %v8524_v37 = vpack.c.bf16 %v4695_v45, %v4691_v41  ;;  %v4700_v39 = vld [vmem:[#allocation17 + $0x450] sm:$0xff]  ;;  %v4707_v41 = vld [vmem:[#allocation17 + $0x488] sm:$0xff] }
 0x752   : > { %8507 = vmatpush1.bf16.msra.mxu0 %v8506_v63  ;;  %v4524_v63 = vld [vmem:[#allocation16] sm:$0xf] }
 0x753   : > { %8635 = vmatpush1.bf16.msra.mxu1 %v8634_v55  ;;  %8509 = vmatprep.subr.bf16.mxu0 %v8508_v53  ;;  %v3921_v55 = vrot.slane %v3908_v49, %v11783_v20  ;;  %v3917_v53 = vrot.slane %v3908_v49, %v11737_v0  ;;  %v4529_v2 = vrot.slane %v4524_v63, %v11732_v62  ;;  %v4713_v49 = vld [vmem:[#allocation17 + $0x4b8] sm:$0xff] }
 0x754   : > { %8637 = vmatprep.subr.bf16.mxu1 %v8636_v59  ;;  %v4511_v59 = vrot.slane %v4498_v51, %v11783_v20  ;;  %v4533_v8 = vrot.slane %v4524_v63, %v11737_v0  ;;  %v4541_v36 = vrot.slane %v4524_v63, %v11742_v3 }
 0x756   : > { %8511 = vmatpush1.bf16.msra.mxu0 %v8510_v15  ;;  %v4515_v15 = vrot.slane %v4498_v51, %v11742_v3 }
 0x757   : > { %8639 = vmatpush1.bf16.msra.mxu1 %v8638_v30  ;;  %8513 = vmatprep.subr.bf16.mxu0 %v8512_v12  ;;  %v4537_v12 = vrot.slane %v4524_v63, %v11783_v20 }
 0x758   : > { %8641 = vmatprep.subr.bf16.mxu1 %v8640_v21 }
 0x75a   : > { %8515 = vmatpush1.bf16.msra.mxu0 %v8514_v17 }
 0x75b   : > { %8643 = vmatpush1.bf16.msra.mxu1 %v8642_v47  ;;  %8517 = vmatprep.subr.bf16.mxu0 %v8516_v19  ;;  %v4690_v19 = vld [vmem:[#allocation17 + $0x400] sm:$0xff] }
 0x75c   : > { %8645 = vmatprep.subr.bf16.mxu1 %v8644_v22  ;;  %v4694_v22 = vld [vmem:[#allocation17 + $0x420] sm:$0xff] }
 0x75d   : > { %v8526_v26 = vpack.c.bf16 %v4694_v22, %v4690_v19  ;;  %v4722_v19 = vld [vmem:[#allocation17 + $0x500] sm:$0xff] }
 0x75e   : > { %8519 = vmatpush1.bf16.msra.mxu0 %v8518_v24 }
 0x75f   : > { %8647 = vmatpush1.bf16.msra.mxu1 %v8646_v25  ;;  %8521 = vmatprep.subr.bf16.mxu0 %v8520_v32  ;;  %v4699_v25 = vld [vmem:[#allocation17 + $0x448] sm:$0xff]  ;;  %v4705_v32 = vld [vmem:[#allocation17 + $0x478] sm:$0xff] }
 0x760   : > { %8649 = vmatprep.subr.bf16.mxu1 %v8648_v34  ;;  %v4698_v34 = vld [vmem:[#allocation17 + $0x440] sm:$0xff]  ;;  %v8528_v46 = vpack.c.bf16 %v4703_v28, %v4699_v25  ;;  %v4735_v25 = vld [vmem:[#allocation17 + $0x568] sm:$0xff]  ;;  %v4733_v28 = vld [vmem:[#allocation17 + $0x558] sm:$0xff] }
 0x762   : > { %8523 = vmatpush1.bf16.msra.mxu0 %v8522_v35  ;;  %v4702_v35 = vld [vmem:[#allocation17 + $0x460] sm:$0xff] }
 0x763   : > { %8651 = vmatpush1.bf16.msra.mxu1 %v8650_v40  ;;  %8525 = vmatprep.subr.bf16.mxu0 %v8524_v37  ;;  %v4704_v40 = vld [vmem:[#allocation17 + $0x470] sm:$0xff]  ;;  %v8656_v37 = vpack.c.bf16 %v4705_v32, %v4701_v29 }
 0x764   : > { %8653 = vmatprep.subr.bf16.mxu1 %v8652_v48  ;;  %v4709_v48 = vld [vmem:[#allocation17 + $0x498] sm:$0xff]  ;;  %v8658_v63 = vpack.c.bf16 %v4704_v40, %v4700_v39  ;;  %v4739_v39 = vld [vmem:[#allocation17 + $0x588] sm:$0xff] }
 0x765   : > { %v4743_v40 = vld [vmem:[#allocation17 + $0x5a8] sm:$0xff] }
 0x7f8   : > { %v4209_v57 = vpop.f32.mrb[6].mxu0 }
 0x7f9   : > { %v9170_v27 = vadd.f32 %v4209_v57, %v3913_v52  ;;  %v4493_v4 = vpop.f32.mrb[6].mxu1  ;;  %v4211_v7 = vpop.f32.mrb[7].mxu0  ;;  %v8530_v52 = vpack.c.bf16 %v4702_v35, %v4698_v34  ;;  %v4708_v57 = vld [vmem:[#allocation17 + $0x490] sm:$0xff] }
 0x7fa   : > { %v9172_v30 = vadd.f32 %v4493_v4, %v3921_v55  ;;  %v9171_v21 = vadd.f32 %v4211_v7, %v3917_v53  ;;  %v4495_v9 = vpop.f32.mrb[7].mxu1  ;;  %v4706_v55 = vld [vmem:[#allocation17 + $0x480] sm:$0xff]  ;;  %v4721_v4 = vld [vmem:[#allocation17 + $0x4f8] sm:$0xff]  ;;  %v4732_v35 = vld [vmem:[#allocation17 + $0x550] sm:$0xff] }
 0x7fb   : > { %v4520_v10 = vmul.f32 %v9170_v27, %v4503_v16  ;;  %v9173_v17 = vadd.f32 %v4495_v9, %v3925_v56  ;;  %v4710_v53 = vld [vmem:[#allocation17 + $0x4a0] sm:$0xff]  ;;  %v8532_v16 = vpack.c.bf16 %v4711_v5, %v4707_v41  ;;  %v8660_v56 = vpack.c.bf16 %v4713_v49, %v4709_v48  ;;  %v4719_v27 = vld [vmem:[#allocation17 + $0x4e8] sm:$0xff]  ;;  %v4716_v9 = vld [vmem:[#allocation17 + $0x4d0] sm:$0xff] }
 0x7fc   : > { %v4522_v47 = vmul.f32 %v9172_v30, %v4511_v59  ;;  %v4521_v50 = vmul.f32 %v9171_v21, %v4507_v60  ;;  %v4712_v59 = vld [vmem:[#allocation17 + $0x4b0] sm:$0xff]  ;;  %v4715_v60 = vld [vmem:[#allocation17 + $0x4c8] sm:$0xff]  ;;  %v8534_v7 = vpack.c.bf16 %v4710_v53, %v4706_v55  ;;  %v4714_v30 = vld [vmem:[#allocation17 + $0x4c0] sm:$0xff]  ;;  %v8548_v49 = vpack.c.bf16 %v4743_v40, %v4739_v39 }
 0x7fd   : > { %v4546_v43 = vadd.f32 %v4529_v2, %v4520_v10  ;;  %v4523_v31 = vmul.f32 %v9173_v17, %v4515_v15  ;;  %v4717_v2 = vld [vmem:[#allocation17 + $0x4d8] sm:$0xff]  ;;  %v8662_v15 = vpack.c.bf16 %v4712_v59, %v4708_v57  ;;  %v8536_v21 = vpack.c.bf16 %v4719_v27, %v4715_v60  ;;  %v4720_v10 = vld [vmem:[#allocation17 + $0x4f0] sm:$0xff]  ;;  %v4723_v17 = vld [vmem:[#allocation17 + $0x508] sm:$0xff] }
 0x7fe   : > { %v11901_v44 = vadd.f32 %v4537_v12, %v4522_v47  ;;  %v4547_v42 = vadd.f32 %v4533_v8, %v4521_v50  ;;  %v4718_v12 = vld [vmem:[#allocation17 + $0x4e0] sm:$0xff]  ;;  %v8664_v8 = vpack.c.bf16 %v4721_v4, %v4717_v2  ;;  %v4725_v47 = vld [vmem:[#allocation17 + $0x518] sm:$0xff]  ;;  %v4747_v55 = vld [vmem:[#allocation17 + $0x5c8] sm:$0xff] }
 0x7ff   : > { %v4549_v18 = vadd.f32 %v4541_v36, %v4523_v31  ;;  %v4554_v24 = vmul.f32 0.1, %v4546_v43  ;;  %vm4550_vm10 = vcmp.ge.f32.partialorder %v4546_v43, 0.0  ;;  %v4727_v36 = vld [vmem:[#allocation17 + $0x528] sm:$0xff]  ;;  %v4729_v50 = vld [vmem:[#allocation17 + $0x538] sm:$0xff]  ;;  %v8666_v31 = vpack.c.bf16 %v4720_v10, %v4716_v9  ;;  %v4738_v5 = vld [vmem:[#allocation17 + $0x580] sm:$0xff] }
 0x800   : > { %vm4551_vm9 = vcmp.ge.f32.partialorder %v4547_v42, 0.0  ;;  %v4555_v54 = vmul.f32 0.1, %v4547_v42  ;;  %v8540_v22 = vpack.c.bf16 %v4727_v36, %v4723_v17  ;;  %v8668_v6 = vpack.c.bf16 %v4729_v50, %v4725_v47  ;;  %v4741_v41 = vld [vmem:[#allocation17 + $0x598] sm:$0xff]  ;;  %v4742_v48 = vld [vmem:[#allocation17 + $0x5a0] sm:$0xff]  ;;  %v4751_v53 = vld [vmem:[#allocation17 + $0x5e8] sm:$0xff] }
 0x801   : > { %v4557_v33 = vmul.f32 0.1, %v4549_v18  ;;  %vm4553_vm11 = vcmp.ge.f32.partialorder %v4549_v18, 0.0  ;;  %v4558_v45 = vsel %vm4550_vm10, %v4546_v43, %v4554_v24  ;;  %v8538_v43 = vpack.c.bf16 %v4718_v12, %v4714_v30  ;;  %v4731_v24 = vld [vmem:[#allocation17 + $0x548] sm:$0xff]  ;;  %v4746_v60 = vld [vmem:[#allocation17 + $0x5c0] sm:$0xff] }
 0x802   : > { %v4559_v38 = vsel %vm4551_vm9, %v4547_v42, %v4555_v54  ;;  %v4726_v42 = vld [vmem:[#allocation17 + $0x520] sm:$0xff]  ;;  %v4737_v54 = vld [vmem:[#allocation17 + $0x578] sm:$0xff]  ;;  %v8550_v57 = vpack.c.bf16 %v4742_v48, %v4738_v5  ;;  %v8552_v2 = vpack.c.bf16 %v4751_v53, %v4747_v55  ;;  %v4755_v30 = vld [vmem:[#allocation17 + $0x608] sm:$0xff]  ;;  %vm4552_vm12 = vcmp.ge.f32.partialorder %v11901_v44, 0.0 }
 0x803   : > { %4904 = vmatprep.mubr.f32.mxu0 %v4559_v38  ;;  %5046 = vmatprep.mubr.f32.mxu1 %v4559_v38  ;;  %v4561_v51 = vsel %vm4553_vm11, %v4549_v18, %v4557_v33  ;;  %v4728_v18 = vld [vmem:[#allocation17 + $0x530] sm:$0xff]  ;;  %v8542_v29 = vpack.c.bf16 %v4726_v42, %v4722_v19  ;;  %v8544_v33 = vpack.c.bf16 %v4735_v25, %v4731_v24  ;;  %v4750_v27 = vld [vmem:[#allocation17 + $0x5e0] sm:$0xff]  ;;  %v4759_v12 = vld [vmem:[#allocation17 + $0x628] sm:$0xff]  ;;  %vm6450_vm10 = vcmask 523264  }
 0x804   : > { %4905 = vmatmul.mubr.f32.vlgmr.msra.gmra.mrb[8].mxu0 %v4558_v45  ;;  %5047 = vmatmul.mubr.f32.vlgmr.msra.gmra.mrb[8].mxu1 %v4558_v45  ;;  %v8670_v32 = vpack.c.bf16 %v4728_v18, %v4724_v23  ;;  %v8672_v34 = vpack.c.bf16 %v4737_v54, %v4733_v28  ;;  %v4736_v38 = vld [vmem:[#allocation17 + $0x570] sm:$0xff]  ;;  %v4745_v45 = vld [vmem:[#allocation17 + $0x5b8] sm:$0xff]  ;;  %v8554_v9 = vpack.c.bf16 %v4750_v27, %v4746_v60  ;;  %v4754_v17 = vld [vmem:[#allocation17 + $0x600] sm:$0xff] }
 0x805   : > { %8527 = vmatpush1.bf16.msra.mxu0 %v8526_v26  ;;  %8655 = vmatpush1.bf16.msra.mxu1 %v8654_v58  ;;  %v4730_v26 = vld [vmem:[#allocation17 + $0x540] sm:$0xff]  ;;  %v8556_v47 = vpack.c.bf16 %v4759_v12, %v4755_v30  ;;  %v4763_v19 = vld [vmem:[#allocation17 + $0x648] sm:$0xff] }
 0x806   : > { %4975 = vmatprep.mubr.f32.mxu0 %v4561_v51  ;;  %5117 = vmatprep.mubr.f32.mxu1 %v4561_v51  ;;  %v4734_v58 = vld [vmem:[#allocation17 + $0x560] sm:$0xff]  ;;  %v8676_v51 = vpack.c.bf16 %v4745_v45, %v4741_v41  ;;  %v4767_v42 = vld [vmem:[#allocation17 + $0x668] sm:$0xff] }
 0x807   : > { %8529 = vmatprep.subr.bf16.mxu0 %v8528_v46  ;;  %8657 = vmatprep.subr.bf16.mxu1 %v8656_v37  ;;  %v8546_v46 = vpack.c.bf16 %v4734_v58, %v4730_v26  ;;  %v8674_v37 = vpack.c.bf16 %v4736_v38, %v4732_v35  ;;  %v4758_v36 = vld [vmem:[#allocation17 + $0x620] sm:$0xff]  ;;  %v8560_v28 = vpack.c.bf16 %v4767_v42, %v4763_v19  ;;  %v4771_v26 = vld [vmem:[#allocation17 + $0x688] sm:$0xff] }
 0x808   : > { %v8558_v23 = vpack.c.bf16 %v4758_v36, %v4754_v17  ;;  %v4762_v24 = vld [vmem:[#allocation17 + $0x640] sm:$0xff]  ;;  %v4775_v58 = vld [vmem:[#allocation17 + $0x6a8] sm:$0xff] }
 0x809   : > { %8531 = vmatpush1.bf16.msra.mxu0 %v8530_v52  ;;  %8659 = vmatpush1.bf16.msra.mxu1 %v8658_v63  ;;  %v4740_v52 = vld [vmem:[#allocation17 + $0x590] sm:$0xff]  ;;  %v4766_v25 = vld [vmem:[#allocation17 + $0x660] sm:$0xff]  ;;  %v8564_v41 = vpack.c.bf16 %v4775_v58, %v4771_v26  ;;  %v4779_v5 = vld [vmem:[#allocation17 + $0x6c8] sm:$0xff] }
 0x80a   : > { %8533 = vmatprep.subr.bf16.mxu0 %v8532_v16  ;;  %8661 = vmatprep.subr.bf16.mxu1 %v8660_v56  ;;  %v4744_v63 = vld [vmem:[#allocation17 + $0x5b0] sm:$0xff]  ;;  %v4749_v16 = vld [vmem:[#allocation17 + $0x5d8] sm:$0xff]  ;;  %v8562_v35 = vpack.c.bf16 %v4766_v25, %v4762_v24  ;;  %v4770_v39 = vld [vmem:[#allocation17 + $0x680] sm:$0xff] }
 0x80b   : > { %v4753_v56 = vld [vmem:[#allocation17 + $0x5f8] sm:$0xff]  ;;  %v8678_v59 = vpack.c.bf16 %v4744_v63, %v4740_v52  ;;  %v4774_v40 = vld [vmem:[#allocation17 + $0x6a0] sm:$0xff]  ;;  %v4783_v48 = vld [vmem:[#allocation17 + $0x6e8] sm:$0xff] }
 0x80c   : > { %v8680_v4 = vpack.c.bf16 %v4753_v56, %v4749_v16  ;;  %v8566_v52 = vpack.c.bf16 %v4774_v40, %v4770_v39  ;;  %v4778_v55 = vld [vmem:[#allocation17 + $0x6c0] sm:$0xff]  ;;  %v8568_v16 = vpack.c.bf16 %v4783_v48, %v4779_v5  ;;  %v4787_v60 = vld [vmem:[#allocation17 + $0x708] sm:$0xff] }
 0x80d   : > { %8535 = vmatpush1.bf16.msra.mxu0 %v8534_v7  ;;  %8663 = vmatpush1.bf16.msra.mxu1 %v8662_v15  ;;  %v4748_v7 = vld [vmem:[#allocation17 + $0x5d0] sm:$0xff]  ;;  %v4782_v53 = vld [vmem:[#allocation17 + $0x6e0] sm:$0xff]  ;;  %v4791_v27 = vld [vmem:[#allocation17 + $0x728] sm:$0xff] }
 0x80e   : > { %8537 = vmatprep.subr.bf16.mxu0 %v8536_v21  ;;  %8665 = vmatprep.subr.bf16.mxu1 %v8664_v8  ;;  %v4752_v15 = vld [vmem:[#allocation17 + $0x5f0] sm:$0xff]  ;;  %v4757_v21 = vld [vmem:[#allocation17 + $0x618] sm:$0xff]  ;;  %v4786_v30 = vld [vmem:[#allocation17 + $0x700] sm:$0xff] }
 0x80f   : > { %v4761_v8 = vld [vmem:[#allocation17 + $0x638] sm:$0xff]  ;;  %v8682_v10 = vpack.c.bf16 %v4752_v15, %v4748_v7  ;;  %v8570_v7 = vpack.c.bf16 %v4782_v53, %v4778_v55  ;;  %v4790_v12 = vld [vmem:[#allocation17 + $0x720] sm:$0xff]  ;;  %v4795_v17 = vld [vmem:[#allocation17 + $0x748] sm:$0xff] }
 0x810   : > { %v8684_v50 = vpack.c.bf16 %v4761_v8, %v4757_v21  ;;  %v8572_v21 = vpack.c.bf16 %v4791_v27, %v4787_v60  ;;  %v4799_v36 = vld [vmem:[#allocation17 + $0x768] sm:$0xff]  ;;  %v4794_v19 = vld [vmem:[#allocation17 + $0x740] sm:$0xff]  ;;  %v5195_v53 = vld [vmem:[#allocation38 + $0x18] sm:$0xff] }
 0x811   : > { %8539 = vmatpush1.bf16.msra.mxu0 %v8538_v43  ;;  %8667 = vmatpush1.bf16.msra.mxu1 %v8666_v31  ;;  %v4756_v43 = vld [vmem:[#allocation17 + $0x610] sm:$0xff]  ;;  %v4798_v42 = vld [vmem:[#allocation17 + $0x760] sm:$0xff]  ;;  %v4803_v24 = vld [vmem:[#allocation17 + $0x788] sm:$0xff] }
 0x812   : > { %8541 = vmatprep.subr.bf16.mxu0 %v8540_v22  ;;  %8669 = vmatprep.subr.bf16.mxu1 %v8668_v6  ;;  %v4760_v31 = vld [vmem:[#allocation17 + $0x630] sm:$0xff]  ;;  %v4765_v22 = vld [vmem:[#allocation17 + $0x658] sm:$0xff]  ;;  %v4807_v25 = vld [vmem:[#allocation17 + $0x7a8] sm:$0xff] }
 0x813   : > { %v4769_v6 = vld [vmem:[#allocation17 + $0x678] sm:$0xff]  ;;  %v8686_v18 = vpack.c.bf16 %v4760_v31, %v4756_v43  ;;  %v8574_v43 = vpack.c.bf16 %v4790_v12, %v4786_v30  ;;  %v4802_v26 = vld [vmem:[#allocation17 + $0x780] sm:$0xff]  ;;  %v4811_v39 = vld [vmem:[#allocation17 + $0x7c8] sm:$0xff]  ;;  %v4556_v12 = vmul.f32 0.1, %v11901_v44 }
 0x814   : > { %v8688_v54 = vpack.c.bf16 %v4769_v6, %v4765_v22  ;;  %v8576_v22 = vpack.c.bf16 %v4799_v36, %v4795_v17  ;;  %v4806_v58 = vld [vmem:[#allocation17 + $0x7a0] sm:$0xff]  ;;  %v4815_v40 = vld [vmem:[#allocation17 + $0x7e8] sm:$0xff] }
 0x815   : > { %8543 = vmatpush1.bf16.msra.mxu0 %v8542_v29  ;;  %8671 = vmatpush1.bf16.msra.mxu1 %v8670_v32  ;;  %v4764_v29 = vld [vmem:[#allocation17 + $0x650] sm:$0xff]  ;;  %v4810_v5 = vld [vmem:[#allocation17 + $0x7c0] sm:$0xff] }
 0x816   : > { %8545 = vmatprep.subr.bf16.mxu0 %v8544_v33  ;;  %8673 = vmatprep.subr.bf16.mxu1 %v8672_v34  ;;  %v4768_v32 = vld [vmem:[#allocation17 + $0x670] sm:$0xff]  ;;  %v4773_v33 = vld [vmem:[#allocation17 + $0x698] sm:$0xff]  ;;  %v4814_v48 = vld [vmem:[#allocation17 + $0x7e0] sm:$0xff] }
 0x817   : > { %v4777_v34 = vld [vmem:[#allocation17 + $0x6b8] sm:$0xff]  ;;  %v8690_v38 = vpack.c.bf16 %v4768_v32, %v4764_v29  ;;  %v8578_v29 = vpack.c.bf16 %v4798_v42, %v4794_v19  ;;  %v5193_v55 = vld [vmem:[#allocation38 + $0x8] sm:$0xff]  ;;  %v5194_v27 = vld [vmem:[#allocation38 + $0x10] sm:$0xff] }
 0x818   : > { %v8692_v45 = vpack.c.bf16 %v4777_v34, %v4773_v33  ;;  %v8580_v33 = vpack.c.bf16 %v4807_v25, %v4803_v24  ;;  %v5192_v60 = vld [vmem:[#allocation38] sm:$0xff]  ;;  %v5197_v30 = vld [vmem:[#allocation38 + $0x28] sm:$0xff] }
 0x819   : > { %8547 = vmatpush1.bf16.msra.mxu0 %v8546_v46  ;;  %8675 = vmatpush1.bf16.msra.mxu1 %v8674_v37  ;;  %v4772_v46 = vld [vmem:[#allocation17 + $0x690] sm:$0xff]  ;;  %v5196_v36 = vld [vmem:[#allocation38 + $0x20] sm:$0xff]  ;;  %v5201_v42 = vld [vmem:[#allocation38 + $0x48] sm:$0xff] }
 0x81a   : > { %8549 = vmatprep.subr.bf16.mxu0 %v8548_v49  ;;  %8677 = vmatprep.subr.bf16.mxu1 %v8676_v51  ;;  %v4776_v37 = vld [vmem:[#allocation17 + $0x6b0] sm:$0xff]  ;;  %v4781_v49 = vld [vmem:[#allocation17 + $0x6d8] sm:$0xff]  ;;  %v5480_v19 = vld [vmem:[#allocation26 + $0x30] sm:$0xff] }
 0x81b   : > { %v4785_v51 = vld [vmem:[#allocation17 + $0x6f8] sm:$0xff]  ;;  %v8694_v63 = vpack.c.bf16 %v4776_v37, %v4772_v46  ;;  %v8582_v46 = vpack.c.bf16 %v4806_v58, %v4802_v26  ;;  %v5482_v26 = vld [vmem:[#allocation26 + $0x40] sm:$0xff]  ;;  %v5484_v58 = vld [vmem:[#allocation26 + $0x50] sm:$0xff] }
 0x81c   : > { %v8696_v56 = vpack.c.bf16 %v4785_v51, %v4781_v49  ;;  %v8584_v49 = vpack.c.bf16 %v4815_v40, %v4811_v39  ;;  %v8854_v39 = vpack.c.bf16 %v5484_v58, %v5482_v26  ;;  %v5204_v40 = vld [vmem:[#allocation38 + $0x60] sm:$0xff] }
 0x81d   : > { %8551 = vmatpush1.bf16.msra.mxu0 %v8550_v57  ;;  %8679 = vmatpush1.bf16.msra.mxu1 %v8678_v59  ;;  %v4780_v57 = vld [vmem:[#allocation17 + $0x6d0] sm:$0xff]  ;;  %v5220_v58 = vld [vmem:[#allocation38 + $0xe0] sm:$0xff] }
 0x81e   : > { %8553 = vmatprep.subr.bf16.mxu0 %v8552_v2  ;;  %8681 = vmatprep.subr.bf16.mxu1 %v8680_v4  ;;  %v4784_v59 = vld [vmem:[#allocation17 + $0x6f0] sm:$0xff]  ;;  %v4789_v2 = vld [vmem:[#allocation17 + $0x718] sm:$0xff] }
 0x81f   : > { %v4793_v4 = vld [vmem:[#allocation17 + $0x738] sm:$0xff]  ;;  %v8698_v15 = vpack.c.bf16 %v4784_v59, %v4780_v57  ;;  %v8586_v57 = vpack.c.bf16 %v4814_v48, %v4810_v5  ;;  %v5488_v5 = vld [vmem:[#allocation26 + $0x70] sm:$0xff] }
 0x820   : > { %v8700_v8 = vpack.c.bf16 %v4793_v4, %v4789_v2  ;;  %v8716_v2 = vpack.c.bf16 %v5195_v53, %v5193_v55  ;;  %v5209_v48 = vld [vmem:[#allocation38 + $0x88] sm:$0xff]  ;;  %v5208_v53 = vld [vmem:[#allocation38 + $0x80] sm:$0xff] }
 0x821   : > { %8555 = vmatpush1.bf16.msra.mxu0 %v8554_v9  ;;  %8683 = vmatpush1.bf16.msra.mxu1 %v8682_v10  ;;  %v4788_v9 = vld [vmem:[#allocation17 + $0x710] sm:$0xff] }
 0x822   : > { %8557 = vmatprep.subr.bf16.mxu0 %v8556_v47  ;;  %8685 = vmatprep.subr.bf16.mxu1 %v8684_v50  ;;  %v4792_v10 = vld [vmem:[#allocation17 + $0x730] sm:$0xff]  ;;  %v4797_v47 = vld [vmem:[#allocation17 + $0x758] sm:$0xff] }
 0x823   : > { %v4801_v50 = vld [vmem:[#allocation17 + $0x778] sm:$0xff]  ;;  %v8702_v31 = vpack.c.bf16 %v4792_v10, %v4788_v9  ;;  %v5481_v9 = vld [vmem:[#allocation26 + $0x38] sm:$0xff]  ;;  %v8718_v10 = vpack.c.bf16 %v5194_v27, %v5192_v60  ;;  %v5492_v60 = vld [vmem:[#allocation26 + $0x90] sm:$0xff] }
 0x824   : > { %v8704_v6 = vpack.c.bf16 %v4801_v50, %v4797_v47  ;;  %v5198_v47 = vld [vmem:[#allocation38 + $0x30] sm:$0xff]  ;;  %v5213_v27 = vld [vmem:[#allocation38 + $0xa8] sm:$0xff] }
 0x825   : > { %8559 = vmatpush1.bf16.msra.mxu0 %v8558_v23  ;;  %8687 = vmatpush1.bf16.msra.mxu1 %v8686_v18  ;;  %v4796_v23 = vld [vmem:[#allocation17 + $0x750] sm:$0xff]  ;;  %v8722_v24 = vpack.c.bf16 %v5198_v47, %v5196_v36  ;;  %v5217_v36 = vld [vmem:[#allocation38 + $0xc8] sm:$0xff] }
 0x826   : > { %8561 = vmatprep.subr.bf16.mxu0 %v8560_v28  ;;  %8689 = vmatprep.subr.bf16.mxu1 %v8688_v54  ;;  %v4800_v18 = vld [vmem:[#allocation17 + $0x770] sm:$0xff]  ;;  %v4805_v28 = vld [vmem:[#allocation17 + $0x798] sm:$0xff] }
 0x827   : > { %v4809_v54 = vld [vmem:[#allocation17 + $0x7b8] sm:$0xff]  ;;  %v8706_v32 = vpack.c.bf16 %v4800_v18, %v4796_v23  ;;  %v5485_v18 = vld [vmem:[#allocation26 + $0x58] sm:$0xff] }
 0x828   : > { %v8708_v34 = vpack.c.bf16 %v4809_v54, %v4805_v28  ;;  %v5483_v23 = vld [vmem:[#allocation26 + $0x48] sm:$0xff]  ;;  %v5202_v54 = vld [vmem:[#allocation38 + $0x50] sm:$0xff] }
 0x829   : > { %8563 = vmatpush1.bf16.msra.mxu0 %v8562_v35  ;;  %8691 = vmatpush1.bf16.msra.mxu1 %v8690_v38  ;;  %v4804_v35 = vld [vmem:[#allocation17 + $0x790] sm:$0xff]  ;;  %v5200_v28 = vld [vmem:[#allocation38 + $0x40] sm:$0xff] }
 0x82a   : > { %8565 = vmatprep.subr.bf16.mxu0 %v8564_v41  ;;  %8693 = vmatprep.subr.bf16.mxu1 %v8692_v45  ;;  %v4808_v38 = vld [vmem:[#allocation17 + $0x7b0] sm:$0xff]  ;;  %v4813_v41 = vld [vmem:[#allocation17 + $0x7d8] sm:$0xff] }
 0x82b   : > { %v4817_v45 = vld [vmem:[#allocation17 + $0x7f8] sm:$0xff]  ;;  %v8710_v37 = vpack.c.bf16 %v4808_v38, %v4804_v35  ;;  %v5489_v35 = vld [vmem:[#allocation26 + $0x78] sm:$0xff]  ;;  %v8726_v38 = vpack.c.bf16 %v5202_v54, %v5200_v28 }
 0x82c   : > { %v8712_v51 = vpack.c.bf16 %v4817_v45, %v4813_v41  ;;  %v5206_v41 = vld [vmem:[#allocation38 + $0x70] sm:$0xff]  ;;  %v5219_v47 = vld [vmem:[#allocation38 + $0xd8] sm:$0xff] }
 0x82d   : > { %8567 = vmatpush1.bf16.msra.mxu0 %v8566_v52  ;;  %8695 = vmatpush1.bf16.msra.mxu1 %v8694_v63  ;;  %v4812_v52 = vld [vmem:[#allocation17 + $0x7d0] sm:$0xff]  ;;  %v5503_v54 = vld [vmem:[#allocation26 + $0xe8] sm:$0xff] }
 0x82e   : > { %8569 = vmatprep.subr.bf16.mxu0 %v8568_v16  ;;  %8697 = vmatprep.subr.bf16.mxu1 %v8696_v56  ;;  %v4816_v63 = vld [vmem:[#allocation17 + $0x7f0] sm:$0xff]  ;;  %v5475_v16 = vld [vmem:[#allocation26 + $0x8] sm:$0xff]  ;;  %v5477_v56 = vld [vmem:[#allocation26 + $0x18] sm:$0xff] }
 0x82f   : > { %v8714_v59 = vpack.c.bf16 %v4816_v63, %v4812_v52  ;;  %v8844_v4 = vpack.c.bf16 %v5477_v56, %v5475_v16  ;;  %v5493_v52 = vld [vmem:[#allocation26 + $0x98] sm:$0xff]  ;;  %v8730_v63 = vpack.c.bf16 %v5206_v41, %v5204_v40  ;;  %v5223_v28 = vld [vmem:[#allocation38 + $0xf8] sm:$0xff] }
 0x830   : > { %v5210_v16 = vld [vmem:[#allocation38 + $0x90] sm:$0xff]  ;;  %v5227_v40 = vld [vmem:[#allocation38 + $0x118] sm:$0xff] }
 0x831   : > { %8571 = vmatpush1.bf16.msra.mxu0 %v8570_v7  ;;  %8699 = vmatpush1.bf16.msra.mxu1 %v8698_v15  ;;  %v5474_v7 = vld [vmem:[#allocation26] sm:$0xff]  ;;  %v5476_v15 = vld [vmem:[#allocation26 + $0x10] sm:$0xff]  ;;  %v5507_v41 = vld [vmem:[#allocation26 + $0x108] sm:$0xff] }
 0x832   : > { %8573 = vmatprep.subr.bf16.mxu0 %v8572_v21  ;;  %8701 = vmatprep.subr.bf16.mxu1 %v8700_v8  ;;  %v5199_v21 = vld [vmem:[#allocation38 + $0x38] sm:$0xff]  ;;  %v8846_v17 = vpack.c.bf16 %v5476_v15, %v5474_v7  ;;  %v5497_v7 = vld [vmem:[#allocation26 + $0xb8] sm:$0xff]  ;;  %v8734_v15 = vpack.c.bf16 %v5210_v16, %v5208_v53 }
 0x833   : > { %v5479_v8 = vld [vmem:[#allocation26 + $0x28] sm:$0xff]  ;;  %v8720_v50 = vpack.c.bf16 %v5199_v21, %v5197_v30  ;;  %v5214_v21 = vld [vmem:[#allocation38 + $0xb0] sm:$0xff] }
 0x834   : > { %v5231_v53 = vld [vmem:[#allocation38 + $0x138] sm:$0xff] }
 0x835   : > { %8575 = vmatpush1.bf16.msra.mxu0 %v8574_v43  ;;  %8703 = vmatpush1.bf16.msra.mxu1 %v8702_v31  ;;  %v8848_v43 = vpack.c.bf16 %v5481_v9, %v5479_v8  ;;  %v5478_v31 = vld [vmem:[#allocation26 + $0x20] sm:$0xff]  ;;  %v5511_v16 = vld [vmem:[#allocation26 + $0x128] sm:$0xff] }
 0x836   : > { %8577 = vmatprep.subr.bf16.mxu0 %v8576_v22  ;;  %8705 = vmatprep.subr.bf16.mxu1 %v8704_v6  ;;  %v4560_v22 = vsel %vm4552_vm12, %v11901_v44, %v4556_v12  ;;  %v5203_v6 = vld [vmem:[#allocation38 + $0x58] sm:$0xff]  ;;  %v8850_v25 = vpack.c.bf16 %v5480_v19, %v5478_v31  ;;  %v5212_v12 = vld [vmem:[#allocation38 + $0xa0] sm:$0xff]  ;;  %vm6611_vm12 = vcmask 7168  }
 0x837   : > { %v5487_v44 = vld [vmem:[#allocation26 + $0x68] sm:$0xff]  ;;  %v8738_v31 = vpack.c.bf16 %v5214_v21, %v5212_v12 }
 0x838   : > { %v5235_v12 = vld [vmem:[#allocation38 + $0x158] sm:$0xff] }
 0x839   : > { %8579 = vmatpush1.bf16.msra.mxu0 %v8578_v29  ;;  %8707 = vmatpush1.bf16.msra.mxu1 %v8706_v32  ;;  %v8724_v29 = vpack.c.bf16 %v5203_v6, %v5201_v42  ;;  %v8852_v32 = vpack.c.bf16 %v5485_v18, %v5483_v23  ;;  %v5216_v42 = vld [vmem:[#allocation38 + $0xc0] sm:$0xff]  ;;  %v8740_v6 = vpack.c.bf16 %v5219_v47, %v5217_v36  ;;  %v5498_v18 = vld [vmem:[#allocation26 + $0xc0] sm:$0xff] }
 0x83a   : > { %8581 = vmatprep.subr.bf16.mxu0 %v8580_v33  ;;  %8709 = vmatprep.subr.bf16.mxu1 %v8708_v34  ;;  %v5205_v33 = vld [vmem:[#allocation38 + $0x68] sm:$0xff]  ;;  %v5207_v34 = vld [vmem:[#allocation38 + $0x78] sm:$0xff]  ;;  %v5234_v36 = vld [vmem:[#allocation38 + $0x150] sm:$0xff] }
 0x83b   : > { %v8728_v45 = vpack.c.bf16 %v5207_v34, %v5205_v33  ;;  %v5222_v33 = vld [vmem:[#allocation38 + $0xf0] sm:$0xff]  ;;  %v5515_v21 = vld [vmem:[#allocation26 + $0x148] sm:$0xff] }
 0x83d   : > { %8583 = vmatpush1.bf16.msra.mxu0 %v8582_v46  ;;  %8711 = vmatpush1.bf16.msra.mxu1 %v8710_v37  ;;  %v8856_v46 = vpack.c.bf16 %v5489_v35, %v5487_v44  ;;  %v5486_v37 = vld [vmem:[#allocation26 + $0x60] sm:$0xff] }
 0x83e   : > { %8585 = vmatprep.subr.bf16.mxu0 %v8584_v49  ;;  %8713 = vmatprep.subr.bf16.mxu1 %v8712_v51  ;;  %v5211_v49 = vld [vmem:[#allocation38 + $0x98] sm:$0xff]  ;;  %v8858_v55 = vpack.c.bf16 %v5488_v5, %v5486_v37  ;;  %v5224_v5 = vld [vmem:[#allocation38 + $0x100] sm:$0xff] }
 0x83f   : > { %v5491_v51 = vld [vmem:[#allocation26 + $0x88] sm:$0xff]  ;;  %v8732_v56 = vpack.c.bf16 %v5211_v49, %v5209_v48  ;;  %v5502_v35 = vld [vmem:[#allocation26 + $0xe0] sm:$0xff] }
 0x840   : > { %v5226_v48 = vld [vmem:[#allocation38 + $0x110] sm:$0xff] }
 0x841   : > { %8587 = vmatpush1.bf16.msra.mxu0 %v8586_v57  ;;  %8715 = vmatpush1.bf16.msra.mxu1 %v8714_v59  ;;  %v8860_v57 = vpack.c.bf16 %v5493_v52, %v5491_v51  ;;  %v5490_v59 = vld [vmem:[#allocation26 + $0x80] sm:$0xff] }
 0x842   : > { %8717 = vmatprep.subr.bf16.mxu0 %v8716_v2  ;;  %8845 = vmatprep.subr.bf16.mxu1 %v8844_v4  ;;  %v5215_v2 = vld [vmem:[#allocation38 + $0xb8] sm:$0xff]  ;;  %v8862_v30 = vpack.c.bf16 %v5492_v60, %v5490_v59  ;;  %v5228_v60 = vld [vmem:[#allocation38 + $0x120] sm:$0xff] }
 0x843   : > { %v5495_v4 = vld [vmem:[#allocation26 + $0xa8] sm:$0xff]  ;;  %v8736_v8 = vpack.c.bf16 %v5215_v2, %v5213_v27  ;;  %v5506_v52 = vld [vmem:[#allocation26 + $0x100] sm:$0xff] }
 0x844   : > { %4976 = vmatmul.mubr.f32.vlgmr.msra.gmra.mrb[8].mxu0 %v4560_v22  ;;  %5118 = vmatmul.mubr.f32.vlgmr.msra.gmra.mrb[8].mxu1 %v4560_v22  ;;  %v8864_v9 = vpack.c.bf16 %v5497_v7, %v5495_v4  ;;  %v5218_v22 = vld [vmem:[#allocation38 + $0xd0] sm:$0xff] }
 0x845   : > { %8719 = vmatpush1.bf16.msra.mxu0 %v8718_v10  ;;  %8847 = vmatpush1.bf16.msra.mxu1 %v8846_v17  ;;  %v5494_v10 = vld [vmem:[#allocation26 + $0xa0] sm:$0xff]  ;;  %v5496_v17 = vld [vmem:[#allocation26 + $0xb0] sm:$0xff] }
 0x846   : > { %8721 = vmatprep.subr.bf16.mxu0 %v8720_v50  ;;  %8849 = vmatprep.subr.bf16.mxu1 %v8848_v43  ;;  %v5499_v50 = vld [vmem:[#allocation26 + $0xc8] sm:$0xff]  ;;  %v5501_v43 = vld [vmem:[#allocation26 + $0xd8] sm:$0xff]  ;;  %v8866_v19 = vpack.c.bf16 %v5496_v17, %v5494_v10  ;;  %v5510_v7 = vld [vmem:[#allocation26 + $0x120] sm:$0xff] }
 0x847   : > { %v8868_v23 = vpack.c.bf16 %v5501_v43, %v5499_v50  ;;  %v5230_v27 = vld [vmem:[#allocation38 + $0x130] sm:$0xff]  ;;  %v5232_v17 = vld [vmem:[#allocation38 + $0x140] sm:$0xff] }
 0x848   : > { %v5514_v43 = vld [vmem:[#allocation26 + $0x140] sm:$0xff] }
 0x849   : > { %8723 = vmatpush1.bf16.msra.mxu0 %v8722_v24  ;;  %8851 = vmatpush1.bf16.msra.mxu1 %v8850_v25  ;;  %v5500_v24 = vld [vmem:[#allocation26 + $0xd0] sm:$0xff] }
 0x84a   : > { %8725 = vmatprep.subr.bf16.mxu0 %v8724_v29  ;;  %8853 = vmatprep.subr.bf16.mxu1 %v8852_v32  ;;  %v5221_v25 = vld [vmem:[#allocation38 + $0xe8] sm:$0xff]  ;;  %v8742_v32 = vpack.c.bf16 %v5218_v22, %v5216_v42  ;;  %v8870_v26 = vpack.c.bf16 %v5500_v24, %v5498_v18  ;;  %v5239_v42 = vld [vmem:[#allocation38 + $0x178] sm:$0xff]  ;;  %v5236_v24 = vld [vmem:[#allocation38 + $0x160] sm:$0xff] }
 0x84b   : > { %v5505_v29 = vld [vmem:[#allocation26 + $0xf8] sm:$0xff]  ;;  %v8744_v34 = vpack.c.bf16 %v5223_v28, %v5221_v25  ;;  %v5519_v22 = vld [vmem:[#allocation26 + $0x168] sm:$0xff] }
 0x84c   : > { %v8872_v44 = vpack.c.bf16 %v5505_v29, %v5503_v54  ;;  %v5238_v25 = vld [vmem:[#allocation38 + $0x170] sm:$0xff] }
 0x84d   : > { %8727 = vmatpush1.bf16.msra.mxu0 %v8726_v38  ;;  %8855 = vmatpush1.bf16.msra.mxu1 %v8854_v39  ;;  %v5504_v38 = vld [vmem:[#allocation26 + $0xf0] sm:$0xff]  ;;  %v5518_v29 = vld [vmem:[#allocation26 + $0x160] sm:$0xff] }
 0x84e   : > { %8729 = vmatprep.subr.bf16.mxu0 %v8728_v45  ;;  %8857 = vmatprep.subr.bf16.mxu1 %v8856_v46  ;;  %v5225_v39 = vld [vmem:[#allocation38 + $0x108] sm:$0xff]  ;;  %v8746_v46 = vpack.c.bf16 %v5222_v33, %v5220_v58  ;;  %v8874_v37 = vpack.c.bf16 %v5504_v38, %v5502_v35  ;;  %v5243_v58 = vld [vmem:[#allocation38 + $0x198] sm:$0xff]  ;;  %v5240_v38 = vld [vmem:[#allocation38 + $0x180] sm:$0xff] }
 0x84f   : > { %v5509_v45 = vld [vmem:[#allocation26 + $0x118] sm:$0xff]  ;;  %v8748_v49 = vpack.c.bf16 %v5227_v40, %v5225_v39  ;;  %v5523_v33 = vld [vmem:[#allocation26 + $0x188] sm:$0xff] }
 0x850   : > { %v8876_v51 = vpack.c.bf16 %v5509_v45, %v5507_v41  ;;  %v5242_v41 = vld [vmem:[#allocation38 + $0x190] sm:$0xff] }
 0x851   : > { %8731 = vmatpush1.bf16.msra.mxu0 %v8730_v63  ;;  %8859 = vmatpush1.bf16.msra.mxu1 %v8858_v55  ;;  %v5508_v63 = vld [vmem:[#allocation26 + $0x110] sm:$0xff]  ;;  %v5522_v45 = vld [vmem:[#allocation26 + $0x180] sm:$0xff] }
 0x852   : > { %8733 = vmatprep.subr.bf16.mxu0 %v8732_v56  ;;  %8861 = vmatprep.subr.bf16.mxu1 %v8860_v57  ;;  %v5229_v55 = vld [vmem:[#allocation38 + $0x128] sm:$0xff]  ;;  %v8750_v57 = vpack.c.bf16 %v5226_v48, %v5224_v5  ;;  %v8878_v59 = vpack.c.bf16 %v5508_v63, %v5506_v52 }
 0x853   : > { %v5513_v56 = vld [vmem:[#allocation26 + $0x138] sm:$0xff]  ;;  %v8752_v2 = vpack.c.bf16 %v5231_v53, %v5229_v55  ;;  %v5244_v55 = vld [vmem:[#allocation38 + $0x1a0] sm:$0xff] }
 0x854   : > { %v8880_v4 = vpack.c.bf16 %v5513_v56, %v5511_v16  ;;  %v5245_v48 = vld [vmem:[#allocation38 + $0x1a8] sm:$0xff]  ;;  %v5246_v53 = vld [vmem:[#allocation38 + $0x1b0] sm:$0xff] }
 0x855   : > { %8735 = vmatpush1.bf16.msra.mxu0 %v8734_v15  ;;  %8863 = vmatpush1.bf16.msra.mxu1 %v8862_v30  ;;  %v5512_v15 = vld [vmem:[#allocation26 + $0x130] sm:$0xff]  ;;  %v5529_v63 = vld [vmem:[#allocation26 + $0x1b8] sm:$0xff]  ;;  %v8770_v56 = vpack.c.bf16 %v5246_v53, %v5244_v55 }
 0x856   : > { %8737 = vmatprep.subr.bf16.mxu0 %v8736_v8  ;;  %8865 = vmatprep.subr.bf16.mxu1 %v8864_v9  ;;  %v5233_v30 = vld [vmem:[#allocation38 + $0x148] sm:$0xff]  ;;  %v8754_v9 = vpack.c.bf16 %v5230_v27, %v5228_v60  ;;  %v8882_v10 = vpack.c.bf16 %v5512_v15, %v5510_v7  ;;  %v5531_v7 = vld [vmem:[#allocation26 + $0x1c8] sm:$0xff] }
 0x857   : > { %v5517_v8 = vld [vmem:[#allocation26 + $0x158] sm:$0xff]  ;;  %v8756_v47 = vpack.c.bf16 %v5235_v12, %v5233_v30  ;;  %v5248_v30 = vld [vmem:[#allocation38 + $0x1c0] sm:$0xff] }
 0x858   : > { %v8884_v50 = vpack.c.bf16 %v5517_v8, %v5515_v21  ;;  %v5249_v27 = vld [vmem:[#allocation38 + $0x1c8] sm:$0xff]  ;;  %v5250_v21 = vld [vmem:[#allocation38 + $0x1d0] sm:$0xff] }
 0x859   : > { %8739 = vmatpush1.bf16.msra.mxu0 %v8738_v31  ;;  %8867 = vmatpush1.bf16.msra.mxu1 %v8866_v19  ;;  %v5516_v31 = vld [vmem:[#allocation26 + $0x150] sm:$0xff]  ;;  %v5533_v15 = vld [vmem:[#allocation26 + $0x1d8] sm:$0xff]  ;;  %v5530_v8 = vld [vmem:[#allocation26 + $0x1c0] sm:$0xff] }
 0x85a   : > { %8741 = vmatprep.subr.bf16.mxu0 %v8740_v6  ;;  %8869 = vmatprep.subr.bf16.mxu1 %v8868_v23  ;;  %v5237_v19 = vld [vmem:[#allocation38 + $0x168] sm:$0xff]  ;;  %v8758_v23 = vpack.c.bf16 %v5234_v36, %v5232_v17  ;;  %v8886_v18 = vpack.c.bf16 %v5516_v31, %v5514_v43  ;;  %v8900_v12 = vpack.c.bf16 %v5533_v15, %v5531_v7 }
 0x85b   : > { %v5521_v6 = vld [vmem:[#allocation26 + $0x178] sm:$0xff]  ;;  %v8760_v28 = vpack.c.bf16 %v5239_v42, %v5237_v19  ;;  %v5252_v19 = vld [vmem:[#allocation38 + $0x1e0] sm:$0xff] }
 0x85c   : > { %v8888_v54 = vpack.c.bf16 %v5521_v6, %v5519_v22  ;;  %v5253_v36 = vld [vmem:[#allocation38 + $0x1e8] sm:$0xff]  ;;  %v5254_v42 = vld [vmem:[#allocation38 + $0x1f0] sm:$0xff] }
 0x85d   : > { %8743 = vmatpush1.bf16.msra.mxu0 %v8742_v32  ;;  %8871 = vmatpush1.bf16.msra.mxu1 %v8870_v26  ;;  %v5520_v32 = vld [vmem:[#allocation26 + $0x170] sm:$0xff]  ;;  %v5537_v31 = vld [vmem:[#allocation26 + $0x1f8] sm:$0xff]  ;;  %v8778_v6 = vpack.c.bf16 %v5254_v42, %v5252_v19 }
 0x85e   : > { %8745 = vmatprep.subr.bf16.mxu0 %v8744_v34  ;;  %8873 = vmatprep.subr.bf16.mxu1 %v8872_v44  ;;  %v5241_v26 = vld [vmem:[#allocation38 + $0x188] sm:$0xff]  ;;  %v8762_v44 = vpack.c.bf16 %v5238_v25, %v5236_v24  ;;  %v8890_v35 = vpack.c.bf16 %v5520_v32, %v5518_v29 }
 0x85f   : > { %v5525_v34 = vld [vmem:[#allocation26 + $0x198] sm:$0xff]  ;;  %v8764_v39 = vpack.c.bf16 %v5243_v58, %v5241_v26  ;;  %v4818_v58 = vld [vmem:[#allocation19] sm:$0xf] }
 0x860   : > { %v8892_v40 = vpack.c.bf16 %v5525_v34, %v5523_v33  ;;  %v5257_v25 = vld [vmem:[#allocation38 + $0x208] sm:$0xff]  ;;  %v4823_v34 = vrot.slane %v4818_v58, %v11732_v62 }
 0x861   : > { %8747 = vmatpush1.bf16.msra.mxu0 %v8746_v46  ;;  %8875 = vmatpush1.bf16.msra.mxu1 %v8874_v37  ;;  %v5524_v46 = vld [vmem:[#allocation26 + $0x190] sm:$0xff]  ;;  %v8766_v37 = vpack.c.bf16 %v5242_v41, %v5240_v38  ;;  %v5541_v32 = vld [vmem:[#allocation26 + $0x218] sm:$0xff]  ;;  %v4827_v38 = vrot.slane %v4818_v58, %v11737_v0 }
 0x862   : > { %8749 = vmatprep.subr.bf16.mxu0 %v8748_v49  ;;  %8877 = vmatprep.subr.bf16.mxu1 %v8876_v51  ;;  %v8894_v5 = vpack.c.bf16 %v5524_v46, %v5522_v45  ;;  %v5247_v49 = vld [vmem:[#allocation38 + $0x1b8] sm:$0xff]  ;;  %v5124_v33 = vld [vmem:[#allocation20] sm:$0xf] }
 0x863   : > { %v5527_v51 = vld [vmem:[#allocation26 + $0x1a8] sm:$0xff]  ;;  %v8768_v52 = vpack.c.bf16 %v5247_v49, %v5245_v48  ;;  %v5129_v45 = vrot.slane %v5124_v33, %v11732_v62  ;;  %v5137_v46 = vrot.slane %v5124_v33, %v11783_v20  ;;  %v5540_v19 = vld [vmem:[#allocation26 + $0x210] sm:$0xff] }
 0x864   : > { %v8896_v16 = vpack.c.bf16 %v5529_v63, %v5527_v51  ;;  %v5133_v51 = vrot.slane %v5124_v33, %v11737_v0 }
 0x865   : > { %8751 = vmatpush1.bf16.msra.mxu0 %v8750_v57  ;;  %8879 = vmatpush1.bf16.msra.mxu1 %v8878_v59  ;;  %v5526_v57 = vld [vmem:[#allocation26 + $0x1a0] sm:$0xff]  ;;  %v5528_v59 = vld [vmem:[#allocation26 + $0x1b0] sm:$0xff] }
 0x866   : > { %8753 = vmatprep.subr.bf16.mxu0 %v8752_v2  ;;  %8881 = vmatprep.subr.bf16.mxu1 %v8880_v4  ;;  %v8898_v60 = vpack.c.bf16 %v5528_v59, %v5526_v57  ;;  %v5251_v2 = vld [vmem:[#allocation38 + $0x1d8] sm:$0xff] }
 0x867   : > { %v8772_v4 = vpack.c.bf16 %v5251_v2, %v5249_v27 }
 0x869   : > { %8755 = vmatpush1.bf16.msra.mxu0 %v8754_v9  ;;  %8883 = vmatpush1.bf16.msra.mxu1 %v8882_v10  ;;  %v5532_v9 = vld [vmem:[#allocation26 + $0x1d0] sm:$0xff]  ;;  %v8774_v10 = vpack.c.bf16 %v5250_v21, %v5248_v30 }
 0x86a   : > { %8757 = vmatprep.subr.bf16.mxu0 %v8756_v47  ;;  %8885 = vmatprep.subr.bf16.mxu1 %v8884_v50  ;;  %v8902_v17 = vpack.c.bf16 %v5532_v9, %v5530_v8  ;;  %v5255_v47 = vld [vmem:[#allocation38 + $0x1f8] sm:$0xff] }
 0x86b   : > { %v5535_v50 = vld [vmem:[#allocation26 + $0x1e8] sm:$0xff]  ;;  %v8776_v43 = vpack.c.bf16 %v5255_v47, %v5253_v36 }
 0x86c   : > { %v8904_v22 = vpack.c.bf16 %v5537_v31, %v5535_v50  ;;  %v5256_v50 = vld [vmem:[#allocation38 + $0x200] sm:$0xff]  ;;  %v5538_v31 = vld [vmem:[#allocation26 + $0x200] sm:$0xff] }
 0x86d   : > { %8759 = vmatpush1.bf16.msra.mxu0 %v8758_v23  ;;  %8887 = vmatpush1.bf16.msra.mxu1 %v8886_v18  ;;  %v5534_v23 = vld [vmem:[#allocation26 + $0x1e0] sm:$0xff]  ;;  %v5536_v18 = vld [vmem:[#allocation26 + $0x1f0] sm:$0xff] }
 0x86e   : > { %8761 = vmatprep.subr.bf16.mxu0 %v8760_v28  ;;  %8889 = vmatprep.subr.bf16.mxu1 %v8888_v54  ;;  %v8906_v24 = vpack.c.bf16 %v5536_v18, %v5534_v23  ;;  %v5259_v28 = vld [vmem:[#allocation38 + $0x218] sm:$0xff] }
 0x86f   : > { %v5539_v54 = vld [vmem:[#allocation26 + $0x208] sm:$0xff]  ;;  %v8780_v29 = vpack.c.bf16 %v5259_v28, %v5257_v25 }
 0x870   : > { %v8908_v26 = vpack.c.bf16 %v5541_v32, %v5539_v54  ;;  %v5260_v28 = vld [vmem:[#allocation38 + $0x220] sm:$0xff] }
 0x871   : > { %8763 = vmatpush1.bf16.msra.mxu0 %v8762_v44  ;;  %8891 = vmatpush1.bf16.msra.mxu1 %v8890_v35  ;;  %v4831_v44 = vrot.slane %v4818_v58, %v11783_v20  ;;  %v5150_v35 = vld [vmem:[#allocation22] sm:$0xf]  ;;  %v5544_v32 = vld [vmem:[#allocation26 + $0x230] sm:$0xff] }
 0x872   : > { %8765 = vmatprep.subr.bf16.mxu0 %v8764_v39  ;;  %8893 = vmatprep.subr.bf16.mxu1 %v8892_v40  ;;  %v4835_v39 = vrot.slane %v4818_v58, %v11742_v3  ;;  %v9576_v40 = vld [vmem:[#allocation25] sm:$0xf]  ;;  %v5155_v55 = vrot.slane %v5150_v35, %v11732_v62  ;;  %v5167_v2 = vrot.slane %v5150_v35, %v11742_v3 }
 0x873   : > { %v2811_v41 = vrot.slane %v9576_v40, %v11732_v62 }
 0x875   : > { %8767 = vmatpush1.bf16.msra.mxu0 %v8766_v37  ;;  %8895 = vmatpush1.bf16.msra.mxu1 %v8894_v5  ;;  %v2815_v37 = vrot.slane %v9576_v40, %v11737_v0  ;;  %v2823_v5 = vrot.slane %v9576_v40, %v11742_v3 }
 0x876   : > { %8769 = vmatprep.subr.bf16.mxu0 %v8768_v52  ;;  %8897 = vmatprep.subr.bf16.mxu1 %v8896_v16  ;;  %v5141_v52 = vrot.slane %v5124_v33, %v11742_v3  ;;  %v5163_v16 = vrot.slane %v5150_v35, %v11783_v20 }
 0x877   : > { %v9167_v9 = vadd.f32 %v11883_v13, %v2815_v37  ;;  %v9169_v20 = vadd.f32 %v11885_v14, %v2823_v5  ;;  %v5543_v13 = vld [vmem:[#allocation26 + $0x228] sm:$0xff]  ;;  %v5545_v14 = vld [vmem:[#allocation26 + $0x238] sm:$0xff] }
 0x879   : > { %8771 = vmatpush1.bf16.msra.mxu0 %v8770_v56  ;;  %8899 = vmatpush1.bf16.msra.mxu1 %v8898_v60  ;;  %v5159_v60 = vrot.slane %v5150_v35, %v11737_v0  ;;  %v5547_v35 = vld [vmem:[#allocation26 + $0x248] sm:$0xff] }
 0x87a   : > { %8773 = vmatprep.subr.bf16.mxu0 %v8772_v4  ;;  %8901 = vmatprep.subr.bf16.mxu1 %v8900_v12  ;;  %v9166_v12 = vadd.f32 %v11879_v61, %v2811_v41  ;;  %v5261_v61 = vld [vmem:[#allocation38 + $0x228] sm:$0xff] }
 0x87d   : > { %8775 = vmatpush1.bf16.msra.mxu0 %v8774_v10  ;;  %8903 = vmatpush1.bf16.msra.mxu1 %v8902_v17 }
 0x87e   : > { %8777 = vmatprep.subr.bf16.mxu0 %v8776_v43  ;;  %8905 = vmatprep.subr.bf16.mxu1 %v8904_v22  ;;  %v5258_v43 = vld [vmem:[#allocation38 + $0x210] sm:$0xff] }
 0x87f   : > { %v8782_v18 = vpack.c.bf16 %v5258_v43, %v5256_v50  ;;  %v5277_v50 = vld [vmem:[#allocation38 + $0x2a8] sm:$0xff]  ;;  %v5559_v43 = vld [vmem:[#allocation26 + $0x2a8] sm:$0xff] }
 0x881   : > { %8779 = vmatpush1.bf16.msra.mxu0 %v8778_v6  ;;  %8907 = vmatpush1.bf16.msra.mxu1 %v8906_v24  ;;  %v5263_v6 = vld [vmem:[#allocation38 + $0x238] sm:$0xff]  ;;  %v8910_v24 = vpack.c.bf16 %v5540_v19, %v5538_v31  ;;  %v5561_v31 = vld [vmem:[#allocation26 + $0x2b8] sm:$0xff] }
 0x882   : > { %8781 = vmatprep.subr.bf16.mxu0 %v8780_v29  ;;  %8909 = vmatprep.subr.bf16.mxu1 %v8908_v26  ;;  %v5542_v29 = vld [vmem:[#allocation26 + $0x220] sm:$0xff]  ;;  %v5265_v26 = vld [vmem:[#allocation38 + $0x248] sm:$0xff]  ;;  %v8784_v33 = vpack.c.bf16 %v5263_v6, %v5261_v61 }
 0x883   : > { %v8914_v41 = vpack.c.bf16 %v5544_v32, %v5542_v29  ;;  %v5278_v61 = vld [vmem:[#allocation38 + $0x2b0] sm:$0xff]  ;;  %v5280_v29 = vld [vmem:[#allocation38 + $0x2c0] sm:$0xff] }
 0x884   : > { %v5282_v32 = vld [vmem:[#allocation38 + $0x2d0] sm:$0xff] }
 0x917   : > { %v4977_v48 = vpop.f32.mrb[8].mxu0  ;;  %v5119_v49 = vpop.f32.mrb[8].mxu1 }
 0x918   : > { %v9174_v63 = vadd.f32 %v4977_v48, %v4823_v34  ;;  %v9176_v53 = vadd.f32 %v5119_v49, %v4831_v44  ;;  %v4979_v56 = vpop.f32.mrb[9].mxu0  ;;  %v5121_v57 = vpop.f32.mrb[9].mxu1  ;;  %v8912_v34 = vpack.c.bf16 %v5545_v14, %v5543_v13  ;;  %v5267_v44 = vld [vmem:[#allocation38 + $0x258] sm:$0xff]  ;;  %v5548_v49 = vld [vmem:[#allocation26 + $0x250] sm:$0xff] }
 0x919   : > { %v9175_v59 = vadd.f32 %v4979_v56, %v4827_v38  ;;  %v9177_v27 = vadd.f32 %v5121_v57, %v4835_v39  ;;  %v5549_v38 = vld [vmem:[#allocation26 + $0x258] sm:$0xff]  ;;  %v8788_v37 = vpack.c.bf16 %v5267_v44, %v5265_v26  ;;  %v5546_v48 = vld [vmem:[#allocation26 + $0x240] sm:$0xff]  ;;  %v5268_v56 = vld [vmem:[#allocation38 + $0x260] sm:$0xff] }
 0x91a   : > { %v5146_v4 = vmul.f32 %v9174_v63, %v5129_v45  ;;  %v5148_v7 = vmul.f32 %v9176_v53, %v5137_v46  ;;  %v5264_v45 = vld [vmem:[#allocation38 + $0x240] sm:$0xff]  ;;  %v5266_v46 = vld [vmem:[#allocation38 + $0x250] sm:$0xff]  ;;  %v8916_v5 = vpack.c.bf16 %v5549_v38, %v5547_v35  ;;  %v5285_v44 = vld [vmem:[#allocation38 + $0x2e8] sm:$0xff] }
 0x91b   : > { %v5147_v15 = vmul.f32 %v9175_v59, %v5133_v51  ;;  %v5149_v30 = vmul.f32 %v9177_v27, %v5141_v52  ;;  %v5269_v51 = vld [vmem:[#allocation38 + $0x268] sm:$0xff]  ;;  %v5271_v52 = vld [vmem:[#allocation38 + $0x278] sm:$0xff]  ;;  %v8790_v53 = vpack.c.bf16 %v5266_v46, %v5264_v45  ;;  %v5270_v57 = vld [vmem:[#allocation38 + $0x270] sm:$0xff] }
 0x91c   : > { %v5172_v21 = vadd.f32 %v5155_v55, %v5146_v4  ;;  %v5174_v8 = vadd.f32 %v5163_v16, %v5148_v7  ;;  %v5551_v63 = vld [vmem:[#allocation26 + $0x268] sm:$0xff]  ;;  %v5553_v55 = vld [vmem:[#allocation26 + $0x278] sm:$0xff]  ;;  %v8918_v16 = vpack.c.bf16 %v5548_v49, %v5546_v48  ;;  %v8792_v59 = vpack.c.bf16 %v5271_v52, %v5269_v51  ;;  %v5550_v27 = vld [vmem:[#allocation26 + $0x260] sm:$0xff] }
 0x91d   : > { %v5173_v10 = vadd.f32 %v5159_v60, %v5147_v15  ;;  %v5175_v17 = vadd.f32 %v5167_v2, %v5149_v30  ;;  %v8920_v60 = vpack.c.bf16 %v5553_v55, %v5551_v63  ;;  %v5552_v2 = vld [vmem:[#allocation26 + $0x270] sm:$0xff]  ;;  %v5275_v7 = vld [vmem:[#allocation38 + $0x298] sm:$0xff]  ;;  %v5557_v30 = vld [vmem:[#allocation26 + $0x298] sm:$0xff] }
 0x91e   : > { %v5176_v36 = vadd.f32 %v9166_v12, %v5172_v21  ;;  %v11926_v47 = vadd.f32 %v11881_v11, %v5174_v8  ;;  %v5262_v11 = vld [vmem:[#allocation38 + $0x230] sm:$0xff]  ;;  %v5273_v4 = vld [vmem:[#allocation38 + $0x288] sm:$0xff]  ;;  %v5555_v15 = vld [vmem:[#allocation26 + $0x288] sm:$0xff]  ;;  %v8794_v12 = vpack.c.bf16 %v5270_v57, %v5268_v56  ;;  %v8922_v21 = vpack.c.bf16 %v5552_v2, %v5550_v27 }
 0x91f   : > { %v5177_v3 = vadd.f32 %v9167_v9, %v5173_v10  ;;  %v5179_v42 = vadd.f32 %v9169_v20, %v5175_v17  ;;  %v8786_v40 = vpack.c.bf16 %v5262_v11, %v5260_v28  ;;  %v5272_v8 = vld [vmem:[#allocation38 + $0x280] sm:$0xff]  ;;  %v5274_v9 = vld [vmem:[#allocation38 + $0x290] sm:$0xff]  ;;  %v8796_v20 = vpack.c.bf16 %v5275_v7, %v5273_v4  ;;  %v5287_v35 = vld [vmem:[#allocation38 + $0x2f8] sm:$0xff] }
 0x920   : > { %v5184_v22 = vmul.f32 0.1, %v5176_v36  ;;  %vm5180_vm14 = vcmp.ge.f32.partialorder %v5176_v36, 0.0  ;;  %v8924_v10 = vpack.c.bf16 %v5557_v30, %v5555_v15  ;;  %v5554_v17 = vld [vmem:[#allocation26 + $0x280] sm:$0xff]  ;;  %v8798_v19 = vpack.c.bf16 %v5274_v9, %v5272_v8  ;;  %v5560_v14 = vld [vmem:[#allocation26 + $0x2b0] sm:$0xff]  ;;  %v5565_v28 = vld [vmem:[#allocation26 + $0x2d8] sm:$0xff] }
 0x921   : > { %vm5181_vm13 = vcmp.ge.f32.partialorder %v5177_v3, 0.0  ;;  %v5185_v23 = vmul.f32 0.1, %v5177_v3  ;;  %v5187_v25 = vmul.f32 0.1, %v5179_v42  ;;  %vm5183_vm15 = vcmp.ge.f32.partialorder %v5179_v42, 0.0 }
 0x922   : > { %v5188_v58 = vsel %vm5180_vm14, %v5176_v36, %v5184_v22  ;;  %v5556_v36 = vld [vmem:[#allocation26 + $0x290] sm:$0xff]  ;;  %v5558_v13 = vld [vmem:[#allocation26 + $0x2a0] sm:$0xff]  ;;  %v5567_v38 = vld [vmem:[#allocation26 + $0x2e8] sm:$0xff]  ;;  %vm5182_vm1 = vcmp.ge.f32.partialorder %v11926_v47, 0.0 }
 0x923   : > { %v5189_v54 = vsel %vm5181_vm13, %v5177_v3, %v5185_v23  ;;  %v5191_v39 = vsel %vm5183_vm15, %v5179_v42, %v5187_v25  ;;  %v5279_v3 = vld [vmem:[#allocation38 + $0x2b8] sm:$0xff]  ;;  %v8926_v42 = vpack.c.bf16 %v5556_v36, %v5554_v17  ;;  %v5276_v22 = vld [vmem:[#allocation38 + $0x2a0] sm:$0xff]  ;;  %v8928_v23 = vpack.c.bf16 %v5561_v31, %v5559_v43  ;;  %v5286_v46 = vld [vmem:[#allocation38 + $0x2f0] sm:$0xff] }
 0x924   : > { %5396 = vmatprep.mubr.f32.mxu0 %v5189_v54  ;;  %5678 = vmatprep.mubr.f32.mxu1 %v5189_v54  ;;  %v8800_v6 = vpack.c.bf16 %v5279_v3, %v5277_v50  ;;  %v5563_v25 = vld [vmem:[#allocation26 + $0x2c8] sm:$0xff]  ;;  %v8802_v11 = vpack.c.bf16 %v5278_v61, %v5276_v22  ;;  %v8930_v54 = vpack.c.bf16 %v5560_v14, %v5558_v13  ;;  %v5566_v48 = vld [vmem:[#allocation26 + $0x2e0] sm:$0xff]  ;;  %v5568_v49 = vld [vmem:[#allocation26 + $0x2f0] sm:$0xff] }
 0x925   : > { %5397 = vmatmul.mubr.f32.vlgmr.msra.gmra.mrb[10].mxu0 %v5188_v58  ;;  %5679 = vmatmul.mubr.f32.vlgmr.msra.gmra.mrb[10].mxu1 %v5188_v58  ;;  %v8932_v58 = vpack.c.bf16 %v5565_v28, %v5563_v25  ;;  %v5284_v45 = vld [vmem:[#allocation38 + $0x2e0] sm:$0xff]  ;;  %v5289_v51 = vld [vmem:[#allocation38 + $0x308] sm:$0xff]  ;;  %v5291_v52 = vld [vmem:[#allocation38 + $0x318] sm:$0xff] }
 0x926   : > { %8783 = vmatpush1.bf16.msra.mxu0 %v8782_v18  ;;  %8911 = vmatpush1.bf16.msra.mxu1 %v8910_v24  ;;  %v5281_v18 = vld [vmem:[#allocation38 + $0x2c8] sm:$0xff]  ;;  %v5283_v24 = vld [vmem:[#allocation38 + $0x2d8] sm:$0xff]  ;;  %v5288_v56 = vld [vmem:[#allocation38 + $0x300] sm:$0xff] }
 0x927   : > { %5467 = vmatprep.mubr.f32.mxu0 %v5191_v39  ;;  %5749 = vmatprep.mubr.f32.mxu1 %v5191_v39  ;;  %v8804_v26 = vpack.c.bf16 %v5283_v24, %v5281_v18  ;;  %v5569_v39 = vld [vmem:[#allocation26 + $0x2f8] sm:$0xff]  ;;  %v5571_v63 = vld [vmem:[#allocation26 + $0x308] sm:$0xff]  ;;  %v5570_v27 = vld [vmem:[#allocation26 + $0x300] sm:$0xff] }
 0x928   : > { %8785 = vmatprep.subr.bf16.mxu0 %v8784_v33  ;;  %8913 = vmatprep.subr.bf16.mxu1 %v8912_v34  ;;  %v5562_v33 = vld [vmem:[#allocation26 + $0x2c0] sm:$0xff]  ;;  %v5564_v34 = vld [vmem:[#allocation26 + $0x2d0] sm:$0xff]  ;;  %v5573_v55 = vld [vmem:[#allocation26 + $0x318] sm:$0xff] }
 0x929   : > { %v5290_v57 = vld [vmem:[#allocation38 + $0x310] sm:$0xff]  ;;  %v5572_v2 = vld [vmem:[#allocation26 + $0x310] sm:$0xff]  ;;  %v5295_v7 = vld [vmem:[#allocation38 + $0x338] sm:$0xff] }
 0x92a   : > { %8787 = vmatpush1.bf16.msra.mxu0 %v8786_v40  ;;  %8915 = vmatpush1.bf16.msra.mxu1 %v8914_v41  ;;  %v8806_v40 = vpack.c.bf16 %v5282_v32, %v5280_v29  ;;  %v8934_v41 = vpack.c.bf16 %v5564_v34, %v5562_v33  ;;  %v5293_v4 = vld [vmem:[#allocation38 + $0x328] sm:$0xff]  ;;  %v5575_v15 = vld [vmem:[#allocation26 + $0x328] sm:$0xff]  ;;  %v5294_v9 = vld [vmem:[#allocation38 + $0x330] sm:$0xff] }
 0x92b   : > { %8789 = vmatprep.subr.bf16.mxu0 %v8788_v37  ;;  %8917 = vmatprep.subr.bf16.mxu1 %v8916_v5  ;;  %v8808_v37 = vpack.c.bf16 %v5287_v35, %v5285_v44  ;;  %v8936_v5 = vpack.c.bf16 %v5569_v39, %v5567_v38  ;;  %v5577_v30 = vld [vmem:[#allocation26 + $0x338] sm:$0xff]  ;;  %v5292_v8 = vld [vmem:[#allocation38 + $0x320] sm:$0xff]  ;;  %v5574_v17 = vld [vmem:[#allocation26 + $0x320] sm:$0xff] }
 0x92c   : > { %v5576_v36 = vld [vmem:[#allocation26 + $0x330] sm:$0xff]  ;;  %v5299_v3 = vld [vmem:[#allocation38 + $0x358] sm:$0xff]  ;;  %v5581_v31 = vld [vmem:[#allocation26 + $0x358] sm:$0xff] }
 0x92d   : > { %v5297_v50 = vld [vmem:[#allocation38 + $0x348] sm:$0xff]  ;;  %v5579_v43 = vld [vmem:[#allocation26 + $0x348] sm:$0xff]  ;;  %v5298_v61 = vld [vmem:[#allocation38 + $0x350] sm:$0xff] }
 0x92e   : > { %8791 = vmatpush1.bf16.msra.mxu0 %v8790_v53  ;;  %8919 = vmatpush1.bf16.msra.mxu1 %v8918_v16  ;;  %v8810_v53 = vpack.c.bf16 %v5286_v46, %v5284_v45  ;;  %v8938_v16 = vpack.c.bf16 %v5568_v49, %v5566_v48  ;;  %v5296_v22 = vld [vmem:[#allocation38 + $0x340] sm:$0xff]  ;;  %v5578_v13 = vld [vmem:[#allocation26 + $0x340] sm:$0xff]  ;;  %v5301_v18 = vld [vmem:[#allocation38 + $0x368] sm:$0xff] }
 0x92f   : > { %8793 = vmatprep.subr.bf16.mxu0 %v8792_v59  ;;  %8921 = vmatprep.subr.bf16.mxu1 %v8920_v60  ;;  %v8812_v59 = vpack.c.bf16 %v5291_v52, %v5289_v51  ;;  %v8940_v60 = vpack.c.bf16 %v5573_v55, %v5571_v63  ;;  %v5580_v14 = vld [vmem:[#allocation26 + $0x350] sm:$0xff]  ;;  %v5303_v24 = vld [vmem:[#allocation38 + $0x378] sm:$0xff]  ;;  %v5585_v28 = vld [vmem:[#allocation26 + $0x378] sm:$0xff] }
 0x930   : > { %v5583_v25 = vld [vmem:[#allocation26 + $0x368] sm:$0xff]  ;;  %v5302_v32 = vld [vmem:[#allocation38 + $0x370] sm:$0xff]  ;;  %v5584_v34 = vld [vmem:[#allocation26 + $0x370] sm:$0xff] }
 0x931   : > { %v5300_v29 = vld [vmem:[#allocation38 + $0x360] sm:$0xff]  ;;  %v5582_v33 = vld [vmem:[#allocation26 + $0x360] sm:$0xff]  ;;  %v5305_v44 = vld [vmem:[#allocation38 + $0x388] sm:$0xff] }
 0x932   : > { %8795 = vmatpush1.bf16.msra.mxu0 %v8794_v12  ;;  %8923 = vmatpush1.bf16.msra.mxu1 %v8922_v21  ;;  %v8814_v12 = vpack.c.bf16 %v5290_v57, %v5288_v56  ;;  %v8942_v21 = vpack.c.bf16 %v5572_v2, %v5570_v27  ;;  %v5307_v35 = vld [vmem:[#allocation38 + $0x398] sm:$0xff]  ;;  %v5589_v39 = vld [vmem:[#allocation26 + $0x398] sm:$0xff]  ;;  %v5304_v45 = vld [vmem:[#allocation38 + $0x380] sm:$0xff] }
 0x933   : > { %8797 = vmatprep.subr.bf16.mxu0 %v8796_v20  ;;  %8925 = vmatprep.subr.bf16.mxu1 %v8924_v10  ;;  %v8816_v20 = vpack.c.bf16 %v5295_v7, %v5293_v4  ;;  %v8944_v10 = vpack.c.bf16 %v5577_v30, %v5575_v15  ;;  %v5587_v38 = vld [vmem:[#allocation26 + $0x388] sm:$0xff]  ;;  %v5306_v46 = vld [vmem:[#allocation38 + $0x390] sm:$0xff]  ;;  %v5588_v49 = vld [vmem:[#allocation26 + $0x390] sm:$0xff] }
 0x934   : > { %v5586_v48 = vld [vmem:[#allocation26 + $0x380] sm:$0xff]  ;;  %v5309_v51 = vld [vmem:[#allocation38 + $0x3a8] sm:$0xff]  ;;  %v5591_v63 = vld [vmem:[#allocation26 + $0x3a8] sm:$0xff] }
 0x935   : > { %v5311_v52 = vld [vmem:[#allocation38 + $0x3b8] sm:$0xff]  ;;  %v5593_v55 = vld [vmem:[#allocation26 + $0x3b8] sm:$0xff]  ;;  %v5308_v56 = vld [vmem:[#allocation38 + $0x3a0] sm:$0xff] }
 0x936   : > { %8799 = vmatpush1.bf16.msra.mxu0 %v8798_v19  ;;  %8927 = vmatpush1.bf16.msra.mxu1 %v8926_v42  ;;  %v8818_v19 = vpack.c.bf16 %v5294_v9, %v5292_v8  ;;  %v8946_v42 = vpack.c.bf16 %v5576_v36, %v5574_v17  ;;  %v5310_v57 = vld [vmem:[#allocation38 + $0x3b0] sm:$0xff]  ;;  %v5592_v2 = vld [vmem:[#allocation26 + $0x3b0] sm:$0xff]  ;;  %v5315_v7 = vld [vmem:[#allocation38 + $0x3d8] sm:$0xff] }
 0x937   : > { %8801 = vmatprep.subr.bf16.mxu0 %v8800_v6  ;;  %8929 = vmatprep.subr.bf16.mxu1 %v8928_v23  ;;  %v8820_v6 = vpack.c.bf16 %v5299_v3, %v5297_v50  ;;  %v8948_v23 = vpack.c.bf16 %v5581_v31, %v5579_v43  ;;  %v5590_v27 = vld [vmem:[#allocation26 + $0x3a0] sm:$0xff]  ;;  %v5313_v4 = vld [vmem:[#allocation38 + $0x3c8] sm:$0xff]  ;;  %v5595_v15 = vld [vmem:[#allocation26 + $0x3c8] sm:$0xff] }
 0x938   : > { %v5597_v30 = vld [vmem:[#allocation26 + $0x3d8] sm:$0xff]  ;;  %v5312_v8 = vld [vmem:[#allocation38 + $0x3c0] sm:$0xff]  ;;  %v5594_v17 = vld [vmem:[#allocation26 + $0x3c0] sm:$0xff] }
 0x939   : > { %v5314_v9 = vld [vmem:[#allocation38 + $0x3d0] sm:$0xff]  ;;  %v5596_v36 = vld [vmem:[#allocation26 + $0x3d0] sm:$0xff]  ;;  %v5319_v3 = vld [vmem:[#allocation38 + $0x3f8] sm:$0xff] }
 0x93a   : > { %8803 = vmatpush1.bf16.msra.mxu0 %v8802_v11  ;;  %8931 = vmatpush1.bf16.msra.mxu1 %v8930_v54  ;;  %v8822_v11 = vpack.c.bf16 %v5298_v61, %v5296_v22  ;;  %v8950_v54 = vpack.c.bf16 %v5580_v14, %v5578_v13  ;;  %v5317_v50 = vld [vmem:[#allocation38 + $0x3e8] sm:$0xff]  ;;  %v5599_v43 = vld [vmem:[#allocation26 + $0x3e8] sm:$0xff]  ;;  %v5598_v13 = vld [vmem:[#allocation26 + $0x3e0] sm:$0xff] }
 0x93b   : > { %8805 = vmatprep.subr.bf16.mxu0 %v8804_v26  ;;  %8933 = vmatprep.subr.bf16.mxu1 %v8932_v58  ;;  %v8824_v26 = vpack.c.bf16 %v5303_v24, %v5301_v18  ;;  %v8952_v58 = vpack.c.bf16 %v5585_v28, %v5583_v25  ;;  %v5601_v31 = vld [vmem:[#allocation26 + $0x3f8] sm:$0xff]  ;;  %v5316_v22 = vld [vmem:[#allocation38 + $0x3e0] sm:$0xff]  ;;  %v8840_v61 = vpack.c.bf16 %v5319_v3, %v5317_v50 }
 0x93c   : > { %v5600_v14 = vld [vmem:[#allocation26 + $0x3f0] sm:$0xff]  ;;  %v5793_v24 = vld [vmem:[#allocation32 + $0x18] sm:$0xff]  ;;  %v5818_v50 = vld [vmem:[#allocation32 + $0xe0] sm:$0xff] }
 0x93d   : > { %v5791_v18 = vld [vmem:[#allocation32 + $0x8] sm:$0xff]  ;;  %v8970_v28 = vpack.c.bf16 %v5600_v14, %v5598_v13  ;;  %v5820_v3 = vld [vmem:[#allocation32 + $0xf0] sm:$0xff] }
 0x93e   : > { %8807 = vmatpush1.bf16.msra.mxu0 %v8806_v40  ;;  %8935 = vmatpush1.bf16.msra.mxu1 %v8934_v41  ;;  %v8826_v40 = vpack.c.bf16 %v5302_v32, %v5300_v29  ;;  %v8954_v41 = vpack.c.bf16 %v5584_v34, %v5582_v33  ;;  %v5792_v29 = vld [vmem:[#allocation32 + $0x10] sm:$0xff]  ;;  %v5186_v32 = vmul.f32 0.1, %v11926_v47 }
 0x93f   : > { %8809 = vmatprep.subr.bf16.mxu0 %v8808_v37  ;;  %8937 = vmatprep.subr.bf16.mxu1 %v8936_v5  ;;  %v8828_v37 = vpack.c.bf16 %v5307_v35, %v5305_v44  ;;  %v8956_v5 = vpack.c.bf16 %v5589_v39, %v5587_v38  ;;  %v5794_v44 = vld [vmem:[#allocation32 + $0x20] sm:$0xff]  ;;  %v5796_v35 = vld [vmem:[#allocation32 + $0x30] sm:$0xff]  ;;  %v5799_v39 = vld [vmem:[#allocation32 + $0x48] sm:$0xff] }
 0x940   : > { %v5190_v38 = vsel %vm5182_vm1, %v11926_v47, %v5186_v32  ;;  %v5809_v47 = vld [vmem:[#allocation32 + $0x98] sm:$0xff]  ;;  %v5832_v32 = vld [vmem:[#allocation32 + $0x150] sm:$0xff] }
 0x942   : > { %8811 = vmatpush1.bf16.msra.mxu0 %v8810_v53  ;;  %8939 = vmatpush1.bf16.msra.mxu1 %v8938_v16  ;;  %v8830_v53 = vpack.c.bf16 %v5306_v46, %v5304_v45  ;;  %v8958_v16 = vpack.c.bf16 %v5588_v49, %v5586_v48  ;;  %v5798_v46 = vld [vmem:[#allocation32 + $0x40] sm:$0xff]  ;;  %v5805_v48 = vld [vmem:[#allocation32 + $0x78] sm:$0xff] }
 0x943   : > { %8813 = vmatprep.subr.bf16.mxu0 %v8812_v59  ;;  %8941 = vmatprep.subr.bf16.mxu1 %v8940_v60  ;;  %v8832_v59 = vpack.c.bf16 %v5311_v52, %v5309_v51  ;;  %v8960_v60 = vpack.c.bf16 %v5593_v55, %v5591_v63  ;;  %v5802_v52 = vld [vmem:[#allocation32 + $0x60] sm:$0xff]  ;;  %v5804_v63 = vld [vmem:[#allocation32 + $0x70] sm:$0xff]  ;;  %v5807_v55 = vld [vmem:[#allocation32 + $0x88] sm:$0xff] }
 0x946   : > { %8815 = vmatpush1.bf16.msra.mxu0 %v8814_v12  ;;  %8943 = vmatpush1.bf16.msra.mxu1 %v8942_v21  ;;  %v8834_v12 = vpack.c.bf16 %v5310_v57, %v5308_v56  ;;  %v8962_v21 = vpack.c.bf16 %v5592_v2, %v5590_v27  ;;  %v5806_v56 = vld [vmem:[#allocation32 + $0x80] sm:$0xff]  ;;  %v5808_v57 = vld [vmem:[#allocation32 + $0x90] sm:$0xff] }
 0x947   : > { %8817 = vmatprep.subr.bf16.mxu0 %v8816_v20  ;;  %8945 = vmatprep.subr.bf16.mxu1 %v8944_v10  ;;  %v8836_v20 = vpack.c.bf16 %v5315_v7, %v5313_v4  ;;  %v8964_v10 = vpack.c.bf16 %v5597_v30, %v5595_v15  ;;  %v8990_v27 = vpack.c.bf16 %v5808_v57, %v5806_v56  ;;  %v5810_v4 = vld [vmem:[#allocation32 + $0xa0] sm:$0xff]  ;;  %v5812_v7 = vld [vmem:[#allocation32 + $0xb0] sm:$0xff]  ;;  %v5815_v15 = vld [vmem:[#allocation32 + $0xc8] sm:$0xff] }
 0x948   : > { %v5817_v30 = vld [vmem:[#allocation32 + $0xd8] sm:$0xff]  ;;  %v5848_v56 = vld [vmem:[#allocation32 + $0x1d0] sm:$0xff] }
 0x94a   : > { %8819 = vmatpush1.bf16.msra.mxu0 %v8818_v19  ;;  %8947 = vmatpush1.bf16.msra.mxu1 %v8946_v42  ;;  %v8838_v19 = vpack.c.bf16 %v5314_v9, %v5312_v8  ;;  %v8966_v42 = vpack.c.bf16 %v5596_v36, %v5594_v17  ;;  %v5814_v8 = vld [vmem:[#allocation32 + $0xc0] sm:$0xff]  ;;  %v5816_v9 = vld [vmem:[#allocation32 + $0xd0] sm:$0xff] }
 0x94b   : > { %8821 = vmatprep.subr.bf16.mxu0 %v8820_v6  ;;  %8949 = vmatprep.subr.bf16.mxu1 %v8948_v23  ;;  %v8968_v6 = vpack.c.bf16 %v5601_v31, %v5599_v43  ;;  %v5318_v23 = vld [vmem:[#allocation38 + $0x3f0] sm:$0xff]  ;;  %v8998_v17 = vpack.c.bf16 %v5816_v9, %v5814_v8  ;;  %v5823_v43 = vld [vmem:[#allocation32 + $0x108] sm:$0xff] }
 0x94c   : > { %v8842_v25 = vpack.c.bf16 %v5318_v23, %v5316_v22  ;;  %v5825_v31 = vld [vmem:[#allocation32 + $0x118] sm:$0xff]  ;;  %v5822_v22 = vld [vmem:[#allocation32 + $0x100] sm:$0xff] }
 0x94d   : > { %v5829_v23 = vld [vmem:[#allocation32 + $0x138] sm:$0xff]  ;;  %v5991_v9 = vld [vmem:[#allocation53 + $0x90] sm:$0xff] }
 0x94e   : > { %8823 = vmatpush1.bf16.msra.mxu0 %v8822_v11  ;;  %8951 = vmatpush1.bf16.msra.mxu1 %v8950_v54  ;;  %v8972_v11 = vpack.c.bf16 %v5793_v24, %v5791_v18  ;;  %v5790_v54 = vld [vmem:[#allocation32] sm:$0xff]  ;;  %v5828_v24 = vld [vmem:[#allocation32 + $0x130] sm:$0xff] }
 0x94f   : > { %8825 = vmatprep.subr.bf16.mxu0 %v8824_v26  ;;  %8953 = vmatprep.subr.bf16.mxu1 %v8952_v58  ;;  %v5795_v26 = vld [vmem:[#allocation32 + $0x28] sm:$0xff]  ;;  %v5797_v58 = vld [vmem:[#allocation32 + $0x38] sm:$0xff]  ;;  %v8974_v33 = vpack.c.bf16 %v5792_v29, %v5790_v54  ;;  %v5826_v18 = vld [vmem:[#allocation32 + $0x120] sm:$0xff] }
 0x950   : > { %v8976_v34 = vpack.c.bf16 %v5797_v58, %v5795_v26  ;;  %v5830_v29 = vld [vmem:[#allocation32 + $0x140] sm:$0xff]  ;;  %v5835_v26 = vld [vmem:[#allocation32 + $0x168] sm:$0xff]  ;;  %v5837_v58 = vld [vmem:[#allocation32 + $0x178] sm:$0xff] }
 0x951   : > { %v5974_v8 = vld [vmem:[#allocation53 + $0x8] sm:$0xff] }
 0x952   : > { %8827 = vmatpush1.bf16.msra.mxu0 %v8826_v40  ;;  %8955 = vmatpush1.bf16.msra.mxu1 %v8954_v41  ;;  %v5801_v40 = vld [vmem:[#allocation32 + $0x58] sm:$0xff]  ;;  %v8978_v41 = vpack.c.bf16 %v5796_v35, %v5794_v44  ;;  %v5834_v44 = vld [vmem:[#allocation32 + $0x160] sm:$0xff]  ;;  %v5836_v35 = vld [vmem:[#allocation32 + $0x170] sm:$0xff] }
 0x953   : > { %8829 = vmatprep.subr.bf16.mxu0 %v8828_v37  ;;  %8957 = vmatprep.subr.bf16.mxu1 %v8956_v5  ;;  %v8980_v45 = vpack.c.bf16 %v5801_v40, %v5799_v39  ;;  %v5800_v37 = vld [vmem:[#allocation32 + $0x50] sm:$0xff]  ;;  %v5803_v5 = vld [vmem:[#allocation32 + $0x68] sm:$0xff]  ;;  %v5841_v39 = vld [vmem:[#allocation32 + $0x198] sm:$0xff]  ;;  %v9018_v40 = vpack.c.bf16 %v5836_v35, %v5834_v44 }
 0x954   : > { %v8982_v49 = vpack.c.bf16 %v5800_v37, %v5798_v46  ;;  %v8984_v51 = vpack.c.bf16 %v5805_v48, %v5803_v5  ;;  %v5840_v46 = vld [vmem:[#allocation32 + $0x190] sm:$0xff]  ;;  %v5843_v5 = vld [vmem:[#allocation32 + $0x1a8] sm:$0xff]  ;;  %v5845_v48 = vld [vmem:[#allocation32 + $0x1b8] sm:$0xff] }
 0x956   : > { %8831 = vmatpush1.bf16.msra.mxu0 %v8830_v53  ;;  %8959 = vmatpush1.bf16.msra.mxu1 %v8958_v16  ;;  %v8986_v53 = vpack.c.bf16 %v5804_v63, %v5802_v52  ;;  %v8988_v16 = vpack.c.bf16 %v5809_v47, %v5807_v55  ;;  %v5844_v52 = vld [vmem:[#allocation32 + $0x1b0] sm:$0xff]  ;;  %v5847_v55 = vld [vmem:[#allocation32 + $0x1c8] sm:$0xff]  ;;  %v5849_v47 = vld [vmem:[#allocation32 + $0x1d8] sm:$0xff] }
 0x957   : > { %8833 = vmatprep.subr.bf16.mxu0 %v8832_v59  ;;  %8961 = vmatprep.subr.bf16.mxu1 %v8960_v60  ;;  %v5811_v59 = vld [vmem:[#allocation32 + $0xa8] sm:$0xff]  ;;  %v5813_v60 = vld [vmem:[#allocation32 + $0xb8] sm:$0xff] }
 0x958   : > { %v8992_v2 = vpack.c.bf16 %v5813_v60, %v5811_v59  ;;  %v5851_v59 = vld [vmem:[#allocation32 + $0x1e8] sm:$0xff]  ;;  %v5853_v60 = vld [vmem:[#allocation32 + $0x1f8] sm:$0xff] }
 0x95a   : > { %8835 = vmatpush1.bf16.msra.mxu0 %v8834_v12  ;;  %8963 = vmatpush1.bf16.msra.mxu1 %v8962_v21  ;;  %v8994_v12 = vpack.c.bf16 %v5812_v7, %v5810_v4  ;;  %v8996_v21 = vpack.c.bf16 %v5817_v30, %v5815_v15  ;;  %v5852_v4 = vld [vmem:[#allocation32 + $0x1f0] sm:$0xff]  ;;  %v5990_v30 = vld [vmem:[#allocation53 + $0x88] sm:$0xff] }
 0x95b   : > { %8837 = vmatprep.subr.bf16.mxu0 %v8836_v20  ;;  %8965 = vmatprep.subr.bf16.mxu1 %v8964_v10  ;;  %v5819_v20 = vld [vmem:[#allocation32 + $0xe8] sm:$0xff]  ;;  %v5821_v10 = vld [vmem:[#allocation32 + $0xf8] sm:$0xff] }
 0x95c   : > { %v9000_v36 = vpack.c.bf16 %v5821_v10, %v5819_v20  ;;  %v5989_v15 = vld [vmem:[#allocation53 + $0x80] sm:$0xff]  ;;  %v5992_v20 = vld [vmem:[#allocation53 + $0x98] sm:$0xff] }
 0x95e   : > { %8839 = vmatpush1.bf16.msra.mxu0 %v8838_v19  ;;  %8967 = vmatpush1.bf16.msra.mxu1 %v8966_v42  ;;  %v9002_v19 = vpack.c.bf16 %v5820_v3, %v5818_v50  ;;  %v9004_v42 = vpack.c.bf16 %v5825_v31, %v5823_v43  ;;  %v5976_v50 = vld [vmem:[#allocation53 + $0x18] sm:$0xff]  ;;  %v5993_v3 = vld [vmem:[#allocation53 + $0xa0] sm:$0xff]  ;;  %v5994_v43 = vld [vmem:[#allocation53 + $0xa8] sm:$0xff] }
 0x95f   : > { %8841 = vmatprep.subr.bf16.mxu0 %v8840_v61  ;;  %8969 = vmatprep.subr.bf16.mxu1 %v8968_v6  ;;  %v5824_v61 = vld [vmem:[#allocation32 + $0x110] sm:$0xff]  ;;  %v5827_v6 = vld [vmem:[#allocation32 + $0x128] sm:$0xff] }
 0x960   : > { %v9006_v13 = vpack.c.bf16 %v5824_v61, %v5822_v22  ;;  %v9008_v14 = vpack.c.bf16 %v5829_v23, %v5827_v6  ;;  %v5978_v22 = vld [vmem:[#allocation53 + $0x28] sm:$0xff]  ;;  %v5995_v61 = vld [vmem:[#allocation53 + $0xb0] sm:$0xff]  ;;  %v5996_v6 = vld [vmem:[#allocation53 + $0xb8] sm:$0xff] }
 0x962   : > { %8843 = vmatpush1.bf16.msra.mxu0 %v8842_v25  ;;  %8971 = vmatpush1.bf16.msra.mxu1 %v8970_v28  ;;  %v5831_v25 = vld [vmem:[#allocation32 + $0x148] sm:$0xff]  ;;  %v5833_v28 = vld [vmem:[#allocation32 + $0x158] sm:$0xff] }
 0x963   : > { %8973 = vmatprep.subr.bf16.mxu0 %v8972_v11  ;;  %v9010_v11 = vpack.c.bf16 %v5828_v24, %v5826_v18  ;;  %v9012_v54 = vpack.c.bf16 %v5833_v28, %v5831_v25  ;;  %v5980_v18 = vld [vmem:[#allocation53 + $0x38] sm:$0xff]  ;;  %v5997_v24 = vld [vmem:[#allocation53 + $0xc0] sm:$0xff]  ;;  %v5998_v25 = vld [vmem:[#allocation53 + $0xc8] sm:$0xff] }
 0x965   : > { %5468 = vmatmul.mubr.f32.vlgmr.msra.gmra.mrb[10].mxu0 %v5190_v38  ;;  %5750 = vmatmul.mubr.f32.vlgmr.msra.gmra.mrb[10].mxu1 %v5190_v38  ;;  %v5839_v38 = vld [vmem:[#allocation32 + $0x188] sm:$0xff] }
 0x966   : > { %8975 = vmatpush1.bf16.msra.mxu0 %v8974_v33  ;;  %v9014_v33 = vpack.c.bf16 %v5832_v32, %v5830_v29  ;;  %v5982_v29 = vld [vmem:[#allocation53 + $0x48] sm:$0xff] }
 0x967   : > { %8977 = vmatprep.subr.bf16.mxu0 %v8976_v34  ;;  %v9016_v34 = vpack.c.bf16 %v5837_v58, %v5835_v26  ;;  %v5602_v26 = vld [vmem:[#allocation28] sm:$0x3]  ;;  %v5756_v58 = vld [vmem:[#allocation29] sm:$0x3] }
 0x968   : > { %v5611_v44 = vrot.slane %v5602_v26, %v11737_v0  ;;  %v5761_v35 = vrot.slane %v5756_v58, %v11732_v62 }
 0x96a   : > { %8979 = vmatpush1.bf16.msra.mxu0 %v8978_v41  ;;  %v9020_v41 = vpack.c.bf16 %v5841_v39, %v5839_v38 }
 0x96b   : > { %8981 = vmatprep.subr.bf16.mxu0 %v8980_v45  ;;  %v5838_v45 = vld [vmem:[#allocation32 + $0x180] sm:$0xff] }
 0x96c   : > { %v9022_v37 = vpack.c.bf16 %v5840_v46, %v5838_v45 }
 0x96e   : > { %8983 = vmatpush1.bf16.msra.mxu0 %v8982_v49  ;;  %v9024_v49 = vpack.c.bf16 %v5845_v48, %v5843_v5 }
 0x96f   : > { %8985 = vmatprep.subr.bf16.mxu0 %v8984_v51  ;;  %v5842_v51 = vld [vmem:[#allocation32 + $0x1a0] sm:$0xff] }
 0x970   : > { %v9026_v63 = vpack.c.bf16 %v5844_v52, %v5842_v51 }
 0x972   : > { %8987 = vmatpush1.bf16.msra.mxu0 %v8986_v53  ;;  %v9028_v53 = vpack.c.bf16 %v5849_v47, %v5847_v55 }
 0x973   : > { %8989 = vmatprep.subr.bf16.mxu0 %v8988_v16  ;;  %v5846_v16 = vld [vmem:[#allocation32 + $0x1c0] sm:$0xff] }
 0x974   : > { %v9030_v57 = vpack.c.bf16 %v5848_v56, %v5846_v16  ;;  %v5999_v56 = vld [vmem:[#allocation53 + $0xd0] sm:$0xff] }
 0x976   : > { %8991 = vmatpush1.bf16.msra.mxu0 %v8990_v27  ;;  %v9032_v27 = vpack.c.bf16 %v5853_v60, %v5851_v59  ;;  %v5983_v60 = vld [vmem:[#allocation53 + $0x50] sm:$0xff] }
 0x977   : > { %8993 = vmatprep.subr.bf16.mxu0 %v8992_v2  ;;  %v5850_v2 = vld [vmem:[#allocation32 + $0x1e0] sm:$0xff] }
 0x978   : > { %v9034_v7 = vpack.c.bf16 %v5852_v4, %v5850_v2  ;;  %v6001_v4 = vld [vmem:[#allocation53 + $0xe0] sm:$0xff] }
 0x97a   : > { %8995 = vmatpush1.bf16.msra.mxu0 %v8994_v12  ;;  %v5973_v12 = vld [vmem:[#allocation53] sm:$0xff] }
 0x97b   : > { %8997 = vmatprep.subr.bf16.mxu0 %v8996_v21  ;;  %v9036_v21 = vpack.c.bf16 %v5990_v30, %v5989_v15  ;;  %v9038_v10 = vpack.c.bf16 %v5974_v8, %v5973_v12  ;;  %v5985_v30 = vld [vmem:[#allocation53 + $0x60] sm:$0xff]  ;;  %v5986_v12 = vld [vmem:[#allocation53 + $0x68] sm:$0xff]  ;;  %v6003_v8 = vld [vmem:[#allocation53 + $0xf0] sm:$0xff] }
 0x97d   : > { %9037 = vmatprep.subr.bf16.mxu1 %v9036_v21  ;;  %v9062_v21 = vpack.c.bf16 %v5986_v12, %v5985_v30  ;;  %v6090_v12 = vld [vmem:[#allocation41 + $0x40] sm:$0xff] }
 0x97e   : > { %8999 = vmatpush1.bf16.msra.mxu0 %v8998_v17  ;;  %v9040_v17 = vpack.c.bf16 %v5992_v20, %v5991_v9  ;;  %9039 = vmatpush3.bf16.msra.mxu1 %v9038_v10  ;;  %v6004_v9 = vld [vmem:[#allocation53 + $0xf8] sm:$0xff]  ;;  %v5987_v10 = vld [vmem:[#allocation53 + $0x70] sm:$0xff] }
 0x97f   : > { %9001 = vmatprep.subr.bf16.mxu0 %v9000_v36  ;;  %v5975_v36 = vld [vmem:[#allocation53 + $0x10] sm:$0xff]  ;;  %v9064_v20 = vpack.c.bf16 %v6004_v9, %v6003_v8  ;;  %v6108_v8 = vld [vmem:[#allocation41 + $0xd0] sm:$0xff] }
 0x980   : > { %v9042_v31 = vpack.c.bf16 %v5976_v50, %v5975_v36  ;;  %9041 = vmatprep.subr.bf16.mxu1 %v9040_v17  ;;  %v5988_v17 = vld [vmem:[#allocation53 + $0x78] sm:$0xff]  ;;  %v6109_v9 = vld [vmem:[#allocation41 + $0xd8] sm:$0xff] }
 0x981   : > { %v9066_v36 = vpack.c.bf16 %v5988_v17, %v5987_v10  ;;  %v6098_v50 = vld [vmem:[#allocation41 + $0x80] sm:$0xff]  ;;  %v9088_v10 = vpack.c.bf16 %v6109_v9, %v6108_v8  ;;  %v6092_v17 = vld [vmem:[#allocation41 + $0x50] sm:$0xff] }
 0x982   : > { %9003 = vmatpush1.bf16.msra.mxu0 %v9002_v19  ;;  %v9044_v19 = vpack.c.bf16 %v5994_v43, %v5993_v3  ;;  %9043 = vmatpush3.bf16.msra.mxu1 %v9042_v31  ;;  %v6099_v3 = vld [vmem:[#allocation41 + $0x88] sm:$0xff]  ;;  %v5854_v31 = vld [vmem:[#allocation34] sm:$0x3]  ;;  %v7171_v8 = vld [vmem:[#allocation43] ss:$0 sm:$0xff] }
 0x983   : > { %9005 = vmatprep.subr.bf16.mxu0 %v9004_v42  ;;  %v5977_v42 = vld [vmem:[#allocation53 + $0x20] sm:$0xff]  ;;  %v9068_v43 = vpack.c.bf16 %v6099_v3, %v6098_v50  ;;  %v6110_v50 = vld [vmem:[#allocation41 + $0xe0] sm:$0xff] }
 0x984   : > { %v9046_v23 = vpack.c.bf16 %v5978_v22, %v5977_v42  ;;  %9045 = vmatprep.subr.bf16.mxu1 %v9044_v19  ;;  %v5937_v19 = vld [vmem:[#allocation35] sm:$0x3]  ;;  %v5859_v42 = vrot.slane %v5854_v31, %v11732_v62  ;;  %v5320_v22 = vld [vmem:[#allocation40] sm:$0x3]  ;;  %v6111_v3 = vld [vmem:[#allocation41 + $0xe8] sm:$0xff] }
 0x986   : > { %9007 = vmatpush1.bf16.msra.mxu0 %v9006_v13  ;;  %v9048_v13 = vpack.c.bf16 %v5996_v6, %v5995_v61  ;;  %9047 = vmatpush3.bf16.msra.mxu1 %v9046_v23  ;;  %v5951_v61 = vld [vmem:[#allocation37] sm:$0x3]  ;;  %v5863_v6 = vrot.slane %v5854_v31, %v11737_v0  ;;  %v5942_v23 = vrot.slane %v5937_v19, %v11732_v62 }
 0x987   : > { %9009 = vmatprep.subr.bf16.mxu0 %v9008_v14  ;;  %v5979_v14 = vld [vmem:[#allocation53 + $0x30] sm:$0xff]  ;;  %v9092_v31 = vpack.c.bf16 %v6111_v3, %v6110_v50 }
 0x988   : > { %v9050_v28 = vpack.c.bf16 %v5980_v18, %v5979_v14  ;;  %9049 = vmatprep.subr.bf16.mxu1 %v9048_v13  ;;  %v5946_v14 = vrot.slane %v5937_v19, %v11737_v0  ;;  %v5325_v18 = vrot.slane %v5320_v22, %v11732_v62  ;;  %v6094_v19 = vld [vmem:[#allocation41 + $0x60] sm:$0xff] }
 0x98a   : > { %9011 = vmatpush1.bf16.msra.mxu0 %v9010_v11  ;;  %v9052_v11 = vpack.c.bf16 %v5998_v25, %v5997_v24  ;;  %9051 = vmatpush3.bf16.msra.mxu1 %v9050_v28  ;;  %v5956_v25 = vrot.slane %v5951_v61, %v11732_v62 }
 0x98b   : > { %9013 = vmatprep.subr.bf16.mxu0 %v9012_v54  ;;  %v5981_v54 = vld [vmem:[#allocation53 + $0x40] sm:$0xff] }
 0x98c   : > { %v9054_v32 = vpack.c.bf16 %v5982_v29, %v5981_v54  ;;  %9053 = vmatprep.subr.bf16.mxu1 %v9052_v11  ;;  %v5329_v11 = vrot.slane %v5320_v22, %v11737_v0  ;;  %v5960_v29 = vrot.slane %v5951_v61, %v11737_v0  ;;  %v6112_v22 = vld [vmem:[#allocation41 + $0xf0] sm:$0xff]  ;;  %v6113_v61 = vld [vmem:[#allocation41 + $0xf8] sm:$0xff] }
 0x98e   : > { %9015 = vmatpush1.bf16.msra.mxu0 %v9014_v33  ;;  %9055 = vmatpush3.bf16.msra.mxu1 %v9054_v32  ;;  %v5607_v33 = vrot.slane %v5602_v26, %v11732_v62 }
 0x98f   : > { %9017 = vmatprep.subr.bf16.mxu0 %v9016_v34  ;;  %v5770_v34 = vld [vmem:[#allocation31] sm:$0x3] }
 0x990   : > { %v5775_v45 = vrot.slane %v5770_v34, %v11732_v62  ;;  %v5779_v48 = vrot.slane %v5770_v34, %v11737_v0  ;;  %v6100_v62 = vld [vmem:[#allocation41 + $0x90] sm:$0xff] }
 0x992   : > { %9019 = vmatpush1.bf16.msra.mxu0 %v9018_v40  ;;  %v5765_v40 = vrot.slane %v5756_v58, %v11737_v0 }
 0x993   : > { %9021 = vmatprep.subr.bf16.mxu0 %v9020_v41 }
 0x996   : > { %9023 = vmatpush1.bf16.msra.mxu0 %v9022_v37 }
 0x997   : > { %9025 = vmatprep.subr.bf16.mxu0 %v9024_v49 }
 0x99a   : > { %9027 = vmatpush1.bf16.msra.mxu0 %v9026_v63 }
 0x99b   : > { %9029 = vmatprep.subr.bf16.mxu0 %v9028_v53 }
 0x99e   : > { %9031 = vmatpush1.bf16.msra.mxu0 %v9030_v57  ;;  %v6000_v57 = vld [vmem:[#allocation53 + $0xd8] sm:$0xff] }
 0x99f   : > { %9033 = vmatprep.subr.bf16.mxu0 %v9032_v27  ;;  %v9056_v59 = vpack.c.bf16 %v6000_v57, %v5999_v56  ;;  %v5984_v27 = vld [vmem:[#allocation53 + $0x58] sm:$0xff]  ;;  %v6104_v56 = vld [vmem:[#allocation41 + $0xb0] sm:$0xff]  ;;  %v6105_v57 = vld [vmem:[#allocation41 + $0xb8] sm:$0xff] }
 0x9a0   : > { %v9058_v2 = vpack.c.bf16 %v5984_v27, %v5983_v60  ;;  %v9080_v60 = vpack.c.bf16 %v6105_v57, %v6104_v56  ;;  %v6088_v27 = vld [vmem:[#allocation41 + $0x30] sm:$0xff] }
 0x9a1   : > { %9057 = vmatprep.subr.bf16.mxu1 %v9056_v59  ;;  %v6328_v56 = vld [vmem:[%s12198_s11 + $0x28] sm:$0xff] }
 0x9a2   : > { %9035 = vmatpush1.bf16.msra.mxu0 %v9034_v7  ;;  %9059 = vmatpush3.bf16.msra.mxu1 %v9058_v2  ;;  %v6002_v7 = vld [vmem:[#allocation53 + $0xe8] sm:$0xff] }
 0x9a3   : > { %v9060_v15 = vpack.c.bf16 %v6002_v7, %v6001_v4  ;;  %v6089_v2 = vld [vmem:[#allocation41 + $0x38] sm:$0xff]  ;;  %v6106_v4 = vld [vmem:[#allocation41 + $0xc0] sm:$0xff]  ;;  %v6107_v7 = vld [vmem:[#allocation41 + $0xc8] sm:$0xff] }
 0x9a4   : > { %v9084_v30 = vpack.c.bf16 %v6107_v7, %v6106_v4  ;;  %v6332_v4 = vld [vmem:[%s12198_s11 + $0x48] sm:$0xff] }
 0x9a5   : > { %9061 = vmatprep.subr.bf16.mxu1 %v9060_v15  ;;  %v9082_v15 = vpack.c.bf16 %v6089_v2, %v6088_v27  ;;  %v6331_v2 = vld [vmem:[%s12198_s11 + $0x40] sm:$0xff] }
 0x9a6   : > { %9063 = vmatpush3.bf16.msra.mxu1 %v9062_v21  ;;  %v6091_v21 = vld [vmem:[#allocation41 + $0x48] sm:$0xff]  ;;  %v9137_v7 = vpack.c.bf16 %v6332_v4, %v6331_v2  ;;  %v6529_v4 = vld [vmem:[%s12200_s8 + $0x10] sm:$0xff] }
 0x9a7   : > { %9065 = vmatprep.subr.bf16.mxu1 %v9064_v20  ;;  %v9086_v20 = vpack.c.bf16 %v6091_v21, %v6090_v12 }
 0x9aa   : > { %9067 = vmatpush3.bf16.msra.mxu1 %v9066_v36  ;;  %v6093_v36 = vld [vmem:[#allocation41 + $0x58] sm:$0xff] }
 0x9ab   : > { %9069 = vmatprep.subr.bf16.mxu1 %v9068_v43  ;;  %v9090_v43 = vpack.c.bf16 %v6093_v36, %v6092_v17  ;;  %v7173_v36 = vld [vmem:[#allocation46] ss:$0 sm:$0xff] }
 0xa38   : > { %v11935_v38 = vpop.f32.mrb[10].mxu0  ;;  %v5751_v39 = vpop.f32.mrb[10].mxu1 }
 0xa39   : > { %v9180_v41 = vadd.f32 %v5751_v39, %v5607_v33  ;;  %v11939_v46 = vpop.f32.mrb[11].mxu0  ;;  %v5753_v37 = vpop.f32.mrb[11].mxu1  ;;  %v9178_v58 = vadd.f32 %v11935_v38, %v5325_v18 }
 0xa3a   : > { %v9181_v5 = vadd.f32 %v5753_v37, %v5611_v44  ;;  %v9179_v34 = vadd.f32 %v11939_v46, %v5329_v11  ;;  %v6101_v37 = vld [vmem:[#allocation41 + $0x98] sm:$0xff]  ;;  %v6103_v46 = vld [vmem:[#allocation41 + $0xa8] sm:$0xff]  ;;  %v10798_v11 = vmov 0.0|0.0  }
 0xa3b   : > { %v5768_v49 = vmul.f32 %v9180_v41, %v5761_v35  ;;  %v6083_v41 = vld [vmem:[#allocation41 + $0x8] sm:$0xff]  ;;  %9100 = vmatprep.subr.bf16.mxu0 %v10798_v11 }
 0xa3c   : > { %v5769_v51 = vmul.f32 %v9181_v5, %v5765_v40  ;;  %v6082_v40 = vld [vmem:[#allocation41] sm:$0xff] }
 0xa3d   : > { %v5782_v52 = vadd.f32 %v5775_v45, %v5768_v49  ;;  %v9072_v49 = vpack.c.bf16 %v6101_v37, %v6100_v62  ;;  %v6221_v62 = vld [vmem:[#allocation47 + $0x58] sm:$0xff] }
 0xa3e   : > { %v5783_v63 = vadd.f32 %v5779_v48, %v5769_v51  ;;  %v9070_v48 = vpack.c.bf16 %v6083_v41, %v6082_v40  ;;  %v6084_v51 = vld [vmem:[#allocation41 + $0x10] sm:$0xff] }
 0xa3f   : > { %v5786_v55 = vmul.f32 0.1, %v5782_v52  ;;  %vm5784_vm3 = vcmp.ge.f32.partialorder %v5782_v52, 0.0  ;;  %v6219_v40 = vld [vmem:[#allocation47 + $0x48] sm:$0xff] }
 0xa40   : > { %vm5785_vm2 = vcmp.ge.f32.partialorder %v5783_v63, 0.0  ;;  %v5787_v47 = vmul.f32 0.1, %v5783_v63 }
 0xa41   : > { %v5788_v16 = vsel %vm5784_vm3, %v5782_v52, %v5786_v55  ;;  %v6085_v52 = vld [vmem:[#allocation41 + $0x18] sm:$0xff] }
 0xa42   : > { %v5789_v53 = vsel %vm5785_vm2, %v5783_v63, %v5787_v47  ;;  %v6102_v63 = vld [vmem:[#allocation41 + $0xa0] sm:$0xff]  ;;  %v9074_v55 = vpack.c.bf16 %v6085_v52, %v6084_v51 }
 0xa43   : > { %5930 = vmatprep.mubr.f32.mxu0 %v5789_v53  ;;  %v9076_v47 = vpack.c.bf16 %v6103_v46, %v6102_v63  ;;  %v6086_v53 = vld [vmem:[#allocation41 + $0x20] sm:$0xff]  ;;  %v6324_v63 = vld [vmem:[%s12198_s11 + $0x8] sm:$0xff] }
 0xa44   : > { %5931 = vmatmul.mubr.f32.vlgmr.msra.gmra.mrb[12].mxu0 %v5788_v16  ;;  %v6087_v16 = vld [vmem:[#allocation41 + $0x28] sm:$0xff]  ;;  %v6225_v51 = vld [vmem:[#allocation47 + $0x78] sm:$0xff] }
 0xa45   : > { %v9078_v59 = vpack.c.bf16 %v6087_v16, %v6086_v53  ;;  %7336 = vmatprep.mubr.msk.f32.mxu0 %vm10799_vm6, %v10797_v1  ;;  %v6325_v46 = vld [vmem:[%s12198_s11 + $0x10] sm:$0xff]  ;;  %v6327_v16 = vld [vmem:[%s12198_s11 + $0x20] sm:$0xff] }
 0xa46   : > { %v9131_v57 = vpack.c.bf16 %v6328_v56, %v6327_v16 }
 0xb17   : > { %v5932_v13 = vpop.f32.mrb[12].mxu0 }
 0xb18   : > { %v5933_v24 = vadd.f32 %v5932_v13, %v5859_v42  ;;  %v5934_v28 = vpop.f32.mrb[13].mxu0  ;;  %v6095_v42 = vld [vmem:[#allocation41 + $0x68] sm:$0xff]  ;;  %v6096_v13 = vld [vmem:[#allocation41 + $0x70] sm:$0xff] }
 0xb19   : > { %v5935_v54 = vadd.f32 %v5934_v28, %v5863_v6  ;;  %v9094_v6 = vpack.c.bf16 %v6095_v42, %v6094_v19  ;;  %v6212_v28 = vld [vmem:[#allocation47 + $0x10] sm:$0xff]  ;;  %v6334_v42 = vld [vmem:[%s12198_s11 + $0x58] sm:$0xff] }
 0xb1a   : > { %v5949_v32 = vmul.f32 %v5942_v23, %v5933_v24  ;;  %v9096_v23 = vpack.c.bf16 %v6113_v61, %v6112_v22  ;;  %v6210_v24 = vld [vmem:[#allocation47] sm:$0xff]  ;;  %v6333_v19 = vld [vmem:[%s12198_s11 + $0x50] sm:$0xff] }
 0xb1b   : > { %v5950_v26 = vmul.f32 %v5946_v14, %v5935_v54  ;;  %v6097_v14 = vld [vmem:[#allocation41 + $0x78] sm:$0xff]  ;;  %v9140_v22 = vpack.c.bf16 %v6334_v42, %v6333_v19  ;;  %v6335_v61 = vld [vmem:[%s12198_s11 + $0x60] sm:$0xff] }
 0xb1c   : > { %v5963_v33 = vadd.f32 %v5956_v25, %v5949_v32  ;;  %v9098_v18 = vpack.c.bf16 %v6097_v14, %v6096_v13  ;;  %v6211_v25 = vld [vmem:[#allocation47 + $0x8] sm:$0xff]  ;;  %v6337_v13 = vld [vmem:[%s12198_s11 + $0x70] sm:$0xff]  ;;  %v6338_v14 = vld [vmem:[%s12198_s11 + $0x78] sm:$0xff] }
 0xb1d   : > { %v5964_v44 = vadd.f32 %v5960_v29, %v5950_v26  ;;  %v9101_v54 = vpack.c.bf16 %v6211_v25, %v6210_v24  ;;  %v6213_v29 = vld [vmem:[#allocation47 + $0x18] sm:$0xff]  ;;  %v6214_v26 = vld [vmem:[#allocation47 + $0x20] sm:$0xff]  ;;  %v6436_v25 = vld [vmem:[%s12199_s16 + $0x8] sm:$0xff] }
 0xb1e   : > { %v5965_v35 = vadd.f32 %v9178_v58, %v5963_v33  ;;  %v9104_v32 = vpack.c.bf16 %v6213_v29, %v6212_v28  ;;  %v6215_v58 = vld [vmem:[#allocation47 + $0x28] sm:$0xff]  ;;  %v6437_v28 = vld [vmem:[%s12199_s16 + $0x10] sm:$0xff]  ;;  %v6438_v29 = vld [vmem:[%s12199_s16 + $0x18] sm:$0xff] }
 0xb1f   : > { %v5966_v39 = vadd.f32 %v9179_v34, %v5964_v44  ;;  %9102 = vmatpush3.bf16.msra.mxu0 %v9101_v54  ;;  %v9107_v33 = vpack.c.bf16 %v6215_v58, %v6214_v26  ;;  %v6216_v34 = vld [vmem:[#allocation47 + $0x30] sm:$0xff]  ;;  %v6217_v44 = vld [vmem:[#allocation47 + $0x38] sm:$0xff]  ;;  %v6435_v24 = vld [vmem:[%s12199_s16] sm:$0xff] }
 0xb20   : > { %v5969_v45 = vmul.f32 0.1, %v5965_v35  ;;  %vm5967_vm5 = vcmp.ge.f32.partialorder %v5965_v35, 0.0  ;;  %9103 = vmatprep.subr.bf16.mxu0 %v10798_v11  ;;  %v9149_v54 = vpack.c.bf16 %v6436_v25, %v6435_v24  ;;  %v7174_v26 = vld [vmem:[#allocation49] ss:$0 sm:$0xff] }
 0xb21   : > { %vm5968_vm4 = vcmp.ge.f32.partialorder %v5966_v39, 0.0  ;;  %v5970_v5 = vmul.f32 0.1, %v5966_v39 }
 0xb22   : > { %v5971_v38 = vsel %vm5967_vm5, %v5965_v35, %v5969_v45  ;;  %v9110_v35 = vpack.c.bf16 %v6217_v44, %v6216_v34  ;;  %v6220_v45 = vld [vmem:[#allocation47 + $0x50] sm:$0xff] }
 0xb23   : > { %v5972_v0 = vsel %vm5968_vm4, %v5966_v39, %v5970_v5  ;;  %9105 = vmatpush3.bf16.msra.mxu0 %v9104_v32  ;;  %v6218_v39 = vld [vmem:[#allocation47 + $0x40] sm:$0xff]  ;;  %v9116_v37 = vpack.c.bf16 %v6221_v62, %v6220_v45  ;;  %v9152_v32 = vpack.c.bf16 %v6438_v29, %v6437_v28 }
 0xb24   : > { %6076 = vmatprep.mubr.f32.mxu1 %v5972_v0  ;;  %9106 = vmatprep.subr.bf16.mxu0 %v10798_v11  ;;  %v9113_v41 = vpack.c.bf16 %v6219_v40, %v6218_v39  ;;  %v6222_v5 = vld [vmem:[#allocation47 + $0x60] sm:$0xff] }
 0xb25   : > { %6077 = vmatmul.mubr.f32.vlgmr.msra.gmra.mrb[12].mxu1 %v5971_v38  ;;  %v7176_v39 = vld [vmem:[#allocation52] ss:$0 sm:$0xff] }
 0xb26   : > { %9071 = vmatpush3.bf16.msra.mxu1 %v9070_v48  ;;  %6185 = vmatprep.mubr.f32.mxu1 %v5972_v0  ;;  %v6223_v48 = vld [vmem:[#allocation47 + $0x68] sm:$0xff] }
 0xb27   : > { %9073 = vmatprep.subr.bf16.mxu1 %v9072_v49  ;;  %9108 = vmatpush3.bf16.msra.mxu0 %v9107_v33  ;;  %v9119_v0 = vpack.c.bf16 %v6223_v48, %v6222_v5  ;;  %v6224_v49 = vld [vmem:[#allocation47 + $0x70] sm:$0xff]  ;;  %v7175_v33 = vld [vmem:[#allocation50] ss:$0 sm:$0xff]  ;;  %v6439_v48 = vld [vmem:[%s12199_s16 + $0x20] sm:$0xff] }
 0xb28   : > { %9109 = vmatprep.subr.bf16.mxu0 %v10798_v11  ;;  %v9122_v52 = vpack.c.bf16 %v6225_v51, %v6224_v49  ;;  %v6441_v51 = vld [vmem:[%s12199_s16 + $0x30] sm:$0xff] }
 0xb2a   : > { %9075 = vmatpush3.bf16.msra.mxu1 %v9074_v55 }
 0xb2b   : > { %9077 = vmatprep.subr.bf16.mxu1 %v9076_v47  ;;  %9111 = vmatpush3.bf16.msra.mxu0 %v9110_v35  ;;  %v6326_v47 = vld [vmem:[%s12198_s11 + $0x18] sm:$0xff] }
 0xb2c   : > { %9112 = vmatprep.subr.bf16.mxu0 %v10798_v11  ;;  %v9128_v53 = vpack.c.bf16 %v6326_v47, %v6325_v46  ;;  %v7170_v35 = vld [vmem:[#allocation55] ss:$0 sm:$0xff]  ;;  %v6528_v46 = vld [vmem:[%s12200_s8 + $0x8] sm:$0xff]  ;;  %v7177_v47 = vld [vmem:[#allocation56] ss:$0 sm:$0xff] }
 0xb2e   : > { %9079 = vmatpush3.bf16.msra.mxu1 %v9078_v59  ;;  %v6329_v59 = vld [vmem:[%s12198_s11 + $0x30] sm:$0xff] }
 0xb2f   : > { %9081 = vmatprep.subr.bf16.mxu1 %v9080_v60  ;;  %9114 = vmatpush3.bf16.msra.mxu0 %v9113_v41  ;;  %v6330_v60 = vld [vmem:[%s12198_s11 + $0x38] sm:$0xff] }
 0xb30   : > { %9115 = vmatprep.subr.bf16.mxu0 %v10798_v11  ;;  %v9134_v27 = vpack.c.bf16 %v6330_v60, %v6329_v59  ;;  %v7179_v60 = vld [vmem:[#allocation59] ss:$0 sm:$0xff] }
 0xb32   : > { %9083 = vmatpush3.bf16.msra.mxu1 %v9082_v15 }
 0xb33   : > { %9085 = vmatprep.subr.bf16.mxu1 %v9084_v30  ;;  %9117 = vmatpush3.bf16.msra.mxu0 %v9116_v37 }
 0xb34   : > { %9118 = vmatprep.subr.bf16.mxu0 %v10798_v11 }
 0xb36   : > { %9087 = vmatpush3.bf16.msra.mxu1 %v9086_v20 }
 0xb37   : > { %9089 = vmatprep.subr.bf16.mxu1 %v9088_v10  ;;  %9120 = vmatpush3.bf16.msra.mxu0 %v9119_v0  ;;  %v7172_v10 = vld [vmem:[#allocation44] ss:$0 sm:$0xff]  ;;  %v6440_v0 = vld [vmem:[%s12199_s16 + $0x28] sm:$0xff] }
 0xb38   : > { %9121 = vmatprep.subr.bf16.mxu0 %v10798_v11  ;;  %v9155_v49 = vpack.c.bf16 %v6440_v0, %v6439_v48 }
 0xb3a   : > { %9091 = vmatpush3.bf16.msra.mxu1 %v9090_v43 }
 0xb3b   : > { %9093 = vmatprep.subr.bf16.mxu1 %v9092_v31  ;;  %9123 = vmatpush3.bf16.msra.mxu0 %v9122_v52  ;;  %v6442_v52 = vld [vmem:[%s12199_s16 + $0x38] sm:$0xff] }
 0xb3c   : > { %9148 = vmatprep.subr.bf16.mxu0 %v10798_v11 }
 0xb3e   : > { %9095 = vmatpush3.bf16.msra.mxu1 %v9094_v6  ;;  %v6336_v6 = vld [vmem:[%s12198_s11 + $0x68] sm:$0xff] }
 0xb3f   : > { %9097 = vmatprep.subr.bf16.mxu1 %v9096_v23  ;;  %v9143_v23 = vpack.c.bf16 %v6336_v6, %v6335_v61 }
 0xb42   : > { %9099 = vmatpush3.bf16.msra.mxu1 %v9098_v18  ;;  %v9146_v18 = vpack.c.bf16 %v6338_v14, %v6337_v13 }
 0xb43   : > { %9124 = vmatprep.subr.bf16.mxu1 %v10798_v11 }
 0xb45   : > { %6186 = vmatmul.mubr.f32.vlgmr.msra.gmra.mrb[14].mxu1 %v5971_v38  ;;  %v6323_v38 = vld [vmem:[%s12198_s11] sm:$0xff] }
 0xb46   : > { %7371 = vmatprep.mubr.msk.f32.mxu1 %vm10799_vm6, %v10797_v1  ;;  %v9125_v55 = vpack.c.bf16 %v6324_v63, %v6323_v38  ;;  %v9158_v38 = vpack.c.bf16 %v6442_v52, %v6441_v51  ;;  %v6527_v63 = vld [vmem:[%s12200_s8] sm:$0xff] }
 0xb48   : > { %9126 = vmatpush3.bf16.msra.mxu1 %v9125_v55  ;;  %v9161_v55 = vpack.c.bf16 %v6528_v46, %v6527_v63 }
 0xb49   : > { %9127 = vmatprep.subr.bf16.mxu1 %v10798_v11 }
 0xb4c   : > { %9129 = vmatpush3.bf16.msra.mxu1 %v9128_v53 }
 0xb4d   : > { %9130 = vmatprep.subr.bf16.mxu1 %v10798_v11 }
 0xb50   : > { %9132 = vmatpush3.bf16.msra.mxu1 %v9131_v57  ;;  %v7178_v57 = vld [vmem:[#allocation58] ss:$0 sm:$0xff] }
 0xb51   : > { %9133 = vmatprep.subr.bf16.mxu1 %v10798_v11 }
 0xb54   : > { %9135 = vmatpush3.bf16.msra.mxu1 %v9134_v27 }
 0xb55   : > { %9136 = vmatprep.subr.bf16.mxu1 %v10798_v11 }
 0xb58   : > { %9138 = vmatpush3.bf16.msra.mxu1 %v9137_v7  ;;  %v6530_v7 = vld [vmem:[%s12200_s8 + $0x18] sm:$0xff] }
 0xb59   : > { %9139 = vmatprep.subr.bf16.mxu1 %v10798_v11 }
 0xb5c   : > { %9141 = vmatpush3.bf16.msra.mxu1 %v9140_v22 }
 0xb5d   : > { %9142 = vmatprep.subr.bf16.mxu1 %v10798_v11 }
 0xb60   : > { %9144 = vmatpush3.bf16.msra.mxu1 %v9143_v23 }
 0xb61   : > { %9145 = vmatprep.subr.bf16.mxu1 %v10798_v11 }
 0xb64   : > { %9147 = vmatpush3.bf16.msra.mxu1 %v9146_v18 }
 0xb65   : > { %9160 = vmatprep.subr.bf16.mxu1 %v10798_v11 }
 0xbf8   : > { %v7218_v15 = vpop.f32.mrb[12].mxu1 }
 0xbf9   : > { %v7219_v30 = vpop.f32.mrb[13].mxu1 }
 0xbfa   : > { %v7220_v12 = vadd.f32 %v7219_v30, %v7218_v15  ;;  %v9164_v15 = vpack.c.bf16 %v6530_v7, %v6529_v4 }
 0xbfc   : > { %v6079_v41 = vadd.f32 %v7220_v12, %v7170_v35 }
 0xc18   : > { %v7253_v21 = vpop.f32.mrb[14].mxu1 }
 0xc19   : > { %v7254_v9 = vpop.f32.mrb[15].mxu1 }
 0xc1a   : > { %v7255_v20 = vadd.f32 %v7254_v9, %v7253_v21 }
 0xc1c   : > { %v6188_v17 = vadd.f32 %v7255_v20, %v7171_v8  ;;  %v7182_v20 = vld [vmem:[#allocation2] ss:$0 sm:$0xff] }
 0xc1e   : > { %v6198_v50 = vmul.f32 %v7172_v10, %v6188_v17 }
 0xc20   : > { %v6206_v3 = vadd.f32 %v7173_v36, %v6198_v50 }
 0xc22   : > { %vm6207_vm7 = vcmp.ge.f32.partialorder %v6206_v3, 0.0  ;;  %v6208_v43 = vmul.f32 0.1, %v6206_v3 }
 0xc24   : > { %v6209_v31 = vsel %vm6207_vm7, %v6206_v3, %v6208_v43 }
 0xc25   : > { %7337 = vmatmul.mubr.f32.vlgmr.msra.gmra.mrb[14].mxu0 %v6209_v31 }
 0xc26   : > { %7390 = vmatprep.mubr.msk.f32.mxu0 %vm10799_vm6, %v10797_v1  ;;  %9150 = vmatpush3.bf16.msra.mxu0 %v9149_v54 }
 0xc27   : > { %9151 = vmatprep.subr.bf16.mxu0 %v10798_v11 }
 0xc2a   : > { %9153 = vmatpush3.bf16.msra.mxu0 %v9152_v32 }
 0xc2b   : > { %9154 = vmatprep.subr.bf16.mxu0 %v10798_v11 }
 0xc2e   : > { %9156 = vmatpush3.bf16.msra.mxu0 %v9155_v49 }
 0xc2f   : > { %9157 = vmatprep.subr.bf16.mxu0 %v10798_v11 }
 0xc32   : > { %9159 = vmatpush3.bf16.msra.mxu0 %v9158_v38 }
 0xcf8   : > { %v6299_v58 = vpop.f32.mrb[14].mxu0 }
 0xcf9   : > { %v6300_v34 = vadd.f32 %v7174_v26, %v6299_v58  ;;  %v7338_v44 = vpop.f32.mrb[15].mxu0 }
 0xcfb   : > { %v6310_v40 = vmul.f32 %v7175_v33, %v6300_v34 }
 0xcfd   : > { %v6318_v45 = vadd.f32 %v7176_v39, %v6310_v40 }
 0xcff   : > { %v6319_v62 = vadd.f32 %v6318_v45, %v6079_v41 }
 0xd01   : > { %vm6320_vm8 = vcmp.ge.f32.partialorder %v6319_v62, 0.0  ;;  %v6321_v37 = vmul.f32 0.1, %v6319_v62 }
 0xd03   : > { %v6322_v5 = vsel %vm6320_vm8, %v6319_v62, %v6321_v37 }
 0xd04   : > { %7372 = vmatmul.mubr.f32.vlgmr.msra.gmra.mrb[16].mxu1 %v6322_v5 }
 0xd05   : > { %7401 = vmatprep.mubr.msk.f32.mxu1 %vm10799_vm6, %v10797_v1  ;;  %9162 = vmatpush3.bf16.msra.mxu1 %v9161_v55 }
 0xd06   : > { %9163 = vmatprep.subr.bf16.mxu1 %v10798_v11  ;;  %v7180_v11 = vld [vmem:[#allocation61] ss:$0 sm:$0xff] }
 0xd09   : > { %9165 = vmatpush3.bf16.msra.mxu1 %v9164_v15 }
 0xdd7   : > { %v6412_v1 = vpop.f32.mrb[16].mxu1 }
 0xdd8   : > { %v6413_v53 = vadd.f32 %v7177_v47, %v6412_v1  ;;  %v7373_v16 = vpop.f32.mrb[17].mxu1 }
 0xdda   : > { %vm6416_vm9 = vcmp.ge.f32.partialorder %v6413_v53, 0.0  ;;  %v6417_v56 = vmul.f32 0.1, %v6413_v53 }
 0xddc   : > { %v6418_v59 = vsel %vm6416_vm9, %v6413_v53, %v6417_v56 }
 0xddd   : > { %v6426_v27 = vmul.f32 %v7178_v57, %v6418_v59 }
 0xddf   : > { %v6434_v2 = vadd.f32 %v7179_v60, %v6426_v27 }
 0xde1   : > { %7391 = vmatmul.mubr.msk.f32.vlgmr.msra.gmra.mrb[16].mxu0 %vm6450_vm10, %v6434_v2 }
 0xeb4   : > { %v6520_v30 = vpop.f32.mrb[16].mxu0 }
 0xeb5   : > { %v6521_v12 = vadd.f32 %v7180_v11, %v6520_v30  ;;  %v7392_v21 = vpop.f32.mrb[17].mxu0 }
 0xeb7   : > { %vm6524_vm11 = vcmp.ge.f32.partialorder %v6521_v12, 0.0  ;;  %v6525_v8 = vmul.f32 0.1, %v6521_v12 }
 0xeb9   : > { %v6526_v9 = vsel %vm6524_vm11, %v6521_v12, %v6525_v8 }
 0xeba   : > { %7402 = vmatmul.mubr.msk.f32.vlgmr.msra.gmra.mrb[18].mxu1 %vm1882_vm0, %v6526_v9 }
 0xf8d   : > { %v6607_v10 = vpop.f32.mrb[18].mxu1 }
 0xf8e   : > { %v6608_v17 = vadd.f32 %v7182_v20, %v6607_v10  ;;  %v7403_v36 = vpop.f32.mrb[19].mxu1 }
 0xf90   : > { %6612 = vst.msk [vmem:[%s1806_s12] sm:$0xff] %vm6611_vm12, %v6608_v17 }
 0xf91 PF: > { %s12202_s23 = sld [smem:[#allocation116_spill]]  ;;  %s12203_s10 = sld [smem:[#allocation117_spill]] }
 0xf92   : > { %s12204_s0 = smov %s10697_s5  ;;  %s12205_s5 = smov %s10701_s22 }
 0xf97   : > { %p118_p1 = scmp.ge.s32.totalorder %s12202_s23, 4   ;;  %s12206_s22 = smov %s12203_s10 }
 0xf99   :  { %120 = sbr.rel (!%p118_p1) target bundleno = 105 (0x69), region = 427 }
 0xfa0   :  { %6632 = vsyncpa [#allocation4], 1 }
 0xfa1   :  { %6634 = vsyncpa [#allocation4 + $0x1], 1 }
 0xfa2   :  { %6635 = vsyncpa [#allocation6], 1 }
 0xfa3   :  { %6636 = vsyncpa [#allocation9], 1 }
 0xfa4   :  { %6637 = vsyncpa [#allocation12], 1 }
 0xfa5   :  { %6638 = vsyncpa [#allocation15], 1 }
 0xfa6   :  { %6639 = vsyncpa [#allocation18], 1 }
 0xfa7   :  { %6640 = vsyncpa [#allocation21], 1 }
 0xfa8   :  { %6641 = vsyncpa [#allocation24], 1 }
 0xfa9   :  { %6642 = vsyncpa [#allocation27], 1 }
 0xfaa   :  { %6643 = vsyncpa [#allocation30], 1 }
 0xfab   :  { %6644 = vsyncpa [#allocation33], 1 }
 0xfac   :  { %6645 = vsyncpa [#allocation36], 1 }
 0xfad   :  { %6646 = vsyncpa [#allocation39], 1 }
 0xfae   :  { %6647 = vsyncpa [#allocation42], 1 }
 0xfaf   :  { %6648 = vsyncpa [#allocation45], 1 }
 0xfb0   :  { %6649 = vsyncpa [#allocation48], 1 }
 0xfb1   :  { %6650 = vsyncpa [#allocation51], 1 }
 0xfb2   :  { %6651 = vsyncpa [#allocation54], 1 }
 0xfb3   :  { %6652 = vsyncpa [#allocation57], 1 }
 0xfb4   :  { %6653 = vsyncpa [#allocation60], 1 }

</bundles_post_ra>
